<compile_context>
chip_gen: v7x
topology: tpu7x:2x2x1
jax: 0.10.0
libtpu: 0.0.40
codegen_flags: <defaults>
</compile_context>

<pallas_src>
import math
import jax
import jax.numpy as jnp
from jax import lax
from jax.experimental import pallas as pl
from jax.experimental.pallas import tpu as pltpu

# ----------------------------- configuration -----------------------------------
N_BATCH = 2          # batch
C_IN    = 4          # in_channels
H_IMG   = 16         # args.height
W_IMG   = 16         # args.width
PATCH   = (4, 4)     # patch_size = [ph, pw]
E_DIM   = 128        # embedding_dim (module default)
N_HEADS = 4          # num_heads    (module default)
N_LAYER = 3          # num_layers   (module default)
FF_DIM  = 1024       # dim_feedforward (hard-coded in module)
FF_CHUNK = 512       # FFN split to bound vreg pressure
LN_EPS  = 1e-5

# conv geometry (exactly as in PST_Path.__init__)
SX = math.floor(W_IMG / PATCH[1])
SY = math.floor(H_IMG / PATCH[0])
KX = W_IMG - SX * (PATCH[1] - 1)
KY = H_IMG - SY * (PATCH[0] - 1)
OH = (H_IMG - KY) // SY + 1
OW = (W_IMG - KX) // SX + 1
P_TOK  = OH * OW                      # conv output tokens per image (16)
S_SEQ  = P_TOK + 1                    # +1 zero token from F.pad (17)
KK     = KY * KX
CKK    = C_IN * KK                    # flattened patch feature width (64)
D_HEAD = E_DIM // N_HEADS             # 32
S_PAD  = ((S_SEQ + 7) // 8) * 8       # sublane-aligned per-batch rows (24)
R_TOT  = N_BATCH * S_PAD              # batch folded onto sublanes (48)

NEG_INF = -1e30


# ----------------------------- fused Pallas kernel -------------------------------
def _layer_norm(x, w, b):
    mu = jnp.mean(x, axis=-1, keepdims=True)
    xc = x - mu
    var = jnp.mean(xc * xc, axis=-1, keepdims=True)
    return xc * lax.rsqrt(var + LN_EPS) * w + b


def pst_fused_kernel(patches_ref, wcomb_ref, poseff_ref, bias_ref,
                     wqkv_ref, bqkv_ref, wo_ref, bo_ref,
                     ln1w_ref, ln1b_ref,
                     w1_ref, b1_ref, w2_ref, b2_ref,
                     ln2w_ref, ln2b_ref,
                     out_ref):
    """Whole PST_Path forward, both batch elements folded onto sublanes.

    patches_ref : (R_TOT, CKK)            zero-padded im2col slab (f32)
    wcomb_ref   : (CKK, E)                 folded depthwise*pointwise weight (bf16)
    poseff_ref  : (R_TOT, E)               positional slab with conv bias folded (f32)
    bias_ref    : (N_HEADS*R_TOT, R_TOT)   block-diag attention bias, stacked per head (f32)
    wqkv_ref    : (L, E, 3E)   bf16        fused [Wq | Wk | Wv]
    bqkv_ref    : (L, 1, 3E)   f32
    wo_ref      : (L, E, E)    bf16
    w1_ref      : (L, E, FF)   bf16
    w2_ref      : (L, FF, E)   bf16
    out_ref     : (R_TOT, E)   f32
    """
    scale = 1.0 / math.sqrt(D_HEAD)
    bf = jnp.bfloat16

    # ---- embedding: folded depthwise+pointwise conv, one bf16 MXU matmul ---------
    x = jnp.dot(patches_ref[...].astype(bf), wcomb_ref[...],
                preferred_element_type=jnp.float32) + poseff_ref[...]     # (R_TOT, E)

    bias_stack = bias_ref[...]                       # (H*R_TOT, R_TOT), hoisted once

    # ---- N_LAYER post-norm transformer encoder layers (unrolled) -----------------
    for l in range(N_LAYER):
        # fused QKV projection: one full-width (R_TOT,E)@(E,3E) bf16 matmul
        qkv = jnp.dot(x.astype(bf), wqkv_ref[l],
                      preferred_element_type=jnp.float32) + bqkv_ref[l]   # (R_TOT, 3E)
        q = (qkv[:, 0:E_DIM] * scale).astype(bf)
        k = qkv[:, E_DIM:2 * E_DIM].astype(bf)
        v = qkv[:, 2 * E_DIM:3 * E_DIM].astype(bf)

        # per-head scores, stacked on the sublane axis for ONE softmax pass
        s_list = []
        for h in range(N_HEADS):
            qh = q[:, h * D_HEAD:(h + 1) * D_HEAD]                        # (R_TOT, D)
            kh = k[:, h * D_HEAD:(h + 1) * D_HEAD]
            s_list.append(lax.dot_general(qh, kh, (((1,), (1,)), ((), ())),
                                          preferred_element_type=jnp.float32))
        s_all = jnp.concatenate(s_list, axis=0) + bias_stack              # (H*R_TOT, R_TOT)
        s_all = s_all - jnp.max(s_all, axis=-1, keepdims=True)
        p_all = jnp.exp(s_all)
        p_all = p_all * pl.reciprocal(jnp.sum(p_all, axis=-1, keepdims=True),
                                      approx=True)
        p_all = p_all.astype(bf)

        # per-head PV, lane-concat heads, one full-width Wo matmul
        heads = []
        for h in range(N_HEADS):
            ph = p_all[h * R_TOT:(h + 1) * R_TOT, :]                      # (R_TOT, R_TOT)
            vh = v[:, h * D_HEAD:(h + 1) * D_HEAD]                        # (R_TOT, D)
            heads.append(jnp.dot(ph, vh, preferred_element_type=jnp.float32))
        attn = jnp.concatenate(heads, axis=1).astype(bf)                  # (R_TOT, E)
        attn = jnp.dot(attn, wo_ref[l],
                       preferred_element_type=jnp.float32) + bo_ref[l]

        # residual + norm1 (f32)
        h1 = _layer_norm(x + attn, ln1w_ref[l], ln1b_ref[l])

        # FFN: linear1 -> relu -> linear2, chunked along FF_DIM
        h1b = h1.astype(bf)
        ff = jnp.zeros((R_TOT, E_DIM), jnp.float32)
        for c in range(FF_DIM // FF_CHUNK):
            lo, hi = c * FF_CHUNK, (c + 1) * FF_CHUNK
            z = jnp.dot(h1b, w1_ref[l, :, lo:hi],
                        preferred_element_type=jnp.float32) + b1_ref[l, :, lo:hi]
            z = jnp.maximum(z, 0.0).astype(bf)
            ff = ff + jnp.dot(z, w2_ref[l, lo:hi, :],
                              preferred_element_type=jnp.float32)
        ff = ff + b2_ref[l]

        # residual + norm2 (f32)
        x = _layer_norm(h1 + ff, ln2w_ref[l], ln2b_ref[l])

    out_ref[...] = x


# ----------------------------- wrapper / glue -------------------------------------
def extract_patches(x):
    """im2col glue (plain JAX): (N, C, H, W) -> (N, P_TOK, C*KK), feature order (c, ky*KX+kx)."""
    cols = []
    for dy in range(KY):
        for dx in range(KX):
            sl = x[:, :, dy:dy + SY * OH:SY, dx:dx + SX * OW:SX]   # (N, C, OH, OW)
            cols.append(sl)
    patches = jnp.stack(cols, axis=-1)                              # (N, C, OH, OW, KK)
    patches = patches.transpose(0, 2, 3, 1, 4).reshape(N_BATCH, P_TOK, CKK)
    return patches


def _full_spec(shape):
    nd = len(shape)
    return pl.BlockSpec(shape, lambda i, _nd=nd: (0,) * _nd)


def pst_path_forward(x, params):
    bf = jnp.bfloat16

    # --- plain-JAX preprocessing (layout plumbing + weight folding) ---------------
    patches = extract_patches(x)                                    # (N, P, CKK)
    patches_pad = jnp.zeros((N_BATCH, S_PAD, CKK), jnp.float32)
    patches_pad = patches_pad.at[:, 1:S_SEQ, :].set(patches)        # row 0 = F.pad zero token
    patches_pad = patches_pad.reshape(R_TOT, CKK)                   # batch folded on sublanes

    # fold depthwise conv into the pointwise 1x1 conv
    w_comb = (params["wd"][:, :, None] * params["wp"][:, None, :]).reshape(CKK, E_DIM)
    b_comb = params["bd"] @ params["wp"] + params["bp"]             # (1, E)

    # effective positional slab: pos for real tokens, conv bias folded into rows 1..P,
    # padded rows zero; tiled once per batch element.
    pos = params["pos"][:S_SEQ, :]
    pos_eff = jnp.zeros((S_PAD, E_DIM), jnp.float32)
    pos_eff = pos_eff.at[0:1, :].set(pos[0:1, :])
    pos_eff = pos_eff.at[1:S_SEQ, :].set(pos[1:S_SEQ, :] + b_comb)
    pos_eff = jnp.tile(pos_eff, (N_BATCH, 1))                       # (R_TOT, E)

    # block-diagonal attention bias (per-batch attention + padded-key masking),
    # pre-stacked over heads on the sublane axis for the batched softmax.
    row = jnp.arange(R_TOT)
    same_batch = (row[:, None] // S_PAD) == (row[None, :] // S_PAD)
    key_valid = (row[None, :] % S_PAD) < S_SEQ
    bias = jnp.where(same_batch & key_valid, 0.0, NEG_INF).astype(jnp.float32)
    bias_stack = jnp.tile(bias, (N_HEADS, 1))                       # (H*R_TOT, R_TOT)

    # bf16 weight slabs (activation-side casts happen inside the kernel; accumulation
    # stays f32).  Biases / LN params stay f32.
    w_comb_bf = w_comb.astype(bf)
    wqkv = jnp.concatenate([params["wq"], params["wk"], params["wv"]], axis=-1).astype(bf)
    bqkv = jnp.concatenate([params["bq"], params["bk"], params["bv"]], axis=-1)
    wo = params["wo"].astype(bf)
    w1 = params["w1"].astype(bf)
    w2 = params["w2"].astype(bf)

    in_specs = [
        _full_spec((R_TOT, CKK)),                       # patches
        _full_spec((CKK, E_DIM)),                       # w_comb (bf16)
        _full_spec((R_TOT, E_DIM)),                     # pos_eff
        _full_spec((N_HEADS * R_TOT, R_TOT)),           # attention bias (stacked)
        _full_spec((N_LAYER, E_DIM, 3 * E_DIM)),        # wqkv (bf16)
        _full_spec((N_LAYER, 1, 3 * E_DIM)),            # bqkv
        _full_spec((N_LAYER, E_DIM, E_DIM)),            # wo (bf16)
        _full_spec((N_LAYER, 1, E_DIM)),                # bo
        _full_spec((N_LAYER, 1, E_DIM)),                # ln1w
        _full_spec((N_LAYER, 1, E_DIM)),                # ln1b
        _full_spec((N_LAYER, E_DIM, FF_DIM)),           # w1 (bf16)
        _full_spec((N_LAYER, 1, FF_DIM)),               # b1
        _full_spec((N_LAYER, FF_DIM, E_DIM)),           # w2 (bf16)
        _full_spec((N_LAYER, 1, E_DIM)),                # b2
        _full_spec((N_LAYER, 1, E_DIM)),                # ln2w
        _full_spec((N_LAYER, 1, E_DIM)),                # ln2b
    ]

    out_pad = pl.pallas_call(
        pst_fused_kernel,
        out_shape=jax.ShapeDtypeStruct((R_TOT, E_DIM), jnp.float32),
        grid=(1,),                                      # single step: weights DMA'd once
        in_specs=in_specs,
        out_specs=pl.BlockSpec((R_TOT, E_DIM), lambda i: (0, 0)),
        compiler_params=pltpu.CompilerParams(
            dimension_semantics=("arbitrary",)),
    )(patches_pad, w_comb_bf, pos_eff, bias_stack,
      wqkv, bqkv, wo, params["bo"],
      params["ln1w"], params["ln1b"],
      w1, params["b1"], w2, params["b2"],
      params["ln2w"], params["ln2b"])

    # unfold batch, drop padded rows, (N, S, E) -> (S, N, E) to match the PyTorch module
    out = out_pad.reshape(N_BATCH, S_PAD, E_DIM)[:, :S_SEQ, :]
    return out.transpose(1, 0, 2)


# ----------------------------- parameter init ------------------------------------
def init_params(key):
    ks = jax.random.split(key, 16)
    sc = 0.05
    params = {
        # depthwise Conv2d(C, C, (KY,KX), groups=C): weight (C,1,KY,KX) -> (C, KK)
        "wd": jax.random.normal(ks[0], (C_IN, KK), jnp.float32) * sc,
        "bd": jax.random.normal(ks[1], (1, C_IN), jnp.float32) * sc,
        # pointwise Conv2d(C, E, 1): weight (E,C,1,1) -> pre-transposed (C, E)
        "wp": jax.random.normal(ks[2], (C_IN, E_DIM), jnp.float32) * sc,
        "bp": jax.random.normal(ks[3], (1, E_DIM), jnp.float32) * sc,
        # positional encodings: torch.rand(500, E)
        "pos": jax.random.uniform(ks[4], (500, E_DIM), jnp.float32),
        # attention projections (pre-transposed so kernel does x @ W): (L, E, E)
        "wq": jax.random.normal(ks[5], (N_LAYER, E_DIM, E_DIM), jnp.float32) * sc,
        "wk": jax.random.normal(ks[6], (N_LAYER, E_DIM, E_DIM), jnp.float32) * sc,
        "wv": jax.random.normal(ks[7], (N_LAYER, E_DIM, E_DIM), jnp.float32) * sc,
        "bq": jnp.zeros((N_LAYER, 1, E_DIM), jnp.float32),
        "bk": jnp.zeros((N_LAYER, 1, E_DIM), jnp.float32),
        "bv": jnp.zeros((N_LAYER, 1, E_DIM), jnp.float32),
        "wo": jax.random.normal(ks[8], (N_LAYER, E_DIM, E_DIM), jnp.float32) * sc,
        "bo": jnp.zeros((N_LAYER, 1, E_DIM), jnp.float32),
        "ln1w": jnp.ones((N_LAYER, 1, E_DIM), jnp.float32),
        "ln1b": jnp.zeros((N_LAYER, 1, E_DIM), jnp.float32),
        # FFN: linear1 (E -> FF), linear2 (FF -> E), pre-transposed
        "w1": jax.random.normal(ks[9], (N_LAYER, E_DIM, FF_DIM), jnp.float32) * sc,
        "b1": jax.random.normal(ks[10], (N_LAYER, 1, FF_DIM), jnp.float32) * sc,
        "w2": jax.random.normal(ks[11], (N_LAYER, FF_DIM, E_DIM), jnp.float32) * sc,
        "b2": jax.random.normal(ks[12], (N_LAYER, 1, E_DIM), jnp.float32) * sc,
        "ln2w": jnp.ones((N_LAYER, 1, E_DIM), jnp.float32),
        "ln2b": jnp.zeros((N_LAYER, 1, E_DIM), jnp.float32),
    }
    return params


# ----------------------------- main ----------------------------------------------
if __name__ == "__main__":
    key = jax.random.PRNGKey(0)
    k_x, k_p = jax.random.split(key)
    x = jax.random.normal(k_x, (N_BATCH, C_IN, H_IMG, W_IMG), jnp.float32)
    params = init_params(k_p)

    fwd = jax.jit(pst_path_forward)
    out = fwd(x, params)                          # (S, N, E) = (17, 2, 128)
    out = jax.block_until_ready(out)
    assert out.shape == (S_SEQ, N_BATCH, E_DIM)
    assert bool(jnp.all(jnp.isfinite(out)))
    print("KERNEL_OK")
</pallas_src>

<mosaic_0001>
module attributes {stable_mosaic.version = 11 : i64} {
  func.func @pst_fused_kernel(%arg0: i32, %arg1: memref<48x64xf32, #tpu.memory_space<vmem>>, %arg2: memref<64x128xbf16, #tpu.memory_space<vmem>>, %arg3: memref<48x128xf32, #tpu.memory_space<vmem>>, %arg4: memref<192x48xf32, #tpu.memory_space<vmem>>, %arg5: memref<3x128x384xbf16, #tpu.memory_space<vmem>>, %arg6: memref<3x1x384xf32, #tpu.memory_space<vmem>>, %arg7: memref<3x128x128xbf16, #tpu.memory_space<vmem>>, %arg8: memref<3x1x128xf32, #tpu.memory_space<vmem>>, %arg9: memref<3x1x128xf32, #tpu.memory_space<vmem>>, %arg10: memref<3x1x128xf32, #tpu.memory_space<vmem>>, %arg11: memref<3x128x1024xbf16, #tpu.memory_space<vmem>>, %arg12: memref<3x1x1024xf32, #tpu.memory_space<vmem>>, %arg13: memref<3x1024x128xbf16, #tpu.memory_space<vmem>>, %arg14: memref<3x1x128xf32, #tpu.memory_space<vmem>>, %arg15: memref<3x1x128xf32, #tpu.memory_space<vmem>>, %arg16: memref<3x1x128xf32, #tpu.memory_space<vmem>>, %arg17: memref<48x128xf32, #tpu.memory_space<vmem>>) attributes {dimension_semantics = [#tpu.dimension_semantics<arbitrary>], iteration_bounds = array<i64: 1>, scalar_prefetch = 0 : i64, scratch_operands = 0 : i64, tpu.core_type = #tpu.core_type<tc>, window_params = [{pipeline_mode = #tpu.pipeline_mode<synchronous>, transform_indices = @transform_0, window_bounds = array<i64: 48, 64>}, {pipeline_mode = #tpu.pipeline_mode<synchronous>, transform_indices = @transform_1, window_bounds = array<i64: 64, 128>}, {pipeline_mode = #tpu.pipeline_mode<synchronous>, transform_indices = @transform_2, window_bounds = array<i64: 48, 128>}, {pipeline_mode = #tpu.pipeline_mode<synchronous>, transform_indices = @transform_3, window_bounds = array<i64: 192, 48>}, {pipeline_mode = #tpu.pipeline_mode<synchronous>, transform_indices = @transform_4, window_bounds = array<i64: 3, 128, 384>}, {pipeline_mode = #tpu.pipeline_mode<synchronous>, transform_indices = @transform_5, window_bounds = array<i64: 3, 1, 384>}, {pipeline_mode = #tpu.pipeline_mode<synchronous>, transform_indices = @transform_6, window_bounds = array<i64: 3, 128, 128>}, {pipeline_mode = #tpu.pipeline_mode<synchronous>, transform_indices = @transform_7, window_bounds = array<i64: 3, 1, 128>}, {pipeline_mode = #tpu.pipeline_mode<synchronous>, transform_indices = @transform_8, window_bounds = array<i64: 3, 1, 128>}, {pipeline_mode = #tpu.pipeline_mode<synchronous>, transform_indices = @transform_9, window_bounds = array<i64: 3, 1, 128>}, {pipeline_mode = #tpu.pipeline_mode<synchronous>, transform_indices = @transform_10, window_bounds = array<i64: 3, 128, 1024>}, {pipeline_mode = #tpu.pipeline_mode<synchronous>, transform_indices = @transform_11, window_bounds = array<i64: 3, 1, 1024>}, {pipeline_mode = #tpu.pipeline_mode<synchronous>, transform_indices = @transform_12, window_bounds = array<i64: 3, 1024, 128>}, {pipeline_mode = #tpu.pipeline_mode<synchronous>, transform_indices = @transform_13, window_bounds = array<i64: 3, 1, 128>}, {pipeline_mode = #tpu.pipeline_mode<synchronous>, transform_indices = @transform_14, window_bounds = array<i64: 3, 1, 128>}, {pipeline_mode = #tpu.pipeline_mode<synchronous>, transform_indices = @transform_15, window_bounds = array<i64: 3, 1, 128>}, {pipeline_mode = #tpu.pipeline_mode<synchronous>, transform_indices = @transform_16, window_bounds = array<i64: 48, 128>}]} {
    %c0 = arith.constant 0 : index
    %c0_0 = arith.constant 0 : index
    %0 = vector.load %arg1[%c0, %c0_0] : memref<48x64xf32, #tpu.memory_space<vmem>>, vector<48x64xf32>
    %1 = arith.truncf %0 : vector<48x64xf32> to vector<48x64xbf16>
    %c0_1 = arith.constant 0 : index
    %c0_2 = arith.constant 0 : index
    %2 = vector.load %arg2[%c0_1, %c0_2] : memref<64x128xbf16, #tpu.memory_space<vmem>>, vector<64x128xbf16>
    %cst = arith.constant dense<0.000000e+00> : vector<48x128xf32>
    %3 = tpu.matmul %1, %2, %cst {dimension_numbers = #tpu.dot_dimension_numbers<[1], [0], [0], [1], [0, 0, 1, 1], [], []>} : vector<48x64xbf16>, vector<64x128xbf16>, vector<48x128xf32> -> vector<48x128xf32>
    %c0_3 = arith.constant 0 : index
    %c0_4 = arith.constant 0 : index
    %4 = vector.load %arg3[%c0_3, %c0_4] : memref<48x128xf32, #tpu.memory_space<vmem>>, vector<48x128xf32>
    %5 = arith.addf %3, %4 : vector<48x128xf32>
    %c0_5 = arith.constant 0 : index
    %c0_6 = arith.constant 0 : index
    %6 = vector.load %arg4[%c0_5, %c0_6] : memref<192x48xf32, #tpu.memory_space<vmem>>, vector<192x48xf32>
    %7 = arith.truncf %5 : vector<48x128xf32> to vector<48x128xbf16>
    %c0_7 = arith.constant 0 : index
    %c0_8 = arith.constant 0 : index
    %c0_9 = arith.constant 0 : index
    %8 = vector.load %arg5[%c0_7, %c0_8, %c0_9] : memref<3x128x384xbf16, #tpu.memory_space<vmem>>, vector<1x128x384xbf16>
    %9 = vector.shape_cast %8 : vector<1x128x384xbf16> to vector<128x384xbf16>
    %cst_10 = arith.constant dense<0.000000e+00> : vector<48x384xf32>
    %10 = tpu.matmul %7, %9, %cst_10 {dimension_numbers = #tpu.dot_dimension_numbers<[1], [0], [0], [1], [0, 0, 1, 1], [], []>} : vector<48x128xbf16>, vector<128x384xbf16>, vector<48x384xf32> -> vector<48x384xf32>
    %c0_11 = arith.constant 0 : index
    %c0_12 = arith.constant 0 : index
    %c0_13 = arith.constant 0 : index
    %11 = vector.load %arg6[%c0_11, %c0_12, %c0_13] : memref<3x1x384xf32, #tpu.memory_space<vmem>>, vector<1x1x384xf32>
    %12 = vector.shape_cast %11 : vector<1x1x384xf32> to vector<1x384xf32>
    %13 = vector.broadcast %12 : vector<1x384xf32> to vector<48x384xf32>
    %14 = arith.addf %10, %13 : vector<48x384xf32>
    %15 = vector.extract_strided_slice %14 {offsets = [0, 0], sizes = [48, 128], strides = [1, 1]} : vector<48x384xf32> to vector<48x128xf32>
    %cst_14 = arith.constant 0.176776692 : f32
    %16 = vector.broadcast %cst_14 : f32 to vector<48x128xf32>
    %17 = arith.mulf %15, %16 : vector<48x128xf32>
    %18 = arith.truncf %17 : vector<48x128xf32> to vector<48x128xbf16>
    %19 = vector.extract_strided_slice %14 {offsets = [0, 128], sizes = [48, 128], strides = [1, 1]} : vector<48x384xf32> to vector<48x128xf32>
    %20 = arith.truncf %19 : vector<48x128xf32> to vector<48x128xbf16>
    %21 = vector.extract_strided_slice %14 {offsets = [0, 256], sizes = [48, 128], strides = [1, 1]} : vector<48x384xf32> to vector<48x128xf32>
    %22 = arith.truncf %21 : vector<48x128xf32> to vector<48x128xbf16>
    %23 = vector.extract_strided_slice %18 {offsets = [0, 0], sizes = [48, 32], strides = [1, 1]} : vector<48x128xbf16> to vector<48x32xbf16>
    %24 = vector.extract_strided_slice %20 {offsets = [0, 0], sizes = [48, 32], strides = [1, 1]} : vector<48x128xbf16> to vector<48x32xbf16>
    %cst_15 = arith.constant dense<0.000000e+00> : vector<48x48xf32>
    %25 = tpu.matmul %23, %24, %cst_15 {dimension_numbers = #tpu.dot_dimension_numbers<[1], [1], [0], [0], [0, 0, 1, 0], [], []>} : vector<48x32xbf16>, vector<48x32xbf16>, vector<48x48xf32> -> vector<48x48xf32>
    %26 = vector.extract_strided_slice %18 {offsets = [0, 32], sizes = [48, 32], strides = [1, 1]} : vector<48x128xbf16> to vector<48x32xbf16>
    %27 = vector.extract_strided_slice %20 {offsets = [0, 32], sizes = [48, 32], strides = [1, 1]} : vector<48x128xbf16> to vector<48x32xbf16>
    %cst_16 = arith.constant dense<0.000000e+00> : vector<48x48xf32>
    %28 = tpu.matmul %26, %27, %cst_16 {dimension_numbers = #tpu.dot_dimension_numbers<[1], [1], [0], [0], [0, 0, 1, 0], [], []>} : vector<48x32xbf16>, vector<48x32xbf16>, vector<48x48xf32> -> vector<48x48xf32>
    %29 = vector.extract_strided_slice %18 {offsets = [0, 64], sizes = [48, 32], strides = [1, 1]} : vector<48x128xbf16> to vector<48x32xbf16>
    %30 = vector.extract_strided_slice %20 {offsets = [0, 64], sizes = [48, 32], strides = [1, 1]} : vector<48x128xbf16> to vector<48x32xbf16>
    %cst_17 = arith.constant dense<0.000000e+00> : vector<48x48xf32>
    %31 = tpu.matmul %29, %30, %cst_17 {dimension_numbers = #tpu.dot_dimension_numbers<[1], [1], [0], [0], [0, 0, 1, 0], [], []>} : vector<48x32xbf16>, vector<48x32xbf16>, vector<48x48xf32> -> vector<48x48xf32>
    %32 = vector.extract_strided_slice %18 {offsets = [0, 96], sizes = [48, 32], strides = [1, 1]} : vector<48x128xbf16> to vector<48x32xbf16>
    %33 = vector.extract_strided_slice %20 {offsets = [0, 96], sizes = [48, 32], strides = [1, 1]} : vector<48x128xbf16> to vector<48x32xbf16>
    %cst_18 = arith.constant dense<0.000000e+00> : vector<48x48xf32>
    %34 = tpu.matmul %32, %33, %cst_18 {dimension_numbers = #tpu.dot_dimension_numbers<[1], [1], [0], [0], [0, 0, 1, 0], [], []>} : vector<48x32xbf16>, vector<48x32xbf16>, vector<48x48xf32> -> vector<48x48xf32>
    %35 = tpu.concatenate %25, %28, %31, %34 in 0 : vector<48x48xf32>, vector<48x48xf32>, vector<48x48xf32>, vector<48x48xf32> -> vector<192x48xf32>
    %36 = arith.addf %35, %6 : vector<192x48xf32>
    %cst_19 = arith.constant dense<0xFF800000> : vector<192xf32>
    %37 = vector.multi_reduction <maximumf>, %36, %cst_19 [1] : vector<192x48xf32> to vector<192xf32>
    %38 = vector.shape_cast %37 : vector<192xf32> to vector<192x1xf32>
    %39 = vector.broadcast %38 : vector<192x1xf32> to vector<192x48xf32>
    %40 = arith.subf %36, %39 : vector<192x48xf32>
    %41 = math.exp %40 : vector<192x48xf32>
    %cst_20 = arith.constant dense<0.000000e+00> : vector<192xf32>
    %42 = vector.multi_reduction <add>, %41, %cst_20 [1] : vector<192x48xf32> to vector<192xf32>
    %43 = vector.shape_cast %42 : vector<192xf32> to vector<192x1xf32>
    %44 = tpu.reciprocal %43 {approx = true} : vector<192x1xf32> -> vector<192x1xf32>
    %45 = vector.broadcast %44 : vector<192x1xf32> to vector<192x48xf32>
    %46 = arith.mulf %41, %45 : vector<192x48xf32>
    %47 = arith.truncf %46 : vector<192x48xf32> to vector<192x48xbf16>
    %48 = vector.extract_strided_slice %47 {offsets = [0, 0], sizes = [48, 48], strides = [1, 1]} : vector<192x48xbf16> to vector<48x48xbf16>
    %49 = vector.extract_strided_slice %22 {offsets = [0, 0], sizes = [48, 32], strides = [1, 1]} : vector<48x128xbf16> to vector<48x32xbf16>
    %cst_21 = arith.constant dense<0.000000e+00> : vector<48x32xf32>
    %50 = tpu.matmul %48, %49, %cst_21 {dimension_numbers = #tpu.dot_dimension_numbers<[1], [0], [0], [1], [0, 0, 1, 1], [], []>} : vector<48x48xbf16>, vector<48x32xbf16>, vector<48x32xf32> -> vector<48x32xf32>
    %51 = vector.extract_strided_slice %47 {offsets = [48, 0], sizes = [48, 48], strides = [1, 1]} : vector<192x48xbf16> to vector<48x48xbf16>
    %52 = vector.extract_strided_slice %22 {offsets = [0, 32], sizes = [48, 32], strides = [1, 1]} : vector<48x128xbf16> to vector<48x32xbf16>
    %cst_22 = arith.constant dense<0.000000e+00> : vector<48x32xf32>
    %53 = tpu.matmul %51, %52, %cst_22 {dimension_numbers = #tpu.dot_dimension_numbers<[1], [0], [0], [1], [0, 0, 1, 1], [], []>} : vector<48x48xbf16>, vector<48x32xbf16>, vector<48x32xf32> -> vector<48x32xf32>
    %54 = vector.extract_strided_slice %47 {offsets = [96, 0], sizes = [48, 48], strides = [1, 1]} : vector<192x48xbf16> to vector<48x48xbf16>
    %55 = vector.extract_strided_slice %22 {offsets = [0, 64], sizes = [48, 32], strides = [1, 1]} : vector<48x128xbf16> to vector<48x32xbf16>
    %cst_23 = arith.constant dense<0.000000e+00> : vector<48x32xf32>
    %56 = tpu.matmul %54, %55, %cst_23 {dimension_numbers = #tpu.dot_dimension_numbers<[1], [0], [0], [1], [0, 0, 1, 1], [], []>} : vector<48x48xbf16>, vector<48x32xbf16>, vector<48x32xf32> -> vector<48x32xf32>
    %57 = vector.extract_strided_slice %47 {offsets = [144, 0], sizes = [48, 48], strides = [1, 1]} : vector<192x48xbf16> to vector<48x48xbf16>
    %58 = vector.extract_strided_slice %22 {offsets = [0, 96], sizes = [48, 32], strides = [1, 1]} : vector<48x128xbf16> to vector<48x32xbf16>
    %cst_24 = arith.constant dense<0.000000e+00> : vector<48x32xf32>
    %59 = tpu.matmul %57, %58, %cst_24 {dimension_numbers = #tpu.dot_dimension_numbers<[1], [0], [0], [1], [0, 0, 1, 1], [], []>} : vector<48x48xbf16>, vector<48x32xbf16>, vector<48x32xf32> -> vector<48x32xf32>
    %60 = tpu.concatenate %50, %53, %56, %59 in 1 : vector<48x32xf32>, vector<48x32xf32>, vector<48x32xf32>, vector<48x32xf32> -> vector<48x128xf32>
    %61 = arith.truncf %60 : vector<48x128xf32> to vector<48x128xbf16>
    %c0_25 = arith.constant 0 : index
    %c0_26 = arith.constant 0 : index
    %c0_27 = arith.constant 0 : index
    %62 = vector.load %arg7[%c0_25, %c0_26, %c0_27] : memref<3x128x128xbf16, #tpu.memory_space<vmem>>, vector<1x128x128xbf16>
    %63 = vector.shape_cast %62 : vector<1x128x128xbf16> to vector<128x128xbf16>
    %cst_28 = arith.constant dense<0.000000e+00> : vector<48x128xf32>
    %64 = tpu.matmul %61, %63, %cst_28 {dimension_numbers = #tpu.dot_dimension_numbers<[1], [0], [0], [1], [0, 0, 1, 1], [], []>} : vector<48x128xbf16>, vector<128x128xbf16>, vector<48x128xf32> -> vector<48x128xf32>
    %c0_29 = arith.constant 0 : index
    %c0_30 = arith.constant 0 : index
    %c0_31 = arith.constant 0 : index
    %65 = vector.load %arg8[%c0_29, %c0_30, %c0_31] : memref<3x1x128xf32, #tpu.memory_space<vmem>>, vector<1x1x128xf32>
    %66 = vector.shape_cast %65 : vector<1x1x128xf32> to vector<1x128xf32>
    %67 = vector.broadcast %66 : vector<1x128xf32> to vector<48x128xf32>
    %68 = arith.addf %64, %67 : vector<48x128xf32>
    %69 = arith.addf %5, %68 : vector<48x128xf32>
    %c0_32 = arith.constant 0 : index
    %c0_33 = arith.constant 0 : index
    %c0_34 = arith.constant 0 : index
    %70 = vector.load %arg9[%c0_32, %c0_33, %c0_34] : memref<3x1x128xf32, #tpu.memory_space<vmem>>, vector<1x1x128xf32>
    %71 = vector.shape_cast %70 : vector<1x1x128xf32> to vector<1x128xf32>
    %c0_35 = arith.constant 0 : index
    %c0_36 = arith.constant 0 : index
    %c0_37 = arith.constant 0 : index
    %72 = vector.load %arg10[%c0_35, %c0_36, %c0_37] : memref<3x1x128xf32, #tpu.memory_space<vmem>>, vector<1x1x128xf32>
    %73 = vector.shape_cast %72 : vector<1x1x128xf32> to vector<1x128xf32>
    %cst_38 = arith.constant dense<0.000000e+00> : vector<48xf32>
    %74 = vector.multi_reduction <add>, %69, %cst_38 [1] : vector<48x128xf32> to vector<48xf32>
    %75 = vector.shape_cast %74 : vector<48xf32> to vector<48x1xf32>
    %cst_39 = arith.constant 1.280000e+02 : f32
    %76 = vector.broadcast %cst_39 : f32 to vector<48x1xf32>
    %77 = arith.divf %75, %76 : vector<48x1xf32>
    %78 = vector.broadcast %77 : vector<48x1xf32> to vector<48x128xf32>
    %79 = arith.subf %69, %78 : vector<48x128xf32>
    %80 = arith.mulf %79, %79 : vector<48x128xf32>
    %cst_40 = arith.constant dense<0.000000e+00> : vector<48xf32>
    %81 = vector.multi_reduction <add>, %80, %cst_40 [1] : vector<48x128xf32> to vector<48xf32>
    %82 = vector.shape_cast %81 : vector<48xf32> to vector<48x1xf32>
    %cst_41 = arith.constant 1.280000e+02 : f32
    %83 = vector.broadcast %cst_41 : f32 to vector<48x1xf32>
    %84 = arith.divf %82, %83 : vector<48x1xf32>
    %cst_42 = arith.constant 9.99999974E-6 : f32
    %85 = vector.broadcast %cst_42 : f32 to vector<48x1xf32>
    %86 = arith.addf %84, %85 : vector<48x1xf32>
    %87 = math.rsqrt %86 : vector<48x1xf32>
    %88 = vector.broadcast %87 : vector<48x1xf32> to vector<48x128xf32>
    %89 = arith.mulf %79, %88 : vector<48x128xf32>
    %90 = vector.broadcast %71 : vector<1x128xf32> to vector<48x128xf32>
    %91 = arith.mulf %89, %90 : vector<48x128xf32>
    %92 = vector.broadcast %73 : vector<1x128xf32> to vector<48x128xf32>
    %93 = arith.addf %91, %92 : vector<48x128xf32>
    %94 = arith.truncf %93 : vector<48x128xf32> to vector<48x128xbf16>
    %cst_43 = arith.constant 0.000000e+00 : f32
    %95 = vector.broadcast %cst_43 : f32 to vector<48x128xf32>
    %c0_44 = arith.constant 0 : index
    %c0_45 = arith.constant 0 : index
    %c0_46 = arith.constant 0 : index
    %96 = vector.load %arg11[%c0_44, %c0_45, %c0_46] : memref<3x128x1024xbf16, #tpu.memory_space<vmem>>, vector<1x128x512xbf16>
    %97 = vector.shape_cast %96 : vector<1x128x512xbf16> to vector<128x512xbf16>
    %cst_47 = arith.constant dense<0.000000e+00> : vector<48x512xf32>
    %98 = tpu.matmul %94, %97, %cst_47 {dimension_numbers = #tpu.dot_dimension_numbers<[1], [0], [0], [1], [0, 0, 1, 1], [], []>} : vector<48x128xbf16>, vector<128x512xbf16>, vector<48x512xf32> -> vector<48x512xf32>
    %c0_48 = arith.constant 0 : index
    %c0_49 = arith.constant 0 : index
    %c0_50 = arith.constant 0 : index
    %99 = vector.load %arg12[%c0_48, %c0_49, %c0_50] : memref<3x1x1024xf32, #tpu.memory_space<vmem>>, vector<1x1x512xf32>
    %100 = vector.shape_cast %99 : vector<1x1x512xf32> to vector<1x512xf32>
    %101 = vector.broadcast %100 : vector<1x512xf32> to vector<48x512xf32>
    %102 = arith.addf %98, %101 : vector<48x512xf32>
    %cst_51 = arith.constant 0.000000e+00 : f32
    %103 = vector.broadcast %cst_51 : f32 to vector<48x512xf32>
    %104 = arith.maximumf %102, %103 : vector<48x512xf32>
    %105 = arith.truncf %104 : vector<48x512xf32> to vector<48x512xbf16>
    %c0_52 = arith.constant 0 : index
    %c0_53 = arith.constant 0 : index
    %c0_54 = arith.constant 0 : index
    %106 = vector.load %arg13[%c0_52, %c0_53, %c0_54] : memref<3x1024x128xbf16, #tpu.memory_space<vmem>>, vector<1x512x128xbf16>
    %107 = vector.shape_cast %106 : vector<1x512x128xbf16> to vector<512x128xbf16>
    %cst_55 = arith.constant dense<0.000000e+00> : vector<48x128xf32>
    %108 = tpu.matmul %105, %107, %cst_55 {dimension_numbers = #tpu.dot_dimension_numbers<[1], [0], [0], [1], [0, 0, 1, 1], [], []>} : vector<48x512xbf16>, vector<512x128xbf16>, vector<48x128xf32> -> vector<48x128xf32>
    %109 = arith.addf %95, %108 : vector<48x128xf32>
    %c0_56 = arith.constant 0 : index
    %c0_57 = arith.constant 0 : index
    %c512 = arith.constant 512 : index
    %110 = vector.load %arg11[%c0_56, %c0_57, %c512] : memref<3x128x1024xbf16, #tpu.memory_space<vmem>>, vector<1x128x512xbf16>
    %111 = vector.shape_cast %110 : vector<1x128x512xbf16> to vector<128x512xbf16>
    %cst_58 = arith.constant dense<0.000000e+00> : vector<48x512xf32>
    %112 = tpu.matmul %94, %111, %cst_58 {dimension_numbers = #tpu.dot_dimension_numbers<[1], [0], [0], [1], [0, 0, 1, 1], [], []>} : vector<48x128xbf16>, vector<128x512xbf16>, vector<48x512xf32> -> vector<48x512xf32>
    %c0_59 = arith.constant 0 : index
    %c0_60 = arith.constant 0 : index
    %c512_61 = arith.constant 512 : index
    %113 = vector.load %arg12[%c0_59, %c0_60, %c512_61] : memref<3x1x1024xf32, #tpu.memory_space<vmem>>, vector<1x1x512xf32>
    %114 = vector.shape_cast %113 : vector<1x1x512xf32> to vector<1x512xf32>
    %115 = vector.broadcast %114 : vector<1x512xf32> to vector<48x512xf32>
    %116 = arith.addf %112, %115 : vector<48x512xf32>
    %cst_62 = arith.constant 0.000000e+00 : f32
    %117 = vector.broadcast %cst_62 : f32 to vector<48x512xf32>
    %118 = arith.maximumf %116, %117 : vector<48x512xf32>
    %119 = arith.truncf %118 : vector<48x512xf32> to vector<48x512xbf16>
    %c0_63 = arith.constant 0 : index
    %c512_64 = arith.constant 512 : index
    %c0_65 = arith.constant 0 : index
    %120 = vector.load %arg13[%c0_63, %c512_64, %c0_65] : memref<3x1024x128xbf16, #tpu.memory_space<vmem>>, vector<1x512x128xbf16>
    %121 = vector.shape_cast %120 : vector<1x512x128xbf16> to vector<512x128xbf16>
    %cst_66 = arith.constant dense<0.000000e+00> : vector<48x128xf32>
    %122 = tpu.matmul %119, %121, %cst_66 {dimension_numbers = #tpu.dot_dimension_numbers<[1], [0], [0], [1], [0, 0, 1, 1], [], []>} : vector<48x512xbf16>, vector<512x128xbf16>, vector<48x128xf32> -> vector<48x128xf32>
    %123 = arith.addf %109, %122 : vector<48x128xf32>
    %c0_67 = arith.constant 0 : index
    %c0_68 = arith.constant 0 : index
    %c0_69 = arith.constant 0 : index
    %124 = vector.load %arg14[%c0_67, %c0_68, %c0_69] : memref<3x1x128xf32, #tpu.memory_space<vmem>>, vector<1x1x128xf32>
    %125 = vector.shape_cast %124 : vector<1x1x128xf32> to vector<1x128xf32>
    %126 = vector.broadcast %125 : vector<1x128xf32> to vector<48x128xf32>
    %127 = arith.addf %123, %126 : vector<48x128xf32>
    %128 = arith.addf %93, %127 : vector<48x128xf32>
    %c0_70 = arith.constant 0 : index
    %c0_71 = arith.constant 0 : index
    %c0_72 = arith.constant 0 : index
    %129 = vector.load %arg15[%c0_70, %c0_71, %c0_72] : memref<3x1x128xf32, #tpu.memory_space<vmem>>, vector<1x1x128xf32>
    %130 = vector.shape_cast %129 : vector<1x1x128xf32> to vector<1x128xf32>
    %c0_73 = arith.constant 0 : index
    %c0_74 = arith.constant 0 : index
    %c0_75 = arith.constant 0 : index
    %131 = vector.load %arg16[%c0_73, %c0_74, %c0_75] : memref<3x1x128xf32, #tpu.memory_space<vmem>>, vector<1x1x128xf32>
    %132 = vector.shape_cast %131 : vector<1x1x128xf32> to vector<1x128xf32>
    %cst_76 = arith.constant dense<0.000000e+00> : vector<48xf32>
    %133 = vector.multi_reduction <add>, %128, %cst_76 [1] : vector<48x128xf32> to vector<48xf32>
    %134 = vector.shape_cast %133 : vector<48xf32> to vector<48x1xf32>
    %cst_77 = arith.constant 1.280000e+02 : f32
    %135 = vector.broadcast %cst_77 : f32 to vector<48x1xf32>
    %136 = arith.divf %134, %135 : vector<48x1xf32>
    %137 = vector.broadcast %136 : vector<48x1xf32> to vector<48x128xf32>
    %138 = arith.subf %128, %137 : vector<48x128xf32>
    %139 = arith.mulf %138, %138 : vector<48x128xf32>
    %cst_78 = arith.constant dense<0.000000e+00> : vector<48xf32>
    %140 = vector.multi_reduction <add>, %139, %cst_78 [1] : vector<48x128xf32> to vector<48xf32>
    %141 = vector.shape_cast %140 : vector<48xf32> to vector<48x1xf32>
    %cst_79 = arith.constant 1.280000e+02 : f32
    %142 = vector.broadcast %cst_79 : f32 to vector<48x1xf32>
    %143 = arith.divf %141, %142 : vector<48x1xf32>
    %cst_80 = arith.constant 9.99999974E-6 : f32
    %144 = vector.broadcast %cst_80 : f32 to vector<48x1xf32>
    %145 = arith.addf %143, %144 : vector<48x1xf32>
    %146 = math.rsqrt %145 : vector<48x1xf32>
    %147 = vector.broadcast %146 : vector<48x1xf32> to vector<48x128xf32>
    %148 = arith.mulf %138, %147 : vector<48x128xf32>
    %149 = vector.broadcast %130 : vector<1x128xf32> to vector<48x128xf32>
    %150 = arith.mulf %148, %149 : vector<48x128xf32>
    %151 = vector.broadcast %132 : vector<1x128xf32> to vector<48x128xf32>
    %152 = arith.addf %150, %151 : vector<48x128xf32>
    %153 = arith.truncf %152 : vector<48x128xf32> to vector<48x128xbf16>
    %c1 = arith.constant 1 : index
    %c0_81 = arith.constant 0 : index
    %c0_82 = arith.constant 0 : index
    %154 = vector.load %arg5[%c1, %c0_81, %c0_82] : memref<3x128x384xbf16, #tpu.memory_space<vmem>>, vector<1x128x384xbf16>
    %155 = vector.shape_cast %154 : vector<1x128x384xbf16> to vector<128x384xbf16>
    %cst_83 = arith.constant dense<0.000000e+00> : vector<48x384xf32>
    %156 = tpu.matmul %153, %155, %cst_83 {dimension_numbers = #tpu.dot_dimension_numbers<[1], [0], [0], [1], [0, 0, 1, 1], [], []>} : vector<48x128xbf16>, vector<128x384xbf16>, vector<48x384xf32> -> vector<48x384xf32>
    %c1_84 = arith.constant 1 : index
    %c0_85 = arith.constant 0 : index
    %c0_86 = arith.constant 0 : index
    %157 = vector.load %arg6[%c1_84, %c0_85, %c0_86] : memref<3x1x384xf32, #tpu.memory_space<vmem>>, vector<1x1x384xf32>
    %158 = vector.shape_cast %157 : vector<1x1x384xf32> to vector<1x384xf32>
    %159 = vector.broadcast %158 : vector<1x384xf32> to vector<48x384xf32>
    %160 = arith.addf %156, %159 : vector<48x384xf32>
    %161 = vector.extract_strided_slice %160 {offsets = [0, 0], sizes = [48, 128], strides = [1, 1]} : vector<48x384xf32> to vector<48x128xf32>
    %cst_87 = arith.constant 0.176776692 : f32
    %162 = vector.broadcast %cst_87 : f32 to vector<48x128xf32>
    %163 = arith.mulf %161, %162 : vector<48x128xf32>
    %164 = arith.truncf %163 : vector<48x128xf32> to vector<48x128xbf16>
    %165 = vector.extract_strided_slice %160 {offsets = [0, 128], sizes = [48, 128], strides = [1, 1]} : vector<48x384xf32> to vector<48x128xf32>
    %166 = arith.truncf %165 : vector<48x128xf32> to vector<48x128xbf16>
    %167 = vector.extract_strided_slice %160 {offsets = [0, 256], sizes = [48, 128], strides = [1, 1]} : vector<48x384xf32> to vector<48x128xf32>
    %168 = arith.truncf %167 : vector<48x128xf32> to vector<48x128xbf16>
    %169 = vector.extract_strided_slice %164 {offsets = [0, 0], sizes = [48, 32], strides = [1, 1]} : vector<48x128xbf16> to vector<48x32xbf16>
    %170 = vector.extract_strided_slice %166 {offsets = [0, 0], sizes = [48, 32], strides = [1, 1]} : vector<48x128xbf16> to vector<48x32xbf16>
    %cst_88 = arith.constant dense<0.000000e+00> : vector<48x48xf32>
    %171 = tpu.matmul %169, %170, %cst_88 {dimension_numbers = #tpu.dot_dimension_numbers<[1], [1], [0], [0], [0, 0, 1, 0], [], []>} : vector<48x32xbf16>, vector<48x32xbf16>, vector<48x48xf32> -> vector<48x48xf32>
    %172 = vector.extract_strided_slice %164 {offsets = [0, 32], sizes = [48, 32], strides = [1, 1]} : vector<48x128xbf16> to vector<48x32xbf16>
    %173 = vector.extract_strided_slice %166 {offsets = [0, 32], sizes = [48, 32], strides = [1, 1]} : vector<48x128xbf16> to vector<48x32xbf16>
    %cst_89 = arith.constant dense<0.000000e+00> : vector<48x48xf32>
    %174 = tpu.matmul %172, %173, %cst_89 {dimension_numbers = #tpu.dot_dimension_numbers<[1], [1], [0], [0], [0, 0, 1, 0], [], []>} : vector<48x32xbf16>, vector<48x32xbf16>, vector<48x48xf32> -> vector<48x48xf32>
    %175 = vector.extract_strided_slice %164 {offsets = [0, 64], sizes = [48, 32], strides = [1, 1]} : vector<48x128xbf16> to vector<48x32xbf16>
    %176 = vector.extract_strided_slice %166 {offsets = [0, 64], sizes = [48, 32], strides = [1, 1]} : vector<48x128xbf16> to vector<48x32xbf16>
    %cst_90 = arith.constant dense<0.000000e+00> : vector<48x48xf32>
    %177 = tpu.matmul %175, %176, %cst_90 {dimension_numbers = #tpu.dot_dimension_numbers<[1], [1], [0], [0], [0, 0, 1, 0], [], []>} : vector<48x32xbf16>, vector<48x32xbf16>, vector<48x48xf32> -> vector<48x48xf32>
    %178 = vector.extract_strided_slice %164 {offsets = [0, 96], sizes = [48, 32], strides = [1, 1]} : vector<48x128xbf16> to vector<48x32xbf16>
    %179 = vector.extract_strided_slice %166 {offsets = [0, 96], sizes = [48, 32], strides = [1, 1]} : vector<48x128xbf16> to vector<48x32xbf16>
    %cst_91 = arith.constant dense<0.000000e+00> : vector<48x48xf32>
    %180 = tpu.matmul %178, %179, %cst_91 {dimension_numbers = #tpu.dot_dimension_numbers<[1], [1], [0], [0], [0, 0, 1, 0], [], []>} : vector<48x32xbf16>, vector<48x32xbf16>, vector<48x48xf32> -> vector<48x48xf32>
    %181 = tpu.concatenate %171, %174, %177, %180 in 0 : vector<48x48xf32>, vector<48x48xf32>, vector<48x48xf32>, vector<48x48xf32> -> vector<192x48xf32>
    %182 = arith.addf %181, %6 : vector<192x48xf32>
    %cst_92 = arith.constant dense<0xFF800000> : vector<192xf32>
    %183 = vector.multi_reduction <maximumf>, %182, %cst_92 [1] : vector<192x48xf32> to vector<192xf32>
    %184 = vector.shape_cast %183 : vector<192xf32> to vector<192x1xf32>
    %185 = vector.broadcast %184 : vector<192x1xf32> to vector<192x48xf32>
    %186 = arith.subf %182, %185 : vector<192x48xf32>
    %187 = math.exp %186 : vector<192x48xf32>
    %cst_93 = arith.constant dense<0.000000e+00> : vector<192xf32>
    %188 = vector.multi_reduction <add>, %187, %cst_93 [1] : vector<192x48xf32> to vector<192xf32>
    %189 = vector.shape_cast %188 : vector<192xf32> to vector<192x1xf32>
    %190 = tpu.reciprocal %189 {approx = true} : vector<192x1xf32> -> vector<192x1xf32>
    %191 = vector.broadcast %190 : vector<192x1xf32> to vector<192x48xf32>
    %192 = arith.mulf %187, %191 : vector<192x48xf32>
    %193 = arith.truncf %192 : vector<192x48xf32> to vector<192x48xbf16>
    %194 = vector.extract_strided_slice %193 {offsets = [0, 0], sizes = [48, 48], strides = [1, 1]} : vector<192x48xbf16> to vector<48x48xbf16>
    %195 = vector.extract_strided_slice %168 {offsets = [0, 0], sizes = [48, 32], strides = [1, 1]} : vector<48x128xbf16> to vector<48x32xbf16>
    %cst_94 = arith.constant dense<0.000000e+00> : vector<48x32xf32>
    %196 = tpu.matmul %194, %195, %cst_94 {dimension_numbers = #tpu.dot_dimension_numbers<[1], [0], [0], [1], [0, 0, 1, 1], [], []>} : vector<48x48xbf16>, vector<48x32xbf16>, vector<48x32xf32> -> vector<48x32xf32>
    %197 = vector.extract_strided_slice %193 {offsets = [48, 0], sizes = [48, 48], strides = [1, 1]} : vector<192x48xbf16> to vector<48x48xbf16>
    %198 = vector.extract_strided_slice %168 {offsets = [0, 32], sizes = [48, 32], strides = [1, 1]} : vector<48x128xbf16> to vector<48x32xbf16>
    %cst_95 = arith.constant dense<0.000000e+00> : vector<48x32xf32>
    %199 = tpu.matmul %197, %198, %cst_95 {dimension_numbers = #tpu.dot_dimension_numbers<[1], [0], [0], [1], [0, 0, 1, 1], [], []>} : vector<48x48xbf16>, vector<48x32xbf16>, vector<48x32xf32> -> vector<48x32xf32>
    %200 = vector.extract_strided_slice %193 {offsets = [96, 0], sizes = [48, 48], strides = [1, 1]} : vector<192x48xbf16> to vector<48x48xbf16>
    %201 = vector.extract_strided_slice %168 {offsets = [0, 64], sizes = [48, 32], strides = [1, 1]} : vector<48x128xbf16> to vector<48x32xbf16>
    %cst_96 = arith.constant dense<0.000000e+00> : vector<48x32xf32>
    %202 = tpu.matmul %200, %201, %cst_96 {dimension_numbers = #tpu.dot_dimension_numbers<[1], [0], [0], [1], [0, 0, 1, 1], [], []>} : vector<48x48xbf16>, vector<48x32xbf16>, vector<48x32xf32> -> vector<48x32xf32>
    %203 = vector.extract_strided_slice %193 {offsets = [144, 0], sizes = [48, 48], strides = [1, 1]} : vector<192x48xbf16> to vector<48x48xbf16>
    %204 = vector.extract_strided_slice %168 {offsets = [0, 96], sizes = [48, 32], strides = [1, 1]} : vector<48x128xbf16> to vector<48x32xbf16>
    %cst_97 = arith.constant dense<0.000000e+00> : vector<48x32xf32>
    %205 = tpu.matmul %203, %204, %cst_97 {dimension_numbers = #tpu.dot_dimension_numbers<[1], [0], [0], [1], [0, 0, 1, 1], [], []>} : vector<48x48xbf16>, vector<48x32xbf16>, vector<48x32xf32> -> vector<48x32xf32>
    %206 = tpu.concatenate %196, %199, %202, %205 in 1 : vector<48x32xf32>, vector<48x32xf32>, vector<48x32xf32>, vector<48x32xf32> -> vector<48x128xf32>
    %207 = arith.truncf %206 : vector<48x128xf32> to vector<48x128xbf16>
    %c1_98 = arith.constant 1 : index
    %c0_99 = arith.constant 0 : index
    %c0_100 = arith.constant 0 : index
    %208 = vector.load %arg7[%c1_98, %c0_99, %c0_100] : memref<3x128x128xbf16, #tpu.memory_space<vmem>>, vector<1x128x128xbf16>
    %209 = vector.shape_cast %208 : vector<1x128x128xbf16> to vector<128x128xbf16>
    %cst_101 = arith.constant dense<0.000000e+00> : vector<48x128xf32>
    %210 = tpu.matmul %207, %209, %cst_101 {dimension_numbers = #tpu.dot_dimension_numbers<[1], [0], [0], [1], [0, 0, 1, 1], [], []>} : vector<48x128xbf16>, vector<128x128xbf16>, vector<48x128xf32> -> vector<48x128xf32>
    %c1_102 = arith.constant 1 : index
    %c0_103 = arith.constant 0 : index
    %c0_104 = arith.constant 0 : index
    %211 = vector.load %arg8[%c1_102, %c0_103, %c0_104] : memref<3x1x128xf32, #tpu.memory_space<vmem>>, vector<1x1x128xf32>
    %212 = vector.shape_cast %211 : vector<1x1x128xf32> to vector<1x128xf32>
    %213 = vector.broadcast %212 : vector<1x128xf32> to vector<48x128xf32>
    %214 = arith.addf %210, %213 : vector<48x128xf32>
    %215 = arith.addf %152, %214 : vector<48x128xf32>
    %c1_105 = arith.constant 1 : index
    %c0_106 = arith.constant 0 : index
    %c0_107 = arith.constant 0 : index
    %216 = vector.load %arg9[%c1_105, %c0_106, %c0_107] : memref<3x1x128xf32, #tpu.memory_space<vmem>>, vector<1x1x128xf32>
    %217 = vector.shape_cast %216 : vector<1x1x128xf32> to vector<1x128xf32>
    %c1_108 = arith.constant 1 : index
    %c0_109 = arith.constant 0 : index
    %c0_110 = arith.constant 0 : index
    %218 = vector.load %arg10[%c1_108, %c0_109, %c0_110] : memref<3x1x128xf32, #tpu.memory_space<vmem>>, vector<1x1x128xf32>
    %219 = vector.shape_cast %218 : vector<1x1x128xf32> to vector<1x128xf32>
    %cst_111 = arith.constant dense<0.000000e+00> : vector<48xf32>
    %220 = vector.multi_reduction <add>, %215, %cst_111 [1] : vector<48x128xf32> to vector<48xf32>
    %221 = vector.shape_cast %220 : vector<48xf32> to vector<48x1xf32>
    %cst_112 = arith.constant 1.280000e+02 : f32
    %222 = vector.broadcast %cst_112 : f32 to vector<48x1xf32>
    %223 = arith.divf %221, %222 : vector<48x1xf32>
    %224 = vector.broadcast %223 : vector<48x1xf32> to vector<48x128xf32>
    %225 = arith.subf %215, %224 : vector<48x128xf32>
    %226 = arith.mulf %225, %225 : vector<48x128xf32>
    %cst_113 = arith.constant dense<0.000000e+00> : vector<48xf32>
    %227 = vector.multi_reduction <add>, %226, %cst_113 [1] : vector<48x128xf32> to vector<48xf32>
    %228 = vector.shape_cast %227 : vector<48xf32> to vector<48x1xf32>
    %cst_114 = arith.constant 1.280000e+02 : f32
    %229 = vector.broadcast %cst_114 : f32 to vector<48x1xf32>
    %230 = arith.divf %228, %229 : vector<48x1xf32>
    %cst_115 = arith.constant 9.99999974E-6 : f32
    %231 = vector.broadcast %cst_115 : f32 to vector<48x1xf32>
    %232 = arith.addf %230, %231 : vector<48x1xf32>
    %233 = math.rsqrt %232 : vector<48x1xf32>
    %234 = vector.broadcast %233 : vector<48x1xf32> to vector<48x128xf32>
    %235 = arith.mulf %225, %234 : vector<48x128xf32>
    %236 = vector.broadcast %217 : vector<1x128xf32> to vector<48x128xf32>
    %237 = arith.mulf %235, %236 : vector<48x128xf32>
    %238 = vector.broadcast %219 : vector<1x128xf32> to vector<48x128xf32>
    %239 = arith.addf %237, %238 : vector<48x128xf32>
    %240 = arith.truncf %239 : vector<48x128xf32> to vector<48x128xbf16>
    %cst_116 = arith.constant 0.000000e+00 : f32
    %241 = vector.broadcast %cst_116 : f32 to vector<48x128xf32>
    %c1_117 = arith.constant 1 : index
    %c0_118 = arith.constant 0 : index
    %c0_119 = arith.constant 0 : index
    %242 = vector.load %arg11[%c1_117, %c0_118, %c0_119] : memref<3x128x1024xbf16, #tpu.memory_space<vmem>>, vector<1x128x512xbf16>
    %243 = vector.shape_cast %242 : vector<1x128x512xbf16> to vector<128x512xbf16>
    %cst_120 = arith.constant dense<0.000000e+00> : vector<48x512xf32>
    %244 = tpu.matmul %240, %243, %cst_120 {dimension_numbers = #tpu.dot_dimension_numbers<[1], [0], [0], [1], [0, 0, 1, 1], [], []>} : vector<48x128xbf16>, vector<128x512xbf16>, vector<48x512xf32> -> vector<48x512xf32>
    %c1_121 = arith.constant 1 : index
    %c0_122 = arith.constant 0 : index
    %c0_123 = arith.constant 0 : index
    %245 = vector.load %arg12[%c1_121, %c0_122, %c0_123] : memref<3x1x1024xf32, #tpu.memory_space<vmem>>, vector<1x1x512xf32>
    %246 = vector.shape_cast %245 : vector<1x1x512xf32> to vector<1x512xf32>
    %247 = vector.broadcast %246 : vector<1x512xf32> to vector<48x512xf32>
    %248 = arith.addf %244, %247 : vector<48x512xf32>
    %cst_124 = arith.constant 0.000000e+00 : f32
    %249 = vector.broadcast %cst_124 : f32 to vector<48x512xf32>
    %250 = arith.maximumf %248, %249 : vector<48x512xf32>
    %251 = arith.truncf %250 : vector<48x512xf32> to vector<48x512xbf16>
    %c1_125 = arith.constant 1 : index
    %c0_126 = arith.constant 0 : index
    %c0_127 = arith.constant 0 : index
    %252 = vector.load %arg13[%c1_125, %c0_126, %c0_127] : memref<3x1024x128xbf16, #tpu.memory_space<vmem>>, vector<1x512x128xbf16>
    %253 = vector.shape_cast %252 : vector<1x512x128xbf16> to vector<512x128xbf16>
    %cst_128 = arith.constant dense<0.000000e+00> : vector<48x128xf32>
    %254 = tpu.matmul %251, %253, %cst_128 {dimension_numbers = #tpu.dot_dimension_numbers<[1], [0], [0], [1], [0, 0, 1, 1], [], []>} : vector<48x512xbf16>, vector<512x128xbf16>, vector<48x128xf32> -> vector<48x128xf32>
    %255 = arith.addf %241, %254 : vector<48x128xf32>
    %c1_129 = arith.constant 1 : index
    %c0_130 = arith.constant 0 : index
    %c512_131 = arith.constant 512 : index
    %256 = vector.load %arg11[%c1_129, %c0_130, %c512_131] : memref<3x128x1024xbf16, #tpu.memory_space<vmem>>, vector<1x128x512xbf16>
    %257 = vector.shape_cast %256 : vector<1x128x512xbf16> to vector<128x512xbf16>
    %cst_132 = arith.constant dense<0.000000e+00> : vector<48x512xf32>
    %258 = tpu.matmul %240, %257, %cst_132 {dimension_numbers = #tpu.dot_dimension_numbers<[1], [0], [0], [1], [0, 0, 1, 1], [], []>} : vector<48x128xbf16>, vector<128x512xbf16>, vector<48x512xf32> -> vector<48x512xf32>
    %c1_133 = arith.constant 1 : index
    %c0_134 = arith.constant 0 : index
    %c512_135 = arith.constant 512 : index
    %259 = vector.load %arg12[%c1_133, %c0_134, %c512_135] : memref<3x1x1024xf32, #tpu.memory_space<vmem>>, vector<1x1x512xf32>
    %260 = vector.shape_cast %259 : vector<1x1x512xf32> to vector<1x512xf32>
    %261 = vector.broadcast %260 : vector<1x512xf32> to vector<48x512xf32>
    %262 = arith.addf %258, %261 : vector<48x512xf32>
    %cst_136 = arith.constant 0.000000e+00 : f32
    %263 = vector.broadcast %cst_136 : f32 to vector<48x512xf32>
    %264 = arith.maximumf %262, %263 : vector<48x512xf32>
    %265 = arith.truncf %264 : vector<48x512xf32> to vector<48x512xbf16>
    %c1_137 = arith.constant 1 : index
    %c512_138 = arith.constant 512 : index
    %c0_139 = arith.constant 0 : index
    %266 = vector.load %arg13[%c1_137, %c512_138, %c0_139] : memref<3x1024x128xbf16, #tpu.memory_space<vmem>>, vector<1x512x128xbf16>
    %267 = vector.shape_cast %266 : vector<1x512x128xbf16> to vector<512x128xbf16>
    %cst_140 = arith.constant dense<0.000000e+00> : vector<48x128xf32>
    %268 = tpu.matmul %265, %267, %cst_140 {dimension_numbers = #tpu.dot_dimension_numbers<[1], [0], [0], [1], [0, 0, 1, 1], [], []>} : vector<48x512xbf16>, vector<512x128xbf16>, vector<48x128xf32> -> vector<48x128xf32>
    %269 = arith.addf %255, %268 : vector<48x128xf32>
    %c1_141 = arith.constant 1 : index
    %c0_142 = arith.constant 0 : index
    %c0_143 = arith.constant 0 : index
    %270 = vector.load %arg14[%c1_141, %c0_142, %c0_143] : memref<3x1x128xf32, #tpu.memory_space<vmem>>, vector<1x1x128xf32>
    %271 = vector.shape_cast %270 : vector<1x1x128xf32> to vector<1x128xf32>
    %272 = vector.broadcast %271 : vector<1x128xf32> to vector<48x128xf32>
    %273 = arith.addf %269, %272 : vector<48x128xf32>
    %274 = arith.addf %239, %273 : vector<48x128xf32>
    %c1_144 = arith.constant 1 : index
    %c0_145 = arith.constant 0 : index
    %c0_146 = arith.constant 0 : index
    %275 = vector.load %arg15[%c1_144, %c0_145, %c0_146] : memref<3x1x128xf32, #tpu.memory_space<vmem>>, vector<1x1x128xf32>
    %276 = vector.shape_cast %275 : vector<1x1x128xf32> to vector<1x128xf32>
    %c1_147 = arith.constant 1 : index
    %c0_148 = arith.constant 0 : index
    %c0_149 = arith.constant 0 : index
    %277 = vector.load %arg16[%c1_147, %c0_148, %c0_149] : memref<3x1x128xf32, #tpu.memory_space<vmem>>, vector<1x1x128xf32>
    %278 = vector.shape_cast %277 : vector<1x1x128xf32> to vector<1x128xf32>
    %cst_150 = arith.constant dense<0.000000e+00> : vector<48xf32>
    %279 = vector.multi_reduction <add>, %274, %cst_150 [1] : vector<48x128xf32> to vector<48xf32>
    %280 = vector.shape_cast %279 : vector<48xf32> to vector<48x1xf32>
    %cst_151 = arith.constant 1.280000e+02 : f32
    %281 = vector.broadcast %cst_151 : f32 to vector<48x1xf32>
    %282 = arith.divf %280, %281 : vector<48x1xf32>
    %283 = vector.broadcast %282 : vector<48x1xf32> to vector<48x128xf32>
    %284 = arith.subf %274, %283 : vector<48x128xf32>
    %285 = arith.mulf %284, %284 : vector<48x128xf32>
    %cst_152 = arith.constant dense<0.000000e+00> : vector<48xf32>
    %286 = vector.multi_reduction <add>, %285, %cst_152 [1] : vector<48x128xf32> to vector<48xf32>
    %287 = vector.shape_cast %286 : vector<48xf32> to vector<48x1xf32>
    %cst_153 = arith.constant 1.280000e+02 : f32
    %288 = vector.broadcast %cst_153 : f32 to vector<48x1xf32>
    %289 = arith.divf %287, %288 : vector<48x1xf32>
    %cst_154 = arith.constant 9.99999974E-6 : f32
    %290 = vector.broadcast %cst_154 : f32 to vector<48x1xf32>
    %291 = arith.addf %289, %290 : vector<48x1xf32>
    %292 = math.rsqrt %291 : vector<48x1xf32>
    %293 = vector.broadcast %292 : vector<48x1xf32> to vector<48x128xf32>
    %294 = arith.mulf %284, %293 : vector<48x128xf32>
    %295 = vector.broadcast %276 : vector<1x128xf32> to vector<48x128xf32>
    %296 = arith.mulf %294, %295 : vector<48x128xf32>
    %297 = vector.broadcast %278 : vector<1x128xf32> to vector<48x128xf32>
    %298 = arith.addf %296, %297 : vector<48x128xf32>
    %299 = arith.truncf %298 : vector<48x128xf32> to vector<48x128xbf16>
    %c2 = arith.constant 2 : index
    %c0_155 = arith.constant 0 : index
    %c0_156 = arith.constant 0 : index
    %300 = vector.load %arg5[%c2, %c0_155, %c0_156] : memref<3x128x384xbf16, #tpu.memory_space<vmem>>, vector<1x128x384xbf16>
    %301 = vector.shape_cast %300 : vector<1x128x384xbf16> to vector<128x384xbf16>
    %cst_157 = arith.constant dense<0.000000e+00> : vector<48x384xf32>
    %302 = tpu.matmul %299, %301, %cst_157 {dimension_numbers = #tpu.dot_dimension_numbers<[1], [0], [0], [1], [0, 0, 1, 1], [], []>} : vector<48x128xbf16>, vector<128x384xbf16>, vector<48x384xf32> -> vector<48x384xf32>
    %c2_158 = arith.constant 2 : index
    %c0_159 = arith.constant 0 : index
    %c0_160 = arith.constant 0 : index
    %303 = vector.load %arg6[%c2_158, %c0_159, %c0_160] : memref<3x1x384xf32, #tpu.memory_space<vmem>>, vector<1x1x384xf32>
    %304 = vector.shape_cast %303 : vector<1x1x384xf32> to vector<1x384xf32>
    %305 = vector.broadcast %304 : vector<1x384xf32> to vector<48x384xf32>
    %306 = arith.addf %302, %305 : vector<48x384xf32>
    %307 = vector.extract_strided_slice %306 {offsets = [0, 0], sizes = [48, 128], strides = [1, 1]} : vector<48x384xf32> to vector<48x128xf32>
    %cst_161 = arith.constant 0.176776692 : f32
    %308 = vector.broadcast %cst_161 : f32 to vector<48x128xf32>
    %309 = arith.mulf %307, %308 : vector<48x128xf32>
    %310 = arith.truncf %309 : vector<48x128xf32> to vector<48x128xbf16>
    %311 = vector.extract_strided_slice %306 {offsets = [0, 128], sizes = [48, 128], strides = [1, 1]} : vector<48x384xf32> to vector<48x128xf32>
    %312 = arith.truncf %311 : vector<48x128xf32> to vector<48x128xbf16>
    %313 = vector.extract_strided_slice %306 {offsets = [0, 256], sizes = [48, 128], strides = [1, 1]} : vector<48x384xf32> to vector<48x128xf32>
    %314 = arith.truncf %313 : vector<48x128xf32> to vector<48x128xbf16>
    %315 = vector.extract_strided_slice %310 {offsets = [0, 0], sizes = [48, 32], strides = [1, 1]} : vector<48x128xbf16> to vector<48x32xbf16>
    %316 = vector.extract_strided_slice %312 {offsets = [0, 0], sizes = [48, 32], strides = [1, 1]} : vector<48x128xbf16> to vector<48x32xbf16>
    %cst_162 = arith.constant dense<0.000000e+00> : vector<48x48xf32>
    %317 = tpu.matmul %315, %316, %cst_162 {dimension_numbers = #tpu.dot_dimension_numbers<[1], [1], [0], [0], [0, 0, 1, 0], [], []>} : vector<48x32xbf16>, vector<48x32xbf16>, vector<48x48xf32> -> vector<48x48xf32>
    %318 = vector.extract_strided_slice %310 {offsets = [0, 32], sizes = [48, 32], strides = [1, 1]} : vector<48x128xbf16> to vector<48x32xbf16>
    %319 = vector.extract_strided_slice %312 {offsets = [0, 32], sizes = [48, 32], strides = [1, 1]} : vector<48x128xbf16> to vector<48x32xbf16>
    %cst_163 = arith.constant dense<0.000000e+00> : vector<48x48xf32>
    %320 = tpu.matmul %318, %319, %cst_163 {dimension_numbers = #tpu.dot_dimension_numbers<[1], [1], [0], [0], [0, 0, 1, 0], [], []>} : vector<48x32xbf16>, vector<48x32xbf16>, vector<48x48xf32> -> vector<48x48xf32>
    %321 = vector.extract_strided_slice %310 {offsets = [0, 64], sizes = [48, 32], strides = [1, 1]} : vector<48x128xbf16> to vector<48x32xbf16>
    %322 = vector.extract_strided_slice %312 {offsets = [0, 64], sizes = [48, 32], strides = [1, 1]} : vector<48x128xbf16> to vector<48x32xbf16>
    %cst_164 = arith.constant dense<0.000000e+00> : vector<48x48xf32>
    %323 = tpu.matmul %321, %322, %cst_164 {dimension_numbers = #tpu.dot_dimension_numbers<[1], [1], [0], [0], [0, 0, 1, 0], [], []>} : vector<48x32xbf16>, vector<48x32xbf16>, vector<48x48xf32> -> vector<48x48xf32>
    %324 = vector.extract_strided_slice %310 {offsets = [0, 96], sizes = [48, 32], strides = [1, 1]} : vector<48x128xbf16> to vector<48x32xbf16>
    %325 = vector.extract_strided_slice %312 {offsets = [0, 96], sizes = [48, 32], strides = [1, 1]} : vector<48x128xbf16> to vector<48x32xbf16>
    %cst_165 = arith.constant dense<0.000000e+00> : vector<48x48xf32>
    %326 = tpu.matmul %324, %325, %cst_165 {dimension_numbers = #tpu.dot_dimension_numbers<[1], [1], [0], [0], [0, 0, 1, 0], [], []>} : vector<48x32xbf16>, vector<48x32xbf16>, vector<48x48xf32> -> vector<48x48xf32>
    %327 = tpu.concatenate %317, %320, %323, %326 in 0 : vector<48x48xf32>, vector<48x48xf32>, vector<48x48xf32>, vector<48x48xf32> -> vector<192x48xf32>
    %328 = arith.addf %327, %6 : vector<192x48xf32>
    %cst_166 = arith.constant dense<0xFF800000> : vector<192xf32>
    %329 = vector.multi_reduction <maximumf>, %328, %cst_166 [1] : vector<192x48xf32> to vector<192xf32>
    %330 = vector.shape_cast %329 : vector<192xf32> to vector<192x1xf32>
    %331 = vector.broadcast %330 : vector<192x1xf32> to vector<192x48xf32>
    %332 = arith.subf %328, %331 : vector<192x48xf32>
    %333 = math.exp %332 : vector<192x48xf32>
    %cst_167 = arith.constant dense<0.000000e+00> : vector<192xf32>
    %334 = vector.multi_reduction <add>, %333, %cst_167 [1] : vector<192x48xf32> to vector<192xf32>
    %335 = vector.shape_cast %334 : vector<192xf32> to vector<192x1xf32>
    %336 = tpu.reciprocal %335 {approx = true} : vector<192x1xf32> -> vector<192x1xf32>
    %337 = vector.broadcast %336 : vector<192x1xf32> to vector<192x48xf32>
    %338 = arith.mulf %333, %337 : vector<192x48xf32>
    %339 = arith.truncf %338 : vector<192x48xf32> to vector<192x48xbf16>
    %340 = vector.extract_strided_slice %339 {offsets = [0, 0], sizes = [48, 48], strides = [1, 1]} : vector<192x48xbf16> to vector<48x48xbf16>
    %341 = vector.extract_strided_slice %314 {offsets = [0, 0], sizes = [48, 32], strides = [1, 1]} : vector<48x128xbf16> to vector<48x32xbf16>
    %cst_168 = arith.constant dense<0.000000e+00> : vector<48x32xf32>
    %342 = tpu.matmul %340, %341, %cst_168 {dimension_numbers = #tpu.dot_dimension_numbers<[1], [0], [0], [1], [0, 0, 1, 1], [], []>} : vector<48x48xbf16>, vector<48x32xbf16>, vector<48x32xf32> -> vector<48x32xf32>
    %343 = vector.extract_strided_slice %339 {offsets = [48, 0], sizes = [48, 48], strides = [1, 1]} : vector<192x48xbf16> to vector<48x48xbf16>
    %344 = vector.extract_strided_slice %314 {offsets = [0, 32], sizes = [48, 32], strides = [1, 1]} : vector<48x128xbf16> to vector<48x32xbf16>
    %cst_169 = arith.constant dense<0.000000e+00> : vector<48x32xf32>
    %345 = tpu.matmul %343, %344, %cst_169 {dimension_numbers = #tpu.dot_dimension_numbers<[1], [0], [0], [1], [0, 0, 1, 1], [], []>} : vector<48x48xbf16>, vector<48x32xbf16>, vector<48x32xf32> -> vector<48x32xf32>
    %346 = vector.extract_strided_slice %339 {offsets = [96, 0], sizes = [48, 48], strides = [1, 1]} : vector<192x48xbf16> to vector<48x48xbf16>
    %347 = vector.extract_strided_slice %314 {offsets = [0, 64], sizes = [48, 32], strides = [1, 1]} : vector<48x128xbf16> to vector<48x32xbf16>
    %cst_170 = arith.constant dense<0.000000e+00> : vector<48x32xf32>
    %348 = tpu.matmul %346, %347, %cst_170 {dimension_numbers = #tpu.dot_dimension_numbers<[1], [0], [0], [1], [0, 0, 1, 1], [], []>} : vector<48x48xbf16>, vector<48x32xbf16>, vector<48x32xf32> -> vector<48x32xf32>
    %349 = vector.extract_strided_slice %339 {offsets = [144, 0], sizes = [48, 48], strides = [1, 1]} : vector<192x48xbf16> to vector<48x48xbf16>
    %350 = vector.extract_strided_slice %314 {offsets = [0, 96], sizes = [48, 32], strides = [1, 1]} : vector<48x128xbf16> to vector<48x32xbf16>
    %cst_171 = arith.constant dense<0.000000e+00> : vector<48x32xf32>
    %351 = tpu.matmul %349, %350, %cst_171 {dimension_numbers = #tpu.dot_dimension_numbers<[1], [0], [0], [1], [0, 0, 1, 1], [], []>} : vector<48x48xbf16>, vector<48x32xbf16>, vector<48x32xf32> -> vector<48x32xf32>
    %352 = tpu.concatenate %342, %345, %348, %351 in 1 : vector<48x32xf32>, vector<48x32xf32>, vector<48x32xf32>, vector<48x32xf32> -> vector<48x128xf32>
    %353 = arith.truncf %352 : vector<48x128xf32> to vector<48x128xbf16>
    %c2_172 = arith.constant 2 : index
    %c0_173 = arith.constant 0 : index
    %c0_174 = arith.constant 0 : index
    %354 = vector.load %arg7[%c2_172, %c0_173, %c0_174] : memref<3x128x128xbf16, #tpu.memory_space<vmem>>, vector<1x128x128xbf16>
    %355 = vector.shape_cast %354 : vector<1x128x128xbf16> to vector<128x128xbf16>
    %cst_175 = arith.constant dense<0.000000e+00> : vector<48x128xf32>
    %356 = tpu.matmul %353, %355, %cst_175 {dimension_numbers = #tpu.dot_dimension_numbers<[1], [0], [0], [1], [0, 0, 1, 1], [], []>} : vector<48x128xbf16>, vector<128x128xbf16>, vector<48x128xf32> -> vector<48x128xf32>
    %c2_176 = arith.constant 2 : index
    %c0_177 = arith.constant 0 : index
    %c0_178 = arith.constant 0 : index
    %357 = vector.load %arg8[%c2_176, %c0_177, %c0_178] : memref<3x1x128xf32, #tpu.memory_space<vmem>>, vector<1x1x128xf32>
    %358 = vector.shape_cast %357 : vector<1x1x128xf32> to vector<1x128xf32>
    %359 = vector.broadcast %358 : vector<1x128xf32> to vector<48x128xf32>
    %360 = arith.addf %356, %359 : vector<48x128xf32>
    %361 = arith.addf %298, %360 : vector<48x128xf32>
    %c2_179 = arith.constant 2 : index
    %c0_180 = arith.constant 0 : index
    %c0_181 = arith.constant 0 : index
    %362 = vector.load %arg9[%c2_179, %c0_180, %c0_181] : memref<3x1x128xf32, #tpu.memory_space<vmem>>, vector<1x1x128xf32>
    %363 = vector.shape_cast %362 : vector<1x1x128xf32> to vector<1x128xf32>
    %c2_182 = arith.constant 2 : index
    %c0_183 = arith.constant 0 : index
    %c0_184 = arith.constant 0 : index
    %364 = vector.load %arg10[%c2_182, %c0_183, %c0_184] : memref<3x1x128xf32, #tpu.memory_space<vmem>>, vector<1x1x128xf32>
    %365 = vector.shape_cast %364 : vector<1x1x128xf32> to vector<1x128xf32>
    %cst_185 = arith.constant dense<0.000000e+00> : vector<48xf32>
    %366 = vector.multi_reduction <add>, %361, %cst_185 [1] : vector<48x128xf32> to vector<48xf32>
    %367 = vector.shape_cast %366 : vector<48xf32> to vector<48x1xf32>
    %cst_186 = arith.constant 1.280000e+02 : f32
    %368 = vector.broadcast %cst_186 : f32 to vector<48x1xf32>
    %369 = arith.divf %367, %368 : vector<48x1xf32>
    %370 = vector.broadcast %369 : vector<48x1xf32> to vector<48x128xf32>
    %371 = arith.subf %361, %370 : vector<48x128xf32>
    %372 = arith.mulf %371, %371 : vector<48x128xf32>
    %cst_187 = arith.constant dense<0.000000e+00> : vector<48xf32>
    %373 = vector.multi_reduction <add>, %372, %cst_187 [1] : vector<48x128xf32> to vector<48xf32>
    %374 = vector.shape_cast %373 : vector<48xf32> to vector<48x1xf32>
    %cst_188 = arith.constant 1.280000e+02 : f32
    %375 = vector.broadcast %cst_188 : f32 to vector<48x1xf32>
    %376 = arith.divf %374, %375 : vector<48x1xf32>
    %cst_189 = arith.constant 9.99999974E-6 : f32
    %377 = vector.broadcast %cst_189 : f32 to vector<48x1xf32>
    %378 = arith.addf %376, %377 : vector<48x1xf32>
    %379 = math.rsqrt %378 : vector<48x1xf32>
    %380 = vector.broadcast %379 : vector<48x1xf32> to vector<48x128xf32>
    %381 = arith.mulf %371, %380 : vector<48x128xf32>
    %382 = vector.broadcast %363 : vector<1x128xf32> to vector<48x128xf32>
    %383 = arith.mulf %381, %382 : vector<48x128xf32>
    %384 = vector.broadcast %365 : vector<1x128xf32> to vector<48x128xf32>
    %385 = arith.addf %383, %384 : vector<48x128xf32>
    %386 = arith.truncf %385 : vector<48x128xf32> to vector<48x128xbf16>
    %cst_190 = arith.constant 0.000000e+00 : f32
    %387 = vector.broadcast %cst_190 : f32 to vector<48x128xf32>
    %c2_191 = arith.constant 2 : index
    %c0_192 = arith.constant 0 : index
    %c0_193 = arith.constant 0 : index
    %388 = vector.load %arg11[%c2_191, %c0_192, %c0_193] : memref<3x128x1024xbf16, #tpu.memory_space<vmem>>, vector<1x128x512xbf16>
    %389 = vector.shape_cast %388 : vector<1x128x512xbf16> to vector<128x512xbf16>
    %cst_194 = arith.constant dense<0.000000e+00> : vector<48x512xf32>
    %390 = tpu.matmul %386, %389, %cst_194 {dimension_numbers = #tpu.dot_dimension_numbers<[1], [0], [0], [1], [0, 0, 1, 1], [], []>} : vector<48x128xbf16>, vector<128x512xbf16>, vector<48x512xf32> -> vector<48x512xf32>
    %c2_195 = arith.constant 2 : index
    %c0_196 = arith.constant 0 : index
    %c0_197 = arith.constant 0 : index
    %391 = vector.load %arg12[%c2_195, %c0_196, %c0_197] : memref<3x1x1024xf32, #tpu.memory_space<vmem>>, vector<1x1x512xf32>
    %392 = vector.shape_cast %391 : vector<1x1x512xf32> to vector<1x512xf32>
    %393 = vector.broadcast %392 : vector<1x512xf32> to vector<48x512xf32>
    %394 = arith.addf %390, %393 : vector<48x512xf32>
    %cst_198 = arith.constant 0.000000e+00 : f32
    %395 = vector.broadcast %cst_198 : f32 to vector<48x512xf32>
    %396 = arith.maximumf %394, %395 : vector<48x512xf32>
    %397 = arith.truncf %396 : vector<48x512xf32> to vector<48x512xbf16>
    %c2_199 = arith.constant 2 : index
    %c0_200 = arith.constant 0 : index
    %c0_201 = arith.constant 0 : index
    %398 = vector.load %arg13[%c2_199, %c0_200, %c0_201] : memref<3x1024x128xbf16, #tpu.memory_space<vmem>>, vector<1x512x128xbf16>
    %399 = vector.shape_cast %398 : vector<1x512x128xbf16> to vector<512x128xbf16>
    %cst_202 = arith.constant dense<0.000000e+00> : vector<48x128xf32>
    %400 = tpu.matmul %397, %399, %cst_202 {dimension_numbers = #tpu.dot_dimension_numbers<[1], [0], [0], [1], [0, 0, 1, 1], [], []>} : vector<48x512xbf16>, vector<512x128xbf16>, vector<48x128xf32> -> vector<48x128xf32>
    %401 = arith.addf %387, %400 : vector<48x128xf32>
    %c2_203 = arith.constant 2 : index
    %c0_204 = arith.constant 0 : index
    %c512_205 = arith.constant 512 : index
    %402 = vector.load %arg11[%c2_203, %c0_204, %c512_205] : memref<3x128x1024xbf16, #tpu.memory_space<vmem>>, vector<1x128x512xbf16>
    %403 = vector.shape_cast %402 : vector<1x128x512xbf16> to vector<128x512xbf16>
    %cst_206 = arith.constant dense<0.000000e+00> : vector<48x512xf32>
    %404 = tpu.matmul %386, %403, %cst_206 {dimension_numbers = #tpu.dot_dimension_numbers<[1], [0], [0], [1], [0, 0, 1, 1], [], []>} : vector<48x128xbf16>, vector<128x512xbf16>, vector<48x512xf32> -> vector<48x512xf32>
    %c2_207 = arith.constant 2 : index
    %c0_208 = arith.constant 0 : index
    %c512_209 = arith.constant 512 : index
    %405 = vector.load %arg12[%c2_207, %c0_208, %c512_209] : memref<3x1x1024xf32, #tpu.memory_space<vmem>>, vector<1x1x512xf32>
    %406 = vector.shape_cast %405 : vector<1x1x512xf32> to vector<1x512xf32>
    %407 = vector.broadcast %406 : vector<1x512xf32> to vector<48x512xf32>
    %408 = arith.addf %404, %407 : vector<48x512xf32>
    %cst_210 = arith.constant 0.000000e+00 : f32
    %409 = vector.broadcast %cst_210 : f32 to vector<48x512xf32>
    %410 = arith.maximumf %408, %409 : vector<48x512xf32>
    %411 = arith.truncf %410 : vector<48x512xf32> to vector<48x512xbf16>
    %c2_211 = arith.constant 2 : index
    %c512_212 = arith.constant 512 : index
    %c0_213 = arith.constant 0 : index
    %412 = vector.load %arg13[%c2_211, %c512_212, %c0_213] : memref<3x1024x128xbf16, #tpu.memory_space<vmem>>, vector<1x512x128xbf16>
    %413 = vector.shape_cast %412 : vector<1x512x128xbf16> to vector<512x128xbf16>
    %cst_214 = arith.constant dense<0.000000e+00> : vector<48x128xf32>
    %414 = tpu.matmul %411, %413, %cst_214 {dimension_numbers = #tpu.dot_dimension_numbers<[1], [0], [0], [1], [0, 0, 1, 1], [], []>} : vector<48x512xbf16>, vector<512x128xbf16>, vector<48x128xf32> -> vector<48x128xf32>
    %415 = arith.addf %401, %414 : vector<48x128xf32>
    %c2_215 = arith.constant 2 : index
    %c0_216 = arith.constant 0 : index
    %c0_217 = arith.constant 0 : index
    %416 = vector.load %arg14[%c2_215, %c0_216, %c0_217] : memref<3x1x128xf32, #tpu.memory_space<vmem>>, vector<1x1x128xf32>
    %417 = vector.shape_cast %416 : vector<1x1x128xf32> to vector<1x128xf32>
    %418 = vector.broadcast %417 : vector<1x128xf32> to vector<48x128xf32>
    %419 = arith.addf %415, %418 : vector<48x128xf32>
    %420 = arith.addf %385, %419 : vector<48x128xf32>
    %c2_218 = arith.constant 2 : index
    %c0_219 = arith.constant 0 : index
    %c0_220 = arith.constant 0 : index
    %421 = vector.load %arg15[%c2_218, %c0_219, %c0_220] : memref<3x1x128xf32, #tpu.memory_space<vmem>>, vector<1x1x128xf32>
    %422 = vector.shape_cast %421 : vector<1x1x128xf32> to vector<1x128xf32>
    %c2_221 = arith.constant 2 : index
    %c0_222 = arith.constant 0 : index
    %c0_223 = arith.constant 0 : index
    %423 = vector.load %arg16[%c2_221, %c0_222, %c0_223] : memref<3x1x128xf32, #tpu.memory_space<vmem>>, vector<1x1x128xf32>
    %424 = vector.shape_cast %423 : vector<1x1x128xf32> to vector<1x128xf32>
    %cst_224 = arith.constant dense<0.000000e+00> : vector<48xf32>
    %425 = vector.multi_reduction <add>, %420, %cst_224 [1] : vector<48x128xf32> to vector<48xf32>
    %426 = vector.shape_cast %425 : vector<48xf32> to vector<48x1xf32>
    %cst_225 = arith.constant 1.280000e+02 : f32
    %427 = vector.broadcast %cst_225 : f32 to vector<48x1xf32>
    %428 = arith.divf %426, %427 : vector<48x1xf32>
    %429 = vector.broadcast %428 : vector<48x1xf32> to vector<48x128xf32>
    %430 = arith.subf %420, %429 : vector<48x128xf32>
    %431 = arith.mulf %430, %430 : vector<48x128xf32>
    %cst_226 = arith.constant dense<0.000000e+00> : vector<48xf32>
    %432 = vector.multi_reduction <add>, %431, %cst_226 [1] : vector<48x128xf32> to vector<48xf32>
    %433 = vector.shape_cast %432 : vector<48xf32> to vector<48x1xf32>
    %cst_227 = arith.constant 1.280000e+02 : f32
    %434 = vector.broadcast %cst_227 : f32 to vector<48x1xf32>
    %435 = arith.divf %433, %434 : vector<48x1xf32>
    %cst_228 = arith.constant 9.99999974E-6 : f32
    %436 = vector.broadcast %cst_228 : f32 to vector<48x1xf32>
    %437 = arith.addf %435, %436 : vector<48x1xf32>
    %438 = math.rsqrt %437 : vector<48x1xf32>
    %439 = vector.broadcast %438 : vector<48x1xf32> to vector<48x128xf32>
    %440 = arith.mulf %430, %439 : vector<48x128xf32>
    %441 = vector.broadcast %422 : vector<1x128xf32> to vector<48x128xf32>
    %442 = arith.mulf %440, %441 : vector<48x128xf32>
    %443 = vector.broadcast %424 : vector<1x128xf32> to vector<48x128xf32>
    %444 = arith.addf %442, %443 : vector<48x128xf32>
    %c0_229 = arith.constant 0 : index
    %c0_230 = arith.constant 0 : index
    %445 = vector.load %arg17[%c0_229, %c0_230] : memref<48x128xf32, #tpu.memory_space<vmem>>, vector<48x128xf32>
    tpu.vector_store %arg17[%c0_229, %c0_230], %444 {strides = array<i32>} : memref<48x128xf32, #tpu.memory_space<vmem>>, vector<48x128xf32>,
    return
  }
  func.func @transform_0(%arg0: i32) -> (i32, i32) {
    %c0_i32 = arith.constant 0 : i32
    %c0_i32_0 = arith.constant 0 : i32
    %c0_i32_1 = arith.constant 0 : i32
    return %c0_i32, %c0_i32_0 : i32, i32
  }
  func.func @transform_1(%arg0: i32) -> (i32, i32) {
    %c0_i32 = arith.constant 0 : i32
    %c0_i32_0 = arith.constant 0 : i32
    %c0_i32_1 = arith.constant 0 : i32
    return %c0_i32, %c0_i32_0 : i32, i32
  }
  func.func @transform_2(%arg0: i32) -> (i32, i32) {
    %c0_i32 = arith.constant 0 : i32
    %c0_i32_0 = arith.constant 0 : i32
    %c0_i32_1 = arith.constant 0 : i32
    return %c0_i32, %c0_i32_0 : i32, i32
  }
  func.func @transform_3(%arg0: i32) -> (i32, i32) {
    %c0_i32 = arith.constant 0 : i32
    %c0_i32_0 = arith.constant 0 : i32
    %c0_i32_1 = arith.constant 0 : i32
    return %c0_i32, %c0_i32_0 : i32, i32
  }
  func.func @transform_4(%arg0: i32) -> (i32, i32, i32) {
    %c0_i32 = arith.constant 0 : i32
    %c0_i32_0 = arith.constant 0 : i32
    %c0_i32_1 = arith.constant 0 : i32
    %c0_i32_2 = arith.constant 0 : i32
    return %c0_i32, %c0_i32_0, %c0_i32_1 : i32, i32, i32
  }
  func.func @transform_5(%arg0: i32) -> (i32, i32, i32) {
    %c0_i32 = arith.constant 0 : i32
    %c0_i32_0 = arith.constant 0 : i32
    %c0_i32_1 = arith.constant 0 : i32
    %c0_i32_2 = arith.constant 0 : i32
    return %c0_i32, %c0_i32_0, %c0_i32_1 : i32, i32, i32
  }
  func.func @transform_6(%arg0: i32) -> (i32, i32, i32) {
    %c0_i32 = arith.constant 0 : i32
    %c0_i32_0 = arith.constant 0 : i32
    %c0_i32_1 = arith.constant 0 : i32
    %c0_i32_2 = arith.constant 0 : i32
    return %c0_i32, %c0_i32_0, %c0_i32_1 : i32, i32, i32
  }
  func.func @transform_7(%arg0: i32) -> (i32, i32, i32) {
    %c0_i32 = arith.constant 0 : i32
    %c0_i32_0 = arith.constant 0 : i32
    %c0_i32_1 = arith.constant 0 : i32
    %c0_i32_2 = arith.constant 0 : i32
    return %c0_i32, %c0_i32_0, %c0_i32_1 : i32, i32, i32
  }
  func.func @transform_8(%arg0: i32) -> (i32, i32, i32) {
    %c0_i32 = arith.constant 0 : i32
    %c0_i32_0 = arith.constant 0 : i32
    %c0_i32_1 = arith.constant 0 : i32
    %c0_i32_2 = arith.constant 0 : i32
    return %c0_i32, %c0_i32_0, %c0_i32_1 : i32, i32, i32
  }
  func.func @transform_9(%arg0: i32) -> (i32, i32, i32) {
    %c0_i32 = arith.constant 0 : i32
    %c0_i32_0 = arith.constant 0 : i32
    %c0_i32_1 = arith.constant 0 : i32
    %c0_i32_2 = arith.constant 0 : i32
    return %c0_i32, %c0_i32_0, %c0_i32_1 : i32, i32, i32
  }
  func.func @transform_10(%arg0: i32) -> (i32, i32, i32) {
    %c0_i32 = arith.constant 0 : i32
    %c0_i32_0 = arith.constant 0 : i32
    %c0_i32_1 = arith.constant 0 : i32
    %c0_i32_2 = arith.constant 0 : i32
    return %c0_i32, %c0_i32_0, %c0_i32_1 : i32, i32, i32
  }
  func.func @transform_11(%arg0: i32) -> (i32, i32, i32) {
    %c0_i32 = arith.constant 0 : i32
    %c0_i32_0 = arith.constant 0 : i32
    %c0_i32_1 = arith.constant 0 : i32
    %c0_i32_2 = arith.constant 0 : i32
    return %c0_i32, %c0_i32_0, %c0_i32_1 : i32, i32, i32
  }
  func.func @transform_12(%arg0: i32) -> (i32, i32, i32) {
    %c0_i32 = arith.constant 0 : i32
    %c0_i32_0 = arith.constant 0 : i32
    %c0_i32_1 = arith.constant 0 : i32
    %c0_i32_2 = arith.constant 0 : i32
    return %c0_i32, %c0_i32_0, %c0_i32_1 : i32, i32, i32
  }
  func.func @transform_13(%arg0: i32) -> (i32, i32, i32) {
    %c0_i32 = arith.constant 0 : i32
    %c0_i32_0 = arith.constant 0 : i32
    %c0_i32_1 = arith.constant 0 : i32
    %c0_i32_2 = arith.constant 0 : i32
    return %c0_i32, %c0_i32_0, %c0_i32_1 : i32, i32, i32
  }
  func.func @transform_14(%arg0: i32) -> (i32, i32, i32) {
    %c0_i32 = arith.constant 0 : i32
    %c0_i32_0 = arith.constant 0 : i32
    %c0_i32_1 = arith.constant 0 : i32
    %c0_i32_2 = arith.constant 0 : i32
    return %c0_i32, %c0_i32_0, %c0_i32_1 : i32, i32, i32
  }
  func.func @transform_15(%arg0: i32) -> (i32, i32, i32) {
    %c0_i32 = arith.constant 0 : i32
    %c0_i32_0 = arith.constant 0 : i32
    %c0_i32_1 = arith.constant 0 : i32
    %c0_i32_2 = arith.constant 0 : i32
    return %c0_i32, %c0_i32_0, %c0_i32_1 : i32, i32, i32
  }
  func.func @transform_16(%arg0: i32) -> (i32, i32) {
    %c0_i32 = arith.constant 0 : i32
    %c0_i32_0 = arith.constant 0 : i32
    %c0_i32_1 = arith.constant 0 : i32
    return %c0_i32, %c0_i32_0 : i32, i32
  }
}

</mosaic_0001>

<bundles_post_ra>
// kernel: pst_path_forward.1
= control target key start
LH: loop header
LB: loop body
LE: loop exit
PB: predicated region body
PF: predicated region fallthrough
CT: control target
= control target key end

     0   :  { %v12949_v0 = vmov 0.0   ;;  %vm12950_vm0 = vmmov 0   ;;  %vm101_vm1 = vcmask 523264   ;;  %v12951_v38 = vmov 0   ;;  %s12952_s27 = smov 96   ;;  %s12954_s28 = smov 32   ;;  %s17069_s1 = inlined_call_operand.vmem [shape: bf16[64,128], index: 1, kind: input, shape index: {}]   ;;  %s17070_s4 = inlined_call_operand.vmem [shape: bf16[3,128,384], index: 4, kind: input, shape index: {}]   ;;  %s17071_s0 = inlined_call_operand.vmem [shape: f32[48,64], index: 0, kind: input, shape index: {}]   ;;  %s17072_s2 = inlined_call_operand.vmem [shape: f32[48,128], index: 2, kind: input, shape index: {}]   ;;  %s17073_s5 = inlined_call_operand.vmem [shape: f32[3,1,384], index: 5, kind: input, shape index: {}]   ;;  %s17074_s3 = inlined_call_operand.vmem [shape: f32[192,48], index: 3, kind: input, shape index: {}]   ;;  %s17075_s6 = inlined_call_operand.vmem [shape: bf16[3,128,128], index: 6, kind: input, shape index: {}]   ;;  %s17076_s7 = inlined_call_operand.vmem [shape: f32[3,1,128], index: 7, kind: input, shape index: {}]   ;;  %s17077_s10 = inlined_call_operand.vmem [shape: bf16[3,128,1024], index: 10, kind: input, shape index: {}]   ;;  %s17078_s8 = inlined_call_operand.vmem [shape: f32[3,1,128], index: 8, kind: input, shape index: {}]   ;;  %s17079_s9 = inlined_call_operand.vmem [shape: f32[3,1,128], index: 9, kind: input, shape index: {}]   ;;  %s17080_s12 = inlined_call_operand.vmem [shape: bf16[3,1024,128], index: 12, kind: input, shape index: {}]   ;;  %s17081_s11 = inlined_call_operand.vmem [shape: f32[3,1,1024], index: 11, kind: input, shape index: {}]   ;;  %s17082_s13 = inlined_call_operand.vmem [shape: f32[3,1,128], index: 13, kind: input, shape index: {}]   ;;  %s17083_s14 = inlined_call_operand.vmem [shape: f32[3,1,128], index: 14, kind: input, shape index: {}]   ;;  %s17084_s15 = inlined_call_operand.vmem [shape: f32[3,1,128], index: 15, kind: input, shape index: {}]   ;;  %s17085_s16 = inlined_call_operand.vmem [shape: f32[48,128], index: 16, kind: output, shape index: {}]  }
   0x1   :  { %17087 = sst [smem:[#allocation2_spill]] %s17069_s1  ;;  %11458 = vmatprep.subr.bf16.mxu0 %v12949_v0  ;;  %11466 = vmatprep.mubr.msk.bf16.mxu0 %vm12950_vm0, %v12949_v0  ;;  %v12229_v4 = vld [vmem:[%s17070_s4 + $0x4] ss:$12 sps:$4 sm:$0xff]   ;;  %v12231_v5 = vld [vmem:[%s17070_s4] ss:$12 sps:$4 sm:$0xff]   ;;  %v57_v17 = vld [vmem:[%s17071_s0 + $0x18] sm:$0xff] }
   0x2   :  { %s17088_s23 = sld [smem:[#allocation2_spill]]  ;;  %v54_v7 = vld [vmem:[%s17071_s0] sm:$0xff]  ;;  %372 = vmatprep.subr.bf16.mxu1 %v12229_v4  ;;  %v12233_v8 = vld [vmem:[%s17070_s4 + $0x1c] ss:$12 sps:$4 sm:$0xff]   ;;  %v12241_v15 = vld [vmem:[%s17070_s4 + $0x4c] ss:$12 sps:$4 sm:$0xff]   ;;  %404 = vmatprep.mubr.bf16.mxu1 %v12951_v38 }
   0x3   :  { %373 = vmatpush1.bf16.msra.mxu1 %v12231_v5  ;;  %v12235_v9 = vld [vmem:[%s17070_s4 + $0x18] ss:$12 sps:$4 sm:$0xff]   ;;  %v55_v10 = vld [vmem:[%s17071_s0 + $0x8] sm:$0xff]  ;;  %v12237_v11 = vld [vmem:[%s17070_s4 + $0x34] ss:$12 sps:$4 sm:$0xff]   ;;  %vm507_vm2 = vcmask 261120  }
   0x4   :  { %374 = vmatprep.subr.bf16.mxu1 %v12233_v8  ;;  %v60_v12 = vpack.c.bf16 %v55_v10, %v54_v7  ;;  %v12239_v13 = vld [vmem:[%s17070_s4 + $0x30] ss:$12 sps:$4 sm:$0xff]   ;;  %v12232_v14 = vld [vmem:[%s17070_s4 + $0x8] ss:$12 sps:$4 sm:$0xff]   ;;  %v12236_v19 = vld [vmem:[%s17070_s4 + $0x20] ss:$12 sps:$4 sm:$0xff]  }
   0x5   :  { %v56_v16 = vld [vmem:[%s17071_s0 + $0x10] sm:$0xff]  ;;  %v12240_v21 = vld [vmem:[%s17070_s4 + $0x38] ss:$12 sps:$4 sm:$0xff]   ;;  %v12247_v22 = vld [vmem:[%s17070_s4 + $0x60] ss:$12 sps:$4 sm:$0xff]   ;;  %vm874_vm3 = vcmask 392192  }
   0x6   :  { %v12243_v18 = vld [vmem:[%s17070_s4 + $0x48] ss:$12 sps:$4 sm:$0xff]   ;;  %v12245_v20 = vld [vmem:[%s17070_s4 + $0x64] ss:$12 sps:$4 sm:$0xff]   ;;  %v61_v23 = vpack.c.bf16 %v57_v17, %v56_v16  ;;  %v12252_v32 = vld [vmem:[%s17070_s4 + $0x80] ss:$12 sps:$4 sm:$0xff]  }
   0x7   :  { %375 = vmatpush1.bf16.msra.mxu1 %v12235_v9  ;;  %v12249_v24 = vld [vmem:[%s17070_s4 + $0x7c] ss:$12 sps:$4 sm:$0xff]   ;;  %v12251_v25 = vld [vmem:[%s17070_s4 + $0x78] ss:$12 sps:$4 sm:$0xff]   ;;  %v12253_v29 = vld [vmem:[%s17070_s4 + $0x94] ss:$12 sps:$4 sm:$0xff]  }
   0x8   :  { %v12225_v1 = vld [vmem:[%s17088_s23] sm:$0xff]   ;;  %v12226_v2 = vld [vmem:[%s17088_s23 + $0x8] sm:$0xff]   ;;  %v12227_v3 = vld [vmem:[%s17088_s23 + $0x10] sm:$0xff]   ;;  %376 = vmatprep.subr.bf16.mxu1 %v12237_v11  ;;  %vm1529_vm4 = vcmask 785408  }
   0x9   :  { %11459 = vmatpush3.bf16.msra.mxu0 %v12225_v1  ;;  %v12228_v6 = vld [vmem:[%s17088_s23 + $0x18] sm:$0xff]   ;;  %v58_v26 = vld [vmem:[%s17071_s0 + $0x20] sm:$0xff]  ;;  %v59_v27 = vld [vmem:[%s17071_s0 + $0x28] sm:$0xff]  ;;  %s12953_s23 = smov 64  }
   0xa   :  { %11460 = vmatprep.subr.bf16.mxu0 %v12949_v0  ;;  %v12244_v28 = vld [vmem:[%s17070_s4 + $0x50] ss:$12 sps:$4 sm:$0xff]   ;;  %v12248_v30 = vld [vmem:[%s17070_s4 + $0x68] ss:$12 sps:$4 sm:$0xff]   ;;  %v62_v31 = vpack.c.bf16 %v59_v27, %v58_v26  ;;  %v12256_v34 = vld [vmem:[%s17070_s4 + $0x98] ss:$12 sps:$4 sm:$0xff]  }
   0xb   :  { %377 = vmatpush1.bf16.msra.mxu1 %v12239_v13  ;;  %v12255_v33 = vld [vmem:[%s17070_s4 + $0x90] ss:$12 sps:$4 sm:$0xff]   ;;  %v12257_v35 = vld [vmem:[%s17070_s4 + $0xac] ss:$12 sps:$4 sm:$0xff]   ;;  %v12259_v36 = vld [vmem:[%s17070_s4 + $0xa8] ss:$12 sps:$4 sm:$0xff]  }
   0xc   :  { %378 = vmatprep.subr.bf16.mxu1 %v12241_v15  ;;  %v12260_v37 = vld [vmem:[%s17070_s4 + $0xb0] ss:$12 sps:$4 sm:$0xff]   ;;  %v71_v39 = vld [vmem:[%s17072_s2] sm:$0xff]  ;;  %v72_v41 = vld [vmem:[%s17072_s2 + $0x8] sm:$0xff] }
   0xd   :  { %11461 = vmatpush3.bf16.msra.mxu0 %v12226_v2  ;;  %v73_v48 = vld [vmem:[%s17072_s2 + $0x10] sm:$0xff]  ;;  %v74_v50 = vld [vmem:[%s17072_s2 + $0x18] sm:$0xff]  ;;  %v75_v57 = vld [vmem:[%s17072_s2 + $0x20] sm:$0xff] }
   0xe   :  { %11462 = vmatprep.subr.bf16.mxu0 %v12949_v0  ;;  %v76_v59 = vld [vmem:[%s17072_s2 + $0x28] sm:$0xff] }
   0xf   :  { %379 = vmatpush1.bf16.msra.mxu1 %v12243_v18 }
  0x10   :  { %380 = vmatprep.subr.bf16.mxu1 %v12245_v20 }
  0x11   :  { %11463 = vmatpush3.bf16.msra.mxu0 %v12227_v3  ;;  %v229_v3 = vlaneseq }
  0x12   :  { %11464 = vmatprep.subr.bf16.mxu0 %v12949_v0 }
  0x13   :  { %381 = vmatpush1.bf16.msra.mxu1 %v12247_v22  ;;  %v13214_v4 = vshrl.u32 %v229_v3, 7 }
  0x14   :  { %382 = vmatprep.subr.bf16.mxu1 %v12249_v24 }
  0x15   :  { %11465 = vmatpush3.bf16.msra.mxu0 %v12228_v6  ;;  %v13217_v5 = vsub.s32 0, %v13214_v4  ;;  %v227_v6 = vld [vmem:[%s17073_s5] sm:$0x7]  ;;  %v13223_v7 = vsub.s32 2, %v13214_v4  ;;  %v13226_v8 = vsub.s32 1, %v13214_v4 }
  0x16   :  { %11478 = vmatprep.subr.bf16.mxu0 %v12949_v0 }
  0x17   :  { %383 = vmatpush1.bf16.msra.mxu1 %v12251_v25  ;;  %v232_v9 = vrot.slane %v227_v6, %v13217_v5  ;;  %v240_v10 = vrot.slane %v227_v6, %v13223_v7  ;;  %v236_v13 = vrot.slane %v227_v6, %v13226_v8 }
  0x18   :  { %11467 = vmatmul.mubr.msk.bf16.vlgmr.msra.gmra.mrb[0].mxu0 %vm101_vm1, %v60_v12  ;;  %384 = vmatprep.subr.bf16.mxu1 %v12253_v29 }
  0x19   :  { %11470 = vmatprep.mubr.msk.bf16.mxu0 %vm12950_vm0, %v12949_v0  ;;  %11479 = vmatpush3.bf16.msra.mxu0 %v12232_v14 }
  0x1a   :  { %11480 = vmatprep.subr.bf16.mxu0 %v12949_v0 }
  0x1b   :  { %385 = vmatpush1.bf16.msra.mxu1 %v12255_v33 }
  0x1c   :  { %386 = vmatprep.subr.bf16.mxu1 %v12257_v35 }
  0x1d   :  { %11481 = vmatpush3.bf16.msra.mxu0 %v12236_v19 }
  0x1e   :  { %11482 = vmatprep.subr.bf16.mxu0 %v12949_v0 }
  0x1f   :  { %387 = vmatpush1.bf16.msra.mxu1 %v12259_v36 }
  0x20   :  { %11471 = vmatmul.mubr.msk.bf16.gmra.mrb[4].mxu0 %vm101_vm1, %v61_v23  ;;  %11506 = vmatprep.subr.bf16.mxu1 %v12949_v0 }
  0x21   :  { %11474 = vmatprep.mubr.msk.bf16.mxu0 %vm12950_vm0, %v12949_v0  ;;  %11483 = vmatpush3.bf16.msra.mxu0 %v12240_v21 }
  0x22   :  { %11484 = vmatprep.subr.bf16.mxu0 %v12949_v0 }
  0x25   :  { %11485 = vmatpush3.bf16.msra.mxu0 %v12244_v28 }
  0x26   :  { %11486 = vmatprep.subr.bf16.mxu0 %v12949_v0 }
  0x28   :  { %11475 = vmatmul.mubr.msk.bf16.gmra.mrb[8].mxu0 %vm101_vm1, %v62_v31 }
  0x29   :  { %11487 = vmatpush3.bf16.msra.mxu0 %v12248_v30  ;;  %11494 = vmatprep.mubr.msk.bf16.mxu0 %vm12950_vm0, %v12949_v0 }
  0x2a   :  { %11488 = vmatprep.subr.bf16.mxu0 %v12949_v0 }
  0x2d   :  { %11489 = vmatpush3.bf16.msra.mxu0 %v12252_v32 }
  0x2e   :  { %11490 = vmatprep.subr.bf16.mxu0 %v12949_v0 }
  0x31   :  { %11491 = vmatpush3.bf16.msra.mxu0 %v12256_v34 }
  0x32   :  { %11492 = vmatprep.subr.bf16.mxu0 %v12949_v0 }
  0x35   :  { %11493 = vmatpush3.bf16.msra.mxu0 %v12260_v37 }
  0x36   :  { %11524 = vmatprep.subr.bf16.mxu0 %v12949_v0 }
  0xeb   :  { %v145_v40 = vpop.f32.mrb[0].mxu0 }
  0xec   :  { %v11468_v42 = vpop.f32.mrb[1].mxu0  ;;  %v13174_v44 = vadd.f32 %v145_v40, %v71_v39 }
  0xed   :  { %v148_v43 = vpop.f32.mrb[2].mxu0 }
  0xee   :  { %v13176_v45 = vadd.f32 %v148_v43, %v72_v41  ;;  %v11469_v46 = vpop.f32.mrb[3].mxu0 }
  0xf0   :  { %v192_v47 = vpack.c.bf16 %v13176_v45, %v13174_v44 }
  0xf2   :  { %405 = vmatmul.mubr.bf16.vlgmr.msra.gmra.mrb[0].mxu1 %v192_v47  ;;  %11495 = vmatmul.mubr.bf16.vlgmr.msra.gmra.mrb[12].mxu0 %v192_v47 }
  0xf3   :  { %v153_v49 = vpop.f32.mrb[4].mxu0  ;;  %414 = vmatprep.mubr.bf16.mxu1 %v12951_v38  ;;  %11498 = vmatprep.mubr.msk.bf16.mxu0 %vm12950_vm0, %v12949_v0 }
  0xf4   :  { %v11472_v51 = vpop.f32.mrb[5].mxu0  ;;  %v13189_v53 = vadd.f32 %v153_v49, %v73_v48 }
  0xf5   :  { %v156_v52 = vpop.f32.mrb[6].mxu0 }
  0xf6   :  { %v13191_v54 = vadd.f32 %v156_v52, %v74_v50  ;;  %v11473_v55 = vpop.f32.mrb[7].mxu0 }
  0xf8   :  { %v193_v56 = vpack.c.bf16 %v13191_v54, %v13189_v53 }
  0xfa   :  { %415 = vmatmul.mubr.bf16.gmra.mrb[4].mxu1 %v193_v56  ;;  %11499 = vmatmul.mubr.bf16.gmra.mrb[16].mxu0 %v193_v56 }
  0xfb   :  { %v161_v58 = vpop.f32.mrb[8].mxu0  ;;  %424 = vmatprep.mubr.bf16.mxu1 %v12951_v38  ;;  %11502 = vmatprep.mubr.msk.bf16.mxu0 %vm12950_vm0, %v12949_v0 }
  0xfc   :  { %v11476_v60 = vpop.f32.mrb[9].mxu0  ;;  %v13204_v62 = vadd.f32 %v161_v58, %v75_v57 }
  0xfd   :  { %v164_v61 = vpop.f32.mrb[10].mxu0 }
  0xfe   :  { %v13206_v63 = vadd.f32 %v164_v61, %v76_v59  ;;  %v11477_v1 = vpop.f32.mrb[11].mxu0 }
 0x100   :  { %v194_v2 = vpack.c.bf16 %v13206_v63, %v13204_v62 }
 0x102   :  { %425 = vmatmul.mubr.bf16.gmra.mrb[8].mxu1 %v194_v2  ;;  %11503 = vmatmul.mubr.bf16.gmra.mrb[20].mxu0 %v194_v2 }
 0x103   :  { %11512 = vmatprep.mubr.msk.bf16.mxu1 %vm12950_vm0, %v12949_v0  ;;  %11530 = vmatprep.mubr.msk.bf16.mxu0 %vm12950_vm0, %v12949_v0 }
 0x1c5   :  { %v406_v11 = vpop.f32.mrb[0].mxu1  ;;  %v469_v12 = vpop.f32.mrb[12].mxu0 }
 0x1c6   :  { %v407_v14 = vadd.f32 %v406_v11, %v232_v9  ;;  %v408_v15 = vpop.f32.mrb[1].mxu1  ;;  %v11496_v16 = vpop.f32.mrb[13].mxu0  ;;  %v470_v19 = vadd.f32 %v469_v12, %v240_v10 }
 0x1c7   :  { %v410_v17 = vpop.f32.mrb[2].mxu1  ;;  %v472_v18 = vpop.f32.mrb[14].mxu0  ;;  %v409_v24 = vadd.f32 %v408_v15, %v236_v13 }
 0x1c8   :  { %v411_v20 = vadd.f32 %v410_v17, %v232_v9  ;;  %v473_v21 = vadd.f32 %v472_v18, %v240_v10  ;;  %v412_v22 = vpop.f32.mrb[3].mxu1  ;;  %v11497_v23 = vpop.f32.mrb[15].mxu0  ;;  %v492_v26 = vmul.f32 0.17677669, %v407_v14 }
 0x1c9   :  { %v413_v25 = vadd.f32 %v412_v22, %v236_v13 }
 0x1ca   :  { %v493_v27 = vmul.f32 0.17677669, %v411_v20  ;;  %v13231_v28 = vpack.c.bf16 %v473_v21, %v470_v19 }
 0x1cb   :  { %v501_v29 = vpack.c.bf16 %v413_v25, %v409_v24 }
 0x1cc   :  { %v13233_v30 = vpack.c.bf16 %v493_v27, %v492_v26 }
 0x1cd   :  { %595 = vrot.lane.b32.xlu0 %v501_v29, %s12952_s27  ;;  %v416_v31 = vpop.f32.mrb[4].mxu1  ;;  %v477_v32 = vpop.f32.mrb[16].mxu0  ;;  %v518_v33 = vsel %vm507_vm2, %v501_v29, 0 }
 0x1ce   :  { %v417_v34 = vadd.f32 %v416_v31, %v232_v9  ;;  %v418_v35 = vpop.f32.mrb[5].mxu1  ;;  %v11500_v36 = vpop.f32.mrb[17].mxu0  ;;  %11507 = vmatpush3.bf16.xpose.msra.mxu1 %v518_v33  ;;  %v478_v40 = vadd.f32 %v477_v32, %v240_v10 }
 0x1cf   :  { %v420_v37 = vpop.f32.mrb[6].mxu1  ;;  %v480_v39 = vpop.f32.mrb[18].mxu0  ;;  %11508 = vmatprep.subr.bf16.mxu1 %v12949_v0  ;;  %v419_v47 = vadd.f32 %v418_v35, %v236_v13 }
 0x1d0   :  { %v421_v41 = vadd.f32 %v420_v37, %v232_v9  ;;  %v481_v42 = vadd.f32 %v480_v39, %v240_v10  ;;  %v422_v43 = vpop.f32.mrb[7].mxu1  ;;  %v11501_v46 = vpop.f32.mrb[19].mxu0  ;;  %v494_v49 = vmul.f32 0.17677669, %v417_v34 }
 0x1d1   :  { %v423_v48 = vadd.f32 %v422_v43, %v236_v13 }
 0x1d2   :  { %v495_v50 = vmul.f32 0.17677669, %v421_v41  ;;  %v13238_v51 = vpack.c.bf16 %v481_v42, %v478_v40 }
 0x1d3   :  { %v502_v52 = vpack.c.bf16 %v423_v48, %v419_v47 }
 0x1d4   :  { %v499_v55 = vpack.c.bf16 %v495_v50, %v494_v49 }
 0x1d5   :  { %597 = vrot.lane.b32.xlu0 %v502_v52, %s12952_s27  ;;  %v426_v56 = vpop.f32.mrb[8].mxu1  ;;  %v485_v57 = vpop.f32.mrb[20].mxu0  ;;  %v521_v58 = vsel %vm507_vm2, %v502_v52, 0 }
 0x1d6   :  { %v427_v59 = vadd.f32 %v426_v56, %v232_v9  ;;  %v428_v60 = vpop.f32.mrb[9].mxu1  ;;  %v11504_v61 = vpop.f32.mrb[21].mxu0  ;;  %11509 = vmatpush3.bf16.xpose.msra.mxu1 %v521_v58  ;;  %v486_v3 = vadd.f32 %v485_v57, %v240_v10  ;;  %v169_v56 = vld [vmem:[%s17074_s3 + $0x8] sm:$0xff] }
 0x1d7   :  { %v430_v1 = vpop.f32.mrb[10].mxu1  ;;  %v488_v2 = vpop.f32.mrb[22].mxu0  ;;  %11510 = vmatprep.subr.bf16.mxu1 %v12949_v0  ;;  %v429_v15 = vadd.f32 %v428_v60, %v236_v13 }
 0x1d8   :  { %v431_v6 = vadd.f32 %v430_v1, %v232_v9  ;;  %v489_v11 = vadd.f32 %v488_v2, %v240_v10  ;;  %v432_v12 = vpop.f32.mrb[11].mxu1  ;;  %v11505_v14 = vpop.f32.mrb[23].mxu0  ;;  %v496_v17 = vmul.f32 0.17677669, %v427_v59 }
 0x1d9   :  { %v433_v16 = vadd.f32 %v432_v12, %v236_v13  ;;  %586 = vrot.lane.b32.xlu0 %v13233_v30, %s12952_s27 }
 0x1da   :  { %v497_v18 = vmul.f32 0.17677669, %v431_v6  ;;  %v13245_v19 = vpack.c.bf16 %v489_v11, %v486_v3  ;;  %v170_v3 = vld [vmem:[%s17074_s3 + $0x10] sm:$0xff]  ;;  %v171_v11 = vld [vmem:[%s17074_s3 + $0x18] sm:$0xff] }
 0x1db   :  { %v503_v20 = vpack.c.bf16 %v433_v16, %v429_v15 }
 0x1dc   :  { %v500_v21 = vpack.c.bf16 %v497_v18, %v496_v17 }
 0x1dd   :  { %684 = vrot.lane.b32.xlu0 %v502_v52, %s12953_s23  ;;  %599 = vrot.lane.b32.xlu1 %v503_v20, %s12952_s27  ;;  %v524_v9 = vsel %vm507_vm2, %v503_v20, 0 }
 0x1de   :  { %11511 = vmatpush3.bf16.xpose.msra.mxu1 %v524_v9 }
 0x1df   :  { %11542 = vmatprep.subr.bf16.mxu1 %v12949_v0 }
 0x1e1   :  { %771 = vrot.lane.b32.xlu0 %v502_v52, %s12954_s28  ;;  %682 = vrot.lane.b32.xlu1 %v501_v29, %s12953_s23  ;;  %v168_v52 = vld [vmem:[%s17074_s3] sm:$0xff] }
 0x1e5   :  { %769 = vrot.lane.b32.xlu1 %v501_v29, %s12954_s28  ;;  %11513 = vmatmul.mubr.msk.bf16.vlgmr.msra.gmra.mrb[12].mxu1 %vm507_vm2, %v13233_v30 }
 0x1e6   :  { %590 = vrot.lane.b32.xlu0 %v500_v21, %s12952_s27  ;;  %11516 = vmatprep.mubr.msk.bf16.mxu1 %vm12950_vm0, %v12949_v0 }
 0x1e9   :  { %588 = vrot.lane.b32.xlu1 %v499_v55, %s12952_s27 }
 0x1ea   :  { %676 = vrot.lane.b32.xlu0 %v13233_v30, %s12953_s23 }
 0x1ed   :  { %686 = vrot.lane.b32.xlu1 %v503_v20, %s12953_s23  ;;  %11517 = vmatmul.mubr.msk.bf16.gmra.mrb[16].mxu1 %vm507_vm2, %v499_v55 }
 0x1ee   :  { %678 = vrot.lane.b32.xlu0 %v499_v55, %s12953_s23  ;;  %11520 = vmatprep.mubr.msk.bf16.mxu1 %vm12950_vm0, %v12949_v0 }
 0x1f1   :  { %773 = vrot.lane.b32.xlu1 %v503_v20, %s12954_s28 }
 0x1f2   :  { %680 = vrot.lane.b32.xlu0 %v500_v21, %s12953_s23 }
 0x1f5   :  { %763 = vrot.lane.b32.xlu1 %v13233_v30, %s12954_s28  ;;  %11521 = vmatmul.mubr.msk.bf16.gmra.mrb[20].mxu1 %vm507_vm2, %v500_v21 }
 0x1f6   :  { %1222 = vrot.lane.b32.xlu0 %v13238_v51, %s12952_s27  ;;  %11548 = vmatprep.mubr.msk.bf16.mxu1 %vm12950_vm0, %v12949_v0 }
 0x1f9   :  { %765 = vrot.lane.b32.xlu1 %v499_v55, %s12954_s28 }
 0x1fd   :  { %767 = vrot.lane.b32.xlu1 %v500_v21, %s12954_s28  ;;  %v172_v21 = vld [vmem:[%s17074_s3 + $0x20] sm:$0xff] }
 0x201   :  { %1220 = vrot.lane.b32.xlu1 %v13231_v28, %s12952_s27 }
 0x205   :  { %1224 = vrot.lane.b32.xlu1 %v13245_v19, %s12952_s27 }
 0x209   :  { %1295 = vrot.lane.b32.xlu1 %v13231_v28, %s12953_s23 }
 0x23f   :  { %v596_v10 = vpop.permute.xlu0 %595 }
 0x240   :  { %v611_v13 = vsel %vm507_vm2, %v596_v10, 0  ;;  %v173_v10 = vld [vmem:[%s17074_s3 + $0x28] sm:$0xff] }
 0x241   :  { %11525 = vmatpush3.bf16.xpose.msra.mxu0 %v611_v13 }
 0x242   :  { %11526 = vmatprep.subr.bf16.mxu0 %v12949_v0 }
 0x247   :  { %v598_v22 = vpop.permute.xlu0 %597 }
 0x248   :  { %v614_v23 = vsel %vm507_vm2, %v598_v22, 0 }
 0x249   :  { %11527 = vmatpush3.bf16.xpose.msra.mxu0 %v614_v23 }
 0x24a   :  { %11528 = vmatprep.subr.bf16.mxu0 %v12949_v0 }
 0x24b   :  { %v587_v26 = vpop.permute.xlu0 %586 }
 0x24f   :  { %v600_v24 = vpop.permute.xlu1 %599  ;;  %v685_v30 = vpop.permute.xlu0 %684 }
 0x250   :  { %v617_v25 = vsel %vm507_vm2, %v600_v24, 0  ;;  %v701_v34 = vsel %vm507_vm2, %v685_v30, 0 }
 0x251   :  { %11529 = vmatpush3.bf16.xpose.msra.mxu0 %v617_v25 }
 0x252   :  { %11560 = vmatprep.subr.bf16.mxu0 %v12949_v0 }
 0x253   :  { %v683_v27 = vpop.permute.xlu1 %682  ;;  %v772_v35 = vpop.permute.xlu0 %771 }
 0x254   :  { %v698_v29 = vsel %vm507_vm2, %v683_v27, 0  ;;  %v788_v37 = vsel %vm507_vm2, %v772_v35, 0 }
 0x255   :  { %11543 = vmatpush3.bf16.xpose.msra.mxu1 %v698_v29  ;;  %v174_v29 = vld [vmem:[%s17074_s3 + $0x30] sm:$0xff] }
 0x256   :  { %11544 = vmatprep.subr.bf16.mxu1 %v12949_v0 }
 0x257   :  { %v770_v31 = vpop.permute.xlu1 %769 }
 0x258   :  { %v785_v32 = vsel %vm507_vm2, %v770_v31, 0  ;;  %11531 = vmatmul.mubr.msk.bf16.vlgmr.msra.gmra.mrb[24].mxu0 %vm507_vm2, %v587_v26  ;;  %v591_v40 = vpop.permute.xlu0 %590  ;;  %v175_v31 = vld [vmem:[%s17074_s3 + $0x38] sm:$0xff] }
 0x259   :  { %11561 = vmatpush3.bf16.xpose.msra.mxu0 %v785_v32  ;;  %11534 = vmatprep.mubr.msk.bf16.mxu0 %vm12950_vm0, %v12949_v0 }
 0x25a   :  { %11562 = vmatprep.subr.bf16.mxu0 %v12949_v0 }
 0x25b   :  { %v589_v33 = vpop.permute.xlu1 %588 }
 0x25c   :  { %v677_v43 = vpop.permute.xlu0 %676 }
 0x25d   :  { %11545 = vmatpush3.bf16.xpose.msra.mxu1 %v701_v34 }
 0x25e   :  { %11546 = vmatprep.subr.bf16.mxu1 %v12949_v0 }
 0x25f   :  { %v687_v36 = vpop.permute.xlu1 %686 }
 0x260   :  { %11535 = vmatmul.mubr.msk.bf16.gmra.mrb[28].mxu0 %vm507_vm2, %v589_v33  ;;  %v704_v39 = vsel %vm507_vm2, %v687_v36, 0  ;;  %v679_v47 = vpop.permute.xlu0 %678 }
 0x261   :  { %11563 = vmatpush3.bf16.xpose.msra.mxu0 %v788_v37  ;;  %11538 = vmatprep.mubr.msk.bf16.mxu0 %vm12950_vm0, %v12949_v0 }
 0x262   :  { %11564 = vmatprep.subr.bf16.mxu0 %v12949_v0 }
 0x263   :  { %v774_v41 = vpop.permute.xlu1 %773 }
 0x264   :  { %v791_v42 = vsel %vm507_vm2, %v774_v41, 0  ;;  %v681_v49 = vpop.permute.xlu0 %680 }
 0x265   :  { %11547 = vmatpush3.bf16.xpose.msra.mxu1 %v704_v39 }
 0x266   :  { %12078 = vmatprep.subr.bf16.mxu1 %v12949_v0 }
 0x267   :  { %v764_v46 = vpop.permute.xlu1 %763 }
 0x268   :  { %11539 = vmatmul.mubr.msk.bf16.gmra.mrb[32].mxu0 %vm507_vm2, %v591_v40 }
 0x269   :  { %11565 = vmatpush3.bf16.xpose.msra.mxu0 %v791_v42  ;;  %11566 = vmatprep.mubr.msk.bf16.mxu0 %vm12950_vm0, %v12949_v0 }
 0x26a   :  { %11578 = vmatprep.subr.bf16.mxu0 %v12949_v0 }
 0x26b   :  { %v766_v48 = vpop.permute.xlu1 %765 }
 0x26c   :  { %11549 = vmatmul.mubr.msk.bf16.vlgmr.msra.gmra.mrb[24].mxu1 %vm507_vm2, %v677_v43 }
 0x26d   :  { %12081 = vmatpush3.bf16.msra.mxu1 %v13231_v28  ;;  %11552 = vmatprep.mubr.msk.bf16.mxu1 %vm12950_vm0, %v12949_v0 }
 0x26e   :  { %12079 = vmatprep.subr.bf16.mxu1 %v12949_v0 }
 0x26f   :  { %v768_v50 = vpop.permute.xlu1 %767 }
 0x270   :  { %11567 = vmatmul.mubr.msk.bf16.vlgmr.msra.gmra.mrb[36].mxu0 %vm507_vm2, %v764_v46 }
 0x271   :  { %11579 = vmatpush3.bf16.msra.mxu0 %v13231_v28  ;;  %12082 = vmatpush3.bf16.msra.mxu1 %v13238_v51 }
 0x272   :  { %11580 = vmatprep.subr.bf16.mxu0 %v12949_v0  ;;  %12080 = vmatprep.subr.bf16.mxu1 %v12949_v0 }
 0x273   :  { %11570 = vmatprep.mubr.msk.bf16.mxu0 %vm12950_vm0, %v12949_v0 }
 0x274   :  { %11553 = vmatmul.mubr.msk.bf16.gmra.mrb[28].mxu1 %vm507_vm2, %v679_v47 }
 0x275   :  { %11581 = vmatpush3.bf16.msra.mxu0 %v13238_v51  ;;  %12083 = vmatpush3.bf16.msra.mxu1 %v13245_v19 }
 0x276   :  { %11582 = vmatprep.subr.bf16.mxu0 %v12949_v0  ;;  %11556 = vmatprep.mubr.msk.bf16.mxu1 %vm12950_vm0, %v12949_v0 }
 0x277   :  { %11614 = vmatprep.subr.bf16.mxu1 %v12949_v0 }
 0x278   :  { %11571 = vmatmul.mubr.msk.bf16.gmra.mrb[40].mxu0 %vm507_vm2, %v766_v48 }
 0x279   :  { %11583 = vmatpush3.bf16.msra.mxu0 %v13245_v19  ;;  %11574 = vmatprep.mubr.msk.bf16.mxu0 %vm12950_vm0, %v12949_v0 }
 0x27a   :  { %11596 = vmatprep.subr.bf16.mxu0 %v12949_v0 }
 0x27c   :  { %11557 = vmatmul.mubr.msk.bf16.gmra.mrb[32].mxu1 %vm507_vm2, %v681_v49  ;;  %v180_v49 = vld [vmem:[%s17074_s3 + $0x60] sm:$0xff] }
 0x27d   :  { %11588 = vmatprep.mubr.msk.bf16.mxu1 %vm12950_vm0, %v12949_v0 }
 0x280   :  { %11575 = vmatmul.mubr.msk.bf16.gmra.mrb[44].mxu0 %vm507_vm2, %v768_v50 }
 0x281   :  { %11584 = vmatprep.mubr.msk.bf16.mxu0 %vm12950_vm0, %v12949_v0 }
 0x2b8   :  { %v560_v55 = vpop.f32.mrb[12].mxu1 }
 0x2b9   :  { %v11514_v57 = vpop.f32.mrb[13].mxu1  ;;  %v13347_v58 = vadd.f32 %v560_v55, %v168_v52  ;;  %v181_v55 = vld [vmem:[%s17074_s3 + $0x68] sm:$0xff] }
 0x2ba   :  { %v563_v59 = vpop.f32.mrb[14].mxu1 }
 0x2bb   :  { %v11515_v60 = vpop.f32.mrb[15].mxu1  ;;  %v875_v61 = vsel %vm874_vm3, %v13347_v58, -inf  ;;  %v13351_v1 = vadd.f32 %v563_v59, %v169_v56  ;;  %v176_v56 = vld [vmem:[%s17074_s3 + $0x40] sm:$0xff] }
 0x2bc   :  { %876 = vmax.xlane.f32.xlu0 %v875_v61  ;;  %v177_v61 = vld [vmem:[%s17074_s3 + $0x48] sm:$0xff] }
 0x2bd   :  { %v878_v2 = vsel %vm874_vm3, %v13351_v1, -inf }
 0x2be   :  { %879 = vmax.xlane.f32.xlu1 %v878_v2 }
 0x2c0   :  { %v568_v6 = vpop.f32.mrb[16].mxu1 }
 0x2c1   :  { %v11518_v12 = vpop.f32.mrb[17].mxu1  ;;  %v13361_v14 = vadd.f32 %v568_v6, %v170_v3 }
 0x2c2   :  { %v571_v15 = vpop.f32.mrb[18].mxu1 }
 0x2c3   :  { %v11519_v16 = vpop.f32.mrb[19].mxu1  ;;  %v881_v17 = vsel %vm874_vm3, %v13361_v14, -inf  ;;  %v13365_v18 = vadd.f32 %v571_v15, %v171_v11 }
 0x2c4   :  { %882 = vmax.xlane.f32.xlu1 %v881_v17 }
 0x2c5   :  { %v884_v20 = vsel %vm874_vm3, %v13365_v18, -inf }
 0x2c6   :  { %885 = vmax.xlane.f32.xlu0 %v884_v20 }
 0x2c8   :  { %v576_v9 = vpop.f32.mrb[20].mxu1 }
 0x2c9   :  { %v11522_v13 = vpop.f32.mrb[21].mxu1  ;;  %v13375_v22 = vadd.f32 %v576_v9, %v172_v21  ;;  %v182_v21 = vld [vmem:[%s17074_s3 + $0x70] sm:$0xff] }
 0x2ca   :  { %v579_v23 = vpop.f32.mrb[22].mxu1 }
 0x2cb   :  { %v11523_v24 = vpop.f32.mrb[23].mxu1  ;;  %v887_v25 = vsel %vm874_vm3, %v13375_v22, -inf  ;;  %v13379_v26 = vadd.f32 %v579_v23, %v173_v10  ;;  %v183_v23 = vld [vmem:[%s17074_s3 + $0x78] sm:$0xff] }
 0x2cc   :  { %888 = vmax.xlane.f32.xlu1 %v887_v25  ;;  %v178_v24 = vld [vmem:[%s17074_s3 + $0x50] sm:$0xff] }
 0x2cd   :  { %v890_v27 = vsel %vm874_vm3, %v13379_v26, -inf }
 0x2ce   :  { %891 = vmax.xlane.f32.xlu0 %v890_v27 }
 0x32b   :  { %v653_v30 = vpop.f32.mrb[24].mxu0 }
 0x32c   :  { %v11532_v32 = vpop.f32.mrb[25].mxu0  ;;  %v13389_v33 = vadd.f32 %v653_v30, %v174_v29 }
 0x32d   :  { %v656_v34 = vpop.f32.mrb[26].mxu0 }
 0x32e   :  { %v11533_v35 = vpop.f32.mrb[27].mxu0  ;;  %v893_v36 = vsel %vm874_vm3, %v13389_v33, -inf  ;;  %v13393_v37 = vadd.f32 %v656_v34, %v175_v31  ;;  %v179_v31 = vld [vmem:[%s17074_s3 + $0x58] sm:$0xff] }
 0x32f   :  { %894 = vmax.xlane.f32.xlu0 %v893_v36 }
 0x330   :  { %v896_v39 = vsel %vm874_vm3, %v13393_v37, -inf }
 0x333   :  { %897 = vmax.xlane.f32.xlu0 %v896_v39  ;;  %v661_v40 = vpop.f32.mrb[28].mxu0 }
 0x334   :  { %v11536_v41 = vpop.f32.mrb[29].mxu0  ;;  %v13415_v11 = vadd.f32 %v661_v40, %v176_v56 }
 0x335   :  { %v664_v42 = vpop.f32.mrb[30].mxu0 }
 0x336   :  { %v11537_v43 = vpop.f32.mrb[31].mxu0  ;;  %v13419_v17 = vadd.f32 %v664_v42, %v177_v61  ;;  %v899_v10 = vsel %vm874_vm3, %v13415_v11, -inf  ;;  %v187_v61 = vld [vmem:[%s17074_s3 + $0x98] sm:$0xff] }
 0x338   :  { %v902_v27 = vsel %vm874_vm3, %v13419_v17, -inf }
 0x33b   :  { %v669_v46 = vpop.f32.mrb[32].mxu0 }
 0x33c   :  { %v11540_v47 = vpop.f32.mrb[33].mxu0  ;;  %v13443_v36 = vadd.f32 %v669_v46, %v178_v24 }
 0x33d   :  { %v672_v48 = vpop.f32.mrb[34].mxu0  ;;  %v184_v47 = vld [vmem:[%s17074_s3 + $0x80] sm:$0xff] }
 0x33e   :  { %v11541_v50 = vpop.f32.mrb[35].mxu0  ;;  %v13447_v42 = vadd.f32 %v672_v48, %v179_v31  ;;  %v186_v48 = vld [vmem:[%s17074_s3 + $0x90] sm:$0xff] }
 0x33f   :  { %v740_v52 = vpop.f32.mrb[24].mxu1  ;;  %v905_v50 = vsel %vm874_vm3, %v13443_v36, -inf }
 0x340   :  { %v11550_v57 = vpop.f32.mrb[25].mxu1  ;;  %v13406_v59 = vadd.f32 %v740_v52, %v180_v49  ;;  %v185_v52 = vld [vmem:[%s17074_s3 + $0x88] sm:$0xff]  ;;  %v908_v56 = vsel %vm874_vm3, %v13447_v42, -inf }
 0x341   :  { %v743_v60 = vpop.f32.mrb[26].mxu1 }
 0x342   :  { %v11551_v2 = vpop.f32.mrb[27].mxu1  ;;  %v911_v3 = vsel %vm874_vm3, %v13406_v59, -inf  ;;  %v13413_v6 = vadd.f32 %v743_v60, %v181_v55 }
 0x343   :  { %912 = vmax.xlane.f32.xlu1 %v911_v3  ;;  %v827_v12 = vpop.f32.mrb[36].mxu0 }
 0x344   :  { %v11568_v15 = vpop.f32.mrb[37].mxu0  ;;  %v914_v16 = vsel %vm874_vm3, %v13413_v6, -inf }
 0x345   :  { %915 = vmax.xlane.f32.xlu0 %v914_v16  ;;  %v830_v20 = vpop.f32.mrb[38].mxu0  ;;  %v13471_v16 = vadd.f32 %v827_v12, %v186_v48 }
 0x346   :  { %v11569_v9 = vpop.f32.mrb[39].mxu0 }
 0x347   :  { %v748_v13 = vpop.f32.mrb[28].mxu1  ;;  %900 = vmax.xlane.f32.xlu1 %v899_v10  ;;  %v188_v9 = vld [vmem:[%s17074_s3 + $0xa0] sm:$0xff] }
 0x348   :  { %v11554_v25 = vpop.f32.mrb[29].mxu1  ;;  %v13434_v29 = vadd.f32 %v748_v13, %v182_v21 }
 0x349   :  { %v751_v30 = vpop.f32.mrb[30].mxu1  ;;  %903 = vmax.xlane.f32.xlu0 %v902_v27  ;;  %v189_v25 = vld [vmem:[%s17074_s3 + $0xa8] sm:$0xff]  ;;  %v929_v27 = vsel %vm874_vm3, %v13471_v16, -inf }
 0x34a   :  { %v11555_v32 = vpop.f32.mrb[31].mxu1  ;;  %v917_v34 = vsel %vm874_vm3, %v13434_v29, -inf  ;;  %v13441_v35 = vadd.f32 %v751_v30, %v183_v23  ;;  %v13478_v23 = vadd.f32 %v830_v20, %v187_v61  ;;  %v191_v61 = vld [vmem:[%s17074_s3 + $0xb8] sm:$0xff] }
 0x34b   :  { %918 = vmax.xlane.f32.xlu1 %v917_v34  ;;  %v835_v39 = vpop.f32.mrb[40].mxu0 }
 0x34c   :  { %v11572_v40 = vpop.f32.mrb[41].mxu0  ;;  %v920_v41 = vsel %vm874_vm3, %v13441_v35, -inf  ;;  %v13485_v30 = vadd.f32 %v835_v39, %v188_v9  ;;  %v932_v31 = vsel %vm874_vm3, %v13478_v23, -inf  ;;  %v13497_v39 = vpop.permute.xlu1 %1220 }
 0x34d   :  { %921 = vmax.xlane.f32.xlu0 %v920_v41  ;;  %v838_v43 = vpop.f32.mrb[42].mxu0  ;;  %v13503_v41 = vpop.permute.xlu0 %1222 }
 0x34e   :  { %v11573_v49 = vpop.f32.mrb[43].mxu0  ;;  %v13489_v32 = vadd.f32 %v838_v43, %v189_v25  ;;  %v935_v20 = vsel %vm874_vm3, %v13485_v30, -inf }
 0x34f   :  { %v756_v46 = vpop.f32.mrb[32].mxu1  ;;  %906 = vmax.xlane.f32.xlu1 %v905_v50 }
 0x350   :  { %v11558_v55 = vpop.f32.mrb[33].mxu1  ;;  %v13462_v57 = vadd.f32 %v756_v46, %v184_v47  ;;  %v938_v34 = vsel %vm874_vm3, %v13489_v32, -inf  ;;  %v13499_v40 = vpop.permute.xlu1 %1224 }
 0x351   :  { %v759_v60 = vpop.f32.mrb[34].mxu1  ;;  %909 = vmax.xlane.f32.xlu0 %v908_v56  ;;  %v877_v47 = vpop.xlane.xlu0 %876 }
 0x352   :  { %v11559_v2 = vpop.f32.mrb[35].mxu1  ;;  %v923_v3 = vsel %vm874_vm3, %v13462_v57, -inf  ;;  %v13469_v15 = vadd.f32 %v759_v60, %v185_v52 }
 0x353   :  { %924 = vmax.xlane.f32.xlu1 %v923_v3  ;;  %v843_v21 = vpop.f32.mrb[44].mxu0 }
 0x354   :  { %v11576_v10 = vpop.f32.mrb[45].mxu0  ;;  %v926_v13 = vsel %vm874_vm3, %v13469_v15, -inf  ;;  %v13505_v43 = vpop.permute.xlu1 %1295 }
 0x355   :  { %927 = vmax.xlane.f32.xlu0 %v926_v13  ;;  %v846_v24 = vpop.f32.mrb[46].mxu0  ;;  %v886_v46 = vpop.xlane.xlu0 %885 }
 0x356   :  { %v11577_v12 = vpop.f32.mrb[47].mxu0  ;;  %v950_v48 = vsub.f32 %v13365_v18, %v886_v46  ;;  %v13518_v3 = vadd.f32 %v846_v24, %v191_v61 }
 0x357   :  { %930 = vmax.xlane.f32.xlu1 %v929_v27  ;;  %v947_v12 = vsub.f32 %v13347_v58, %v877_v47 }
 0x358   :  { %v880_v49 = vpop.xlane.xlu1 %879  ;;  %v977_v56 = vmul.f32 1.442695, %v950_v48 }
 0x359   :  { %933 = vmax.xlane.f32.xlu0 %v932_v31  ;;  %v948_v50 = vsub.f32 %v13351_v1, %v880_v49  ;;  %v971_v31 = vmul.f32 1.442695, %v947_v12 }
 0x35b   :  { %936 = vmax.xlane.f32.xlu1 %v935_v20  ;;  %v973_v52 = vmul.f32 1.442695, %v948_v50  ;;  %v892_v55 = vpop.xlane.xlu0 %891 }
 0x35c   :  { %v952_v60 = vsub.f32 %v13379_v26, %v892_v55  ;;  %v944_v26 = vsel %vm874_vm3, %v13518_v3, -inf  ;;  %v883_v27 = vpop.xlane.xlu1 %882 }
 0x35d   :  { %939 = vmax.xlane.f32.xlu0 %v938_v34  ;;  %12541 = vpow2.f32 %v973_v52  ;;  %v949_v20 = vsub.f32 %v13361_v14, %v883_v27 }
 0x35e   :  { %12543 = vpow2.f32 %v977_v56  ;;  %v981_v1 = vmul.f32 1.442695, %v952_v60 }
 0x35f   :  { %v975_v49 = vmul.f32 1.442695, %v949_v20 }
 0x360   :  { %12545 = vpow2.f32 %v981_v1  ;;  %v889_v34 = vpop.xlane.xlu1 %888 }
 0x361   :  { %12547 = vpow2.f32 %v971_v31  ;;  %v951_v50 = vsub.f32 %v13375_v22, %v889_v34 }
 0x362   :  { %12549 = vpow2.f32 %v975_v49 }
 0x363   :  { %v979_v46 = vmul.f32 1.442695, %v951_v50 }
 0x365   :  { %12551 = vpow2.f32 %v979_v46 }
 0x367   :  { %v13524_v9 = vpop.eup %12541 }
 0x368   :  { %v1022_v10 = vsel %vm874_vm3, %v13524_v9, 0.0 }
 0x36c   :  { %1297 = vrot.lane.b32.xlu1 %v13238_v51, %s12953_s23 }
 0x373   :  { %1370 = vrot.lane.b32.xlu0 %v13231_v28, %s12954_s28  ;;  %v190_v28 = vld [vmem:[%s17074_s3 + $0xb0] sm:$0xff] }
 0x374   :  { %v13516_v2 = vadd.f32 %v843_v21, %v190_v28  ;;  %v13528_v21 = vpop.eup %12543 }
 0x375   :  { %v1028_v13 = vsel %vm874_vm3, %v13528_v21, 0.0  ;;  %v13532_v24 = vpop.eup %12545 }
 0x376   :  { %v941_v18 = vsel %vm874_vm3, %v13516_v2, -inf  ;;  %v1034_v25 = vsel %vm874_vm3, %v13532_v24, 0.0 }
 0x390   :  { %942 = vmax.xlane.f32.xlu1 %v941_v18 }
 0x392   :  { %945 = vmax.xlane.f32.xlu0 %v944_v26 }
 0x396   :  { %1023 = vadd.xlane.f32.xlu0 %v1022_v10 }
 0x39a   :  { %1029 = vadd.xlane.f32.xlu0 %v1028_v13 }
 0x39e   :  { %1035 = vadd.xlane.f32.xlu0 %v1034_v25 }
 0x3a1   :  { %1372 = vrot.lane.b32.xlu1 %v13238_v51, %s12954_s28  ;;  %v13542_v51 = vpop.eup %12547 }
 0x3a2   :  { %v1019_v14 = vsel %vm874_vm3, %v13542_v51, 0.0  ;;  %v13547_v60 = vpop.eup %12549 }
 0x3a3   :  { %v1025_v22 = vsel %vm874_vm3, %v13547_v60, 0.0 }
 0x3bc   :  { %v895_v52 = vpop.xlane.xlu0 %894 }
 0x3bd   :  { %v953_v48 = vsub.f32 %v13389_v33, %v895_v52  ;;  %v13551_v33 = vpop.eup %12551 }
 0x3be   :  { %v1031_v28 = vsel %vm874_vm3, %v13551_v33, 0.0 }
 0x3bf   :  { %v983_v55 = vmul.f32 1.442695, %v953_v48 }
 0x3c0   :  { %v898_v56 = vpop.xlane.xlu0 %897 }
 0x3c1   :  { %v954_v58 = vsub.f32 %v13393_v37, %v898_v56  ;;  %12553 = vpow2.f32 %v983_v55 }
 0x3c3   :  { %v985_v47 = vmul.f32 1.442695, %v954_v58 }
 0x3c5   :  { %12555 = vpow2.f32 %v985_v47  ;;  %1020 = vadd.xlane.f32.xlu1 %v1019_v14 }
 0x3c9   :  { %1026 = vadd.xlane.f32.xlu1 %v1025_v22 }
 0x3cb   :  { %v13555_v61 = vpop.eup %12553 }
 0x3cc   :  { %v1037_v18 = vsel %vm874_vm3, %v13555_v61, 0.0 }
 0x3cd   :  { %1032 = vadd.xlane.f32.xlu1 %v1031_v28 }
 0x3cf   :  { %v13557_v37 = vpop.eup %12555 }
 0x3d0   :  { %v913_v1 = vpop.xlane.xlu1 %912  ;;  %v1040_v26 = vsel %vm874_vm3, %v13557_v37, 0.0 }
 0x3d1   :  { %v959_v10 = vsub.f32 %v13406_v59, %v913_v1  ;;  %1038 = vadd.xlane.f32.xlu1 %v1037_v18  ;;  %1041 = vadd.xlane.f32.xlu0 %v1040_v26 }
 0x3d2   :  { %v916_v13 = vpop.xlane.xlu0 %915 }
 0x3d3   :  { %v995_v25 = vmul.f32 1.442695, %v959_v10  ;;  %v960_v12 = vsub.f32 %v13413_v6, %v916_v13 }
 0x3d4   :  { %v901_v27 = vpop.xlane.xlu1 %900 }
 0x3d5   :  { %12557 = vpow2.f32 %v995_v25  ;;  %v997_v31 = vmul.f32 1.442695, %v960_v12  ;;  %v955_v20 = vsub.f32 %v13415_v11, %v901_v27 }
 0x3d6   :  { %v904_v34 = vpop.xlane.xlu0 %903 }
 0x3d7   :  { %12559 = vpow2.f32 %v997_v31  ;;  %v987_v49 = vmul.f32 1.442695, %v955_v20  ;;  %v956_v50 = vsub.f32 %v13419_v17, %v904_v34 }
 0x3d8   :  { %v919_v46 = vpop.xlane.xlu1 %918 }
 0x3d9   :  { %12561 = vpow2.f32 %v987_v49  ;;  %v961_v59 = vsub.f32 %v13434_v29, %v919_v46  ;;  %v989_v48 = vmul.f32 1.442695, %v956_v50 }
 0x3da   :  { %v922_v52 = vpop.xlane.xlu0 %921 }
 0x3db   :  { %v999_v55 = vmul.f32 1.442695, %v961_v59  ;;  %v962_v56 = vsub.f32 %v13441_v35, %v922_v52 }
 0x3dc   :  { %v907_v6 = vpop.xlane.xlu1 %906 }
 0x3dd   :  { %12563 = vpow2.f32 %v999_v55  ;;  %v957_v58 = vsub.f32 %v13443_v36, %v907_v6  ;;  %v1001_v14 = vmul.f32 1.442695, %v962_v56 }
 0x3de   :  { %v910_v47 = vpop.xlane.xlu0 %909  ;;  %12565 = vpow2.f32 %v989_v48 }
 0x3df   :  { %v13570_v11 = vpop.eup %12557  ;;  %v991_v22 = vmul.f32 1.442695, %v957_v58  ;;  %v958_v17 = vsub.f32 %v13447_v42, %v910_v47 }
 0x3e0   :  { %v925_v28 = vpop.xlane.xlu1 %924  ;;  %v1055_v29 = vsel %vm874_vm3, %v13570_v11, 0.0 }
 0x3e1   :  { %v13575_v1 = vpop.eup %12559  ;;  %12567 = vpow2.f32 %v991_v22  ;;  %v963_v35 = vsub.f32 %v13462_v57, %v925_v28  ;;  %1056 = vadd.xlane.f32.xlu1 %v1055_v29  ;;  %v993_v10 = vmul.f32 1.442695, %v958_v17 }
 0x3e2   :  { %v928_v18 = vpop.xlane.xlu0 %927  ;;  %v1058_v36 = vsel %vm874_vm3, %v13575_v1, 0.0  ;;  %12569 = vpow2.f32 %v1001_v14 }
 0x3e3   :  { %v13580_v26 = vpop.eup %12561  ;;  %v1003_v13 = vmul.f32 1.442695, %v963_v35  ;;  %v964_v42 = vsub.f32 %v13469_v15, %v928_v18  ;;  %1059 = vadd.xlane.f32.xlu0 %v1058_v36 }
 0x3e4   :  { %v931_v25 = vpop.xlane.xlu1 %930  ;;  %v1043_v12 = vsel %vm874_vm3, %v13580_v26, 0.0 }
 0x3e5   :  { %12571 = vpow2.f32 %v1003_v13  ;;  %v965_v57 = vsub.f32 %v13471_v16, %v931_v25  ;;  %1044 = vadd.xlane.f32.xlu1 %v1043_v12  ;;  %v1005_v20 = vmul.f32 1.442695, %v964_v42 }
 0x3e6   :  { %v934_v27 = vpop.xlane.xlu0 %933  ;;  %12573 = vpow2.f32 %v993_v10 }
 0x3e7   :  { %v13586_v31 = vpop.eup %12563  ;;  %v1007_v34 = vmul.f32 1.442695, %v965_v57  ;;  %v966_v49 = vsub.f32 %v13478_v23, %v934_v27 }
 0x3e8   :  { %v937_v50 = vpop.xlane.xlu1 %936  ;;  %v1061_v15 = vsel %vm874_vm3, %v13586_v31, 0.0  ;;  %v13591_v46 = vpop.eup %12565 }
 0x3e9   :  { %12575 = vpow2.f32 %v1007_v34  ;;  %1062 = vadd.xlane.f32.xlu0 %v1061_v15  ;;  %v1009_v16 = vmul.f32 1.442695, %v966_v49  ;;  %v967_v52 = vsub.f32 %v13485_v30, %v937_v50  ;;  %v1046_v23 = vsel %vm874_vm3, %v13591_v46, 0.0 }
 0x3ea   :  { %12577 = vpow2.f32 %v1005_v20  ;;  %v940_v48 = vpop.xlane.xlu0 %939 }
 0x3eb   :  { %v13593_v59 = vpop.eup %12567  ;;  %12579 = vpow2.f32 %v1009_v16  ;;  %v1011_v58 = vmul.f32 1.442695, %v967_v52  ;;  %v968_v47 = vsub.f32 %v13489_v32, %v940_v48 }
 0x3ec   :  { %v1049_v55 = vsel %vm874_vm3, %v13593_v59, 0.0  ;;  %v13600_v56 = vpop.eup %12569  ;;  %v1298_v57 = vpop.permute.xlu1 %1297 }
 0x3ed   :  { %1050 = vadd.xlane.f32.xlu1 %v1049_v55  ;;  %1047 = vadd.xlane.f32.xlu0 %v1046_v23  ;;  %v1064_v14 = vsel %vm874_vm3, %v13600_v56, 0.0  ;;  %12581 = vpow2.f32 %v1011_v58  ;;  %v1013_v28 = vmul.f32 1.442695, %v968_v47 }
 0x3ee   :  { %v13635_v27 = vpop.permute.xlu0 %1370 }
 0x3ef   :  { %v13602_v6 = vpop.eup %12571  ;;  %12583 = vpow2.f32 %v1013_v28 }
 0x3f0   :  { %v1067_v30 = vsel %vm874_vm3, %v13602_v6, 0.0  ;;  %v13609_v22 = vpop.eup %12573 }
 0x3f1   :  { %1068 = vadd.xlane.f32.xlu1 %v1067_v30  ;;  %1065 = vadd.xlane.f32.xlu0 %v1064_v14  ;;  %v1052_v32 = vsel %vm874_vm3, %v13609_v22, 0.0 }
 0x3f3   :  { %v13611_v17 = vpop.eup %12575 }
 0x3f4   :  { %v1073_v29 = vsel %vm874_vm3, %v13611_v17, 0.0  ;;  %v13617_v35 = vpop.eup %12577 }
 0x3f5   :  { %1074 = vadd.xlane.f32.xlu1 %v1073_v29  ;;  %1053 = vadd.xlane.f32.xlu0 %v1052_v32  ;;  %v1070_v18 = vsel %vm874_vm3, %v13617_v35, 0.0  ;;  %v13621_v36 = vpop.eup %12579 }
 0x3f6   :  { %v1076_v10 = vsel %vm874_vm3, %v13621_v36, 0.0 }
 0x3f7   :  { %v13625_v13 = vpop.eup %12581 }
 0x3f8   :  { %v1079_v42 = vsel %vm874_vm3, %v13625_v13, 0.0 }
 0x3f9   :  { %1071 = vadd.xlane.f32.xlu0 %v1070_v18  ;;  %v13629_v25 = vpop.eup %12583 }
 0x3fa   :  { %v1082_v12 = vsel %vm874_vm3, %v13629_v25, 0.0 }
 0x3fd   :  { %1077 = vadd.xlane.f32.xlu0 %v1076_v10 }
 0x401   :  { %1080 = vadd.xlane.f32.xlu0 %v1079_v42 }
 0x405   :  { %1083 = vadd.xlane.f32.xlu0 %v1082_v12 }
 0x406   :  { %1299 = vrot.lane.b32.xlu1 %v13245_v19, %s12953_s23 }
 0x41d   :  { %v943_v20 = vpop.xlane.xlu1 %942 }
 0x41e   :  { %v969_v34 = vsub.f32 %v13516_v2, %v943_v20 }
 0x41f   :  { %v946_v49 = vpop.xlane.xlu0 %945 }
 0x420   :  { %v1015_v50 = vmul.f32 1.442695, %v969_v34  ;;  %v970_v15 = vsub.f32 %v13518_v3, %v946_v49 }
 0x421   :  { %v1373_v3 = vpop.permute.xlu1 %1372 }
 0x422   :  { %12585 = vpow2.f32 %v1015_v50  ;;  %v1017_v16 = vmul.f32 1.442695, %v970_v15 }
 0x423   :  { %v1024_v2 = vpop.xlane.xlu0 %1023 }
 0x424   :  { %12587 = vpow2.f32 %v1017_v16 }
 0x425   :  { %12589 = vrcp.f32 %v1024_v2 }
 0x427   :  { %v1030_v58 = vpop.xlane.xlu0 %1029 }
 0x42b   :  { %v1036_v14 = vpop.xlane.xlu0 %1035 }
 0x42c   :  { %v13639_v52 = vpop.eup %12585 }
 0x42d   :  { %v1085_v48 = vsel %vm874_vm3, %v13639_v52, 0.0 }
 0x42e   :  { %v13643_v55 = vpop.eup %12587  ;;  %1086 = vadd.xlane.f32.xlu0 %v1085_v48 }
 0x42f   :  { %v1088_v23 = vsel %vm874_vm3, %v13643_v55, 0.0  ;;  %v12590_v29 = vpop.eup %12589 }
 0x430   :  { %v1116_v18 = vmul.f32 %v12590_v29, %v13524_v9 }
 0x432   :  { %1089 = vadd.xlane.f32.xlu0 %v1088_v23 }
 0x448   :  { %1374 = vrot.lane.b32.xlu0 %v13245_v19, %s12954_s28 }
 0x452   :  { %v1021_v47 = vpop.xlane.xlu1 %1020 }
 0x453   :  { %12591 = vrcp.f32 %v1021_v47 }
 0x454   :  { %12593 = vrcp.f32 %v1030_v58 }
 0x456   :  { %v1027_v30 = vpop.xlane.xlu1 %1026 }
 0x457   :  { %12595 = vrcp.f32 %v1027_v30 }
 0x45a   :  { %v1033_v28 = vpop.xlane.xlu1 %1032 }
 0x45b   :  { %12597 = vrcp.f32 %v1033_v28 }
 0x45c   :  { %12599 = vrcp.f32 %v1036_v14 }
 0x45d   :  { %v12592_v32 = vpop.eup %12591 }
 0x45e   :  { %v1115_v10 = vmul.f32 %v12592_v32, %v13542_v51  ;;  %v1039_v19 = vpop.xlane.xlu1 %1038  ;;  %v1042_v42 = vpop.xlane.xlu0 %1041 }
 0x45f   :  { %v12594_v12 = vpop.eup %12593  ;;  %12601 = vrcp.f32 %v1039_v19 }
 0x460   :  { %v1139_v20 = vpack.c.bf16 %v1116_v18, %v1115_v10  ;;  %12603 = vrcp.f32 %v1042_v42  ;;  %v1118_v49 = vmul.f32 %v12594_v12, %v13528_v21 }
 0x461   :  { %v12596_v34 = vpop.eup %12595 }
 0x462   :  { %v1117_v50 = vmul.f32 %v12596_v34, %v13547_v60  ;;  %11585 = vmatmul.mubr.msk.bf16.vlgmr.msra.gmra.mrb[48].mxu0 %vm874_vm3, %v1139_v20 }
 0x463   :  { %11597 = vmatpush3.bf16.msra.mxu0 %v13497_v39  ;;  %11602 = vmatprep.mubr.msk.bf16.mxu0 %vm12950_vm0, %v12949_v0 }
 0x464   :  { %v1140_v9 = vpack.c.bf16 %v1118_v49, %v1117_v50  ;;  %11598 = vmatprep.subr.bf16.mxu0 %v12949_v0 }
 0x465   :  { %v12598_v51 = vpop.eup %12597 }
 0x466   :  { %11589 = vmatmul.mubr.msk.bf16.vlgmr.msra.gmra.mrb[36].mxu1 %vm874_vm3, %v1140_v9  ;;  %v12600_v15 = vpop.eup %12599  ;;  %v1119_v39 = vmul.f32 %v12598_v51, %v13551_v33 }
 0x467   :  { %11599 = vmatpush3.bf16.msra.mxu0 %v13503_v41  ;;  %11615 = vmatpush3.bf16.msra.mxu1 %v13505_v43  ;;  %v1120_v48 = vmul.f32 %v12600_v15, %v13532_v24 }
 0x468   :  { %11600 = vmatprep.subr.bf16.mxu0 %v12949_v0  ;;  %11616 = vmatprep.subr.bf16.mxu1 %v12949_v0 }
 0x469   :  { %v12602_v21 = vpop.eup %12601  ;;  %11592 = vmatprep.mubr.msk.bf16.mxu1 %vm12950_vm0, %v12949_v0  ;;  %v1141_v41 = vpack.c.bf16 %v1120_v48, %v1119_v39 }
 0x46a   :  { %v12604_v60 = vpop.eup %12603  ;;  %v1121_v16 = vmul.f32 %v12602_v21, %v13555_v61 }
 0x46b   :  { %v1122_v23 = vmul.f32 %v12604_v60, %v13557_v37  ;;  %11601 = vmatpush3.bf16.msra.mxu0 %v13499_v40  ;;  %11617 = vmatpush3.bf16.msra.mxu1 %v1298_v57 }
 0x46c   :  { %11632 = vmatprep.subr.bf16.mxu0 %v12949_v0  ;;  %11618 = vmatprep.subr.bf16.mxu1 %v12949_v0 }
 0x46d   :  { %v1142_v43 = vpack.c.bf16 %v1122_v23, %v1121_v16 }
 0x46e   :  { %11593 = vmatmul.mubr.msk.bf16.gmra.mrb[40].mxu1 %vm874_vm3, %v1141_v41  ;;  %v1057_v33 = vpop.xlane.xlu1 %1056 }
 0x46f   :  { %11603 = vmatmul.mubr.msk.bf16.vlgmr.msra.gmra.mrb[52].mxu0 %vm874_vm3, %v1142_v43  ;;  %11620 = vmatprep.mubr.msk.bf16.mxu1 %vm12950_vm0, %v12949_v0 }
 0x470   :  { %11633 = vmatpush3.bf16.msra.mxu0 %v13635_v27  ;;  %11606 = vmatprep.mubr.msk.bf16.mxu0 %vm12950_vm0, %v12949_v0  ;;  %v1060_v40 = vpop.xlane.xlu0 %1059 }
 0x471   :  { %11634 = vmatprep.subr.bf16.mxu0 %v12949_v0  ;;  %12605 = vrcp.f32 %v1060_v40 }
 0x472   :  { %v1045_v24 = vpop.xlane.xlu1 %1044  ;;  %12607 = vrcp.f32 %v1057_v33 }
 0x473   :  { %12609 = vrcp.f32 %v1045_v24 }
 0x474   :  { %11635 = vmatpush3.bf16.msra.mxu0 %v1373_v3 }
 0x475   :  { %11636 = vmatprep.subr.bf16.mxu0 %v12949_v0 }
 0x476   :  { %v1063_v61 = vpop.xlane.xlu0 %1062 }
 0x47a   :  { %v1051_v37 = vpop.xlane.xlu1 %1050  ;;  %v1048_v57 = vpop.xlane.xlu0 %1047 }
 0x47b   :  { %12611 = vrcp.f32 %v1048_v57  ;;  %v12606_v27 = vpop.eup %12605 }
 0x47c   :  { %v12608_v14 = vpop.eup %12607  ;;  %v1128_v28 = vmul.f32 %v12606_v27, %v13575_v1 }
 0x47d   :  { %v12610_v3 = vpop.eup %12609  ;;  %v1127_v32 = vmul.f32 %v12608_v14, %v13570_v11 }
 0x47e   :  { %v1069_v2 = vpop.xlane.xlu1 %1068  ;;  %v1066_v58 = vpop.xlane.xlu0 %1065  ;;  %v1123_v19 = vmul.f32 %v12610_v3, %v13580_v26 }
 0x47f   :  { %12613 = vrcp.f32 %v1066_v58  ;;  %v1145_v12 = vpack.c.bf16 %v1128_v28, %v1127_v32 }
 0x480   :  { %12615 = vrcp.f32 %v1063_v61 }
 0x481   :  { %12617 = vrcp.f32 %v1051_v37 }
 0x482   :  { %v1075_v47 = vpop.xlane.xlu1 %1074  ;;  %v1054_v30 = vpop.xlane.xlu0 %1053 }
 0x483   :  { %12619 = vrcp.f32 %v1054_v30 }
 0x485   :  { %v12612_v29 = vpop.eup %12611 }
 0x486   :  { %v1300_v18 = vpop.permute.xlu1 %1299  ;;  %v1072_v10 = vpop.xlane.xlu0 %1071  ;;  %v1124_v42 = vmul.f32 %v12612_v29, %v13591_v46 }
 0x487   :  { %12621 = vrcp.f32 %v1072_v10  ;;  %11619 = vmatpush3.bf16.msra.mxu1 %v1300_v18 }
 0x488   :  { %11650 = vmatprep.subr.bf16.mxu1 %v12949_v0  ;;  %12623 = vrcp.f32 %v1069_v2  ;;  %v1143_v20 = vpack.c.bf16 %v1124_v42, %v1123_v19 }
 0x489   :  { %v12614_v34 = vpop.eup %12613 }
 0x48a   :  { %11621 = vmatmul.mubr.msk.bf16.vlgmr.msra.gmra.mrb[44].mxu1 %vm874_vm3, %v1145_v12  ;;  %v12616_v1 = vpop.eup %12615  ;;  %11607 = vmatmul.mubr.msk.bf16.gmra.mrb[56].mxu0 %vm874_vm3, %v1143_v20  ;;  %v1130_v26 = vmul.f32 %v12614_v34, %v13600_v56 }
 0x48b   :  { %11624 = vmatprep.mubr.msk.bf16.mxu1 %vm12950_vm0, %v12949_v0  ;;  %v12618_v11 = vpop.eup %12617  ;;  %11610 = vmatprep.mubr.msk.bf16.mxu0 %vm12950_vm0, %v12949_v0  ;;  %v1129_v49 = vmul.f32 %v12616_v1, %v13586_v31  ;;  %v12261_v1 = vld [vmem:[%s17075_s6] sm:$0xff]  }
 0x48c   :  { %v1125_v50 = vmul.f32 %v12618_v11, %v13593_v59  ;;  %11651 = vmatpush3.bf16.msra.mxu1 %v12261_v1  ;;  %v12262_v11 = vld [vmem:[%s17075_s6 + $0x8] sm:$0xff]  }
 0x48d   :  { %v12620_v46 = vpop.eup %12619  ;;  %v1146_v51 = vpack.c.bf16 %v1130_v26, %v1129_v49  ;;  %11652 = vmatprep.subr.bf16.mxu1 %v12949_v0 }
 0x48e   :  { %v1126_v9 = vmul.f32 %v12620_v46, %v13609_v22  ;;  %v1078_v22 = vpop.xlane.xlu0 %1077  ;;  %v12263_v46 = vld [vmem:[%s17075_s6 + $0x10] sm:$0xff]  }
 0x48f   :  { %12625 = vrcp.f32 %v1078_v22 }
 0x490   :  { %v1144_v39 = vpack.c.bf16 %v1126_v9, %v1125_v50  ;;  %12627 = vrcp.f32 %v1075_v47  ;;  %11653 = vmatpush3.bf16.msra.mxu1 %v12262_v11 }
 0x491   :  { %v12622_v15 = vpop.eup %12621  ;;  %11654 = vmatprep.subr.bf16.mxu1 %v12949_v0 }
 0x492   :  { %11625 = vmatmul.mubr.msk.bf16.gmra.mrb[48].mxu1 %vm874_vm3, %v1146_v51  ;;  %v12624_v21 = vpop.eup %12623  ;;  %11611 = vmatmul.mubr.msk.bf16.gmra.mrb[60].mxu0 %vm874_vm3, %v1144_v39  ;;  %v1132_v56 = vmul.f32 %v12622_v15, %v13617_v35  ;;  %v1081_v60 = vpop.xlane.xlu0 %1080 }
 0x493   :  { %11628 = vmatprep.mubr.msk.bf16.mxu1 %vm12950_vm0, %v12949_v0  ;;  %11638 = vmatprep.mubr.msk.bf16.mxu0 %vm12950_vm0, %v12949_v0  ;;  %v1131_v31 = vmul.f32 %v12624_v21, %v13602_v6 }
 0x494   :  { %11655 = vmatpush3.bf16.msra.mxu1 %v12263_v46 }
 0x495   :  { %v1147_v59 = vpack.c.bf16 %v1132_v56, %v1131_v31  ;;  %11656 = vmatprep.subr.bf16.mxu1 %v12949_v0 }
 0x496   :  { %v1084_v16 = vpop.xlane.xlu0 %1083 }
 0x497   :  { %12629 = vrcp.f32 %v1084_v16 }
 0x498   :  { %12631 = vrcp.f32 %v1081_v60  ;;  %v12265_v60 = vld [vmem:[%s17075_s6 + $0x20] sm:$0xff]  }
 0x499   :  { %v12626_v23 = vpop.eup %12625 }
 0x49a   :  { %11629 = vmatmul.mubr.msk.bf16.gmra.mrb[52].mxu1 %vm874_vm3, %v1147_v59  ;;  %v12628_v41 = vpop.eup %12627  ;;  %v1134_v43 = vmul.f32 %v12626_v23, %v13621_v36  ;;  %v12264_v59 = vld [vmem:[%s17075_s6 + $0x18] sm:$0xff]  }
 0x49b   :  { %11666 = vmatprep.mubr.msk.bf16.mxu1 %vm12950_vm0, %v12949_v0  ;;  %v1133_v6 = vmul.f32 %v12628_v41, %v13611_v17  ;;  %11657 = vmatpush3.bf16.msra.mxu1 %v12264_v59 }
 0x49c   :  { %11658 = vmatprep.subr.bf16.mxu1 %v12949_v0 }
 0x49d   :  { %v1148_v40 = vpack.c.bf16 %v1134_v43, %v1133_v6 }
 0x49f   :  { %11659 = vmatpush3.bf16.msra.mxu1 %v12265_v60 }
 0x4a0   :  { %11660 = vmatprep.subr.bf16.mxu1 %v12949_v0 }
 0x4a1   :  { %v12630_v24 = vpop.eup %12629 }
 0x4a2   :  { %v12632_v61 = vpop.eup %12631  ;;  %v1136_v37 = vmul.f32 %v12630_v24, %v13629_v25  ;;  %v12266_v24 = vld [vmem:[%s17075_s6 + $0x28] sm:$0xff]  }
 0x4a3   :  { %v1135_v57 = vmul.f32 %v12632_v61, %v13625_v13  ;;  %11661 = vmatpush3.bf16.msra.mxu1 %v12266_v24 }
 0x4a4   :  { %11662 = vmatprep.subr.bf16.mxu1 %v12949_v0 }
 0x4a5   :  { %v1149_v2 = vpack.c.bf16 %v1136_v37, %v1135_v57  ;;  %v12267_v57 = vld [vmem:[%s17075_s6 + $0x30] sm:$0xff]  }
 0x4a7   :  { %11663 = vmatpush3.bf16.msra.mxu1 %v12267_v57 }
 0x4a8   :  { %11664 = vmatprep.subr.bf16.mxu1 %v12949_v0 }
 0x4bb   :  { %v1087_v48 = vpop.xlane.xlu0 %1086 }
 0x4bf   :  { %v1090_v35 = vpop.xlane.xlu0 %1089 }
 0x4c0   :  { %12633 = vrcp.f32 %v1090_v35 }
 0x4c1   :  { %12635 = vrcp.f32 %v1087_v48 }
 0x4c3   :  { %v1375_v33 = vpop.permute.xlu0 %1374 }
 0x4c4   :  { %11637 = vmatpush3.bf16.msra.mxu0 %v1375_v33 }
 0x4c7   :  { %11639 = vmatmul.mubr.msk.bf16.vlgmr.msra.gmra.mrb[64].mxu0 %vm874_vm3, %v1148_v40 }
 0x4c8   :  { %11642 = vmatprep.mubr.msk.bf16.mxu0 %vm12950_vm0, %v12949_v0 }
 0x4ca   :  { %v12634_v36 = vpop.eup %12633 }
 0x4cb   :  { %v12636_v17 = vpop.eup %12635  ;;  %v1138_v58 = vmul.f32 %v12634_v36, %v13643_v55 }
 0x4cc   :  { %v1137_v27 = vmul.f32 %v12636_v17, %v13639_v52 }
 0x4ce   :  { %v1150_v47 = vpack.c.bf16 %v1138_v58, %v1137_v27  ;;  %v12268_v58 = vld [vmem:[%s17075_s6 + $0x38] sm:$0xff]  }
 0x4cf   :  { %11643 = vmatmul.mubr.msk.bf16.gmra.mrb[68].mxu0 %vm874_vm3, %v1149_v2  ;;  %11665 = vmatpush3.bf16.msra.mxu1 %v12268_v58 }
 0x4d0   :  { %11646 = vmatprep.mubr.msk.bf16.mxu0 %vm12950_vm0, %v12949_v0 }
 0x4d7   :  { %11647 = vmatmul.mubr.msk.bf16.gmra.mrb[72].mxu0 %vm874_vm3, %v1150_v47 }
 0x4d8   :  { %2015 = vmatprep.mubr.bf16.mxu0 %v12951_v38 }
 0x535   :  { %v13721_v25 = vpop.f32.mrb[48].mxu0 }
 0x536   :  { %v11586_v13 = vpop.f32.mrb[49].mxu0 }
 0x537   :  { %v13723_v30 = vpop.f32.mrb[50].mxu0 }
 0x538   :  { %v11587_v14 = vpop.f32.mrb[51].mxu0 }
 0x539   :  { %v13725_v3 = vpop.f32.mrb[36].mxu1 }
 0x53a   :  { %v11590_v28 = vpop.f32.mrb[37].mxu1 }
 0x53b   :  { %v13727_v29 = vpop.f32.mrb[38].mxu1 }
 0x53c   :  { %v11591_v32 = vpop.f32.mrb[39].mxu1 }
 0x541   :  { %v13729_v55 = vpop.f32.mrb[40].mxu1 }
 0x542   :  { %v1272_v52 = vpop.f32.mrb[52].mxu0  ;;  %v11594_v18 = vpop.f32.mrb[41].mxu1 }
 0x543   :  { %v11604_v10 = vpop.f32.mrb[53].mxu0  ;;  %v13731_v19 = vpop.f32.mrb[42].mxu1 }
 0x544   :  { %v1275_v42 = vpop.f32.mrb[54].mxu0  ;;  %v11595_v12 = vpop.f32.mrb[43].mxu1 }
 0x545   :  { %v12090_v20 = vpack.i.bf16 %v1275_v42, %v1272_v52  ;;  %v11605_v34 = vpop.f32.mrb[55].mxu0 }
 0x547   :  { %12091 = vrot.lane.b32.xlu1 %v12090_v20, %s12954_s28 }
 0x55d   :  { %v1347_v26 = vpop.f32.mrb[44].mxu1  ;;  %v1280_v49 = vpop.f32.mrb[56].mxu0 }
 0x55e   :  { %v11622_v50 = vpop.f32.mrb[45].mxu1  ;;  %v11608_v9 = vpop.f32.mrb[57].mxu0 }
 0x55f   :  { %v1350_v51 = vpop.f32.mrb[46].mxu1  ;;  %v1283_v15 = vpop.f32.mrb[58].mxu0 }
 0x560   :  { %v12095_v39 = vpack.i.bf16 %v1350_v51, %v1347_v26  ;;  %v11623_v21 = vpop.f32.mrb[47].mxu1  ;;  %v12105_v56 = vpack.i.bf16 %v1283_v15, %v1280_v49  ;;  %v11609_v31 = vpop.f32.mrb[59].mxu0 }
 0x562   :  { %12096 = vrot.lane.b32.xlu1 %v12095_v39, %s12953_s23 }
 0x565   :  { %v1355_v22 = vpop.f32.mrb[48].mxu1  ;;  %v1288_v16 = vpop.f32.mrb[60].mxu0 }
 0x566   :  { %v11626_v48 = vpop.f32.mrb[49].mxu1  ;;  %v11612_v23 = vpop.f32.mrb[61].mxu0 }
 0x567   :  { %v1358_v35 = vpop.f32.mrb[50].mxu1  ;;  %v1291_v41 = vpop.f32.mrb[62].mxu0 }
 0x568   :  { %v12110_v43 = vpack.i.bf16 %v1358_v35, %v1355_v22  ;;  %v11627_v6 = vpop.f32.mrb[51].mxu1  ;;  %v12120_v33 = vpack.i.bf16 %v1291_v41, %v1288_v16  ;;  %v11613_v40 = vpop.f32.mrb[63].mxu0 }
 0x56d   :  { %v1363_v61 = vpop.f32.mrb[52].mxu1 }
 0x56e   :  { %v11630_v37 = vpop.f32.mrb[53].mxu1 }
 0x56f   :  { %v1366_v2 = vpop.f32.mrb[54].mxu1 }
 0x570   :  { %v12125_v36 = vpack.i.bf16 %v1366_v2, %v1363_v61  ;;  %v11631_v17 = vpop.f32.mrb[55].mxu1 }
 0x59a   :  { %v1422_v27 = vpop.f32.mrb[64].mxu0 }
 0x59b   :  { %v11640_v47 = vpop.f32.mrb[65].mxu0 }
 0x59c   :  { %v1425_v13 = vpop.f32.mrb[66].mxu0 }
 0x59d   :  { %v12100_v14 = vpack.i.bf16 %v1425_v13, %v1422_v27  ;;  %v11641_v28 = vpop.f32.mrb[67].mxu0 }
 0x59f   :  { %12101 = vrot.lane.b32.xlu1 %v12100_v14, %s12952_s27 }
 0x5a2   :  { %v1430_v32 = vpop.f32.mrb[68].mxu0 }
 0x5a3   :  { %12106 = vrot.lane.b32.xlu1 %v12105_v56, %s12954_s28  ;;  %v11644_v52 = vpop.f32.mrb[69].mxu0 }
 0x5a4   :  { %v1433_v18 = vpop.f32.mrb[70].mxu0 }
 0x5a5   :  { %v12115_v10 = vpack.i.bf16 %v1433_v18, %v1430_v32  ;;  %v11645_v42 = vpop.f32.mrb[71].mxu0 }
 0x5a7   :  { %12111 = vrot.lane.b32.xlu1 %v12110_v43, %s12953_s23  ;;  %12116 = vrot.lane.b32.xlu0 %v12115_v10, %s12952_s27 }
 0x5aa   :  { %v1438_v12 = vpop.f32.mrb[72].mxu0 }
 0x5ab   :  { %12121 = vrot.lane.b32.xlu1 %v12120_v33, %s12954_s28  ;;  %12126 = vrot.lane.b32.xlu0 %v12125_v36, %s12953_s23  ;;  %v11648_v20 = vpop.f32.mrb[73].mxu0 }
 0x5ac   :  { %v1441_v34 = vpop.f32.mrb[74].mxu0 }
 0x5ad   :  { %v12130_v1 = vpack.i.bf16 %v1441_v34, %v1438_v12  ;;  %v11649_v11 = vpop.f32.mrb[75].mxu0 }
 0x5af   :  { %12131 = vrot.lane.b32.xlu1 %v12130_v1, %s12952_s27 }
 0x5b9   :  { %v12092_v26 = vpop.permute.xlu1 %12091 }
 0x5ba   :  { %v12094_v49 = vunpack.i.h.bf16 %v12092_v26  ;;  %v12093_v50 = vunpack.i.l.bf16 %v12092_v26 }
 0x5bc   :  { %v1518_v39 = vsel %vm507_vm2, %v13723_v30, %v12094_v49  ;;  %v1517_v21 = vsel %vm507_vm2, %v13721_v25, %v12093_v50 }
 0x5d4   :  { %v12097_v46 = vpop.permute.xlu1 %12096 }
 0x5d5   :  { %v12099_v9 = vunpack.i.h.bf16 %v12097_v46  ;;  %v12098_v51 = vunpack.i.l.bf16 %v12097_v46 }
 0x5d7   :  { %v1523_v59 = vsel %vm101_vm1, %v1517_v21, %v12098_v51  ;;  %v1524_v22 = vsel %vm101_vm1, %v1518_v39, %v12099_v9 }
 0x611   :  { %v12102_v15 = vpop.permute.xlu1 %12101 }
 0x612   :  { %v12104_v56 = vunpack.i.h.bf16 %v12102_v15  ;;  %v12103_v31 = vunpack.i.l.bf16 %v12102_v15 }
 0x614   :  { %v1531_v60 = vsel %vm1529_vm4, %v1524_v22, %v12104_v56  ;;  %v1530_v16 = vsel %vm1529_vm4, %v1523_v59, %v12103_v31 }
 0x615   :  { %v1536_v48 = vpack.c.bf16 %v1531_v60, %v1530_v16  ;;  %v12107_v23 = vpop.permute.xlu1 %12106 }
 0x616   :  { %v12109_v35 = vunpack.i.h.bf16 %v12107_v23  ;;  %v12108_v41 = vunpack.i.l.bf16 %v12107_v23 }
 0x617   :  { %11667 = vmatmul.mubr.bf16.vlgmr.msra.gmra.mrb[56].mxu1 %v1536_v48 }
 0x618   :  { %11670 = vmatprep.mubr.msk.bf16.mxu1 %vm12950_vm0, %v12949_v0  ;;  %v1520_v24 = vsel %vm507_vm2, %v13727_v29, %v12109_v35  ;;  %v1519_v61 = vsel %vm507_vm2, %v13725_v3, %v12108_v41 }
 0x619   :  { %v12112_v30 = vpop.permute.xlu1 %12111  ;;  %v12117_v25 = vpop.permute.xlu0 %12116 }
 0x61a   :  { %v12114_v43 = vunpack.i.h.bf16 %v12112_v30  ;;  %v12113_v6 = vunpack.i.l.bf16 %v12112_v30  ;;  %v12119_v33 = vunpack.i.h.bf16 %v12117_v25  ;;  %v12118_v40 = vunpack.i.l.bf16 %v12117_v25  ;;  %v1770_v30 = vld [vmem:[%s17077_s10 + $0x8] sm:$0xff] }
 0x61c   :  { %v1525_v37 = vsel %vm101_vm1, %v1519_v61, %v12113_v6  ;;  %v1526_v57 = vsel %vm101_vm1, %v1520_v24, %v12114_v43  ;;  %v1775_v6 = vld [vmem:[%s17077_s10 + $0x60] sm:$0xff]  ;;  %v1774_v61 = vld [vmem:[%s17077_s10 + $0x48] sm:$0xff] }
 0x61d   :  { %v12122_v2 = vpop.permute.xlu1 %12121  ;;  %v12127_v36 = vpop.permute.xlu0 %12126  ;;  %v1532_v17 = vsel %vm1529_vm4, %v1525_v37, %v12118_v40  ;;  %v1533_v58 = vsel %vm1529_vm4, %v1526_v57, %v12119_v33  ;;  %v1776_v37 = vld [vmem:[%s17077_s10 + $0x68] sm:$0xff] }
 0x61e   :  { %v12124_v27 = vunpack.i.h.bf16 %v12122_v2  ;;  %v12123_v47 = vunpack.i.l.bf16 %v12122_v2  ;;  %v12129_v13 = vunpack.i.h.bf16 %v12127_v36  ;;  %v12128_v14 = vunpack.i.l.bf16 %v12127_v36 }
 0x61f   :  { %v1537_v28 = vpack.c.bf16 %v1533_v58, %v1532_v17  ;;  %v9831_v57 = vcombine.high %v1774_v61, %v1776_v37  ;;  %v9830_v36 = vcombine.low %v1774_v61, %v1776_v37 }
 0x620   :  { %v1522_v29 = vsel %vm507_vm2, %v13731_v19, %v12124_v27  ;;  %v1521_v3 = vsel %vm507_vm2, %v13729_v55, %v12123_v47  ;;  %v9813_v55 = vld [vmem:[%s17076_s7] ss:$0 sm:$0xff] }
 0x621   :  { %11671 = vmatmul.mubr.bf16.gmra.mrb[60].mxu1 %v1537_v28  ;;  %v12132_v32 = vpop.permute.xlu1 %12131  ;;  %v1527_v10 = vsel %vm101_vm1, %v1521_v3, %v12128_v14  ;;  %v1528_v42 = vsel %vm101_vm1, %v1522_v29, %v12129_v13 }
 0x622   :  { %v12134_v52 = vunpack.i.h.bf16 %v12132_v32  ;;  %v12133_v18 = vunpack.i.l.bf16 %v12132_v32  ;;  %11674 = vmatprep.mubr.msk.bf16.mxu1 %vm12950_vm0, %v12949_v0 }
 0x624   :  { %v1534_v12 = vsel %vm1529_vm4, %v1527_v10, %v12133_v18  ;;  %v1535_v20 = vsel %vm1529_vm4, %v1528_v42, %v12134_v52 }
 0x625   :  { %v1538_v34 = vpack.c.bf16 %v1535_v20, %v1534_v12 }
 0x629   :  { %11675 = vmatmul.mubr.bf16.gmra.mrb[64].mxu1 %v1538_v34 }
 0x62a   :  { %2078 = vmatprep.mubr.bf16.mxu1 %v12951_v38 }
 0x6ea   :  { %v1644_v19 = vpop.f32.mrb[56].mxu1 }
 0x6eb   :  { %v11668_v1 = vpop.f32.mrb[57].mxu1  ;;  %v1645_v11 = vadd.f32 %v9813_v55, %v1644_v19 }
 0x6ec   :  { %v1647_v26 = vpop.f32.mrb[58].mxu1  ;;  %v1777_v1 = vld [vmem:[%s17077_s10 + $0x80] sm:$0xff] }
 0x6ed   :  { %v11669_v46 = vpop.f32.mrb[59].mxu1  ;;  %v1667_v49 = vadd.f32 %v1645_v11, %v13174_v44  ;;  %v1648_v50 = vadd.f32 %v9813_v55, %v1647_v26  ;;  %v1779_v11 = vld [vmem:[%s17077_s10 + $0xa0] sm:$0xff]  ;;  %v1778_v26 = vld [vmem:[%s17077_s10 + $0x88] sm:$0xff] }
 0x6ef   :  { %1675 = vadd.xlane.f32.xlu0 %v1667_v49  ;;  %v1668_v9 = vadd.f32 %v1648_v50, %v13176_v45  ;;  %v9833_v50 = vcombine.high %v1777_v1, %v1779_v11 }
 0x6f1   :  { %1677 = vadd.xlane.f32.xlu1 %v1668_v9 }
 0x6f4   :  { %v1652_v51 = vpop.f32.mrb[60].mxu1 }
 0x6f5   :  { %v11672_v15 = vpop.f32.mrb[61].mxu1  ;;  %v1653_v39 = vadd.f32 %v9813_v55, %v1652_v51  ;;  %v9832_v51 = vcombine.low %v1777_v1, %v1779_v11  ;;  %v2211_v1 = vld [vmem:[%s17077_s10 + $0x30] sm:$0xff]  ;;  %v2210_v11 = vld [vmem:[%s17077_s10 + $0x18] sm:$0xff] }
 0x6f6   :  { %v1655_v21 = vpop.f32.mrb[62].mxu1 }
 0x6f7   :  { %v11673_v56 = vpop.f32.mrb[63].mxu1  ;;  %v1669_v31 = vadd.f32 %v1653_v39, %v13189_v53  ;;  %v1656_v59 = vadd.f32 %v9813_v55, %v1655_v21  ;;  %v1769_v53 = vld [vmem:[%s17077_s10] sm:$0xff] }
 0x6f9   :  { %1679 = vadd.xlane.f32.xlu0 %v1669_v31  ;;  %v1670_v22 = vadd.f32 %v1656_v59, %v13191_v54  ;;  %v1771_v54 = vld [vmem:[%s17077_s10 + $0x20] sm:$0xff] }
 0x6fa   :  { %v9824_v25 = vcombine.low %v1769_v53, %v1771_v54  ;;  %v9825_v43 = vcombine.high %v1769_v53, %v1771_v54  ;;  %v1783_v59 = vld [vmem:[%s17077_s10 + $0xe0] sm:$0xff]  ;;  %v1786_v53 = vld [vmem:[%s17077_s10 + $0x108] sm:$0xff] }
 0x6fc   :  { %v1660_v60 = vpop.f32.mrb[64].mxu1  ;;  %1983 = vmatprep.subr.bf16.mxu0 %v9825_v43 }
 0x6fd   :  { %1681 = vadd.xlane.f32.xlu0 %v1670_v22  ;;  %v11676_v16 = vpop.f32.mrb[65].mxu1  ;;  %v1661_v44 = vadd.f32 %v9813_v55, %v1660_v60  ;;  %1984 = vmatpush1.bf16.msra.mxu0 %v9824_v25 }
 0x6fe   :  { %v1663_v48 = vpop.f32.mrb[66].mxu1 }
 0x6ff   :  { %v11677_v23 = vpop.f32.mrb[67].mxu1  ;;  %v1671_v45 = vadd.f32 %v1661_v44, %v13204_v62  ;;  %v1664_v35 = vadd.f32 %v9813_v55, %v1663_v48  ;;  %v1772_v62 = vld [vmem:[%s17077_s10 + $0x28] sm:$0xff] }
 0x700   :  { %v9826_v33 = vcombine.low %v1770_v30, %v1772_v62  ;;  %v9827_v40 = vcombine.high %v1770_v30, %v1772_v62  ;;  %v1784_v44 = vld [vmem:[%s17077_s10 + $0xe8] sm:$0xff] }
 0x701   :  { %1683 = vadd.xlane.f32.xlu1 %v1671_v45  ;;  %v1672_v41 = vadd.f32 %v1664_v35, %v13206_v63  ;;  %v1773_v63 = vld [vmem:[%s17077_s10 + $0x40] sm:$0xff]  ;;  %v1788_v30 = vld [vmem:[%s17077_s10 + $0x128] sm:$0xff] }
 0x702   :  { %v9829_v24 = vcombine.high %v1773_v63, %v1775_v6  ;;  %2046 = vmatprep.subr.bf16.mxu1 %v9827_v40  ;;  %v9828_v2 = vcombine.low %v1773_v63, %v1775_v6  ;;  %v1785_v35 = vld [vmem:[%s17077_s10 + $0x100] sm:$0xff]  ;;  %v9842_v43 = vcombine.low %v1786_v53, %v1788_v30  ;;  %v9843_v62 = vcombine.high %v1786_v53, %v1788_v30 }
 0x703   :  { %1685 = vadd.xlane.f32.xlu0 %v1672_v41  ;;  %2047 = vmatpush1.bf16.msra.mxu1 %v9826_v33  ;;  %v1789_v63 = vld [vmem:[%s17077_s10 + $0x140] sm:$0xff]  ;;  %v1790_v33 = vld [vmem:[%s17077_s10 + $0x148] sm:$0xff] }
 0x704   :  { %1985 = vmatprep.subr.bf16.mxu0 %v9829_v24  ;;  %2048 = vmatprep.subr.bf16.mxu1 %v9831_v57  ;;  %v1791_v6 = vld [vmem:[%s17077_s10 + $0x160] sm:$0xff]  ;;  %v1792_v24 = vld [vmem:[%s17077_s10 + $0x168] sm:$0xff] }
 0x705   :  { %1986 = vmatpush1.bf16.msra.mxu0 %v9828_v2  ;;  %v9845_v40 = vcombine.high %v1789_v63, %v1791_v6  ;;  %v9844_v61 = vcombine.low %v1789_v63, %v1791_v6  ;;  %v9846_v37 = vcombine.low %v1790_v33, %v1792_v24  ;;  %v9847_v57 = vcombine.high %v1790_v33, %v1792_v24  ;;  %v1793_v2 = vld [vmem:[%s17077_s10 + $0x180] sm:$0xff] }
 0x706   :  { %1987 = vmatprep.subr.bf16.mxu0 %v9833_v50  ;;  %v2212_v50 = vld [vmem:[%s17077_s10 + $0x38] sm:$0xff]  ;;  %v13954_v63 = vld [vmem:[%s17079_s9] ss:$0 sm:$0xff] }
 0x707   :  { %2049 = vmatpush1.bf16.msra.mxu1 %v9830_v36  ;;  %v1795_v36 = vld [vmem:[%s17077_s10 + $0x1a0] sm:$0xff] }
 0x709   :  { %1988 = vmatpush1.bf16.msra.mxu0 %v9832_v51  ;;  %v9859_v51 = vcombine.high %v2210_v11, %v2212_v50 }
 0x77c   :  { %v1676_v17 = vpop.xlane.xlu0 %1675 }
 0x77d   :  { %v1688_v58 = vmul.f32 0.0078125, %v1676_v17  ;;  %v1794_v17 = vld [vmem:[%s17077_s10 + $0x188] sm:$0xff] }
 0x77e   :  { %v1678_v27 = vpop.xlane.xlu1 %1677 }
 0x77f   :  { %v1689_v47 = vmul.f32 0.0078125, %v1678_v27  ;;  %v13835_v13 = vsub.f32 %v1667_v49, %v1688_v58  ;;  %v9849_v58 = vcombine.high %v1793_v2, %v1795_v36  ;;  %v1796_v27 = vld [vmem:[%s17077_s10 + $0x1a8] sm:$0xff] }
 0x781   :  { %v1700_v14 = vmul.f32 %v13835_v13, %v13835_v13  ;;  %v13839_v28 = vsub.f32 %v1668_v9, %v1689_v47  ;;  %v1780_v9 = vld [vmem:[%s17077_s10 + $0xa8] sm:$0xff]  ;;  %v9848_v47 = vcombine.low %v1793_v2, %v1795_v36 }
 0x782   :  { %v9834_v15 = vcombine.low %v1778_v26, %v1780_v9  ;;  %v9835_v39 = vcombine.high %v1778_v26, %v1780_v9  ;;  %v9858_v9 = vcombine.low %v2210_v11, %v2212_v50  ;;  %v2224_v11 = vld [vmem:[%s17077_s10 + $0xf8] sm:$0xff] }
 0x783   :  { %1706 = vadd.xlane.f32.xlu1 %v1700_v14  ;;  %v1701_v29 = vmul.f32 %v13839_v28, %v13839_v28  ;;  %v9850_v14 = vcombine.low %v1794_v17, %v1796_v27 }
 0x784   :  { %2050 = vmatprep.subr.bf16.mxu1 %v9835_v39 }
 0x785   :  { %1708 = vadd.xlane.f32.xlu0 %v1701_v29  ;;  %2051 = vmatpush1.bf16.msra.mxu1 %v9834_v15  ;;  %v9851_v29 = vcombine.high %v1794_v17, %v1796_v27 }
 0x786   :  { %v1680_v3 = vpop.xlane.xlu0 %1679 }
 0x787   :  { %v1690_v32 = vmul.f32 0.0078125, %v1680_v3  ;;  %v1797_v3 = vld [vmem:[%s17077_s10 + $0x1c0] sm:$0xff] }
 0x789   :  { %v13843_v52 = vsub.f32 %v1669_v31, %v1690_v32  ;;  %v1781_v31 = vld [vmem:[%s17077_s10 + $0xc0] sm:$0xff] }
 0x78a   :  { %v1682_v18 = vpop.xlane.xlu0 %1681  ;;  %v9837_v16 = vcombine.high %v1781_v31, %v1783_v59  ;;  %v9836_v48 = vcombine.low %v1781_v31, %v1783_v59  ;;  %v1799_v32 = vld [vmem:[%s17077_s10 + $0x1e0] sm:$0xff] }
 0x78b   :  { %v1691_v10 = vmul.f32 0.0078125, %v1682_v18  ;;  %v1702_v42 = vmul.f32 %v13843_v52, %v13843_v52  ;;  %v1798_v18 = vld [vmem:[%s17077_s10 + $0x1c8] sm:$0xff] }
 0x78c   :  { %1989 = vmatprep.subr.bf16.mxu0 %v9837_v16 }
 0x78d   :  { %1710 = vadd.xlane.f32.xlu1 %v1702_v42  ;;  %v13847_v12 = vsub.f32 %v1670_v22, %v1691_v10  ;;  %v1782_v22 = vld [vmem:[%s17077_s10 + $0xc8] sm:$0xff]  ;;  %1990 = vmatpush1.bf16.msra.mxu0 %v9836_v48  ;;  %v9853_v10 = vcombine.high %v1797_v3, %v1799_v32 }
 0x78e   :  { %v1684_v20 = vpop.xlane.xlu1 %1683  ;;  %v9838_v23 = vcombine.low %v1782_v22, %v1784_v44  ;;  %v1800_v42 = vld [vmem:[%s17077_s10 + $0x1e8] sm:$0xff] }
 0x78f   :  { %v1692_v34 = vmul.f32 0.0078125, %v1684_v20  ;;  %v1703_v55 = vmul.f32 %v13847_v12, %v13847_v12  ;;  %v9852_v20 = vcombine.low %v1797_v3, %v1799_v32  ;;  %v2218_v3 = vld [vmem:[%s17077_s10 + $0x98] sm:$0xff] }
 0x790   :  { %v1686_v19 = vpop.xlane.xlu0 %1685  ;;  %v2220_v32 = vld [vmem:[%s17077_s10 + $0xb8] sm:$0xff] }
 0x791   :  { %v1693_v46 = vmul.f32 0.0078125, %v1686_v19  ;;  %1712 = vadd.xlane.f32.xlu0 %v1703_v55  ;;  %v13860_v49 = vsub.f32 %v1671_v45, %v1692_v34  ;;  %v9839_v45 = vcombine.high %v1782_v22, %v1784_v44  ;;  %v9854_v34 = vcombine.low %v1798_v18, %v1800_v42  ;;  %v2209_v19 = vld [vmem:[%s17077_s10 + $0x10] sm:$0xff] }
 0x792   :  { %v9855_v55 = vcombine.high %v1798_v18, %v1800_v42  ;;  %v9856_v26 = vcombine.low %v2209_v19, %v2211_v1 }
 0x793   :  { %v1704_v21 = vmul.f32 %v13860_v49, %v13860_v49  ;;  %v13867_v56 = vsub.f32 %v1672_v41, %v1693_v46  ;;  %2052 = vmatprep.subr.bf16.mxu1 %v9839_v45  ;;  %v1787_v41 = vld [vmem:[%s17077_s10 + $0x120] sm:$0xff]  ;;  %v9857_v46 = vcombine.high %v2209_v19, %v2211_v1  ;;  %v2222_v1 = vld [vmem:[%s17077_s10 + $0xd8] sm:$0xff] }
 0x794   :  { %2053 = vmatpush1.bf16.msra.mxu1 %v9838_v23  ;;  %v9841_v54 = vcombine.high %v1785_v35, %v1787_v41  ;;  %v9840_v25 = vcombine.low %v1785_v35, %v1787_v41  ;;  %v13946_v45 = vld [vmem:[%s17078_s8] ss:$0 sm:$0xff] }
 0x795   :  { %1714 = vadd.xlane.f32.xlu1 %v1704_v21  ;;  %v1705_v60 = vmul.f32 %v13867_v56, %v13867_v56  ;;  %2054 = vmatprep.subr.bf16.mxu1 %v9843_v62 }
 0x796   :  { %1991 = vmatprep.subr.bf16.mxu0 %v9841_v54 }
 0x797   :  { %1716 = vadd.xlane.f32.xlu0 %v1705_v60  ;;  %1992 = vmatpush1.bf16.msra.mxu0 %v9840_v25 }
 0x798   :  { %2055 = vmatpush1.bf16.msra.mxu1 %v9842_v43  ;;  %1993 = vmatprep.subr.bf16.mxu0 %v9845_v40 }
 0x799   :  { %2056 = vmatprep.subr.bf16.mxu1 %v9847_v57 }
 0x79b   :  { %1994 = vmatpush1.bf16.msra.mxu0 %v9844_v61  ;;  %v2214_v61 = vld [vmem:[%s17077_s10 + $0x58] sm:$0xff] }
 0x79c   :  { %2057 = vmatpush1.bf16.msra.mxu1 %v9846_v37  ;;  %1995 = vmatprep.subr.bf16.mxu0 %v9849_v58  ;;  %v2216_v37 = vld [vmem:[%s17077_s10 + $0x78] sm:$0xff] }
 0x79d   :  { %2058 = vmatprep.subr.bf16.mxu1 %v9851_v29  ;;  %v9863_v27 = vcombine.high %v2214_v61, %v2216_v37  ;;  %v2219_v29 = vld [vmem:[%s17077_s10 + $0xb0] sm:$0xff]  ;;  %v9862_v42 = vcombine.low %v2214_v61, %v2216_v37  ;;  %v2234_v37 = vld [vmem:[%s17077_s10 + $0x198] sm:$0xff] }
 0x79e   :  { %v2233_v61 = vld [vmem:[%s17077_s10 + $0x190] sm:$0xff] }
 0x79f   :  { %1996 = vmatpush1.bf16.msra.mxu0 %v9848_v47  ;;  %v2217_v47 = vld [vmem:[%s17077_s10 + $0x90] sm:$0xff] }
 0x7a0   :  { %2059 = vmatpush1.bf16.msra.mxu1 %v9850_v14  ;;  %1997 = vmatprep.subr.bf16.mxu0 %v9853_v10  ;;  %v9864_v50 = vcombine.low %v2217_v47, %v2219_v29 }
 0x7a1   :  { %2060 = vmatprep.subr.bf16.mxu1 %v9855_v55  ;;  %v2221_v55 = vld [vmem:[%s17077_s10 + $0xd0] sm:$0xff] }
 0x7a3   :  { %1998 = vmatpush1.bf16.msra.mxu0 %v9852_v20  ;;  %v9865_v20 = vcombine.high %v2217_v47, %v2219_v29 }
 0x7a4   :  { %2061 = vmatpush1.bf16.msra.mxu1 %v9854_v34  ;;  %2423 = vmatprep.subr.bf16.mxu0 %v9857_v46  ;;  %v9867_v34 = vcombine.high %v2218_v3, %v2220_v32 }
 0x7a5   :  { %2486 = vmatprep.subr.bf16.mxu1 %v9859_v51 }
 0x810   :  { %v1707_v15 = vpop.xlane.xlu1 %1706 }
 0x811   :  { %v1718_v39 = vmul.f32 0.0078125, %v1707_v15 }
 0x812   :  { %v1709_v21 = vpop.xlane.xlu0 %1708 }
 0x813   :  { %v1724_v31 = vadd.f32 1e-05, %v1718_v39  ;;  %v1719_v59 = vmul.f32 0.0078125, %v1709_v21  ;;  %v9871_v39 = vcombine.high %v2222_v1, %v2224_v11  ;;  %v2225_v21 = vld [vmem:[%s17077_s10 + $0x110] sm:$0xff] }
 0x815   :  { %12637 = vrsqrt.f32 %v1724_v31  ;;  %v1725_v22 = vadd.f32 1e-05, %v1719_v59  ;;  %v2226_v59 = vld [vmem:[%s17077_s10 + $0x118] sm:$0xff] }
 0x817   :  { %12639 = vrsqrt.f32 %v1725_v22  ;;  %v2228_v22 = vld [vmem:[%s17077_s10 + $0x138] sm:$0xff] }
 0x81a   :  { %v1711_v60 = vpop.xlane.xlu1 %1710 }
 0x81b   :  { %v1720_v16 = vmul.f32 0.0078125, %v1711_v60 }
 0x81d   :  { %v1726_v44 = vadd.f32 1e-05, %v1720_v16 }
 0x81e   :  { %v1713_v48 = vpop.xlane.xlu0 %1712 }
 0x81f   :  { %v12638_v23 = vpop.eup %12637  ;;  %12641 = vrsqrt.f32 %v1726_v44  ;;  %v1721_v35 = vmul.f32 0.0078125, %v1713_v48 }
 0x820   :  { %v1736_v41 = vmul.f32 %v12638_v23, %v13835_v13  ;;  %v2213_v13 = vld [vmem:[%s17077_s10 + $0x50] sm:$0xff] }
 0x821   :  { %v12640_v53 = vpop.eup %12639  ;;  %v1727_v54 = vadd.f32 1e-05, %v1721_v35  ;;  %v9870_v35 = vcombine.low %v2222_v1, %v2224_v11  ;;  %v12269_v1 = vld [vmem:[%s17080_s12 + $0x140] sm:$0xff]  }
 0x822   :  { %v1748_v30 = vmul.f32 %v13946_v45, %v1736_v41  ;;  %v1737_v25 = vmul.f32 %v12640_v53, %v13839_v28  ;;  %v1715_v43 = vpop.xlane.xlu1 %1714  ;;  %v2215_v28 = vld [vmem:[%s17077_s10 + $0x70] sm:$0xff]  ;;  %v12271_v11 = vld [vmem:[%s17080_s12 + $0x100] sm:$0xff]  }
 0x823   :  { %12643 = vrsqrt.f32 %v1727_v54  ;;  %v1722_v62 = vmul.f32 0.0078125, %v1715_v43  ;;  %v9861_v58 = vcombine.high %v2213_v13, %v2215_v28  ;;  %v9860_v10 = vcombine.low %v2213_v13, %v2215_v28  ;;  %v2230_v43 = vld [vmem:[%s17077_s10 + $0x158] sm:$0xff] }
 0x824   :  { %v1749_v6 = vmul.f32 %v13946_v45, %v1737_v25  ;;  %v1717_v33 = vpop.xlane.xlu0 %1716  ;;  %v13970_v57 = vadd.f32 %v13954_v63, %v1748_v30  ;;  %v9875_v54 = vcombine.high %v2226_v59, %v2228_v22  ;;  %v2229_v25 = vld [vmem:[%s17077_s10 + $0x150] sm:$0xff]  ;;  %v9874_v13 = vcombine.low %v2226_v59, %v2228_v22  ;;  %v12282_v59 = vld [vmem:[%s17080_s12 + $0x1d8] sm:$0xff]  }
 0x825   :  { %v1728_v40 = vadd.f32 1e-05, %v1722_v62  ;;  %v1723_v24 = vmul.f32 0.0078125, %v1717_v33  ;;  %v2232_v62 = vld [vmem:[%s17077_s10 + $0x178] sm:$0xff] }
 0x826   :  { %v13973_v2 = vadd.f32 %v13954_v63, %v1749_v6  ;;  %v9879_v28 = vcombine.high %v2230_v43, %v2232_v62  ;;  %v9878_v47 = vcombine.low %v2230_v43, %v2232_v62  ;;  %v12283_v22 = vld [vmem:[%s17080_s12 + $0x118] sm:$0xff]   ;;  %v12294_v43 = vld [vmem:[%s17080_s12 + $0x1f0] sm:$0xff]  }
 0x827   :  { %12645 = vrsqrt.f32 %v1728_v40  ;;  %v1729_v36 = vadd.f32 1e-05, %v1723_v24  ;;  %v12295_v62 = vld [vmem:[%s17080_s12 + $0x130] sm:$0xff]  }
 0x828   :  { %v13977_v17 = vpack.c.bf16 %v13973_v2, %v13970_v57 }
 0x829   :  { %v12642_v14 = vpop.eup %12641  ;;  %12647 = vrsqrt.f32 %v1729_v36  ;;  %v2236_v36 = vld [vmem:[%s17077_s10 + $0x1b8] sm:$0xff] }
 0x82a   :  { %2016 = vmatmul.mubr.bf16.vlgmr.msra.gmra.mrb[76].mxu0 %v13977_v17  ;;  %2079 = vmatmul.mubr.bf16.vlgmr.msra.gmra.mrb[68].mxu1 %v13977_v17  ;;  %v1738_v18 = vmul.f32 %v12642_v14, %v13843_v52  ;;  %v2223_v52 = vld [vmem:[%s17077_s10 + $0xf0] sm:$0xff] }
 0x82b   :  { %2424 = vmatpush1.bf16.msra.mxu0 %v9856_v26  ;;  %2487 = vmatpush1.bf16.msra.mxu1 %v9858_v9  ;;  %v9866_v9 = vcombine.low %v2218_v3, %v2220_v32  ;;  %v9869_v15 = vcombine.high %v2221_v55, %v2223_v52  ;;  %v9868_v23 = vcombine.low %v2221_v55, %v2223_v52  ;;  %v2237_v32 = vld [vmem:[%s17077_s10 + $0x1d0] sm:$0xff] }
 0x82c   :  { %2425 = vmatprep.subr.bf16.mxu0 %v9861_v58  ;;  %2488 = vmatprep.subr.bf16.mxu1 %v9863_v27  ;;  %v1750_v46 = vmul.f32 %v13946_v45, %v1738_v18  ;;  %v9883_v3 = vcombine.high %v2234_v37, %v2236_v36  ;;  %v2238_v18 = vld [vmem:[%s17077_s10 + $0x1d8] sm:$0xff] }
 0x82d   :  { %v12644_v19 = vpop.eup %12643  ;;  %2025 = vmatprep.mubr.bf16.mxu0 %v12951_v38  ;;  %2088 = vmatprep.mubr.bf16.mxu1 %v12951_v38 }
 0x82e   :  { %v1739_v26 = vmul.f32 %v12644_v19, %v13847_v12  ;;  %v2227_v12 = vld [vmem:[%s17077_s10 + $0x130] sm:$0xff]  ;;  %v14024_v60 = vadd.f32 %v13954_v63, %v1750_v46  ;;  %v12273_v46 = vld [vmem:[%s17080_s12 + $0x148] sm:$0xff]  }
 0x82f   :  { %2426 = vmatpush1.bf16.msra.mxu0 %v9860_v10  ;;  %2489 = vmatpush1.bf16.msra.mxu1 %v9862_v42  ;;  %v9873_v41 = vcombine.high %v2225_v21, %v2227_v12  ;;  %v9872_v33 = vcombine.low %v2225_v21, %v2227_v12  ;;  %v2240_v10 = vld [vmem:[%s17077_s10 + $0x1f8] sm:$0xff]  ;;  %v12279_v21 = vld [vmem:[%s17080_s12 + $0x110] sm:$0xff]  }
 0x830   :  { %2427 = vmatprep.subr.bf16.mxu0 %v9865_v20  ;;  %2490 = vmatprep.subr.bf16.mxu1 %v9867_v34  ;;  %v1751_v51 = vmul.f32 %v13946_v45, %v1739_v26  ;;  %v9882_v20 = vcombine.low %v2234_v37, %v2236_v36  ;;  %v9887_v55 = vcombine.high %v2238_v18, %v2240_v10  ;;  %v12272_v26 = vld [vmem:[%s17080_s12 + $0x180] sm:$0xff]   ;;  %v12280_v12 = vld [vmem:[%s17080_s12 + $0x190] sm:$0xff]  }
 0x831   :  { %v12646_v31 = vpop.eup %12645  ;;  %v9886_v52 = vcombine.low %v2238_v18, %v2240_v10  ;;  %v1801_v37 = vld [vmem:[%s17081_s11] sm:$0xf] }
 0x832   :  { %v14027_v16 = vadd.f32 %v13954_v63, %v1751_v51  ;;  %v1740_v44 = vmul.f32 %v12646_v31, %v13860_v49  ;;  %v2231_v49 = vld [vmem:[%s17077_s10 + $0x170] sm:$0xff]  ;;  %v12276_v51 = vld [vmem:[%s17080_s12 + $0x188] sm:$0xff]   ;;  %v12281_v31 = vld [vmem:[%s17080_s12 + $0x158] sm:$0xff]   ;;  %v14204_v36 = vrot.slane %v1801_v37, %v13217_v5 }
 0x833   :  { %v12648_v48 = vpop.eup %12647  ;;  %2428 = vmatpush1.bf16.msra.mxu0 %v9864_v50  ;;  %2491 = vmatpush1.bf16.msra.mxu1 %v9866_v9  ;;  %v9877_v24 = vcombine.high %v2229_v25, %v2231_v49  ;;  %v9876_v27 = vcombine.low %v2229_v25, %v2231_v49  ;;  %v12274_v50 = vld [vmem:[%s17080_s12 + $0x1c8] sm:$0xff]   ;;  %v12293_v49 = vld [vmem:[%s17080_s12 + $0x170] sm:$0xff]  }
 0x834   :  { %v14032_v53 = vpack.c.bf16 %v14027_v16, %v14024_v60  ;;  %2429 = vmatprep.subr.bf16.mxu0 %v9869_v15  ;;  %2492 = vmatprep.subr.bf16.mxu1 %v9871_v39  ;;  %v1741_v30 = vmul.f32 %v12648_v48, %v13867_v56  ;;  %v1752_v56 = vmul.f32 %v13946_v45, %v1740_v44  ;;  %v12275_v9 = vld [vmem:[%s17080_s12 + $0x108] sm:$0xff]   ;;  %v12277_v15 = vld [vmem:[%s17080_s12 + $0x150] sm:$0xff]   ;;  %v12284_v44 = vld [vmem:[%s17080_s12 + $0x198] sm:$0xff]  }
 0x835   :  { %v12278_v39 = vld [vmem:[%s17080_s12 + $0x1d0] sm:$0xff]   ;;  %v12285_v48 = vld [vmem:[%s17080_s12 + $0x160] sm:$0xff]   ;;  %v12292_v25 = vld [vmem:[%s17080_s12 + $0x1a8] sm:$0xff]  }
 0x836   :  { %2026 = vmatmul.mubr.bf16.gmra.mrb[80].mxu0 %v14032_v53  ;;  %2089 = vmatmul.mubr.bf16.gmra.mrb[72].mxu1 %v14032_v53  ;;  %v1753_v6 = vmul.f32 %v13946_v45, %v1741_v30  ;;  %v2235_v45 = vld [vmem:[%s17077_s10 + $0x1b0] sm:$0xff]  ;;  %v14069_v58 = vadd.f32 %v13954_v63, %v1752_v56  ;;  %v12291_v30 = vld [vmem:[%s17080_s12 + $0x128] sm:$0xff]  }
 0x837   :  { %2430 = vmatpush1.bf16.msra.mxu0 %v9868_v23  ;;  %2493 = vmatpush1.bf16.msra.mxu1 %v9870_v35  ;;  %v9881_v29 = vcombine.high %v2233_v61, %v2235_v45  ;;  %v9880_v42 = vcombine.low %v2233_v61, %v2235_v45  ;;  %v12286_v23 = vld [vmem:[%s17080_s12 + $0x1e0] sm:$0xff]   ;;  %v12296_v56 = vld [vmem:[%s17080_s12 + $0x1b0] sm:$0xff]   ;;  %v14198_v45 = vsub.s32 3, %v13214_v4 }
 0x838   :  { %2431 = vmatprep.subr.bf16.mxu0 %v9873_v41  ;;  %2494 = vmatprep.subr.bf16.mxu1 %v9875_v54  ;;  %v14052_v40 = vadd.f32 %v13954_v63, %v1753_v6  ;;  %v2239_v63 = vld [vmem:[%s17077_s10 + $0x1f0] sm:$0xff]  ;;  %v12287_v35 = vld [vmem:[%s17080_s12 + $0x120] sm:$0xff]   ;;  %v12290_v54 = vld [vmem:[%s17080_s12 + $0x1e8] sm:$0xff]  }
 0x839   :  { %2035 = vmatprep.mubr.bf16.mxu0 %v12951_v38  ;;  %2098 = vmatprep.mubr.bf16.mxu1 %v12951_v38  ;;  %v9885_v34 = vcombine.high %v2237_v32, %v2239_v63  ;;  %v9884_v19 = vcombine.low %v2237_v32, %v2239_v63  ;;  %v12288_v41 = vld [vmem:[%s17080_s12 + $0x1a0] sm:$0xff]   ;;  %v12297_v6 = vld [vmem:[%s17080_s12 + $0x178] sm:$0xff]  }
 0x83a   :  { %v1768_v14 = vpack.c.bf16 %v14052_v40, %v14069_v58  ;;  %v12302_v61 = vld [vmem:[%s17080_s12 + $0xc0] sm:$0xff]  }
 0x83b   :  { %2432 = vmatpush1.bf16.msra.mxu0 %v9872_v33  ;;  %2495 = vmatpush1.bf16.msra.mxu1 %v9874_v13  ;;  %v12298_v33 = vld [vmem:[%s17080_s12 + $0x1f8] sm:$0xff]  }
 0x83c   :  { %2433 = vmatprep.subr.bf16.mxu0 %v9877_v24  ;;  %2496 = vmatprep.subr.bf16.mxu1 %v9879_v28  ;;  %v12299_v13 = vld [vmem:[%s17080_s12 + $0x138] sm:$0xff]   ;;  %v12301_v28 = vld [vmem:[%s17080_s12 + $0x40] sm:$0xff]  }
 0x83d   :  { %v12300_v24 = vld [vmem:[%s17080_s12 + $0x1b8] sm:$0xff]  }
 0x83e   :  { %2036 = vmatmul.mubr.bf16.gmra.mrb[84].mxu0 %v1768_v14  ;;  %2099 = vmatmul.mubr.bf16.gmra.mrb[76].mxu1 %v1768_v14 }
 0x83f   :  { %2434 = vmatpush1.bf16.msra.mxu0 %v9876_v27  ;;  %2497 = vmatpush1.bf16.msra.mxu1 %v9878_v47  ;;  %v14207_v27 = vrot.slane %v1801_v37, %v13223_v7  ;;  %v14210_v47 = vrot.slane %v1801_v37, %v13226_v8 }
 0x840   :  { %2435 = vmatprep.subr.bf16.mxu0 %v9881_v29  ;;  %2498 = vmatprep.subr.bf16.mxu1 %v9883_v3 }
 0x841   :  { %2455 = vmatprep.mubr.bf16.mxu0 %v12951_v38  ;;  %2518 = vmatprep.mubr.bf16.mxu1 %v12951_v38 }
 0x843   :  { %2436 = vmatpush1.bf16.msra.mxu0 %v9880_v42  ;;  %2499 = vmatpush1.bf16.msra.mxu1 %v9882_v20 }
 0x844   :  { %2437 = vmatprep.subr.bf16.mxu0 %v9885_v34  ;;  %2500 = vmatprep.subr.bf16.mxu1 %v9887_v55 }
 0x847   :  { %2438 = vmatpush1.bf16.msra.mxu0 %v9884_v19  ;;  %2501 = vmatpush1.bf16.msra.mxu1 %v9886_v52 }
 0x848   :  { %10910 = vmatprep.subr.bf16.mxu0 %v12269_v1 }
 0x84a   :  { %2456 = vmatmul.mubr.bf16.vlgmr.msra.gmra.mrb[88].mxu0 %v13977_v17  ;;  %2519 = vmatmul.mubr.bf16.vlgmr.msra.gmra.mrb[80].mxu1 %v13977_v17  ;;  %v12270_v17 = vld [vmem:[%s17080_s12 + $0x1c0] sm:$0xff]  }
 0x84b   :  { %2465 = vmatprep.mubr.bf16.mxu0 %v12951_v38  ;;  %2528 = vmatprep.mubr.bf16.mxu1 %v12951_v38 }
 0x84c   :  { %10944 = vmatprep.subr.bf16.mxu1 %v12270_v17  ;;  %10911 = vmatpush3.bf16.msra.mxu0 %v12271_v11 }
 0x84d   :  { %10945 = vmatpush3.bf16.msra.mxu1 %v12272_v26  ;;  %10912 = vmatprep.subr.bf16.mxu0 %v12273_v46 }
 0x84e   :  { %10946 = vmatprep.subr.bf16.mxu1 %v12274_v50 }
 0x850   :  { %10913 = vmatpush3.bf16.msra.mxu0 %v12275_v9 }
 0x851   :  { %10947 = vmatpush3.bf16.msra.mxu1 %v12276_v51  ;;  %10914 = vmatprep.subr.bf16.mxu0 %v12277_v15 }
 0x852   :  { %2466 = vmatmul.mubr.bf16.gmra.mrb[92].mxu0 %v14032_v53  ;;  %2529 = vmatmul.mubr.bf16.gmra.mrb[84].mxu1 %v14032_v53  ;;  %v12289_v53 = vld [vmem:[%s17080_s12 + $0x168] sm:$0xff]  }
 0x853   :  { %2475 = vmatprep.mubr.bf16.mxu0 %v12951_v38  ;;  %2538 = vmatprep.mubr.bf16.mxu1 %v12951_v38 }
 0x854   :  { %10948 = vmatprep.subr.bf16.mxu1 %v12278_v39  ;;  %10915 = vmatpush3.bf16.msra.mxu0 %v12279_v21 }
 0x855   :  { %10949 = vmatpush3.bf16.msra.mxu1 %v12280_v12  ;;  %10916 = vmatprep.subr.bf16.mxu0 %v12281_v31 }
 0x856   :  { %10950 = vmatprep.subr.bf16.mxu1 %v12282_v59 }
 0x858   :  { %10917 = vmatpush3.bf16.msra.mxu0 %v12283_v22 }
 0x859   :  { %10951 = vmatpush3.bf16.msra.mxu1 %v12284_v44  ;;  %10918 = vmatprep.subr.bf16.mxu0 %v12285_v48 }
 0x85a   :  { %2476 = vmatmul.mubr.bf16.gmra.mrb[96].mxu0 %v1768_v14  ;;  %2539 = vmatmul.mubr.bf16.gmra.mrb[88].mxu1 %v1768_v14  ;;  %v14213_v14 = vrot.slane %v1801_v37, %v14198_v45 }
 0x85b   :  { %10952 = vmatprep.subr.bf16.mxu1 %v12286_v23 }
 0x85c   :  { %10919 = vmatpush3.bf16.msra.mxu0 %v12287_v35 }
 0x85d   :  { %10953 = vmatpush3.bf16.msra.mxu1 %v12288_v41  ;;  %10920 = vmatprep.subr.bf16.mxu0 %v12289_v53 }
 0x85e   :  { %10954 = vmatprep.subr.bf16.mxu1 %v12290_v54 }
 0x860   :  { %10921 = vmatpush3.bf16.msra.mxu0 %v12291_v30 }
 0x861   :  { %10955 = vmatpush3.bf16.msra.mxu1 %v12292_v25  ;;  %10922 = vmatprep.subr.bf16.mxu0 %v12293_v49 }
 0x862   :  { %10956 = vmatprep.subr.bf16.mxu1 %v12294_v43 }
 0x864   :  { %10923 = vmatpush3.bf16.msra.mxu0 %v12295_v62 }
 0x865   :  { %10957 = vmatpush3.bf16.msra.mxu1 %v12296_v56  ;;  %10924 = vmatprep.subr.bf16.mxu0 %v12297_v6 }
 0x866   :  { %10958 = vmatprep.subr.bf16.mxu1 %v12298_v33 }
 0x868   :  { %10925 = vmatpush3.bf16.msra.mxu0 %v12299_v13 }
 0x869   :  { %10959 = vmatpush3.bf16.msra.mxu1 %v12300_v24  ;;  %10978 = vmatprep.subr.bf16.mxu0 %v12301_v28 }
 0x86a   :  { %11012 = vmatprep.subr.bf16.mxu1 %v12302_v61 }
 0x8fd   :  { %v2017_v29 = vpop.f32.mrb[76].mxu0  ;;  %v2080_v3 = vpop.f32.mrb[68].mxu1 }
 0x8fe   :  { %v2018_v4 = vadd.f32 %v2017_v29, %v14204_v36  ;;  %v2081_v32 = vadd.f32 %v2080_v3, %v14207_v27  ;;  %v2019_v63 = vpop.f32.mrb[77].mxu0  ;;  %v2082_v18 = vpop.f32.mrb[69].mxu1 }
 0x8ff   :  { %v2020_v10 = vadd.f32 %v2019_v63, %v14210_v47  ;;  %v2083_v42 = vadd.f32 %v2082_v18, %v14213_v14  ;;  %v2021_v20 = vpop.f32.mrb[78].mxu0  ;;  %v2084_v34 = vpop.f32.mrb[70].mxu1 }
 0x900   :  { %v2109_v55 = vmax.f32 %v2018_v4, 0.0  ;;  %v2111_v19 = vmax.f32 %v2081_v32, 0.0  ;;  %v2022_v52 = vadd.f32 %v2021_v20, %v14204_v36  ;;  %v2085_v1 = vadd.f32 %v2084_v34, %v14207_v27  ;;  %v2023_v17 = vpop.f32.mrb[79].mxu0  ;;  %v2086_v11 = vpop.f32.mrb[71].mxu1 }
 0x901   :  { %v2110_v26 = vmax.f32 %v2020_v10, 0.0  ;;  %v2112_v46 = vmax.f32 %v2083_v42, 0.0  ;;  %v2024_v50 = vadd.f32 %v2023_v17, %v14210_v47  ;;  %v2087_v9 = vadd.f32 %v2086_v11, %v14213_v14 }
 0x902   :  { %v2113_v51 = vmax.f32 %v2022_v52, 0.0  ;;  %v2115_v15 = vmax.f32 %v2085_v1, 0.0 }
 0x903   :  { %v2114_v39 = vmax.f32 %v2024_v50, 0.0  ;;  %v2116_v21 = vmax.f32 %v2087_v9, 0.0 }
 0x904   :  { %v14223_v12 = vpack.c.bf16 %v2113_v51, %v2109_v55  ;;  %v14225_v31 = vpack.c.bf16 %v2115_v15, %v2111_v19 }
 0x905   :  { %v14227_v59 = vpack.c.bf16 %v2114_v39, %v2110_v26  ;;  %v14229_v22 = vpack.c.bf16 %v2116_v21, %v2112_v46 }
 0x909   :  { %v2027_v44 = vpop.f32.mrb[80].mxu0  ;;  %v2090_v48 = vpop.f32.mrb[72].mxu1 }
 0x90a   :  { %v2028_v23 = vadd.f32 %v2027_v44, %v14204_v36  ;;  %v2091_v35 = vadd.f32 %v2090_v48, %v14207_v27  ;;  %v2029_v41 = vpop.f32.mrb[81].mxu0  ;;  %v2092_v53 = vpop.f32.mrb[73].mxu1 }
 0x90b   :  { %v2030_v54 = vadd.f32 %v2029_v41, %v14210_v47  ;;  %v2093_v30 = vadd.f32 %v2092_v53, %v14213_v14  ;;  %v2031_v25 = vpop.f32.mrb[82].mxu0  ;;  %v2094_v49 = vpop.f32.mrb[74].mxu1  ;;  %v2241_v41 = vld [vmem:[%s17081_s11 + $0x4] sm:$0xf] }
 0x90c   :  { %v2117_v43 = vmax.f32 %v2028_v23, 0.0  ;;  %v2119_v62 = vmax.f32 %v2091_v35, 0.0  ;;  %v2032_v56 = vadd.f32 %v2031_v25, %v14204_v36  ;;  %v2095_v6 = vadd.f32 %v2094_v49, %v14207_v27  ;;  %v2033_v33 = vpop.f32.mrb[83].mxu0  ;;  %v2096_v13 = vpop.f32.mrb[75].mxu1 }
 0x90d   :  { %v2118_v24 = vmax.f32 %v2030_v54, 0.0  ;;  %v2120_v28 = vmax.f32 %v2093_v30, 0.0  ;;  %v2034_v61 = vadd.f32 %v2033_v33, %v14210_v47  ;;  %v2097_v37 = vadd.f32 %v2096_v13, %v14213_v14 }
 0x90e   :  { %v2121_v29 = vmax.f32 %v2032_v56, 0.0  ;;  %v2123_v3 = vmax.f32 %v2095_v6, 0.0  ;;  %v14276_v56 = vrot.slane %v2241_v41, %v14198_v45 }
 0x90f   :  { %v2122_v4 = vmax.f32 %v2034_v61, 0.0  ;;  %v2124_v32 = vmax.f32 %v2097_v37, 0.0 }
 0x910   :  { %v14239_v63 = vpack.c.bf16 %v2121_v29, %v2117_v43  ;;  %v14241_v18 = vpack.c.bf16 %v2123_v3, %v2119_v62  ;;  %v14273_v62 = vrot.slane %v2241_v41, %v13226_v8 }
 0x911   :  { %v2037_v10 = vpop.f32.mrb[84].mxu0  ;;  %v2100_v42 = vpop.f32.mrb[76].mxu1  ;;  %v14243_v20 = vpack.c.bf16 %v2122_v4, %v2118_v24  ;;  %v14245_v34 = vpack.c.bf16 %v2124_v32, %v2120_v28 }
 0x912   :  { %v2038_v55 = vadd.f32 %v2037_v10, %v14204_v36  ;;  %v2101_v19 = vadd.f32 %v2100_v42, %v14207_v27  ;;  %v2039_v52 = vpop.f32.mrb[85].mxu0  ;;  %v2102_v1 = vpop.f32.mrb[77].mxu1 }
 0x913   :  { %v2040_v17 = vadd.f32 %v2039_v52, %v14210_v47  ;;  %v2103_v11 = vadd.f32 %v2102_v1, %v14213_v14  ;;  %v2041_v26 = vpop.f32.mrb[86].mxu0  ;;  %v2104_v46 = vpop.f32.mrb[78].mxu1 }
 0x914   :  { %v2125_v50 = vmax.f32 %v2038_v55, 0.0  ;;  %v2127_v9 = vmax.f32 %v2101_v19, 0.0  ;;  %v2042_v51 = vadd.f32 %v2041_v26, %v14204_v36  ;;  %v2105_v15 = vadd.f32 %v2104_v46, %v14207_v27  ;;  %v2043_v39 = vpop.f32.mrb[87].mxu0  ;;  %v2106_v21 = vpop.f32.mrb[79].mxu1 }
 0x915   :  { %v2126_v44 = vmax.f32 %v2040_v17, 0.0  ;;  %v2128_v48 = vmax.f32 %v2103_v11, 0.0  ;;  %v2044_v23 = vadd.f32 %v2043_v39, %v14210_v47  ;;  %v2107_v35 = vadd.f32 %v2106_v21, %v14213_v14 }
 0x916   :  { %v2129_v53 = vmax.f32 %v2042_v51, 0.0  ;;  %v2131_v54 = vmax.f32 %v2105_v15, 0.0  ;;  %v14267_v47 = vrot.slane %v2241_v41, %v13217_v5  ;;  %v14270_v14 = vrot.slane %v2241_v41, %v13223_v7  ;;  %v12304_v41 = vld [vmem:[%s17080_s12 + $0x80] sm:$0xff]  }
 0x917   :  { %v2130_v30 = vmax.f32 %v2044_v23, 0.0  ;;  %v2132_v25 = vmax.f32 %v2107_v35, 0.0  ;;  %v12303_v35 = vld [vmem:[%s17080_s12] sm:$0xff]  }
 0x918   :  { %v14258_v49 = vpack.c.bf16 %v2129_v53, %v2125_v50  ;;  %v14260_v36 = vpack.c.bf16 %v2131_v54, %v2127_v9 }
 0x919   :  { %v14262_v27 = vpack.c.bf16 %v2130_v30, %v2126_v44  ;;  %v14264_v43 = vpack.c.bf16 %v2132_v25, %v2128_v48 }
 0x91d   :  { %v2457_v6 = vpop.f32.mrb[88].mxu0  ;;  %v2520_v33 = vpop.f32.mrb[80].mxu1 }
 0x91e   :  { %v2458_v13 = vadd.f32 %v2457_v6, %v14267_v47  ;;  %v2521_v24 = vadd.f32 %v2520_v33, %v14270_v14  ;;  %v2459_v28 = vpop.f32.mrb[89].mxu0  ;;  %v2522_v61 = vpop.f32.mrb[81].mxu1  ;;  %v12305_v6 = vld [vmem:[%s17080_s12 + $0x48] sm:$0xff]  }
 0x91f   :  { %v2460_v37 = vadd.f32 %v2459_v28, %v14273_v62  ;;  %v2523_v29 = vadd.f32 %v2522_v61, %v14276_v56  ;;  %v2461_v3 = vpop.f32.mrb[90].mxu0  ;;  %v2524_v4 = vpop.f32.mrb[82].mxu1  ;;  %v12306_v33 = vld [vmem:[%s17080_s12 + $0xc8] sm:$0xff]  }
 0x920   :  { %v2549_v32 = vmax.f32 %v2458_v13, 0.0  ;;  %v2551_v10 = vmax.f32 %v2521_v24, 0.0  ;;  %v2462_v42 = vadd.f32 %v2461_v3, %v14267_v47  ;;  %v2525_v55 = vadd.f32 %v2524_v4, %v14270_v14  ;;  %v2463_v19 = vpop.f32.mrb[91].mxu0  ;;  %v2526_v52 = vpop.f32.mrb[83].mxu1 }
 0x921   :  { %v2550_v1 = vmax.f32 %v2460_v37, 0.0  ;;  %v2552_v17 = vmax.f32 %v2523_v29, 0.0  ;;  %v2464_v11 = vadd.f32 %v2463_v19, %v14273_v62  ;;  %v2527_v26 = vadd.f32 %v2526_v52, %v14276_v56 }
 0x922   :  { %v2553_v46 = vmax.f32 %v2462_v42, 0.0  ;;  %v2555_v50 = vmax.f32 %v2525_v55, 0.0  ;;  %v12307_v42 = vld [vmem:[%s17080_s12 + $0x8] sm:$0xff]  }
 0x923   :  { %v2554_v9 = vmax.f32 %v2464_v11, 0.0  ;;  %v2556_v51 = vmax.f32 %v2527_v26, 0.0  ;;  %v12308_v55 = vld [vmem:[%s17080_s12 + $0x88] sm:$0xff]   ;;  %v12309_v11 = vld [vmem:[%s17080_s12 + $0x50] sm:$0xff]  }
 0x924   :  { %v2573_v15 = vpack.c.bf16 %v2553_v46, %v2549_v32  ;;  %v2575_v39 = vpack.c.bf16 %v2555_v50, %v2551_v10  ;;  %v12310_v26 = vld [vmem:[%s17080_s12 + $0xd0] sm:$0xff]  }
 0x925   :  { %v2467_v21 = vpop.f32.mrb[92].mxu0  ;;  %v2530_v44 = vpop.f32.mrb[84].mxu1  ;;  %v2574_v48 = vpack.c.bf16 %v2554_v9, %v2550_v1  ;;  %v2576_v23 = vpack.c.bf16 %v2556_v51, %v2552_v17 }
 0x926   :  { %v2468_v53 = vadd.f32 %v2467_v21, %v14267_v47  ;;  %v2531_v54 = vadd.f32 %v2530_v44, %v14270_v14  ;;  %v2469_v30 = vpop.f32.mrb[93].mxu0  ;;  %v2532_v25 = vpop.f32.mrb[85].mxu1 }
 0x927   :  { %v2470_v13 = vadd.f32 %v2469_v30, %v14273_v62  ;;  %v2533_v24 = vadd.f32 %v2532_v25, %v14276_v56  ;;  %v2471_v28 = vpop.f32.mrb[94].mxu0  ;;  %v2534_v61 = vpop.f32.mrb[86].mxu1  ;;  %2873 = vmatprep.mubr.bf16.mxu0 %v2574_v48  ;;  %2930 = vmatprep.mubr.bf16.mxu1 %v2576_v23 }
 0x928   :  { %v2472_v37 = vadd.f32 %v2471_v28, %v14267_v47  ;;  %v2535_v29 = vadd.f32 %v2534_v61, %v14270_v14  ;;  %v2473_v3 = vpop.f32.mrb[95].mxu0  ;;  %v2536_v4 = vpop.f32.mrb[87].mxu1  ;;  %2874 = vmatmul.mubr.bf16.vlgmr.msra.gmra.mrb[100].mxu0 %v2573_v15  ;;  %2931 = vmatmul.mubr.bf16.vlgmr.msra.gmra.mrb[92].mxu1 %v2575_v39  ;;  %v2557_v19 = vmax.f32 %v2468_v53, 0.0  ;;  %v2559_v52 = vmax.f32 %v2531_v54, 0.0 }
 0x929   :  { %v2474_v32 = vadd.f32 %v2473_v3, %v14273_v62  ;;  %v2537_v10 = vadd.f32 %v2536_v4, %v14276_v56  ;;  %10979 = vmatpush3.bf16.msra.mxu0 %v12303_v35  ;;  %11013 = vmatpush3.bf16.msra.mxu1 %v12304_v41  ;;  %v2558_v46 = vmax.f32 %v2470_v13, 0.0  ;;  %v2560_v50 = vmax.f32 %v2533_v24, 0.0  ;;  %v12311_v35 = vld [vmem:[%s17080_s12 + $0x10] sm:$0xff]  }
 0x92a   :  { %v2561_v1 = vmax.f32 %v2472_v37, 0.0  ;;  %v2563_v17 = vmax.f32 %v2535_v29, 0.0  ;;  %10980 = vmatprep.subr.bf16.mxu0 %v12305_v6  ;;  %11014 = vmatprep.subr.bf16.mxu1 %v12306_v33  ;;  %v12312_v41 = vld [vmem:[%s17080_s12 + $0x90] sm:$0xff]   ;;  %v12313_v6 = vld [vmem:[%s17080_s12 + $0x58] sm:$0xff]  }
 0x92b   :  { %v2562_v9 = vmax.f32 %v2474_v32, 0.0  ;;  %v2564_v51 = vmax.f32 %v2537_v10, 0.0  ;;  %v12314_v33 = vld [vmem:[%s17080_s12 + $0xd8] sm:$0xff]  }
 0x92c   :  { %v2577_v15 = vpack.c.bf16 %v2561_v1, %v2557_v19  ;;  %v2579_v39 = vpack.c.bf16 %v2563_v17, %v2559_v52 }
 0x92d   :  { %10981 = vmatpush3.bf16.msra.mxu0 %v12307_v42  ;;  %11015 = vmatpush3.bf16.msra.mxu1 %v12308_v55  ;;  %v2477_v21 = vpop.f32.mrb[96].mxu0  ;;  %v2540_v44 = vpop.f32.mrb[88].mxu1  ;;  %v2578_v48 = vpack.c.bf16 %v2562_v9, %v2558_v46  ;;  %v2580_v23 = vpack.c.bf16 %v2564_v51, %v2560_v50  ;;  %v12315_v42 = vld [vmem:[%s17080_s12 + $0x18] sm:$0xff]  }
 0x92e   :  { %v2478_v53 = vadd.f32 %v2477_v21, %v14267_v47  ;;  %v2541_v54 = vadd.f32 %v2540_v44, %v14270_v14  ;;  %v2479_v30 = vpop.f32.mrb[97].mxu0  ;;  %v2542_v25 = vpop.f32.mrb[89].mxu1  ;;  %10982 = vmatprep.subr.bf16.mxu0 %v12309_v11  ;;  %11016 = vmatprep.subr.bf16.mxu1 %v12310_v26  ;;  %v12321_v21 = vld [vmem:[%s17080_s12 + $0x68] sm:$0xff]  }
 0x92f   :  { %v2480_v13 = vadd.f32 %v2479_v30, %v14273_v62  ;;  %v2543_v24 = vadd.f32 %v2542_v25, %v14276_v56  ;;  %v2481_v28 = vpop.f32.mrb[98].mxu0  ;;  %v2544_v61 = vpop.f32.mrb[90].mxu1  ;;  %2881 = vmatprep.mubr.bf16.mxu0 %v2578_v48  ;;  %2938 = vmatprep.mubr.bf16.mxu1 %v2580_v23  ;;  %v12322_v44 = vld [vmem:[%s17080_s12 + $0xe8] sm:$0xff]   ;;  %v12331_v30 = vld [vmem:[%s17080_s12 + $0x38] sm:$0xff]  }
 0x930   :  { %v2482_v37 = vadd.f32 %v2481_v28, %v14267_v47  ;;  %v2545_v29 = vadd.f32 %v2544_v61, %v14270_v14  ;;  %v2483_v3 = vpop.f32.mrb[99].mxu0  ;;  %v2546_v4 = vpop.f32.mrb[91].mxu1  ;;  %2882 = vmatmul.mubr.bf16.gmra.mrb[104].mxu0 %v2577_v15  ;;  %2939 = vmatmul.mubr.bf16.gmra.mrb[96].mxu1 %v2579_v39  ;;  %v12316_v47 = vld [vmem:[%s17080_s12 + $0x98] sm:$0xff]   ;;  %v2565_v55 = vmax.f32 %v2478_v53, 0.0  ;;  %v2567_v14 = vmax.f32 %v2541_v54, 0.0  ;;  %v12319_v15 = vld [vmem:[%s17080_s12 + $0x20] sm:$0xff]  }
 0x931   :  { %v2484_v32 = vadd.f32 %v2483_v3, %v14273_v62  ;;  %v2547_v10 = vadd.f32 %v2546_v4, %v14276_v56  ;;  %10983 = vmatpush3.bf16.msra.mxu0 %v12311_v35  ;;  %11017 = vmatpush3.bf16.msra.mxu1 %v12312_v41  ;;  %v12317_v62 = vld [vmem:[%s17080_s12 + $0x60] sm:$0xff]   ;;  %v2566_v1 = vmax.f32 %v2480_v13, 0.0  ;;  %v2568_v17 = vmax.f32 %v2543_v24, 0.0  ;;  %v12323_v48 = vld [vmem:[%s17080_s12 + $0x28] sm:$0xff]   ;;  %v12325_v35 = vld [vmem:[%s17080_s12 + $0x70] sm:$0xff]  }
 0x932   :  { %v2569_v19 = vmax.f32 %v2482_v37, 0.0  ;;  %v2571_v52 = vmax.f32 %v2545_v29, 0.0  ;;  %10984 = vmatprep.subr.bf16.mxu0 %v12313_v6  ;;  %11018 = vmatprep.subr.bf16.mxu1 %v12314_v33  ;;  %v12318_v56 = vld [vmem:[%s17080_s12 + $0xe0] sm:$0xff]   ;;  %v12324_v23 = vld [vmem:[%s17080_s12 + $0xa8] sm:$0xff]   ;;  %v12326_v41 = vld [vmem:[%s17080_s12 + $0xf0] sm:$0xff]  }
 0x933   :  { %v2570_v11 = vmax.f32 %v2484_v32, 0.0  ;;  %v2572_v26 = vmax.f32 %v2547_v10, 0.0  ;;  %v12320_v39 = vld [vmem:[%s17080_s12 + $0xa0] sm:$0xff]   ;;  %v12327_v53 = vld [vmem:[%s17080_s12 + $0x30] sm:$0xff]   ;;  %v12330_v54 = vld [vmem:[%s17080_s12 + $0xf8] sm:$0xff]  }
 0x934   :  { %v2581_v46 = vpack.c.bf16 %v2569_v19, %v2565_v55  ;;  %v2583_v50 = vpack.c.bf16 %v2571_v52, %v2567_v14  ;;  %v12332_v25 = vld [vmem:[%s17080_s12 + $0xb8] sm:$0xff]  }
 0x935   :  { %v2582_v9 = vpack.c.bf16 %v2570_v11, %v2566_v1  ;;  %v2584_v51 = vpack.c.bf16 %v2572_v26, %v2568_v17  ;;  %10985 = vmatpush3.bf16.msra.mxu0 %v12315_v42  ;;  %11019 = vmatpush3.bf16.msra.mxu1 %v12316_v47 }
 0x936   :  { %10986 = vmatprep.subr.bf16.mxu0 %v12317_v62  ;;  %11020 = vmatprep.subr.bf16.mxu1 %v12318_v56 }
 0x937   :  { %2889 = vmatprep.mubr.bf16.mxu0 %v2582_v9  ;;  %2946 = vmatprep.mubr.bf16.mxu1 %v2584_v51 }
 0x938   :  { %2890 = vmatmul.mubr.bf16.gmra.mrb[108].mxu0 %v2581_v46  ;;  %2947 = vmatmul.mubr.bf16.gmra.mrb[100].mxu1 %v2583_v50 }
 0x939   :  { %10987 = vmatpush3.bf16.msra.mxu0 %v12319_v15  ;;  %11021 = vmatpush3.bf16.msra.mxu1 %v12320_v39 }
 0x93a   :  { %3179 = vmatprep.mubr.bf16.mxu0 %v14227_v59  ;;  %3236 = vmatprep.mubr.bf16.mxu1 %v14229_v22  ;;  %v12328_v59 = vld [vmem:[%s17080_s12 + $0xb0] sm:$0xff]   ;;  %v12329_v22 = vld [vmem:[%s17080_s12 + $0x78] sm:$0xff]  }
 0x93b   :  { %10988 = vmatprep.subr.bf16.mxu0 %v12321_v21  ;;  %11022 = vmatprep.subr.bf16.mxu1 %v12322_v44 }
 0x93d   :  { %10989 = vmatpush3.bf16.msra.mxu0 %v12323_v48  ;;  %11023 = vmatpush3.bf16.msra.mxu1 %v12324_v23 }
 0x93e   :  { %10990 = vmatprep.subr.bf16.mxu0 %v12325_v35  ;;  %11024 = vmatprep.subr.bf16.mxu1 %v12326_v41 }
 0x941   :  { %10991 = vmatpush3.bf16.msra.mxu0 %v12327_v53  ;;  %11025 = vmatpush3.bf16.msra.mxu1 %v12328_v59 }
 0x942   :  { %10992 = vmatprep.subr.bf16.mxu0 %v12329_v22  ;;  %11026 = vmatprep.subr.bf16.mxu1 %v12330_v54 }
 0x945   :  { %10993 = vmatpush3.bf16.msra.mxu0 %v12331_v30  ;;  %11027 = vmatpush3.bf16.msra.mxu1 %v12332_v25 }
 0x946   :  { %11678 = vmatprep.subr.bf16.mxu1 %v12949_v0 }
 0x948   :  { %3180 = vmatmul.mubr.bf16.vlgmr.msra.gmra.mrb[112].mxu0 %v14223_v12  ;;  %3237 = vmatmul.mubr.bf16.vlgmr.msra.gmra.mrb[104].mxu1 %v14225_v31 }
 0x949   :  { %3187 = vmatprep.mubr.bf16.mxu0 %v14243_v20  ;;  %3244 = vmatprep.mubr.bf16.mxu1 %v14245_v34 }
 0x950   :  { %3188 = vmatmul.mubr.bf16.gmra.mrb[116].mxu0 %v14239_v63  ;;  %3245 = vmatmul.mubr.bf16.gmra.mrb[108].mxu1 %v14241_v18 }
 0x951   :  { %3195 = vmatprep.mubr.bf16.mxu0 %v14262_v27  ;;  %3252 = vmatprep.mubr.bf16.mxu1 %v14264_v43 }
 0x958   :  { %3196 = vmatmul.mubr.bf16.gmra.mrb[120].mxu0 %v14258_v49  ;;  %3253 = vmatmul.mubr.bf16.gmra.mrb[112].mxu1 %v14260_v36 }
 0x959   :  { %3586 = vmatprep.mubr.bf16.mxu0 %v12951_v38  ;;  %11694 = vmatprep.mubr.msk.bf16.mxu1 %vm12950_vm0, %v12949_v0 }
 0x9fb   :  { %v10926_v12 = vpop.f32.mrb[100].mxu0  ;;  %v10960_v31 = vpop.f32.mrb[92].mxu1 }
 0x9fc   :  { %v10927_v20 = vpop.f32.mrb[101].mxu0  ;;  %v10961_v34 = vpop.f32.mrb[93].mxu1 }
 0x9fd   :  { %v10928_v63 = vadd.f32 %v10927_v20, %v10926_v12  ;;  %v10962_v6 = vadd.f32 %v10961_v34, %v10960_v31  ;;  %v10929_v18 = vpop.f32.mrb[102].mxu0  ;;  %v10963_v33 = vpop.f32.mrb[94].mxu1  ;;  %v9952_v34 = vld [vmem:[%s17082_s13] ss:$0 sm:$0xff] }
 0x9fe   :  { %v10930_v27 = vpop.f32.mrb[103].mxu0  ;;  %v10964_v13 = vpop.f32.mrb[95].mxu1 }
 0x9ff   :  { %v2933_v43 = vadd.f32 %v10962_v6, %v10928_v63  ;;  %v10931_v24 = vadd.f32 %v10930_v27, %v10929_v18  ;;  %v10965_v49 = vadd.f32 %v10964_v13, %v10963_v33 }
 0xa01   :  { %v2936_v28 = vadd.f32 %v10965_v49, %v10931_v24 }
 0xa03   :  { %v10932_v36 = vpop.f32.mrb[104].mxu0  ;;  %v10966_v61 = vpop.f32.mrb[96].mxu1 }
 0xa04   :  { %v10933_v37 = vpop.f32.mrb[105].mxu0  ;;  %v10967_v29 = vpop.f32.mrb[97].mxu1 }
 0xa05   :  { %v10934_v3 = vadd.f32 %v10933_v37, %v10932_v36  ;;  %v10968_v4 = vadd.f32 %v10967_v29, %v10966_v61  ;;  %v10935_v32 = vpop.f32.mrb[106].mxu0  ;;  %v10969_v10 = vpop.f32.mrb[98].mxu1 }
 0xa06   :  { %v10936_v42 = vpop.f32.mrb[107].mxu0  ;;  %v10970_v47 = vpop.f32.mrb[99].mxu1 }
 0xa07   :  { %v2941_v55 = vadd.f32 %v10968_v4, %v10934_v3  ;;  %v10937_v14 = vadd.f32 %v10936_v42, %v10935_v32  ;;  %v10971_v19 = vadd.f32 %v10970_v47, %v10969_v10 }
 0xa09   :  { %v2944_v52 = vadd.f32 %v10971_v19, %v10937_v14 }
 0xa0b   :  { %v10938_v62 = vpop.f32.mrb[108].mxu0  ;;  %v10972_v56 = vpop.f32.mrb[100].mxu1 }
 0xa0c   :  { %v10939_v1 = vpop.f32.mrb[109].mxu0  ;;  %v10973_v17 = vpop.f32.mrb[101].mxu1 }
 0xa0d   :  { %v10940_v11 = vadd.f32 %v10939_v1, %v10938_v62  ;;  %v10974_v26 = vadd.f32 %v10973_v17, %v10972_v56  ;;  %v10941_v46 = vpop.f32.mrb[110].mxu0  ;;  %v10975_v50 = vpop.f32.mrb[102].mxu1 }
 0xa0e   :  { %v10942_v9 = vpop.f32.mrb[111].mxu0  ;;  %v10976_v51 = vpop.f32.mrb[103].mxu1 }
 0xa0f   :  { %v2949_v15 = vadd.f32 %v10974_v26, %v10940_v11  ;;  %v10943_v39 = vadd.f32 %v10942_v9, %v10941_v46  ;;  %v10977_v21 = vadd.f32 %v10976_v51, %v10975_v50 }
 0xa11   :  { %v2952_v44 = vadd.f32 %v10977_v21, %v10943_v39 }
 0xa1b   :  { %v10994_v48 = vpop.f32.mrb[112].mxu0  ;;  %v11028_v23 = vpop.f32.mrb[104].mxu1 }
 0xa1c   :  { %v10995_v35 = vpop.f32.mrb[113].mxu0  ;;  %v11029_v41 = vpop.f32.mrb[105].mxu1 }
 0xa1d   :  { %v10996_v53 = vadd.f32 %v10995_v35, %v10994_v48  ;;  %v11030_v59 = vadd.f32 %v11029_v41, %v11028_v23  ;;  %v10997_v22 = vpop.f32.mrb[114].mxu0  ;;  %v11031_v54 = vpop.f32.mrb[106].mxu1 }
 0xa1e   :  { %v10998_v30 = vpop.f32.mrb[115].mxu0  ;;  %v11032_v25 = vpop.f32.mrb[107].mxu1 }
 0xa1f   :  { %v3182_v12 = vadd.f32 %v10996_v53, %v2933_v43  ;;  %v10999_v31 = vadd.f32 %v10998_v30, %v10997_v22  ;;  %v11033_v20 = vadd.f32 %v11032_v25, %v11031_v54 }
 0xa21   :  { %v3239_v63 = vadd.f32 %v11030_v59, %v3182_v12  ;;  %v3185_v6 = vadd.f32 %v10999_v31, %v2936_v28 }
 0xa23   :  { %v3242_v18 = vadd.f32 %v11033_v20, %v3185_v6  ;;  %v11000_v33 = vpop.f32.mrb[116].mxu0  ;;  %v11034_v27 = vpop.f32.mrb[108].mxu1  ;;  %v3268_v13 = vadd.f32 %v9952_v34, %v3239_v63 }
 0xa24   :  { %v11001_v24 = vpop.f32.mrb[117].mxu0  ;;  %v11035_v49 = vpop.f32.mrb[109].mxu1 }
 0xa25   :  { %v3269_v36 = vadd.f32 %v9952_v34, %v3242_v18  ;;  %v11002_v61 = vadd.f32 %v11001_v24, %v11000_v33  ;;  %v11036_v37 = vadd.f32 %v11035_v49, %v11034_v27  ;;  %v11003_v29 = vpop.f32.mrb[118].mxu0  ;;  %v11037_v3 = vpop.f32.mrb[110].mxu1  ;;  %v3274_v43 = vadd.f32 %v3268_v13, %v13970_v57 }
 0xa26   :  { %v11004_v4 = vpop.f32.mrb[119].mxu0  ;;  %v11038_v32 = vpop.f32.mrb[111].mxu1 }
 0xa27   :  { %v3190_v10 = vadd.f32 %v11002_v61, %v2941_v55  ;;  %v11005_v42 = vadd.f32 %v11004_v4, %v11003_v29  ;;  %v11039_v47 = vadd.f32 %v11038_v32, %v11037_v3  ;;  %3282 = vadd.xlane.f32.xlu1 %v3274_v43  ;;  %v3275_v28 = vadd.f32 %v3269_v36, %v13973_v2 }
 0xa29   :  { %v3247_v14 = vadd.f32 %v11036_v37, %v3190_v10  ;;  %v3193_v19 = vadd.f32 %v11005_v42, %v2944_v52  ;;  %3284 = vadd.xlane.f32.xlu0 %v3275_v28  ;;  %v12343_v10 = vld [vmem:[%s17070_s4 + $0xf4] ss:$12 sps:$4 sm:$0xff]  }
 0xa2b   :  { %v3250_v62 = vadd.f32 %v11039_v47, %v3193_v19  ;;  %v11006_v56 = vpop.f32.mrb[120].mxu0  ;;  %v11040_v1 = vpop.f32.mrb[112].mxu1  ;;  %v3270_v17 = vadd.f32 %v9952_v34, %v3247_v14  ;;  %v12344_v14 = vld [vmem:[%s17070_s4 + $0xf8] ss:$12 sps:$4 sm:$0xff]  }
 0xa2c   :  { %v11007_v11 = vpop.f32.mrb[121].mxu0  ;;  %v11041_v26 = vpop.f32.mrb[113].mxu1 }
 0xa2d   :  { %v3271_v46 = vadd.f32 %v9952_v34, %v3250_v62  ;;  %v11008_v50 = vadd.f32 %v11007_v11, %v11006_v56  ;;  %v11042_v57 = vadd.f32 %v11041_v26, %v11040_v1  ;;  %v11009_v9 = vpop.f32.mrb[122].mxu0  ;;  %v11043_v51 = vpop.f32.mrb[114].mxu1  ;;  %v3276_v55 = vadd.f32 %v3270_v17, %v14024_v60  ;;  %v12333_v60 = vld [vmem:[%s17070_s4 + $0xc0] ss:$12 sps:$4 sm:$0xff]   ;;  %v12345_v56 = vld [vmem:[%s17070_s4 + $0x108] ss:$12 sps:$4 sm:$0xff]  }
 0xa2e   :  { %v11010_v39 = vpop.f32.mrb[123].mxu0  ;;  %v11044_v21 = vpop.f32.mrb[115].mxu1  ;;  %v12347_v62 = vld [vmem:[%s17070_s4 + $0x10c] ss:$12 sps:$4 sm:$0xff]   ;;  %v12348_v1 = vld [vmem:[%s17070_s4 + $0x110] ss:$12 sps:$4 sm:$0xff]  }
 0xa2f   :  { %v3198_v48 = vadd.f32 %v11008_v50, %v2949_v15  ;;  %v11011_v2 = vadd.f32 %v11010_v39, %v11009_v9  ;;  %v11045_v23 = vadd.f32 %v11044_v21, %v11043_v51  ;;  %3286 = vadd.xlane.f32.xlu1 %v3276_v55  ;;  %v3277_v52 = vadd.f32 %v3271_v46, %v14027_v16  ;;  %v12335_v16 = vld [vmem:[%s17070_s4 + $0xc4] ss:$12 sps:$4 sm:$0xff]   ;;  %v12336_v15 = vld [vmem:[%s17070_s4 + $0xc8] ss:$12 sps:$4 sm:$0xff]   ;;  %v12349_v11 = vld [vmem:[%s17070_s4 + $0x120] ss:$12 sps:$4 sm:$0xff]  }
 0xa30   :  { %3554 = vmatprep.subr.bf16.mxu0 %v12335_v16  ;;  %11679 = vmatpush3.bf16.msra.mxu1 %v12336_v15  ;;  %v12351_v17 = vld [vmem:[%s17070_s4 + $0x124] ss:$12 sps:$4 sm:$0xff]   ;;  %v12352_v26 = vld [vmem:[%s17070_s4 + $0x128] ss:$12 sps:$4 sm:$0xff]   ;;  %v12363_v39 = vld [vmem:[%s17070_s4 + $0x16c] ss:$12 sps:$4 sm:$0xff]  }
 0xa31   :  { %v3255_v35 = vadd.f32 %v11042_v57, %v3198_v48  ;;  %v3201_v41 = vadd.f32 %v11011_v2, %v2952_v44  ;;  %3288 = vadd.xlane.f32.xlu0 %v3277_v52  ;;  %3555 = vmatpush1.bf16.msra.mxu0 %v12333_v60  ;;  %v12337_v44 = vld [vmem:[%s17070_s4 + $0xd8] ss:$12 sps:$4 sm:$0xff]   ;;  %v12355_v46 = vld [vmem:[%s17070_s4 + $0x13c] ss:$12 sps:$4 sm:$0xff]   ;;  %v12356_v57 = vld [vmem:[%s17070_s4 + $0x140] ss:$12 sps:$4 sm:$0xff]  }
 0xa32   :  { %11680 = vmatprep.subr.bf16.mxu1 %v12949_v0  ;;  %v12353_v50 = vld [vmem:[%s17070_s4 + $0x138] ss:$12 sps:$4 sm:$0xff]   ;;  %v12359_v9 = vld [vmem:[%s17070_s4 + $0x154] ss:$12 sps:$4 sm:$0xff]   ;;  %v12357_v51 = vld [vmem:[%s17070_s4 + $0x150] ss:$12 sps:$4 sm:$0xff]  }
 0xa33   :  { %v3272_v53 = vadd.f32 %v9952_v34, %v3255_v35  ;;  %v3258_v59 = vadd.f32 %v11045_v23, %v3201_v41  ;;  %v12361_v21 = vld [vmem:[%s17070_s4 + $0x168] ss:$12 sps:$4 sm:$0xff]   ;;  %v12364_v48 = vld [vmem:[%s17070_s4 + $0x170] ss:$12 sps:$4 sm:$0xff]  }
 0xa35   :  { %v3273_v22 = vadd.f32 %v9952_v34, %v3258_v59  ;;  %v3278_v54 = vadd.f32 %v3272_v53, %v14069_v58  ;;  %v12339_v58 = vld [vmem:[%s17070_s4 + $0xdc] ss:$12 sps:$4 sm:$0xff]  }
 0xa36   :  { %3556 = vmatprep.subr.bf16.mxu0 %v12339_v58  ;;  %v9953_v58 = vld [vmem:[%s17083_s14] ss:$0 sm:$0xff] }
 0xa37   :  { %3290 = vadd.xlane.f32.xlu1 %v3278_v54  ;;  %v3279_v30 = vadd.f32 %v3273_v22, %v14052_v40  ;;  %v12340_v40 = vld [vmem:[%s17070_s4 + $0xe0] ss:$12 sps:$4 sm:$0xff]   ;;  %3557 = vmatpush1.bf16.msra.mxu0 %v12337_v44 }
 0xa38   :  { %11681 = vmatpush3.bf16.msra.mxu1 %v12340_v40  ;;  %3558 = vmatprep.subr.bf16.mxu0 %v12343_v10 }
 0xa39   :  { %3292 = vadd.xlane.f32.xlu0 %v3279_v30  ;;  %11682 = vmatprep.subr.bf16.mxu1 %v12949_v0 }
 0xa3c   :  { %11683 = vmatpush3.bf16.msra.mxu1 %v12344_v14 }
 0xa3d   :  { %11684 = vmatprep.subr.bf16.mxu1 %v12949_v0 }
 0xa40   :  { %11685 = vmatpush3.bf16.msra.mxu1 %v12348_v1 }
 0xa41   :  { %11686 = vmatprep.subr.bf16.mxu1 %v12949_v0 }
 0xa44   :  { %11687 = vmatpush3.bf16.msra.mxu1 %v12352_v26 }
 0xa45   :  { %11688 = vmatprep.subr.bf16.mxu1 %v12949_v0 }
 0xa48   :  { %11689 = vmatpush3.bf16.msra.mxu1 %v12356_v57 }
 0xa49   :  { %11690 = vmatprep.subr.bf16.mxu1 %v12949_v0 }
 0xab4   :  { %v3283_v25 = vpop.xlane.xlu1 %3282 }
 0xab5   :  { %v3294_v12 = vmul.f32 0.0078125, %v3283_v25 }
 0xab6   :  { %v3285_v31 = vpop.xlane.xlu0 %3284 }
 0xab7   :  { %v14437_v20 = vsub.f32 %v3274_v43, %v3294_v12  ;;  %v3295_v34 = vmul.f32 0.0078125, %v3285_v31 }
 0xab9   :  { %v14439_v63 = vsub.f32 %v3275_v28, %v3295_v34  ;;  %v3306_v6 = vmul.f32 %v14437_v20, %v14437_v20  ;;  %v12341_v28 = vld [vmem:[%s17070_s4 + $0xf0] ss:$12 sps:$4 sm:$0xff]  }
 0xaba   :  { %3559 = vmatpush1.bf16.msra.mxu0 %v12341_v28 }
 0xabb   :  { %3312 = vadd.xlane.f32.xlu1 %v3306_v6  ;;  %v3307_v18 = vmul.f32 %v14439_v63, %v14439_v63  ;;  %3560 = vmatprep.subr.bf16.mxu0 %v12347_v62 }
 0xabc   :  { %v3287_v33 = vpop.xlane.xlu1 %3286 }
 0xabd   :  { %v3296_v27 = vmul.f32 0.0078125, %v3287_v33  ;;  %3314 = vadd.xlane.f32.xlu0 %v3307_v18 }
 0xabe   :  { %v3289_v13 = vpop.xlane.xlu0 %3288  ;;  %3561 = vmatpush1.bf16.msra.mxu0 %v12345_v56 }
 0xabf   :  { %v14445_v24 = vsub.f32 %v3276_v55, %v3296_v27  ;;  %v3297_v49 = vmul.f32 0.0078125, %v3289_v13  ;;  %3562 = vmatprep.subr.bf16.mxu0 %v12351_v17  ;;  %v12360_v55 = vld [vmem:[%s17070_s4 + $0x158] ss:$12 sps:$4 sm:$0xff]   ;;  %v9954_v27 = vld [vmem:[%s17084_s15] ss:$0 sm:$0xff] }
 0xac0   :  { %11691 = vmatpush3.bf16.msra.mxu1 %v12360_v55 }
 0xac1   :  { %v14447_v36 = vsub.f32 %v3277_v52, %v3297_v49  ;;  %v3308_v61 = vmul.f32 %v14445_v24, %v14445_v24  ;;  %11692 = vmatprep.subr.bf16.mxu1 %v12949_v0 }
 0xac2   :  { %3563 = vmatpush1.bf16.msra.mxu0 %v12349_v11 }
 0xac3   :  { %3316 = vadd.xlane.f32.xlu1 %v3308_v61  ;;  %v3309_v37 = vmul.f32 %v14447_v36, %v14447_v36  ;;  %3564 = vmatprep.subr.bf16.mxu0 %v12355_v46 }
 0xac4   :  { %v3291_v29 = vpop.xlane.xlu1 %3290  ;;  %11693 = vmatpush3.bf16.msra.mxu1 %v12364_v48 }
 0xac5   :  { %v3298_v3 = vmul.f32 0.0078125, %v3291_v29  ;;  %3318 = vadd.xlane.f32.xlu0 %v3309_v37  ;;  %11724 = vmatprep.subr.bf16.mxu1 %v12949_v0 }
 0xac6   :  { %v3293_v43 = vpop.xlane.xlu0 %3292  ;;  %3565 = vmatpush1.bf16.msra.mxu0 %v12353_v50 }
 0xac7   :  { %v14453_v4 = vsub.f32 %v3278_v54, %v3298_v3  ;;  %v3299_v32 = vmul.f32 0.0078125, %v3293_v43  ;;  %3566 = vmatprep.subr.bf16.mxu0 %v12359_v9 }
 0xac9   :  { %v14458_v42 = vsub.f32 %v3279_v30, %v3299_v32  ;;  %v3310_v47 = vmul.f32 %v14453_v4, %v14453_v4 }
 0xaca   :  { %3567 = vmatpush1.bf16.msra.mxu0 %v12357_v51 }
 0xacb   :  { %3320 = vadd.xlane.f32.xlu1 %v3310_v47  ;;  %v3311_v19 = vmul.f32 %v14458_v42, %v14458_v42  ;;  %3568 = vmatprep.subr.bf16.mxu0 %v12363_v39 }
 0xacd   :  { %3322 = vadd.xlane.f32.xlu0 %v3311_v19 }
 0xace   :  { %3569 = vmatpush1.bf16.msra.mxu0 %v12361_v21 }
 0xacf   :  { %11706 = vmatprep.subr.bf16.mxu0 %v12949_v0 }
 0xb48   :  { %v3313_v2 = vpop.xlane.xlu1 %3312 }
 0xb49   :  { %v3324_v23 = vmul.f32 0.0078125, %v3313_v2 }
 0xb4a   :  { %v3315_v52 = vpop.xlane.xlu0 %3314 }
 0xb4b   :  { %v3330_v35 = vadd.f32 1e-05, %v3324_v23  ;;  %v3325_v41 = vmul.f32 0.0078125, %v3315_v52 }
 0xb4d   :  { %12649 = vrsqrt.f32 %v3330_v35  ;;  %v3331_v53 = vadd.f32 1e-05, %v3325_v41 }
 0xb4f   :  { %12651 = vrsqrt.f32 %v3331_v53 }
 0xb50   :  { %v3317_v59 = vpop.xlane.xlu1 %3316 }
 0xb51   :  { %v3326_v22 = vmul.f32 0.0078125, %v3317_v59 }
 0xb52   :  { %v3319_v54 = vpop.xlane.xlu0 %3318 }
 0xb53   :  { %v3332_v30 = vadd.f32 1e-05, %v3326_v22  ;;  %v3327_v60 = vmul.f32 0.0078125, %v3319_v54 }
 0xb55   :  { %12653 = vrsqrt.f32 %v3332_v30  ;;  %v3333_v16 = vadd.f32 1e-05, %v3327_v60 }
 0xb57   :  { %v12650_v15 = vpop.eup %12649  ;;  %12655 = vrsqrt.f32 %v3333_v16 }
 0xb58   :  { %v3342_v40 = vmul.f32 %v12650_v15, %v14437_v20  ;;  %v3321_v44 = vpop.xlane.xlu1 %3320 }
 0xb59   :  { %v12652_v25 = vpop.eup %12651  ;;  %v3328_v12 = vmul.f32 0.0078125, %v3321_v44 }
 0xb5a   :  { %v3354_v31 = vmul.f32 %v9953_v58, %v3342_v40  ;;  %v3343_v34 = vmul.f32 %v12652_v25, %v14439_v63  ;;  %v3323_v6 = vpop.xlane.xlu0 %3322 }
 0xb5b   :  { %v3334_v18 = vadd.f32 1e-05, %v3328_v12  ;;  %v3329_v33 = vmul.f32 0.0078125, %v3323_v6 }
 0xb5c   :  { %v3355_v13 = vmul.f32 %v9953_v58, %v3343_v34  ;;  %v14530_v61 = vadd.f32 %v9954_v27, %v3354_v31 }
 0xb5d   :  { %12657 = vrsqrt.f32 %v3334_v18  ;;  %v3335_v49 = vadd.f32 1e-05, %v3329_v33 }
 0xb5e   :  { %v14532_v37 = vadd.f32 %v9954_v27, %v3355_v13 }
 0xb5f   :  { %v12654_v20 = vpop.eup %12653  ;;  %12659 = vrsqrt.f32 %v3335_v49 }
 0xb60   :  { %v3372_v29 = vpack.c.bf16 %v14532_v37, %v14530_v61  ;;  %v3344_v63 = vmul.f32 %v12654_v20, %v14445_v24 }
 0xb61   :  { %v12656_v3 = vpop.eup %12655 }
 0xb62   :  { %3587 = vmatmul.mubr.bf16.vlgmr.msra.gmra.mrb[124].mxu0 %v3372_v29  ;;  %11695 = vmatmul.mubr.bf16.vlgmr.msra.gmra.mrb[116].mxu1 %v3372_v29  ;;  %v3345_v43 = vmul.f32 %v12656_v3, %v14447_v36  ;;  %v3356_v32 = vmul.f32 %v9953_v58, %v3344_v63 }
 0xb63   :  { %3596 = vmatprep.mubr.bf16.mxu0 %v12951_v38  ;;  %11698 = vmatprep.mubr.msk.bf16.mxu1 %vm12950_vm0, %v12949_v0 }
 0xb64   :  { %v3357_v10 = vmul.f32 %v9953_v58, %v3345_v43  ;;  %v14541_v47 = vadd.f32 %v9954_v27, %v3356_v32 }
 0xb66   :  { %v14543_v28 = vadd.f32 %v9954_v27, %v3357_v10 }
 0xb67   :  { %v12658_v14 = vpop.eup %12657 }
 0xb68   :  { %v3373_v24 = vpack.c.bf16 %v14543_v28, %v14541_v47  ;;  %v3346_v19 = vmul.f32 %v12658_v14, %v14453_v4  ;;  %v9987_v4 = vld [vmem:[%s17073_s5 + $0x3] sm:$0x7] }
 0xb69   :  { %v12660_v62 = vpop.eup %12659  ;;  %v3422_v46 = vrot.slane %v9987_v4, %v13223_v7  ;;  %v3418_v9 = vrot.slane %v9987_v4, %v13226_v8 }
 0xb6a   :  { %3597 = vmatmul.mubr.bf16.gmra.mrb[128].mxu0 %v3373_v24  ;;  %11699 = vmatmul.mubr.bf16.gmra.mrb[120].mxu1 %v3373_v24  ;;  %v3347_v36 = vmul.f32 %v12660_v62, %v14458_v42  ;;  %v3358_v56 = vmul.f32 %v9953_v58, %v3346_v19  ;;  %v3414_v42 = vrot.slane %v9987_v4, %v13217_v5 }
 0xb6b   :  { %3606 = vmatprep.mubr.bf16.mxu0 %v12951_v38  ;;  %11702 = vmatprep.mubr.msk.bf16.mxu1 %vm12950_vm0, %v12949_v0 }
 0xb6c   :  { %v3359_v1 = vmul.f32 %v9953_v58, %v3347_v36  ;;  %v14552_v17 = vadd.f32 %v9954_v27, %v3358_v56 }
 0xb6e   :  { %v14554_v11 = vadd.f32 %v9954_v27, %v3359_v1 }
 0xb70   :  { %v3374_v26 = vpack.c.bf16 %v14554_v11, %v14552_v17 }
 0xb72   :  { %3607 = vmatmul.mubr.bf16.gmra.mrb[132].mxu0 %v3374_v26  ;;  %11703 = vmatmul.mubr.bf16.gmra.mrb[124].mxu1 %v3374_v26 }
 0xb73   :  { %11712 = vmatprep.mubr.msk.bf16.mxu0 %vm12950_vm0, %v12949_v0  ;;  %11730 = vmatprep.mubr.msk.bf16.mxu1 %vm12950_vm0, %v12949_v0 }
 0xc35   :  { %v3588_v50 = vpop.f32.mrb[124].mxu0  ;;  %v3651_v57 = vpop.f32.mrb[116].mxu1 }
 0xc36   :  { %v3589_v51 = vadd.f32 %v3588_v50, %v3414_v42  ;;  %v3590_v55 = vpop.f32.mrb[125].mxu0  ;;  %v11696_v39 = vpop.f32.mrb[117].mxu1  ;;  %v3652_v2 = vadd.f32 %v3651_v57, %v3422_v46 }
 0xc37   :  { %v3592_v21 = vpop.f32.mrb[126].mxu0  ;;  %v3654_v48 = vpop.f32.mrb[118].mxu1  ;;  %v3591_v53 = vadd.f32 %v3590_v55, %v3418_v9 }
 0xc38   :  { %v3593_v23 = vadd.f32 %v3592_v21, %v3414_v42  ;;  %v3655_v52 = vadd.f32 %v3654_v48, %v3422_v46  ;;  %v3594_v35 = vpop.f32.mrb[127].mxu0  ;;  %v11697_v41 = vpop.f32.mrb[119].mxu1  ;;  %v3674_v22 = vmul.f32 0.17677669, %v3589_v51 }
 0xc39   :  { %v3595_v59 = vadd.f32 %v3594_v35, %v3418_v9 }
 0xc3a   :  { %v3675_v54 = vmul.f32 0.17677669, %v3593_v23  ;;  %v14568_v30 = vpack.c.bf16 %v3655_v52, %v3652_v2 }
 0xc3b   :  { %v3683_v60 = vpack.c.bf16 %v3595_v59, %v3591_v53 }
 0xc3c   :  { %v14570_v16 = vpack.c.bf16 %v3675_v54, %v3674_v22 }
 0xc3d   :  { %3776 = vrot.lane.b32.xlu1 %v3683_v60, %s12952_s27  ;;  %v3598_v15 = vpop.f32.mrb[128].mxu0  ;;  %v3659_v58 = vpop.f32.mrb[120].mxu1  ;;  %v3699_v40 = vsel %vm507_vm2, %v3683_v60, 0 }
 0xc3e   :  { %v3599_v44 = vadd.f32 %v3598_v15, %v3414_v42  ;;  %v3600_v25 = vpop.f32.mrb[129].mxu0  ;;  %v11700_v12 = vpop.f32.mrb[121].mxu1  ;;  %11707 = vmatpush3.bf16.xpose.msra.mxu0 %v3699_v40  ;;  %v3660_v6 = vadd.f32 %v3659_v58, %v3422_v46 }
 0xc3f   :  { %v3602_v31 = vpop.f32.mrb[130].mxu0  ;;  %v3662_v34 = vpop.f32.mrb[122].mxu1  ;;  %11708 = vmatprep.subr.bf16.mxu0 %v12949_v0  ;;  %v3601_v49 = vadd.f32 %v3600_v25, %v3418_v9 }
 0xc40   :  { %v3603_v18 = vadd.f32 %v3602_v31, %v3414_v42  ;;  %v3663_v33 = vadd.f32 %v3662_v34, %v3422_v46  ;;  %v3604_v27 = vpop.f32.mrb[131].mxu0  ;;  %v11701_v13 = vpop.f32.mrb[123].mxu1  ;;  %v3676_v29 = vmul.f32 0.17677669, %v3599_v44 }
 0xc41   :  { %v3605_v20 = vadd.f32 %v3604_v27, %v3418_v9 }
 0xc42   :  { %v3677_v63 = vmul.f32 0.17677669, %v3603_v18  ;;  %v14575_v3 = vpack.c.bf16 %v3663_v33, %v3660_v6 }
 0xc43   :  { %v3684_v43 = vpack.c.bf16 %v3605_v20, %v3601_v49 }
 0xc44   :  { %v3681_v32 = vpack.c.bf16 %v3677_v63, %v3676_v29 }
 0xc45   :  { %3778 = vrot.lane.b32.xlu0 %v3684_v43, %s12952_s27  ;;  %v3608_v10 = vpop.f32.mrb[132].mxu0  ;;  %v3667_v14 = vpop.f32.mrb[124].mxu1  ;;  %v3702_v24 = vsel %vm507_vm2, %v3684_v43, 0 }
 0xc46   :  { %v3609_v19 = vadd.f32 %v3608_v10, %v3414_v42  ;;  %v3610_v62 = vpop.f32.mrb[133].mxu0  ;;  %v11704_v36 = vpop.f32.mrb[125].mxu1  ;;  %11709 = vmatpush3.bf16.xpose.msra.mxu0 %v3702_v24  ;;  %v3668_v26 = vadd.f32 %v3667_v14, %v3422_v46  ;;  %v12901_v24 = vld [vmem:[%s17074_s3] sm:$0xff] }
 0xc47   :  { %v3612_v56 = vpop.f32.mrb[134].mxu0  ;;  %v3670_v1 = vpop.f32.mrb[126].mxu1  ;;  %11710 = vmatprep.subr.bf16.mxu0 %v12949_v0  ;;  %v3611_v55 = vadd.f32 %v3610_v62, %v3418_v9 }
 0xc48   :  { %v3613_v4 = vadd.f32 %v3612_v56, %v3414_v42  ;;  %v3671_v50 = vadd.f32 %v3670_v1, %v3422_v46  ;;  %v3614_v57 = vpop.f32.mrb[135].mxu0  ;;  %v11705_v51 = vpop.f32.mrb[127].mxu1  ;;  %v3678_v21 = vmul.f32 0.17677669, %v3609_v19  ;;  %v12902_v56 = vld [vmem:[%s17074_s3 + $0x8] sm:$0xff] }
 0xc49   :  { %v3615_v39 = vadd.f32 %v3614_v57, %v3418_v9  ;;  %3767 = vrot.lane.b32.xlu0 %v14570_v16, %s12952_s27  ;;  %v12903_v51 = vld [vmem:[%s17074_s3 + $0x10] sm:$0xff] }
 0xc4a   :  { %v3679_v48 = vmul.f32 0.17677669, %v3613_v4  ;;  %v14582_v2 = vpack.c.bf16 %v3671_v50, %v3668_v26 }
 0xc4b   :  { %v3685_v23 = vpack.c.bf16 %v3615_v39, %v3611_v55 }
 0xc4c   :  { %v3682_v52 = vpack.c.bf16 %v3679_v48, %v3678_v21  ;;  %v12904_v48 = vld [vmem:[%s17074_s3 + $0x18] sm:$0xff] }
 0xc4d   :  { %3865 = vrot.lane.b32.xlu0 %v3684_v43, %s12953_s23  ;;  %3780 = vrot.lane.b32.xlu1 %v3685_v23, %s12952_s27  ;;  %v3705_v42 = vsel %vm507_vm2, %v3685_v23, 0 }
 0xc4e   :  { %11711 = vmatpush3.bf16.xpose.msra.mxu0 %v3705_v42 }
 0xc4f   :  { %11742 = vmatprep.subr.bf16.mxu0 %v12949_v0 }
 0xc51   :  { %3952 = vrot.lane.b32.xlu0 %v3684_v43, %s12954_s28  ;;  %3863 = vrot.lane.b32.xlu1 %v3683_v60, %s12953_s23 }
 0xc55   :  { %3950 = vrot.lane.b32.xlu1 %v3683_v60, %s12954_s28  ;;  %11713 = vmatmul.mubr.msk.bf16.vlgmr.msra.gmra.mrb[136].mxu0 %vm507_vm2, %v14570_v16 }
 0xc56   :  { %3771 = vrot.lane.b32.xlu0 %v3682_v52, %s12952_s27  ;;  %11716 = vmatprep.mubr.msk.bf16.mxu0 %vm12950_vm0, %v12949_v0 }
 0xc59   :  { %3769 = vrot.lane.b32.xlu1 %v3681_v32, %s12952_s27 }
 0xc5a   :  { %3857 = vrot.lane.b32.xlu0 %v14570_v16, %s12953_s23 }
 0xc5d   :  { %3867 = vrot.lane.b32.xlu1 %v3685_v23, %s12953_s23  ;;  %11717 = vmatmul.mubr.msk.bf16.gmra.mrb[140].mxu0 %vm507_vm2, %v3681_v32 }
 0xc5e   :  { %3859 = vrot.lane.b32.xlu0 %v3681_v32, %s12953_s23  ;;  %11720 = vmatprep.mubr.msk.bf16.mxu0 %vm12950_vm0, %v12949_v0 }
 0xc61   :  { %3954 = vrot.lane.b32.xlu1 %v3685_v23, %s12954_s28 }
 0xc62   :  { %3861 = vrot.lane.b32.xlu0 %v3682_v52, %s12953_s23 }
 0xc65   :  { %3944 = vrot.lane.b32.xlu1 %v14570_v16, %s12954_s28  ;;  %11721 = vmatmul.mubr.msk.bf16.gmra.mrb[144].mxu0 %vm507_vm2, %v3682_v52 }
 0xc66   :  { %4402 = vrot.lane.b32.xlu0 %v14575_v3, %s12952_s27  ;;  %11748 = vmatprep.mubr.msk.bf16.mxu0 %vm12950_vm0, %v12949_v0 }
 0xc69   :  { %3946 = vrot.lane.b32.xlu1 %v3681_v32, %s12954_s28 }
 0xc6d   :  { %3948 = vrot.lane.b32.xlu1 %v3682_v52, %s12954_s28 }
 0xc71   :  { %4400 = vrot.lane.b32.xlu1 %v14568_v30, %s12952_s27 }
 0xc75   :  { %4404 = vrot.lane.b32.xlu1 %v14582_v2, %s12952_s27 }
 0xc79   :  { %4475 = vrot.lane.b32.xlu1 %v14568_v30, %s12953_s23 }
 0xcaf   :  { %v3777_v46 = vpop.permute.xlu1 %3776 }
 0xcb0   :  { %v3792_v9 = vsel %vm507_vm2, %v3777_v46, 0 }
 0xcb1   :  { %11725 = vmatpush3.bf16.xpose.msra.mxu1 %v3792_v9 }
 0xcb2   :  { %11726 = vmatprep.subr.bf16.mxu1 %v12949_v0 }
 0xcb7   :  { %v3779_v35 = vpop.permute.xlu0 %3778 }
 0xcb8   :  { %v3795_v41 = vsel %vm507_vm2, %v3779_v35, 0  ;;  %v12905_v35 = vld [vmem:[%s17074_s3 + $0x20] sm:$0xff] }
 0xcb9   :  { %11727 = vmatpush3.bf16.xpose.msra.mxu1 %v3795_v41 }
 0xcba   :  { %11728 = vmatprep.subr.bf16.mxu1 %v12949_v0 }
 0xcbb   :  { %v3768_v53 = vpop.permute.xlu0 %3767 }
 0xcbf   :  { %v3781_v59 = vpop.permute.xlu1 %3780  ;;  %v3866_v60 = vpop.permute.xlu0 %3865 }
 0xcc0   :  { %v3798_v22 = vsel %vm507_vm2, %v3781_v59, 0  ;;  %v3882_v25 = vsel %vm507_vm2, %v3866_v60, 0 }
 0xcc1   :  { %11729 = vmatpush3.bf16.xpose.msra.mxu1 %v3798_v22  ;;  %v12906_v22 = vld [vmem:[%s17074_s3 + $0x28] sm:$0xff] }
 0xcc2   :  { %11760 = vmatprep.subr.bf16.mxu1 %v12949_v0 }
 0xcc3   :  { %v3864_v54 = vpop.permute.xlu1 %3863  ;;  %v3953_v40 = vpop.permute.xlu0 %3952 }
 0xcc4   :  { %v3879_v16 = vsel %vm507_vm2, %v3864_v54, 0  ;;  %v3969_v31 = vsel %vm507_vm2, %v3953_v40, 0  ;;  %v12907_v40 = vld [vmem:[%s17074_s3 + $0x30] sm:$0xff] }
 0xcc5   :  { %11743 = vmatpush3.bf16.xpose.msra.mxu0 %v3879_v16 }
 0xcc6   :  { %11744 = vmatprep.subr.bf16.mxu0 %v12949_v0 }
 0xcc7   :  { %v3951_v15 = vpop.permute.xlu1 %3950 }
 0xcc8   :  { %v3966_v58 = vsel %vm507_vm2, %v3951_v15, 0  ;;  %11731 = vmatmul.mubr.msk.bf16.vlgmr.msra.gmra.mrb[128].mxu1 %vm507_vm2, %v3768_v53  ;;  %v3772_v34 = vpop.permute.xlu0 %3771 }
 0xcc9   :  { %11761 = vmatpush3.bf16.xpose.msra.mxu1 %v3966_v58  ;;  %11734 = vmatprep.mubr.msk.bf16.mxu1 %vm12950_vm0, %v12949_v0 }
 0xcca   :  { %11762 = vmatprep.subr.bf16.mxu1 %v12949_v0 }
 0xccb   :  { %v3770_v44 = vpop.permute.xlu1 %3769 }
 0xccc   :  { %v3858_v33 = vpop.permute.xlu0 %3857 }
 0xccd   :  { %11745 = vmatpush3.bf16.xpose.msra.mxu0 %v3882_v25 }
 0xcce   :  { %11746 = vmatprep.subr.bf16.mxu0 %v12949_v0 }
 0xccf   :  { %v3868_v12 = vpop.permute.xlu1 %3867 }
 0xcd0   :  { %11735 = vmatmul.mubr.msk.bf16.gmra.mrb[132].mxu1 %vm507_vm2, %v3770_v44  ;;  %v3885_v18 = vsel %vm507_vm2, %v3868_v12, 0  ;;  %v3860_v20 = vpop.permute.xlu0 %3859 }
 0xcd1   :  { %11763 = vmatpush3.bf16.xpose.msra.mxu1 %v3969_v31  ;;  %11738 = vmatprep.mubr.msk.bf16.mxu1 %vm12950_vm0, %v12949_v0  ;;  %v12908_v31 = vld [vmem:[%s17074_s3 + $0x38] sm:$0xff] }
 0xcd2   :  { %11764 = vmatprep.subr.bf16.mxu1 %v12949_v0 }
 0xcd3   :  { %v3955_v6 = vpop.permute.xlu1 %3954 }
 0xcd4   :  { %v3972_v13 = vsel %vm507_vm2, %v3955_v6, 0  ;;  %v3862_v63 = vpop.permute.xlu0 %3861 }
 0xcd5   :  { %11747 = vmatpush3.bf16.xpose.msra.mxu0 %v3885_v18 }
 0xcd6   :  { %11778 = vmatprep.subr.bf16.mxu0 %v12949_v0 }
 0xcd7   :  { %v3945_v27 = vpop.permute.xlu1 %3944 }
 0xcd8   :  { %11739 = vmatmul.mubr.msk.bf16.gmra.mrb[136].mxu1 %vm507_vm2, %v3772_v34  ;;  %v4403_v32 = vpop.permute.xlu0 %4402 }
 0xcd9   :  { %11765 = vmatpush3.bf16.xpose.msra.mxu1 %v3972_v13  ;;  %11766 = vmatprep.mubr.msk.bf16.mxu1 %vm12950_vm0, %v12949_v0 }
 0xcda   :  { %11796 = vmatprep.subr.bf16.mxu1 %v12949_v0 }
 0xcdb   :  { %v3947_v49 = vpop.permute.xlu1 %3946 }
 0xcdc   :  { %11749 = vmatmul.mubr.msk.bf16.vlgmr.msra.gmra.mrb[148].mxu0 %vm507_vm2, %v3858_v33 }
 0xcdd   :  { %11779 = vmatpush3.bf16.msra.mxu0 %v14568_v30  ;;  %11752 = vmatprep.mubr.msk.bf16.mxu0 %vm12950_vm0, %v12949_v0 }
 0xcde   :  { %11780 = vmatprep.subr.bf16.mxu0 %v12949_v0 }
 0xcdf   :  { %v3949_v29 = vpop.permute.xlu1 %3948 }
 0xce0   :  { %11767 = vmatmul.mubr.msk.bf16.vlgmr.msra.gmra.mrb[140].mxu1 %vm507_vm2, %v3945_v27 }
 0xce1   :  { %11781 = vmatpush3.bf16.msra.mxu0 %v14575_v3  ;;  %11770 = vmatprep.mubr.msk.bf16.mxu1 %vm12950_vm0, %v12949_v0 }
 0xce2   :  { %11782 = vmatprep.subr.bf16.mxu0 %v12949_v0 }
 0xce3   :  { %v4401_v43 = vpop.permute.xlu1 %4400 }
 0xce4   :  { %11753 = vmatmul.mubr.msk.bf16.gmra.mrb[152].mxu0 %vm507_vm2, %v3860_v20  ;;  %11797 = vmatpush3.bf16.msra.mxu1 %v4401_v43 }
 0xce5   :  { %11783 = vmatpush3.bf16.msra.mxu0 %v14582_v2  ;;  %11798 = vmatprep.subr.bf16.mxu1 %v12949_v0 }
 0xce6   :  { %11756 = vmatprep.mubr.msk.bf16.mxu0 %vm12950_vm0, %v12949_v0  ;;  %11814 = vmatprep.subr.bf16.mxu0 %v12949_v0 }
 0xce7   :  { %v4405_v10 = vpop.permute.xlu1 %4404 }
 0xce8   :  { %11771 = vmatmul.mubr.msk.bf16.gmra.mrb[144].mxu1 %vm507_vm2, %v3947_v49 }
 0xce9   :  { %11799 = vmatpush3.bf16.msra.mxu1 %v4403_v32  ;;  %11774 = vmatprep.mubr.msk.bf16.mxu1 %vm12950_vm0, %v12949_v0 }
 0xcea   :  { %11800 = vmatprep.subr.bf16.mxu1 %v12949_v0 }
 0xcec   :  { %11757 = vmatmul.mubr.msk.bf16.gmra.mrb[156].mxu0 %vm507_vm2, %v3862_v63 }
 0xced   :  { %11801 = vmatpush3.bf16.msra.mxu1 %v4405_v10  ;;  %11784 = vmatprep.mubr.msk.bf16.mxu0 %vm12950_vm0, %v12949_v0 }
 0xcee   :  { %11832 = vmatprep.subr.bf16.mxu1 %v12949_v0 }
 0xcf0   :  { %11775 = vmatmul.mubr.msk.bf16.gmra.mrb[148].mxu1 %vm507_vm2, %v3949_v29 }
 0xcf1   :  { %11802 = vmatprep.mubr.msk.bf16.mxu1 %vm12950_vm0, %v12949_v0 }
 0xd28   :  { %v3741_v14 = vpop.f32.mrb[136].mxu0 }
 0xd29   :  { %v14678_v19 = vadd.f32 %v12901_v24, %v3741_v14  ;;  %v11714_v62 = vpop.f32.mrb[137].mxu0  ;;  %v12909_v14 = vld [vmem:[%s17074_s3 + $0x60] sm:$0xff] }
 0xd2a   :  { %v3744_v36 = vpop.f32.mrb[138].mxu0 }
 0xd2b   :  { %v14683_v1 = vadd.f32 %v12902_v56, %v3744_v36  ;;  %v11715_v26 = vpop.f32.mrb[139].mxu0  ;;  %v4055_v4 = vsel %vm874_vm3, %v14678_v19, -inf  ;;  %v12910_v56 = vld [vmem:[%s17074_s3 + $0x40] sm:$0xff] }
 0xd2c   :  { %4056 = vmax.xlane.f32.xlu0 %v4055_v4  ;;  %v12911_v4 = vld [vmem:[%s17074_s3 + $0x68] sm:$0xff] }
 0xd2d   :  { %v4058_v50 = vsel %vm874_vm3, %v14683_v1, -inf }
 0xd2e   :  { %4059 = vmax.xlane.f32.xlu1 %v4058_v50 }
 0xd30   :  { %v3749_v57 = vpop.f32.mrb[140].mxu0 }
 0xd31   :  { %v14692_v55 = vadd.f32 %v12903_v51, %v3749_v57  ;;  %v11718_v39 = vpop.f32.mrb[141].mxu0 }
 0xd32   :  { %v3752_v21 = vpop.f32.mrb[142].mxu0 }
 0xd33   :  { %v14697_v23 = vadd.f32 %v12904_v48, %v3752_v21  ;;  %v11719_v52 = vpop.f32.mrb[143].mxu0  ;;  %v4061_v42 = vsel %vm874_vm3, %v14692_v55, -inf  ;;  %v12912_v21 = vld [vmem:[%s17074_s3 + $0x48] sm:$0xff] }
 0xd34   :  { %4062 = vmax.xlane.f32.xlu1 %v4061_v42 }
 0xd35   :  { %v4064_v46 = vsel %vm874_vm3, %v14697_v23, -inf }
 0xd36   :  { %4065 = vmax.xlane.f32.xlu0 %v4064_v46 }
 0xd38   :  { %v3757_v9 = vpop.f32.mrb[144].mxu0 }
 0xd39   :  { %v14706_v41 = vadd.f32 %v12905_v35, %v3757_v9  ;;  %v11722_v53 = vpop.f32.mrb[145].mxu0 }
 0xd3a   :  { %v3760_v59 = vpop.f32.mrb[146].mxu0 }
 0xd3b   :  { %v14711_v54 = vadd.f32 %v12906_v22, %v3760_v59  ;;  %v11723_v60 = vpop.f32.mrb[147].mxu0  ;;  %v4067_v16 = vsel %vm874_vm3, %v14706_v41, -inf  ;;  %v12913_v59 = vld [vmem:[%s17074_s3 + $0x70] sm:$0xff] }
 0xd3c   :  { %4068 = vmax.xlane.f32.xlu1 %v4067_v16 }
 0xd3d   :  { %v4070_v15 = vsel %vm874_vm3, %v14711_v54, -inf }
 0xd3e   :  { %4071 = vmax.xlane.f32.xlu0 %v4070_v15 }
 0xd9b   :  { %v3834_v58 = vpop.f32.mrb[128].mxu1 }
 0xd9c   :  { %v14720_v44 = vadd.f32 %v12907_v40, %v3834_v58  ;;  %v11732_v25 = vpop.f32.mrb[129].mxu1  ;;  %v12914_v58 = vld [vmem:[%s17074_s3 + $0x50] sm:$0xff] }
 0xd9d   :  { %v3837_v12 = vpop.f32.mrb[130].mxu1  ;;  %v12915_v25 = vld [vmem:[%s17074_s3 + $0x78] sm:$0xff] }
 0xd9e   :  { %v14725_v34 = vadd.f32 %v12908_v31, %v3837_v12  ;;  %v11733_v6 = vpop.f32.mrb[131].mxu1  ;;  %v4073_v18 = vsel %vm874_vm3, %v14720_v44, -inf }
 0xd9f   :  { %4074 = vmax.xlane.f32.xlu0 %v4073_v18 }
 0xda0   :  { %v4076_v33 = vsel %vm874_vm3, %v14725_v34, -inf }
 0xda3   :  { %4077 = vmax.xlane.f32.xlu0 %v4076_v33  ;;  %v3842_v27 = vpop.f32.mrb[132].mxu1  ;;  %v12916_v33 = vld [vmem:[%s17074_s3 + $0x58] sm:$0xff] }
 0xda4   :  { %v11736_v13 = vpop.f32.mrb[133].mxu1  ;;  %v14739_v26 = vadd.f32 %v12910_v56, %v3842_v27  ;;  %v12918_v56 = vld [vmem:[%s17074_s3 + $0x90] sm:$0xff] }
 0xda5   :  { %v3845_v49 = vpop.f32.mrb[134].mxu1 }
 0xda6   :  { %v11737_v20 = vpop.f32.mrb[135].mxu1  ;;  %v14751_v48 = vadd.f32 %v12912_v21, %v3845_v49  ;;  %v4079_v35 = vsel %vm874_vm3, %v14739_v26, -inf }
 0xda8   :  { %v4082_v16 = vsel %vm874_vm3, %v14751_v48, -inf }
 0xdab   :  { %v3850_v29 = vpop.f32.mrb[136].mxu1 }
 0xdac   :  { %v11740_v63 = vpop.f32.mrb[137].mxu1  ;;  %v14767_v40 = vadd.f32 %v12914_v58, %v3850_v29 }
 0xdad   :  { %v3853_v43 = vpop.f32.mrb[138].mxu1 }
 0xdae   :  { %v11741_v32 = vpop.f32.mrb[139].mxu1  ;;  %v14779_v27 = vadd.f32 %v12916_v33, %v3853_v43  ;;  %v4085_v63 = vsel %vm874_vm3, %v14767_v40, -inf  ;;  %v14833_v33 = vpop.permute.xlu1 %4475 }
 0xdaf   :  { %v3921_v10 = vpop.f32.mrb[148].mxu0 }
 0xdb0   :  { %v14734_v24 = vadd.f32 %v12909_v14, %v3921_v10  ;;  %v11750_v62 = vpop.f32.mrb[149].mxu0  ;;  %v12917_v10 = vld [vmem:[%s17074_s3 + $0x80] sm:$0xff] }
 0xdb1   :  { %v3924_v36 = vpop.f32.mrb[150].mxu0  ;;  %v4088_v62 = vsel %vm874_vm3, %v14779_v27, -inf }
 0xdb2   :  { %v14744_v50 = vadd.f32 %v12911_v4, %v3924_v36  ;;  %v11751_v57 = vpop.f32.mrb[151].mxu0  ;;  %v4091_v51 = vsel %vm874_vm3, %v14734_v24, -inf }
 0xdb3   :  { %4092 = vmax.xlane.f32.xlu1 %v4091_v51  ;;  %v4008_v39 = vpop.f32.mrb[140].mxu1  ;;  %v12919_v57 = vld [vmem:[%s17074_s3 + $0x88] sm:$0xff] }
 0xdb4   :  { %v11768_v52 = vpop.f32.mrb[141].mxu1  ;;  %v4094_v42 = vsel %vm874_vm3, %v14744_v50, -inf  ;;  %v14795_v4 = vadd.f32 %v12918_v56, %v4008_v39 }
 0xdb5   :  { %4095 = vmax.xlane.f32.xlu0 %v4094_v42  ;;  %v4011_v46 = vpop.f32.mrb[142].mxu1 }
 0xdb6   :  { %v11769_v9 = vpop.f32.mrb[143].mxu1  ;;  %v4109_v58 = vsel %vm874_vm3, %v14795_v4, -inf }
 0xdb7   :  { %4080 = vmax.xlane.f32.xlu1 %v4079_v35  ;;  %v3929_v53 = vpop.f32.mrb[152].mxu0  ;;  %v12920_v9 = vld [vmem:[%s17074_s3 + $0x98] sm:$0xff] }
 0xdb8   :  { %v14760_v22 = vadd.f32 %v12913_v59, %v3929_v53  ;;  %v11754_v60 = vpop.f32.mrb[153].mxu0  ;;  %v14807_v35 = vadd.f32 %v12920_v9, %v4011_v46  ;;  %v12922_v46 = vld [vmem:[%s17074_s3 + $0xa8] sm:$0xff] }
 0xdb9   :  { %4083 = vmax.xlane.f32.xlu0 %v4082_v16  ;;  %v3932_v15 = vpop.f32.mrb[154].mxu0  ;;  %v12921_v60 = vld [vmem:[%s17074_s3 + $0xa0] sm:$0xff] }
 0xdba   :  { %v14772_v12 = vadd.f32 %v12915_v25, %v3932_v15  ;;  %v11755_v31 = vpop.f32.mrb[155].mxu0  ;;  %v4097_v6 = vsel %vm874_vm3, %v14760_v22, -inf }
 0xdbb   :  { %4098 = vmax.xlane.f32.xlu1 %v4097_v6  ;;  %v4016_v18 = vpop.f32.mrb[144].mxu1  ;;  %v4112_v31 = vsel %vm874_vm3, %v14807_v35, -inf }
 0xdbc   :  { %v11772_v13 = vpop.f32.mrb[145].mxu1  ;;  %v4100_v49 = vsel %vm874_vm3, %v14772_v12, -inf  ;;  %v14814_v16 = vadd.f32 %v12921_v60, %v4016_v18 }
 0xdbd   :  { %4101 = vmax.xlane.f32.xlu0 %v4100_v49  ;;  %v4019_v20 = vpop.f32.mrb[146].mxu1  ;;  %v4057_v13 = vpop.xlane.xlu0 %4056 }
 0xdbe   :  { %v11773_v29 = vpop.f32.mrb[147].mxu1  ;;  %v14821_v25 = vadd.f32 %v12922_v46, %v4019_v20  ;;  %v4115_v6 = vsel %vm874_vm3, %v14814_v16, -inf  ;;  %v4060_v49 = vpop.xlane.xlu1 %4059 }
 0xdbf   :  { %4086 = vmax.xlane.f32.xlu1 %v4085_v63  ;;  %v3937_v32 = vpop.f32.mrb[156].mxu0  ;;  %v4128_v20 = vsub.f32 %v14683_v1, %v4060_v49  ;;  %v12924_v1 = vld [vmem:[%s17074_s3 + $0xb8] sm:$0xff] }
 0xdc0   :  { %v14788_v14 = vadd.f32 %v12917_v10, %v3937_v32  ;;  %v11758_v43 = vpop.f32.mrb[157].mxu0  ;;  %v4118_v18 = vsel %vm874_vm3, %v14821_v25, -inf }
 0xdc1   :  { %4089 = vmax.xlane.f32.xlu0 %v4088_v62  ;;  %v3940_v36 = vpop.f32.mrb[158].mxu0  ;;  %v4153_v63 = vmul.f32 1.442695, %v4128_v20 }
 0xdc2   :  { %v14800_v51 = vadd.f32 %v12919_v57, %v3940_v36  ;;  %v11759_v21 = vpop.f32.mrb[159].mxu0  ;;  %v4103_v52 = vsel %vm874_vm3, %v14788_v14, -inf  ;;  %v12923_v36 = vld [vmem:[%s17074_s3 + $0xb0] sm:$0xff]  ;;  %v4063_v60 = vpop.xlane.xlu1 %4062 }
 0xdc3   :  { %4104 = vmax.xlane.f32.xlu1 %v4103_v52  ;;  %v4024_v42 = vpop.f32.mrb[148].mxu1  ;;  %v4066_v29 = vpop.xlane.xlu0 %4065  ;;  %12661 = vpow2.f32 %v4153_v63 }
 0xdc4   :  { %v11776_v39 = vpop.f32.mrb[149].mxu1  ;;  %v4106_v53 = vsel %vm874_vm3, %v14800_v51, -inf  ;;  %v4130_v32 = vsub.f32 %v14697_v23, %v4066_v29 }
 0xdc5   :  { %4107 = vmax.xlane.f32.xlu0 %v4106_v53  ;;  %v4027_v59 = vpop.f32.mrb[150].mxu1 }
 0xdc6   :  { %v11777_v15 = vpop.f32.mrb[151].mxu1  ;;  %v4157_v43 = vmul.f32 1.442695, %v4130_v32  ;;  %v14846_v57 = vadd.f32 %v12924_v1, %v4027_v59  ;;  %v4127_v59 = vsub.f32 %v14678_v19, %v4057_v13 }
 0xdc7   :  { %4110 = vmax.xlane.f32.xlu1 %v4109_v58  ;;  %v4129_v58 = vsub.f32 %v14692_v55, %v4063_v60 }
 0xdc8   :  { %12663 = vpow2.f32 %v4157_v43  ;;  %v4151_v15 = vmul.f32 1.442695, %v4127_v59 }
 0xdc9   :  { %4113 = vmax.xlane.f32.xlu0 %v4112_v31  ;;  %v4069_v46 = vpop.xlane.xlu1 %4068  ;;  %v4155_v31 = vmul.f32 1.442695, %v4129_v58 }
 0xdcb   :  { %4116 = vmax.xlane.f32.xlu1 %v4115_v6  ;;  %v4072_v10 = vpop.xlane.xlu0 %4071  ;;  %v4131_v6 = vsub.f32 %v14706_v41, %v4069_v46 }
 0xdcc   :  { %v4132_v62 = vsub.f32 %v14711_v54, %v4072_v10  ;;  %v4124_v54 = vsel %vm874_vm3, %v14846_v57, -inf }
 0xdcd   :  { %4119 = vmax.xlane.f32.xlu0 %v4118_v18  ;;  %v14852_v21 = vpop.eup %12661  ;;  %v4159_v18 = vmul.f32 1.442695, %v4131_v6 }
 0xdce   :  { %v4161_v56 = vmul.f32 1.442695, %v4132_v62  ;;  %v4202_v52 = vsel %vm874_vm3, %v14852_v21, 0.0 }
 0xdd0   :  { %12665 = vpow2.f32 %v4161_v56 }
 0xdd1   :  { %12667 = vpow2.f32 %v4151_v15 }
 0xdd2   :  { %12669 = vpow2.f32 %v4155_v31 }
 0xdd3   :  { %12671 = vpow2.f32 %v4159_v18 }
 0xddc   :  { %4477 = vrot.lane.b32.xlu1 %v14575_v3, %s12953_s23 }
 0xde3   :  { %4550 = vrot.lane.b32.xlu0 %v14568_v30, %s12954_s28  ;;  %v14841_v30 = vadd.f32 %v12923_v36, %v4024_v42  ;;  %v14856_v42 = vpop.eup %12663 }
 0xde4   :  { %v4208_v9 = vsel %vm874_vm3, %v14856_v42, 0.0  ;;  %v14860_v39 = vpop.eup %12665 }
 0xde5   :  { %v4121_v23 = vsel %vm874_vm3, %v14841_v30, -inf  ;;  %v4214_v53 = vsel %vm874_vm3, %v14860_v39, 0.0 }
 0xe00   :  { %4122 = vmax.xlane.f32.xlu1 %v4121_v23 }
 0xe02   :  { %4125 = vmax.xlane.f32.xlu0 %v4124_v54 }
 0xe06   :  { %4203 = vadd.xlane.f32.xlu0 %v4202_v52 }
 0xe0a   :  { %4209 = vadd.xlane.f32.xlu0 %v4208_v9 }
 0xe0e   :  { %4215 = vadd.xlane.f32.xlu0 %v4214_v53 }
 0xe11   :  { %4552 = vrot.lane.b32.xlu1 %v14575_v3, %s12954_s28  ;;  %v14870_v3 = vpop.eup %12667 }
 0xe12   :  { %v4199_v55 = vsel %vm874_vm3, %v14870_v3, 0.0  ;;  %v14875_v32 = vpop.eup %12669 }
 0xe13   :  { %v4205_v41 = vsel %vm874_vm3, %v14875_v32, 0.0 }
 0xe2c   :  { %v4075_v49 = vpop.xlane.xlu0 %4074 }
 0xe2d   :  { %v4133_v20 = vsub.f32 %v14720_v44, %v4075_v49  ;;  %v14879_v44 = vpop.eup %12671 }
 0xe2e   :  { %v4211_v10 = vsel %vm874_vm3, %v14879_v44, 0.0 }
 0xe2f   :  { %v4163_v29 = vmul.f32 1.442695, %v4133_v20 }
 0xe30   :  { %v4078_v63 = vpop.xlane.xlu0 %4077 }
 0xe31   :  { %v4134_v19 = vsub.f32 %v14725_v34, %v4078_v63  ;;  %12673 = vpow2.f32 %v4163_v29 }
 0xe33   :  { %v4165_v13 = vmul.f32 1.442695, %v4134_v19 }
 0xe35   :  { %12675 = vpow2.f32 %v4165_v13  ;;  %4200 = vadd.xlane.f32.xlu1 %v4199_v55 }
 0xe39   :  { %4206 = vadd.xlane.f32.xlu1 %v4205_v41 }
 0xe3b   :  { %v14883_v43 = vpop.eup %12673 }
 0xe3c   :  { %v4217_v56 = vsel %vm874_vm3, %v14883_v43, 0.0 }
 0xe3d   :  { %4212 = vadd.xlane.f32.xlu1 %v4211_v10 }
 0xe3f   :  { %v14885_v34 = vpop.eup %12675 }
 0xe40   :  { %v4093_v62 = vpop.xlane.xlu1 %4092  ;;  %v4220_v36 = vsel %vm874_vm3, %v14885_v34, 0.0 }
 0xe41   :  { %v4139_v1 = vsub.f32 %v14734_v24, %v4093_v62  ;;  %4221 = vadd.xlane.f32.xlu0 %v4220_v36  ;;  %4218 = vadd.xlane.f32.xlu1 %v4217_v56 }
 0xe42   :  { %v4096_v23 = vpop.xlane.xlu0 %4095 }
 0xe43   :  { %v4175_v54 = vmul.f32 1.442695, %v4139_v1  ;;  %v4140_v52 = vsub.f32 %v14744_v50, %v4096_v23 }
 0xe44   :  { %v4081_v9 = vpop.xlane.xlu1 %4080 }
 0xe45   :  { %12677 = vpow2.f32 %v4175_v54  ;;  %v4177_v53 = vmul.f32 1.442695, %v4140_v52  ;;  %v4135_v59 = vsub.f32 %v14739_v26, %v4081_v9 }
 0xe46   :  { %v4084_v60 = vpop.xlane.xlu0 %4083 }
 0xe47   :  { %12679 = vpow2.f32 %v4177_v53  ;;  %v4167_v15 = vmul.f32 1.442695, %v4135_v59  ;;  %v4136_v58 = vsub.f32 %v14751_v48, %v4084_v60 }
 0xe48   :  { %v4099_v46 = vpop.xlane.xlu1 %4098 }
 0xe49   :  { %12681 = vpow2.f32 %v4167_v15  ;;  %v4141_v24 = vsub.f32 %v14760_v22, %v4099_v46  ;;  %v4169_v6 = vmul.f32 1.442695, %v4136_v58 }
 0xe4a   :  { %v4102_v31 = vpop.xlane.xlu0 %4101 }
 0xe4b   :  { %v4179_v18 = vmul.f32 1.442695, %v4141_v24  ;;  %v4142_v49 = vsub.f32 %v14772_v12, %v4102_v31 }
 0xe4c   :  { %v4087_v50 = vpop.xlane.xlu1 %4086 }
 0xe4d   :  { %12683 = vpow2.f32 %v4179_v18  ;;  %v4137_v20 = vsub.f32 %v14767_v40, %v4087_v50  ;;  %v4181_v63 = vmul.f32 1.442695, %v4142_v49 }
 0xe4e   :  { %v4090_v29 = vpop.xlane.xlu0 %4089  ;;  %12685 = vpow2.f32 %v4169_v6 }
 0xe4f   :  { %v14898_v26 = vpop.eup %12677  ;;  %v4171_v19 = vmul.f32 1.442695, %v4137_v20  ;;  %v4138_v48 = vsub.f32 %v14779_v27, %v4090_v29 }
 0xe50   :  { %v4105_v13 = vpop.xlane.xlu1 %4104  ;;  %v4235_v22 = vsel %vm874_vm3, %v14898_v26, 0.0 }
 0xe51   :  { %v14903_v55 = vpop.eup %12679  ;;  %12687 = vpow2.f32 %v4171_v19  ;;  %v4143_v12 = vsub.f32 %v14788_v14, %v4105_v13  ;;  %4236 = vadd.xlane.f32.xlu1 %v4235_v22  ;;  %v4173_v62 = vmul.f32 1.442695, %v4138_v48 }
 0xe52   :  { %v4108_v41 = vpop.xlane.xlu0 %4107  ;;  %v4238_v40 = vsel %vm874_vm3, %v14903_v55, 0.0  ;;  %12689 = vpow2.f32 %v4181_v63 }
 0xe53   :  { %v14908_v10 = vpop.eup %12681  ;;  %v4183_v36 = vmul.f32 1.442695, %v4143_v12  ;;  %v4144_v27 = vsub.f32 %v14800_v51, %v4108_v41  ;;  %4239 = vadd.xlane.f32.xlu0 %v4238_v40 }
 0xe54   :  { %v4111_v56 = vpop.xlane.xlu1 %4110  ;;  %v4223_v1 = vsel %vm874_vm3, %v14908_v10, 0.0 }
 0xe55   :  { %12691 = vpow2.f32 %v4183_v36  ;;  %v4145_v14 = vsub.f32 %v14795_v4, %v4111_v56  ;;  %4224 = vadd.xlane.f32.xlu1 %v4223_v1  ;;  %v4185_v52 = vmul.f32 1.442695, %v4144_v27 }
 0xe56   :  { %v4114_v23 = vpop.xlane.xlu0 %4113  ;;  %12693 = vpow2.f32 %v4173_v62 }
 0xe57   :  { %v14914_v54 = vpop.eup %12683  ;;  %v4187_v9 = vmul.f32 1.442695, %v4145_v14  ;;  %v4146_v53 = vsub.f32 %v14807_v35, %v4114_v23 }
 0xe58   :  { %v4117_v59 = vpop.xlane.xlu1 %4116  ;;  %v4241_v51 = vsel %vm874_vm3, %v14914_v54, 0.0  ;;  %v14919_v60 = vpop.eup %12685 }
 0xe59   :  { %12695 = vpow2.f32 %v4187_v9  ;;  %4242 = vadd.xlane.f32.xlu0 %v4241_v51  ;;  %v4189_v4 = vmul.f32 1.442695, %v4146_v53  ;;  %v4147_v58 = vsub.f32 %v14814_v16, %v4117_v59  ;;  %v4226_v24 = vsel %vm874_vm3, %v14919_v60, 0.0 }
 0xe5a   :  { %12697 = vpow2.f32 %v4185_v52  ;;  %v4120_v46 = vpop.xlane.xlu0 %4119 }
 0xe5b   :  { %v14921_v15 = vpop.eup %12687  ;;  %12699 = vpow2.f32 %v4189_v4  ;;  %v4191_v18 = vmul.f32 1.442695, %v4147_v58  ;;  %v4148_v49 = vsub.f32 %v14821_v25, %v4120_v46 }
 0xe5c   :  { %v4229_v35 = vsel %vm874_vm3, %v14921_v15, 0.0  ;;  %v14928_v31 = vpop.eup %12689  ;;  %v4478_v27 = vpop.permute.xlu1 %4477 }
 0xe5d   :  { %4227 = vadd.xlane.f32.xlu0 %v4226_v24  ;;  %4230 = vadd.xlane.f32.xlu1 %v4229_v35  ;;  %v4244_v16 = vsel %vm874_vm3, %v14928_v31, 0.0  ;;  %12701 = vpow2.f32 %v4191_v18  ;;  %v4193_v63 = vmul.f32 1.442695, %v4148_v49 }
 0xe5e   :  { %v4551_v56 = vpop.permute.xlu0 %4550 }
 0xe5f   :  { %v14930_v6 = vpop.eup %12691  ;;  %12703 = vpow2.f32 %v4193_v63 }
 0xe60   :  { %v4247_v50 = vsel %vm874_vm3, %v14930_v6, 0.0  ;;  %v14937_v20 = vpop.eup %12693 }
 0xe61   :  { %4245 = vadd.xlane.f32.xlu0 %v4244_v16  ;;  %4248 = vadd.xlane.f32.xlu1 %v4247_v50  ;;  %v4232_v19 = vsel %vm874_vm3, %v14937_v20, 0.0 }
 0xe63   :  { %v14939_v29 = vpop.eup %12695 }
 0xe64   :  { %v4253_v25 = vsel %vm874_vm3, %v14939_v29, 0.0  ;;  %v14945_v48 = vpop.eup %12697 }
 0xe65   :  { %4233 = vadd.xlane.f32.xlu0 %v4232_v19  ;;  %4254 = vadd.xlane.f32.xlu1 %v4253_v25  ;;  %v4250_v13 = vsel %vm874_vm3, %v14945_v48, 0.0  ;;  %v14949_v22 = vpop.eup %12699 }
 0xe66   :  { %v4256_v12 = vsel %vm874_vm3, %v14949_v22, 0.0 }
 0xe67   :  { %v14953_v41 = vpop.eup %12701 }
 0xe68   :  { %v4259_v40 = vsel %vm874_vm3, %v14953_v41, 0.0 }
 0xe69   :  { %4251 = vadd.xlane.f32.xlu0 %v4250_v13  ;;  %v14957_v62 = vpop.eup %12703 }
 0xe6a   :  { %v4262_v36 = vsel %vm874_vm3, %v14957_v62, 0.0 }
 0xe6d   :  { %4257 = vadd.xlane.f32.xlu0 %v4256_v12 }
 0xe71   :  { %4260 = vadd.xlane.f32.xlu0 %v4259_v40 }
 0xe75   :  { %4263 = vadd.xlane.f32.xlu0 %v4262_v36 }
 0xe76   :  { %4479 = vrot.lane.b32.xlu1 %v14582_v2, %s12953_s23 }
 0xe8d   :  { %v4123_v1 = vpop.xlane.xlu1 %4122 }
 0xe8e   :  { %v4149_v14 = vsub.f32 %v14841_v30, %v4123_v1 }
 0xe8f   :  { %v4126_v23 = vpop.xlane.xlu0 %4125 }
 0xe90   :  { %v4195_v52 = vmul.f32 1.442695, %v4149_v14  ;;  %v4150_v9 = vsub.f32 %v14846_v57, %v4126_v23 }
 0xe91   :  { %v4553_v30 = vpop.permute.xlu1 %4552 }
 0xe92   :  { %12705 = vpow2.f32 %v4195_v52  ;;  %v4197_v53 = vmul.f32 1.442695, %v4150_v9 }
 0xe93   :  { %v4204_v57 = vpop.xlane.xlu0 %4203 }
 0xe94   :  { %12707 = vpow2.f32 %v4197_v53 }
 0xe95   :  { %12709 = vrcp.f32 %v4204_v57 }
 0xe97   :  { %v4210_v24 = vpop.xlane.xlu0 %4209 }
 0xe9b   :  { %v4216_v18 = vpop.xlane.xlu0 %4215 }
 0xe9c   :  { %v14965_v59 = vpop.eup %12705 }
 0xe9d   :  { %v4265_v51 = vsel %vm874_vm3, %v14965_v59, 0.0 }
 0xe9e   :  { %v14969_v4 = vpop.eup %12707  ;;  %4266 = vadd.xlane.f32.xlu0 %v4265_v51 }
 0xe9f   :  { %v4268_v58 = vsel %vm874_vm3, %v14969_v4, 0.0  ;;  %v12710_v16 = vpop.eup %12709 }
 0xea0   :  { %v4296_v63 = vmul.f32 %v12710_v16, %v14852_v21 }
 0xea2   :  { %4269 = vadd.xlane.f32.xlu0 %v4268_v58 }
 0xeb8   :  { %4554 = vrot.lane.b32.xlu0 %v14582_v2, %s12954_s28 }
 0xec2   :  { %v4201_v46 = vpop.xlane.xlu1 %4200 }
 0xec3   :  { %12711 = vrcp.f32 %v4201_v46 }
 0xec6   :  { %v4207_v35 = vpop.xlane.xlu1 %4206 }
 0xec7   :  { %12713 = vrcp.f32 %v4207_v35 }
 0xec8   :  { %12715 = vrcp.f32 %v4210_v24 }
 0xeca   :  { %v4213_v49 = vpop.xlane.xlu1 %4212 }
 0xecb   :  { %12717 = vrcp.f32 %v4213_v49 }
 0xecd   :  { %v12712_v50 = vpop.eup %12711 }
 0xece   :  { %v4295_v19 = vmul.f32 %v12712_v50, %v14870_v3  ;;  %v4222_v25 = vpop.xlane.xlu0 %4221  ;;  %v4219_v2 = vpop.xlane.xlu1 %4218 }
 0xecf   :  { %12719 = vrcp.f32 %v4222_v25 }
 0xed0   :  { %v4319_v13 = vpack.c.bf16 %v4296_v63, %v4295_v19  ;;  %12721 = vrcp.f32 %v4219_v2 }
 0xed1   :  { %v12714_v12 = vpop.eup %12713  ;;  %12723 = vrcp.f32 %v4216_v18 }
 0xed2   :  { %11785 = vmatmul.mubr.msk.bf16.vlgmr.msra.gmra.mrb[160].mxu0 %vm874_vm3, %v4319_v13  ;;  %v12716_v40 = vpop.eup %12715  ;;  %v4297_v21 = vmul.f32 %v12714_v12, %v14875_v32 }
 0xed3   :  { %11815 = vmatpush3.bf16.msra.mxu0 %v14833_v33  ;;  %11788 = vmatprep.mubr.msk.bf16.mxu0 %vm12950_vm0, %v12949_v0  ;;  %v4298_v3 = vmul.f32 %v12716_v40, %v14856_v42 }
 0xed4   :  { %11816 = vmatprep.subr.bf16.mxu0 %v12949_v0 }
 0xed5   :  { %v12718_v36 = vpop.eup %12717  ;;  %v4320_v1 = vpack.c.bf16 %v4298_v3, %v4297_v21 }
 0xed6   :  { %v4299_v32 = vmul.f32 %v12718_v36, %v14879_v44 }
 0xed7   :  { %11817 = vmatpush3.bf16.msra.mxu0 %v4478_v27 }
 0xed8   :  { %11818 = vmatprep.subr.bf16.mxu0 %v12949_v0 }
 0xed9   :  { %v12720_v14 = vpop.eup %12719 }
 0xeda   :  { %v12722_v23 = vpop.eup %12721  ;;  %v4302_v52 = vmul.f32 %v12720_v14, %v14885_v34  ;;  %11789 = vmatmul.mubr.msk.bf16.gmra.mrb[164].mxu0 %vm874_vm3, %v4320_v1 }
 0xedb   :  { %v12724_v33 = vpop.eup %12723  ;;  %v4301_v9 = vmul.f32 %v12722_v23, %v14883_v43  ;;  %11792 = vmatprep.mubr.msk.bf16.mxu0 %vm12950_vm0, %v12949_v0 }
 0xedc   :  { %v4300_v27 = vmul.f32 %v12724_v33, %v14860_v39 }
 0xedd   :  { %v4322_v42 = vpack.c.bf16 %v4302_v52, %v4301_v9 }
 0xede   :  { %v4237_v53 = vpop.xlane.xlu1 %4236  ;;  %v4321_v51 = vpack.c.bf16 %v4300_v27, %v4299_v32 }
 0xedf   :  { %11803 = vmatmul.mubr.msk.bf16.vlgmr.msra.gmra.mrb[152].mxu1 %vm874_vm3, %v4322_v42 }
 0xee0   :  { %11833 = vmatpush3.bf16.msra.mxu1 %v4551_v56  ;;  %11806 = vmatprep.mubr.msk.bf16.mxu1 %vm12950_vm0, %v12949_v0  ;;  %v4240_v34 = vpop.xlane.xlu0 %4239 }
 0xee1   :  { %11834 = vmatprep.subr.bf16.mxu1 %v12949_v0  ;;  %12725 = vrcp.f32 %v4240_v34 }
 0xee2   :  { %11793 = vmatmul.mubr.msk.bf16.gmra.mrb[168].mxu0 %vm874_vm3, %v4321_v51  ;;  %v4225_v39 = vpop.xlane.xlu1 %4224  ;;  %12727 = vrcp.f32 %v4237_v53 }
 0xee3   :  { %11820 = vmatprep.mubr.msk.bf16.mxu0 %vm12950_vm0, %v12949_v0  ;;  %12729 = vrcp.f32 %v4225_v39 }
 0xee4   :  { %11835 = vmatpush3.bf16.msra.mxu1 %v4553_v30 }
 0xee5   :  { %11836 = vmatprep.subr.bf16.mxu1 %v12949_v0 }
 0xee6   :  { %v4243_v44 = vpop.xlane.xlu0 %4242 }
 0xeea   :  { %v4228_v43 = vpop.xlane.xlu0 %4227  ;;  %v4231_v56 = vpop.xlane.xlu1 %4230 }
 0xeeb   :  { %12731 = vrcp.f32 %v4228_v43  ;;  %v12726_v46 = vpop.eup %12725 }
 0xeec   :  { %v12728_v24 = vpop.eup %12727  ;;  %v4308_v49 = vmul.f32 %v12726_v46, %v14903_v55 }
 0xeed   :  { %v12730_v30 = vpop.eup %12729  ;;  %v4307_v50 = vmul.f32 %v12728_v24, %v14898_v26 }
 0xeee   :  { %v4246_v58 = vpop.xlane.xlu0 %4245  ;;  %v4249_v57 = vpop.xlane.xlu1 %4248  ;;  %v4303_v25 = vmul.f32 %v12730_v30, %v14908_v10 }
 0xeef   :  { %12733 = vrcp.f32 %v4246_v58  ;;  %v4325_v13 = vpack.c.bf16 %v4308_v49, %v4307_v50 }
 0xef0   :  { %12735 = vrcp.f32 %v4243_v44 }
 0xef1   :  { %12737 = vrcp.f32 %v4231_v56 }
 0xef2   :  { %v4234_v35 = vpop.xlane.xlu0 %4233  ;;  %v4255_v18 = vpop.xlane.xlu1 %4254 }
 0xef3   :  { %12739 = vrcp.f32 %v4234_v35 }
 0xef5   :  { %v12732_v16 = vpop.eup %12731 }
 0xef6   :  { %v4252_v63 = vpop.xlane.xlu0 %4251  ;;  %v4480_v19 = vpop.permute.xlu1 %4479  ;;  %v4304_v2 = vmul.f32 %v12732_v16, %v14919_v60 }
 0xef7   :  { %12741 = vrcp.f32 %v4252_v63  ;;  %11819 = vmatpush3.bf16.msra.mxu0 %v4480_v19 }
 0xef8   :  { %v4323_v12 = vpack.c.bf16 %v4304_v2, %v4303_v25  ;;  %11850 = vmatprep.subr.bf16.mxu0 %v12949_v0  ;;  %12743 = vrcp.f32 %v4249_v57 }
 0xef9   :  { %v12734_v40 = vpop.eup %12733 }
 0xefa   :  { %v12736_v21 = vpop.eup %12735  ;;  %11807 = vmatmul.mubr.msk.bf16.gmra.mrb[156].mxu1 %vm874_vm3, %v4323_v12  ;;  %11821 = vmatmul.mubr.msk.bf16.vlgmr.msra.gmra.mrb[172].mxu0 %vm874_vm3, %v4325_v13  ;;  %v4310_v55 = vmul.f32 %v12734_v40, %v14928_v31 }
 0xefb   :  { %v12738_v26 = vpop.eup %12737  ;;  %11810 = vmatprep.mubr.msk.bf16.mxu1 %vm12950_vm0, %v12949_v0  ;;  %11824 = vmatprep.mubr.msk.bf16.mxu0 %vm12950_vm0, %v12949_v0  ;;  %v4309_v36 = vmul.f32 %v12736_v21, %v14914_v54  ;;  %v4258_v54 = vpop.xlane.xlu0 %4257  ;;  %v12365_v21 = vld [vmem:[%s17075_s6 + $0x40] sm:$0xff]  }
 0xefc   :  { %v4305_v60 = vmul.f32 %v12738_v26, %v14921_v15  ;;  %12745 = vrcp.f32 %v4258_v54  ;;  %11851 = vmatpush3.bf16.msra.mxu0 %v12365_v21  ;;  %v12366_v26 = vld [vmem:[%s17075_s6 + $0x48] sm:$0xff]  }
 0xefd   :  { %v12740_v10 = vpop.eup %12739  ;;  %v4326_v14 = vpack.c.bf16 %v4310_v55, %v4309_v36  ;;  %12747 = vrcp.f32 %v4255_v18  ;;  %11852 = vmatprep.subr.bf16.mxu0 %v12949_v0 }
 0xefe   :  { %v4306_v3 = vmul.f32 %v12740_v10, %v14937_v20 }
 0xeff   :  { %v4261_v33 = vpop.xlane.xlu0 %4260 }
 0xf00   :  { %v4324_v1 = vpack.c.bf16 %v4306_v3, %v4305_v60  ;;  %11853 = vmatpush3.bf16.msra.mxu0 %v12366_v26  ;;  %v12367_v60 = vld [vmem:[%s17075_s6 + $0x50] sm:$0xff]  }
 0xf01   :  { %v12742_v23 = vpop.eup %12741  ;;  %11854 = vmatprep.subr.bf16.mxu0 %v12949_v0 }
 0xf02   :  { %11811 = vmatmul.mubr.msk.bf16.gmra.mrb[160].mxu1 %vm874_vm3, %v4324_v1  ;;  %11825 = vmatmul.mubr.msk.bf16.gmra.mrb[176].mxu0 %vm874_vm3, %v4326_v14  ;;  %v12744_v52 = vpop.eup %12743  ;;  %v4312_v15 = vmul.f32 %v12742_v23, %v14945_v48 }
 0xf03   :  { %11828 = vmatprep.mubr.msk.bf16.mxu0 %vm12950_vm0, %v12949_v0  ;;  %11838 = vmatprep.mubr.msk.bf16.mxu1 %vm12950_vm0, %v12949_v0  ;;  %v4311_v31 = vmul.f32 %v12744_v52, %v14930_v6  ;;  %v4264_v9 = vpop.xlane.xlu0 %4263 }
 0xf04   :  { %12749 = vrcp.f32 %v4264_v9  ;;  %11855 = vmatpush3.bf16.msra.mxu0 %v12367_v60  ;;  %v12369_v9 = vld [vmem:[%s17075_s6 + $0x60] sm:$0xff]  }
 0xf05   :  { %v4327_v20 = vpack.c.bf16 %v4312_v15, %v4311_v31  ;;  %12751 = vrcp.f32 %v4261_v33  ;;  %11856 = vmatprep.subr.bf16.mxu0 %v12949_v0 }
 0xf06   :  { %v12746_v42 = vpop.eup %12745 }
 0xf07   :  { %v12748_v53 = vpop.eup %12747  ;;  %v4314_v48 = vmul.f32 %v12746_v42, %v14949_v22 }
 0xf08   :  { %v4313_v6 = vmul.f32 %v12748_v53, %v14939_v29 }
 0xf0a   :  { %11829 = vmatmul.mubr.msk.bf16.gmra.mrb[180].mxu0 %vm874_vm3, %v4327_v20  ;;  %v4328_v34 = vpack.c.bf16 %v4314_v48, %v4313_v6  ;;  %v12368_v20 = vld [vmem:[%s17075_s6 + $0x58] sm:$0xff]  }
 0xf0b   :  { %11866 = vmatprep.mubr.msk.bf16.mxu0 %vm12950_vm0, %v12949_v0  ;;  %11857 = vmatpush3.bf16.msra.mxu0 %v12368_v20 }
 0xf0c   :  { %11858 = vmatprep.subr.bf16.mxu0 %v12949_v0 }
 0xf0e   :  { %v12750_v39 = vpop.eup %12749 }
 0xf0f   :  { %v12752_v44 = vpop.eup %12751  ;;  %v4316_v43 = vmul.f32 %v12750_v39, %v14957_v62  ;;  %11859 = vmatpush3.bf16.msra.mxu0 %v12369_v9  ;;  %v12370_v39 = vld [vmem:[%s17075_s6 + $0x68] sm:$0xff]  }
 0xf10   :  { %v4315_v56 = vmul.f32 %v12752_v44, %v14953_v41  ;;  %11860 = vmatprep.subr.bf16.mxu0 %v12949_v0 }
 0xf12   :  { %v4329_v58 = vpack.c.bf16 %v4316_v43, %v4315_v56  ;;  %v12371_v43 = vld [vmem:[%s17075_s6 + $0x70] sm:$0xff]  }
 0xf13   :  { %11861 = vmatpush3.bf16.msra.mxu0 %v12370_v39 }
 0xf14   :  { %11862 = vmatprep.subr.bf16.mxu0 %v12949_v0 }
 0xf17   :  { %11863 = vmatpush3.bf16.msra.mxu0 %v12371_v43 }
 0xf18   :  { %11864 = vmatprep.subr.bf16.mxu0 %v12949_v0 }
 0xf2b   :  { %v4267_v32 = vpop.xlane.xlu0 %4266 }
 0xf2f   :  { %v4270_v27 = vpop.xlane.xlu0 %4269 }
 0xf30   :  { %12753 = vrcp.f32 %v4270_v27 }
 0xf31   :  { %12755 = vrcp.f32 %v4267_v32 }
 0xf33   :  { %v4555_v51 = vpop.permute.xlu0 %4554 }
 0xf34   :  { %11837 = vmatpush3.bf16.msra.mxu1 %v4555_v51 }
 0xf37   :  { %11839 = vmatmul.mubr.msk.bf16.vlgmr.msra.gmra.mrb[164].mxu1 %vm874_vm3, %v4328_v34 }
 0xf38   :  { %11842 = vmatprep.mubr.msk.bf16.mxu1 %vm12950_vm0, %v12949_v0 }
 0xf3a   :  { %v12754_v22 = vpop.eup %12753 }
 0xf3b   :  { %v12756_v29 = vpop.eup %12755  ;;  %v4318_v57 = vmul.f32 %v12754_v22, %v14969_v4 }
 0xf3c   :  { %v4317_v46 = vmul.f32 %v12756_v29, %v14965_v59 }
 0xf3e   :  { %v4330_v24 = vpack.c.bf16 %v4318_v57, %v4317_v46  ;;  %v12372_v57 = vld [vmem:[%s17075_s6 + $0x78] sm:$0xff]  }
 0xf3f   :  { %11843 = vmatmul.mubr.msk.bf16.gmra.mrb[168].mxu1 %vm874_vm3, %v4329_v58  ;;  %11865 = vmatpush3.bf16.msra.mxu0 %v12372_v57 }
 0xf40   :  { %11846 = vmatprep.mubr.msk.bf16.mxu1 %vm12950_vm0, %v12949_v0 }
 0xf47   :  { %11847 = vmatmul.mubr.msk.bf16.gmra.mrb[172].mxu1 %vm874_vm3, %v4330_v24 }
 0xf48   :  { %5199 = vmatprep.mubr.bf16.mxu1 %v12951_v38 }
 0xfa5   :  { %v15040_v62 = vpop.f32.mrb[160].mxu0 }
 0xfa6   :  { %v11786_v41 = vpop.f32.mrb[161].mxu0 }
 0xfa7   :  { %v15042_v35 = vpop.f32.mrb[162].mxu0 }
 0xfa8   :  { %v11787_v18 = vpop.f32.mrb[163].mxu0 }
 0xfad   :  { %v15044_v30 = vpop.f32.mrb[164].mxu0 }
 0xfae   :  { %v11790_v49 = vpop.f32.mrb[165].mxu0 }
 0xfaf   :  { %v15046_v16 = vpop.f32.mrb[166].mxu0 }
 0xfb0   :  { %v11791_v50 = vpop.f32.mrb[167].mxu0 }
 0xfb2   :  { %v4452_v4 = vpop.f32.mrb[152].mxu1 }
 0xfb3   :  { %v11804_v63 = vpop.f32.mrb[153].mxu1 }
 0xfb4   :  { %v4455_v59 = vpop.f32.mrb[154].mxu1 }
 0xfb5   :  { %v12135_v19 = vpack.i.bf16 %v4455_v59, %v4452_v4  ;;  %v11805_v25 = vpop.f32.mrb[155].mxu1  ;;  %v15048_v2 = vpop.f32.mrb[168].mxu0 }
 0xfb6   :  { %v11794_v13 = vpop.f32.mrb[169].mxu0 }
 0xfb7   :  { %12136 = vrot.lane.b32.xlu1 %v12135_v19, %s12954_s28  ;;  %v15051_v12 = vpop.f32.mrb[170].mxu0 }
 0xfb8   :  { %v11795_v40 = vpop.f32.mrb[171].mxu0 }
 0xfcd   :  { %v4460_v55 = vpop.f32.mrb[156].mxu1  ;;  %v4527_v10 = vpop.f32.mrb[172].mxu0 }
 0xfce   :  { %v11808_v3 = vpop.f32.mrb[157].mxu1  ;;  %v11822_v36 = vpop.f32.mrb[173].mxu0 }
 0xfcf   :  { %v4463_v1 = vpop.f32.mrb[158].mxu1  ;;  %v4530_v14 = vpop.f32.mrb[174].mxu0 }
 0xfd0   :  { %v12150_v23 = vpack.i.bf16 %v4463_v1, %v4460_v55  ;;  %v12140_v52 = vpack.i.bf16 %v4530_v14, %v4527_v10  ;;  %v11809_v15 = vpop.f32.mrb[159].mxu1  ;;  %v11823_v31 = vpop.f32.mrb[175].mxu0 }
 0xfd2   :  { %12141 = vrot.lane.b32.xlu1 %v12140_v52, %s12953_s23 }
 0xfd5   :  { %v4468_v54 = vpop.f32.mrb[160].mxu1  ;;  %v4535_v33 = vpop.f32.mrb[176].mxu0 }
 0xfd6   :  { %v11812_v32 = vpop.f32.mrb[161].mxu1  ;;  %v11826_v42 = vpop.f32.mrb[177].mxu0 }
 0xfd7   :  { %v4471_v27 = vpop.f32.mrb[162].mxu1  ;;  %v4538_v53 = vpop.f32.mrb[178].mxu0 }
 0xfd8   :  { %v12165_v48 = vpack.i.bf16 %v4471_v27, %v4468_v54  ;;  %v12155_v6 = vpack.i.bf16 %v4538_v53, %v4535_v33  ;;  %v11813_v51 = vpop.f32.mrb[163].mxu1  ;;  %v11827_v34 = vpop.f32.mrb[179].mxu0 }
 0xfdd   :  { %v4543_v44 = vpop.f32.mrb[180].mxu0 }
 0xfde   :  { %v11830_v56 = vpop.f32.mrb[181].mxu0 }
 0xfdf   :  { %v4546_v58 = vpop.f32.mrb[182].mxu0 }
 0xfe0   :  { %v12170_v22 = vpack.i.bf16 %v4546_v58, %v4543_v44  ;;  %v11831_v29 = vpop.f32.mrb[183].mxu0 }
0x100a   :  { %v4602_v46 = vpop.f32.mrb[164].mxu1 }
0x100b   :  { %v11840_v24 = vpop.f32.mrb[165].mxu1 }
0x100c   :  { %v4605_v41 = vpop.f32.mrb[166].mxu1 }
0x100d   :  { %v12145_v18 = vpack.i.bf16 %v4605_v41, %v4602_v46  ;;  %v11841_v49 = vpop.f32.mrb[167].mxu1 }
0x100f   :  { %12146 = vrot.lane.b32.xlu1 %v12145_v18, %s12952_s27 }
0x1012   :  { %v4610_v50 = vpop.f32.mrb[168].mxu1 }
0x1013   :  { %v11844_v4 = vpop.f32.mrb[169].mxu1  ;;  %12151 = vrot.lane.b32.xlu1 %v12150_v23, %s12954_s28 }
0x1014   :  { %v4613_v63 = vpop.f32.mrb[170].mxu1 }
0x1015   :  { %v12160_v59 = vpack.i.bf16 %v4613_v63, %v4610_v50  ;;  %v11845_v19 = vpop.f32.mrb[171].mxu1 }
0x1017   :  { %12161 = vrot.lane.b32.xlu0 %v12160_v59, %s12952_s27  ;;  %12156 = vrot.lane.b32.xlu1 %v12155_v6, %s12953_s23 }
0x101a   :  { %v4618_v25 = vpop.f32.mrb[172].mxu1 }
0x101b   :  { %v11848_v13 = vpop.f32.mrb[173].mxu1  ;;  %12166 = vrot.lane.b32.xlu1 %v12165_v48, %s12954_s28  ;;  %12171 = vrot.lane.b32.xlu0 %v12170_v22, %s12953_s23 }
0x101c   :  { %v4621_v40 = vpop.f32.mrb[174].mxu1 }
0x101d   :  { %v12175_v21 = vpack.i.bf16 %v4621_v40, %v4618_v25  ;;  %v11849_v26 = vpop.f32.mrb[175].mxu1 }
0x101f   :  { %12176 = vrot.lane.b32.xlu1 %v12175_v21, %s12952_s27 }
0x1029   :  { %v12137_v55 = vpop.permute.xlu1 %12136 }
0x102a   :  { %v12139_v60 = vunpack.i.h.bf16 %v12137_v55  ;;  %v12138_v3 = vunpack.i.l.bf16 %v12137_v55 }
0x102c   :  { %v4698_v23 = vsel %vm507_vm2, %v15042_v35, %v12139_v60  ;;  %v4697_v52 = vsel %vm507_vm2, %v15040_v62, %v12138_v3 }
0x1044   :  { %v12142_v10 = vpop.permute.xlu1 %12141 }
0x1045   :  { %v12144_v36 = vunpack.i.h.bf16 %v12142_v10  ;;  %v12143_v1 = vunpack.i.l.bf16 %v12142_v10 }
0x1047   :  { %v4703_v20 = vsel %vm101_vm1, %v4697_v52, %v12143_v1  ;;  %v4704_v54 = vsel %vm101_vm1, %v4698_v23, %v12144_v36 }
0x1081   :  { %v12147_v14 = vpop.permute.xlu1 %12146 }
0x1082   :  { %v12149_v15 = vunpack.i.h.bf16 %v12147_v14  ;;  %v12148_v31 = vunpack.i.l.bf16 %v12147_v14 }
0x1084   :  { %v4709_v33 = vsel %vm1529_vm4, %v4703_v20, %v12148_v31  ;;  %v4710_v9 = vsel %vm1529_vm4, %v4704_v54, %v12149_v15 }
0x1085   :  { %v4715_v32 = vpack.c.bf16 %v4710_v9, %v4709_v33  ;;  %v12152_v42 = vpop.permute.xlu1 %12151 }
0x1086   :  { %v12154_v27 = vunpack.i.h.bf16 %v12152_v42  ;;  %v12153_v53 = vunpack.i.l.bf16 %v12152_v42 }
0x1087   :  { %11867 = vmatmul.mubr.bf16.vlgmr.msra.gmra.mrb[184].mxu0 %v4715_v32 }
0x1088   :  { %11870 = vmatprep.mubr.msk.bf16.mxu0 %vm12950_vm0, %v12949_v0  ;;  %v4700_v39 = vsel %vm507_vm2, %v15046_v16, %v12154_v27  ;;  %v4699_v44 = vsel %vm507_vm2, %v15044_v30, %v12153_v53 }
0x1089   :  { %v12162_v35 = vpop.permute.xlu0 %12161  ;;  %v12157_v62 = vpop.permute.xlu1 %12156 }
0x108a   :  { %v12164_v48 = vunpack.i.h.bf16 %v12162_v35  ;;  %v12163_v6 = vunpack.i.l.bf16 %v12162_v35  ;;  %v12159_v51 = vunpack.i.h.bf16 %v12157_v62  ;;  %v12158_v34 = vunpack.i.l.bf16 %v12157_v62  ;;  %v10067_v35 = vld [vmem:[%s17077_s10 + $0x208] sm:$0xff] }
0x108c   :  { %v4705_v43 = vsel %vm101_vm1, %v4699_v44, %v12158_v34  ;;  %v4706_v56 = vsel %vm101_vm1, %v4700_v39, %v12159_v51  ;;  %v10071_v44 = vld [vmem:[%s17077_s10 + $0x248] sm:$0xff] }
0x108d   :  { %v12172_v58 = vpop.permute.xlu0 %12171  ;;  %v12167_v22 = vpop.permute.xlu1 %12166  ;;  %v4711_v29 = vsel %vm1529_vm4, %v4705_v43, %v12163_v6  ;;  %v4712_v57 = vsel %vm1529_vm4, %v4706_v56, %v12164_v48  ;;  %v10070_v48 = vld [vmem:[%s17077_s10 + $0x240] sm:$0xff]  ;;  %v10073_v43 = vld [vmem:[%s17077_s10 + $0x268] sm:$0xff] }
0x108e   :  { %v12169_v46 = vunpack.i.h.bf16 %v12167_v22  ;;  %v12168_v24 = vunpack.i.l.bf16 %v12167_v22  ;;  %v12174_v41 = vunpack.i.h.bf16 %v12172_v58  ;;  %v12173_v18 = vunpack.i.l.bf16 %v12172_v58  ;;  %v10072_v6 = vld [vmem:[%s17077_s10 + $0x260] sm:$0xff] }
0x108f   :  { %v4716_v49 = vpack.c.bf16 %v4712_v57, %v4711_v29  ;;  %v10104_v39 = vcombine.high %v10070_v48, %v10072_v6  ;;  %v10106_v56 = vcombine.high %v10071_v44, %v10073_v43  ;;  %v10103_v58 = vcombine.low %v10070_v48, %v10072_v6  ;;  %v10086_v48 = vld [vmem:[%s17077_s10 + $0x340] sm:$0xff] }
0x1090   :  { %v4702_v16 = vsel %vm507_vm2, %v15051_v12, %v12169_v46  ;;  %v4701_v30 = vsel %vm507_vm2, %v15048_v2, %v12168_v24  ;;  %v10053_v2 = vld [vmem:[%s17076_s7 + $0x1] ss:$0 sm:$0xff]  ;;  %v10105_v22 = vcombine.low %v10071_v44, %v10073_v43 }
0x1091   :  { %11871 = vmatmul.mubr.bf16.gmra.mrb[188].mxu0 %v4716_v49  ;;  %v12177_v50 = vpop.permute.xlu1 %12176  ;;  %v4707_v59 = vsel %vm101_vm1, %v4701_v30, %v12173_v18  ;;  %v4708_v19 = vsel %vm101_vm1, %v4702_v16, %v12174_v41  ;;  %v10088_v6 = vld [vmem:[%s17077_s10 + $0x360] sm:$0xff] }
0x1092   :  { %v12179_v4 = vunpack.i.h.bf16 %v12177_v50  ;;  %v12178_v63 = vunpack.i.l.bf16 %v12177_v50  ;;  %11874 = vmatprep.mubr.msk.bf16.mxu0 %vm12950_vm0, %v12949_v0  ;;  %v10119_v44 = vcombine.low %v10086_v48, %v10088_v6 }
0x1094   :  { %v4713_v25 = vsel %vm1529_vm4, %v4707_v59, %v12178_v63  ;;  %v4714_v13 = vsel %vm1529_vm4, %v4708_v19, %v12179_v4 }
0x1095   :  { %v4717_v40 = vpack.c.bf16 %v4714_v13, %v4713_v25 }
0x1099   :  { %11875 = vmatmul.mubr.bf16.gmra.mrb[192].mxu0 %v4717_v40 }
0x109a   :  { %5262 = vmatprep.mubr.bf16.mxu0 %v12951_v38 }
0x115a   :  { %v4825_v12 = vpop.f32.mrb[184].mxu0 }
0x115b   :  { %v4826_v21 = vadd.f32 %v10053_v2, %v4825_v12  ;;  %v11868_v26 = vpop.f32.mrb[185].mxu0 }
0x115c   :  { %v4828_v55 = vpop.f32.mrb[186].mxu0  ;;  %v10076_v26 = vld [vmem:[%s17077_s10 + $0x2a0] sm:$0xff] }
0x115d   :  { %v4848_v10 = vadd.f32 %v4826_v21, %v14530_v61  ;;  %v4829_v60 = vadd.f32 %v10053_v2, %v4828_v55  ;;  %v11869_v3 = vpop.f32.mrb[187].mxu0  ;;  %v10074_v21 = vld [vmem:[%s17077_s10 + $0x280] sm:$0xff]  ;;  %v10075_v55 = vld [vmem:[%s17077_s10 + $0x288] sm:$0xff] }
0x115e   :  { %v10108_v3 = vcombine.high %v10074_v21, %v10076_v26 }
0x115f   :  { %v4849_v36 = vadd.f32 %v4829_v60, %v14532_v37  ;;  %4858 = vadd.xlane.f32.xlu0 %v4848_v10 }
0x1161   :  { %4860 = vadd.xlane.f32.xlu1 %v4849_v36 }
0x1164   :  { %v4833_v1 = vpop.f32.mrb[188].mxu0 }
0x1165   :  { %v4834_v14 = vadd.f32 %v10053_v2, %v4833_v1  ;;  %v11872_v23 = vpop.f32.mrb[189].mxu0  ;;  %v10107_v1 = vcombine.low %v10074_v21, %v10076_v26  ;;  %v10197_v21 = vld [vmem:[%s17077_s10 + $0x230] sm:$0xff]  ;;  %v10196_v26 = vld [vmem:[%s17077_s10 + $0x218] sm:$0xff] }
0x1166   :  { %v4836_v52 = vpop.f32.mrb[190].mxu0 }
0x1167   :  { %v4850_v15 = vadd.f32 %v4834_v14, %v14541_v47  ;;  %v4837_v31 = vadd.f32 %v10053_v2, %v4836_v52  ;;  %v11873_v20 = vpop.f32.mrb[191].mxu0  ;;  %v10066_v47 = vld [vmem:[%s17077_s10 + $0x200] sm:$0xff] }
0x1168   :  { %v10080_v20 = vld [vmem:[%s17077_s10 + $0x2e0] sm:$0xff] }
0x1169   :  { %4862 = vadd.xlane.f32.xlu0 %v4850_v15  ;;  %v4851_v54 = vadd.f32 %v4837_v31, %v14543_v28  ;;  %v10068_v28 = vld [vmem:[%s17077_s10 + $0x220] sm:$0xff] }
0x116a   :  { %v10099_v62 = vcombine.low %v10066_v47, %v10068_v28  ;;  %v10078_v31 = vld [vmem:[%s17077_s10 + $0x2c0] sm:$0xff] }
0x116c   :  { %v4841_v33 = vpop.f32.mrb[192].mxu0 }
0x116d   :  { %v4842_v9 = vadd.f32 %v10053_v2, %v4841_v33  ;;  %4864 = vadd.xlane.f32.xlu0 %v4851_v54  ;;  %v11876_v61 = vpop.f32.mrb[193].mxu0 }
0x116e   :  { %v4844_v32 = vpop.f32.mrb[194].mxu0  ;;  %v10081_v61 = vld [vmem:[%s17077_s10 + $0x2e8] sm:$0xff] }
0x116f   :  { %v4852_v37 = vadd.f32 %v4842_v9, %v14552_v17  ;;  %v4845_v42 = vadd.f32 %v10053_v2, %v4844_v32  ;;  %v11877_v27 = vpop.f32.mrb[195].mxu0  ;;  %v10100_v17 = vcombine.high %v10066_v47, %v10068_v28  ;;  %v10112_v9 = vcombine.high %v10078_v31, %v10080_v20  ;;  %v10083_v47 = vld [vmem:[%s17077_s10 + $0x308] sm:$0xff] }
0x1170   :  { %v10111_v32 = vcombine.low %v10078_v31, %v10080_v20  ;;  %v10082_v27 = vld [vmem:[%s17077_s10 + $0x300] sm:$0xff] }
0x1171   :  { %v4853_v53 = vadd.f32 %v4845_v42, %v14554_v11  ;;  %4866 = vadd.xlane.f32.xlu1 %v4852_v37  ;;  %v10069_v11 = vld [vmem:[%s17077_s10 + $0x228] sm:$0xff]  ;;  %5167 = vmatprep.subr.bf16.mxu1 %v10100_v17 }
0x1172   :  { %v10101_v51 = vcombine.low %v10067_v35, %v10069_v11  ;;  %v10102_v34 = vcombine.high %v10067_v35, %v10069_v11  ;;  %5168 = vmatpush1.bf16.msra.mxu1 %v10099_v62  ;;  %v10085_v35 = vld [vmem:[%s17077_s10 + $0x328] sm:$0xff] }
0x1173   :  { %4868 = vadd.xlane.f32.xlu0 %v4853_v53  ;;  %5169 = vmatprep.subr.bf16.mxu1 %v10104_v39  ;;  %v10117_v17 = vcombine.low %v10083_v47, %v10085_v35  ;;  %v10118_v11 = vcombine.high %v10083_v47, %v10085_v35  ;;  %v10089_v39 = vld [vmem:[%s17077_s10 + $0x368] sm:$0xff] }
0x1174   :  { %5230 = vmatprep.subr.bf16.mxu0 %v10102_v34  ;;  %v10120_v34 = vcombine.high %v10086_v48, %v10088_v6  ;;  %v15273_v48 = vld [vmem:[%s17079_s9 + $0x1] ss:$0 sm:$0xff] }
0x1175   :  { %5231 = vmatpush1.bf16.msra.mxu0 %v10101_v51  ;;  %v10087_v51 = vld [vmem:[%s17077_s10 + $0x348] sm:$0xff] }
0x1176   :  { %5232 = vmatprep.subr.bf16.mxu0 %v10106_v56  ;;  %5170 = vmatpush1.bf16.msra.mxu1 %v10103_v58  ;;  %v10121_v43 = vcombine.low %v10087_v51, %v10089_v39  ;;  %v10122_v56 = vcombine.high %v10087_v51, %v10089_v39  ;;  %v10090_v58 = vld [vmem:[%s17077_s10 + $0x380] sm:$0xff] }
0x1177   :  { %5171 = vmatprep.subr.bf16.mxu1 %v10108_v3  ;;  %v10198_v3 = vld [vmem:[%s17077_s10 + $0x238] sm:$0xff] }
0x1179   :  { %5233 = vmatpush1.bf16.msra.mxu0 %v10105_v22  ;;  %v10092_v22 = vld [vmem:[%s17077_s10 + $0x3a0] sm:$0xff] }
0x117a   :  { %5172 = vmatpush1.bf16.msra.mxu1 %v10107_v1  ;;  %v10231_v1 = vcombine.high %v10196_v26, %v10198_v3 }
0x117b   :  { %5173 = vmatprep.subr.bf16.mxu1 %v10112_v9 }
0x117e   :  { %5174 = vmatpush1.bf16.msra.mxu1 %v10111_v32 }
0x11ec   :  { %v4859_v29 = vpop.xlane.xlu0 %4858 }
0x11ed   :  { %v4870_v57 = vmul.f32 0.0078125, %v4859_v29  ;;  %v10091_v29 = vld [vmem:[%s17077_s10 + $0x388] sm:$0xff] }
0x11ee   :  { %v4861_v46 = vpop.xlane.xlu1 %4860 }
0x11ef   :  { %v15154_v24 = vsub.f32 %v4848_v10, %v4870_v57  ;;  %v4871_v41 = vmul.f32 0.0078125, %v4861_v46  ;;  %v10124_v57 = vcombine.high %v10090_v58, %v10092_v22  ;;  %v10093_v46 = vld [vmem:[%s17077_s10 + $0x3a8] sm:$0xff] }
0x11f1   :  { %v15156_v18 = vsub.f32 %v4849_v36, %v4871_v41  ;;  %v4882_v49 = vmul.f32 %v15154_v24, %v15154_v24  ;;  %v10077_v36 = vld [vmem:[%s17077_s10 + $0x2a8] sm:$0xff]  ;;  %v10123_v41 = vcombine.low %v10090_v58, %v10092_v22 }
0x11f2   :  { %v10109_v14 = vcombine.low %v10075_v55, %v10077_v36  ;;  %v10110_v23 = vcombine.high %v10075_v55, %v10077_v36  ;;  %v10230_v36 = vcombine.low %v10196_v26, %v10198_v3  ;;  %v10210_v26 = vld [vmem:[%s17077_s10 + $0x2f8] sm:$0xff] }
0x11f3   :  { %4888 = vadd.xlane.f32.xlu1 %v4882_v49  ;;  %v4883_v16 = vmul.f32 %v15156_v18, %v15156_v18  ;;  %v10125_v49 = vcombine.low %v10091_v29, %v10093_v46 }
0x11f4   :  { %5234 = vmatprep.subr.bf16.mxu0 %v10110_v23 }
0x11f5   :  { %4890 = vadd.xlane.f32.xlu0 %v4883_v16  ;;  %5235 = vmatpush1.bf16.msra.mxu0 %v10109_v14  ;;  %v10126_v16 = vcombine.high %v10091_v29, %v10093_v46 }
0x11f6   :  { %v4863_v30 = vpop.xlane.xlu0 %4862 }
0x11f7   :  { %v4872_v50 = vmul.f32 0.0078125, %v4863_v30  ;;  %v10094_v30 = vld [vmem:[%s17077_s10 + $0x3c0] sm:$0xff] }
0x11f9   :  { %v15162_v4 = vsub.f32 %v4850_v15, %v4872_v50  ;;  %v10096_v50 = vld [vmem:[%s17077_s10 + $0x3e0] sm:$0xff] }
0x11fa   :  { %v4865_v63 = vpop.xlane.xlu0 %4864 }
0x11fb   :  { %v4873_v59 = vmul.f32 0.0078125, %v4865_v63  ;;  %v4884_v19 = vmul.f32 %v15162_v4, %v15162_v4  ;;  %v10095_v63 = vld [vmem:[%s17077_s10 + $0x3c8] sm:$0xff] }
0x11fd   :  { %v15166_v25 = vsub.f32 %v4851_v54, %v4873_v59  ;;  %4892 = vadd.xlane.f32.xlu1 %v4884_v19  ;;  %v10079_v54 = vld [vmem:[%s17077_s10 + $0x2c8] sm:$0xff]  ;;  %v10128_v59 = vcombine.high %v10094_v30, %v10096_v50 }
0x11fe   :  { %v4867_v13 = vpop.xlane.xlu1 %4866  ;;  %v10114_v42 = vcombine.high %v10079_v54, %v10081_v61  ;;  %v10097_v19 = vld [vmem:[%s17077_s10 + $0x3e8] sm:$0xff] }
0x11ff   :  { %v4874_v40 = vmul.f32 0.0078125, %v4867_v13  ;;  %v4885_v2 = vmul.f32 %v15166_v25, %v15166_v25  ;;  %v10127_v13 = vcombine.low %v10094_v30, %v10096_v50  ;;  %v10204_v30 = vld [vmem:[%s17077_s10 + $0x298] sm:$0xff] }
0x1200   :  { %v4869_v12 = vpop.xlane.xlu0 %4868  ;;  %5236 = vmatprep.subr.bf16.mxu0 %v10114_v42  ;;  %v15265_v42 = vld [vmem:[%s17078_s8 + $0x1] ss:$0 sm:$0xff]  ;;  %v10206_v50 = vld [vmem:[%s17077_s10 + $0x2b8] sm:$0xff] }
0x1201   :  { %v15179_v10 = vsub.f32 %v4852_v37, %v4874_v40  ;;  %v4875_v60 = vmul.f32 0.0078125, %v4869_v12  ;;  %4894 = vadd.xlane.f32.xlu0 %v4885_v2  ;;  %v10113_v37 = vcombine.low %v10079_v54, %v10081_v61  ;;  %v10129_v40 = vcombine.low %v10095_v63, %v10097_v19  ;;  %v10195_v12 = vld [vmem:[%s17077_s10 + $0x210] sm:$0xff] }
0x1202   :  { %v10130_v2 = vcombine.high %v10095_v63, %v10097_v19  ;;  %v10228_v55 = vcombine.low %v10195_v12, %v10197_v21 }
0x1203   :  { %v15184_v52 = vsub.f32 %v4853_v53, %v4875_v60  ;;  %v4886_v15 = vmul.f32 %v15179_v10, %v15179_v10  ;;  %v10084_v53 = vld [vmem:[%s17077_s10 + $0x320] sm:$0xff]  ;;  %5237 = vmatpush1.bf16.msra.mxu0 %v10113_v37  ;;  %v10229_v60 = vcombine.high %v10195_v12, %v10197_v21  ;;  %v10208_v21 = vld [vmem:[%s17077_s10 + $0x2d8] sm:$0xff] }
0x1204   :  { %v10116_v28 = vcombine.high %v10082_v27, %v10084_v53  ;;  %v10115_v62 = vcombine.low %v10082_v27, %v10084_v53  ;;  %5238 = vmatprep.subr.bf16.mxu0 %v10118_v11 }
0x1205   :  { %4896 = vadd.xlane.f32.xlu1 %v4886_v15  ;;  %v4887_v33 = vmul.f32 %v15184_v52, %v15184_v52 }
0x1206   :  { %5175 = vmatprep.subr.bf16.mxu1 %v10116_v28 }
0x1207   :  { %4898 = vadd.xlane.f32.xlu0 %v4887_v33  ;;  %5176 = vmatpush1.bf16.msra.mxu1 %v10115_v62 }
0x1208   :  { %5239 = vmatpush1.bf16.msra.mxu0 %v10117_v17  ;;  %5177 = vmatprep.subr.bf16.mxu1 %v10120_v34 }
0x1209   :  { %5240 = vmatprep.subr.bf16.mxu0 %v10122_v56 }
0x120b   :  { %5178 = vmatpush1.bf16.msra.mxu1 %v10119_v44  ;;  %v10200_v44 = vld [vmem:[%s17077_s10 + $0x258] sm:$0xff] }
0x120c   :  { %5241 = vmatpush1.bf16.msra.mxu0 %v10121_v43  ;;  %5179 = vmatprep.subr.bf16.mxu1 %v10124_v57  ;;  %v10202_v43 = vld [vmem:[%s17077_s10 + $0x278] sm:$0xff] }
0x120d   :  { %5242 = vmatprep.subr.bf16.mxu0 %v10126_v16  ;;  %v10235_v46 = vcombine.high %v10200_v44, %v10202_v43  ;;  %v10205_v16 = vld [vmem:[%s17077_s10 + $0x2b0] sm:$0xff]  ;;  %v10234_v19 = vcombine.low %v10200_v44, %v10202_v43  ;;  %v10220_v43 = vld [vmem:[%s17077_s10 + $0x398] sm:$0xff] }
0x120e   :  { %v10219_v44 = vld [vmem:[%s17077_s10 + $0x390] sm:$0xff] }
0x120f   :  { %5180 = vmatpush1.bf16.msra.mxu1 %v10123_v41  ;;  %v10203_v41 = vld [vmem:[%s17077_s10 + $0x290] sm:$0xff] }
0x1210   :  { %5243 = vmatpush1.bf16.msra.mxu0 %v10125_v49  ;;  %5181 = vmatprep.subr.bf16.mxu1 %v10128_v59  ;;  %v10236_v3 = vcombine.low %v10203_v41, %v10205_v16 }
0x1211   :  { %5244 = vmatprep.subr.bf16.mxu0 %v10130_v2  ;;  %v10207_v2 = vld [vmem:[%s17077_s10 + $0x2d0] sm:$0xff] }
0x1213   :  { %5182 = vmatpush1.bf16.msra.mxu1 %v10127_v13  ;;  %v10237_v13 = vcombine.high %v10203_v41, %v10205_v16 }
0x1214   :  { %5245 = vmatpush1.bf16.msra.mxu0 %v10129_v40  ;;  %5608 = vmatprep.subr.bf16.mxu1 %v10229_v60  ;;  %v10239_v40 = vcombine.high %v10204_v30, %v10206_v50 }
0x1215   :  { %5671 = vmatprep.subr.bf16.mxu0 %v10231_v1 }
0x1280   :  { %v4889_v14 = vpop.xlane.xlu1 %4888 }
0x1281   :  { %v4900_v23 = vmul.f32 0.0078125, %v4889_v14 }
0x1282   :  { %v4891_v15 = vpop.xlane.xlu0 %4890 }
0x1283   :  { %v4906_v31 = vadd.f32 1e-05, %v4900_v23  ;;  %v4901_v20 = vmul.f32 0.0078125, %v4891_v15  ;;  %v10243_v23 = vcombine.high %v10208_v21, %v10210_v26  ;;  %v10211_v15 = vld [vmem:[%s17077_s10 + $0x310] sm:$0xff] }
0x1285   :  { %12757 = vrsqrt.f32 %v4906_v31  ;;  %v4907_v54 = vadd.f32 1e-05, %v4901_v20  ;;  %v10212_v20 = vld [vmem:[%s17077_s10 + $0x318] sm:$0xff] }
0x1287   :  { %12759 = vrsqrt.f32 %v4907_v54  ;;  %v10214_v54 = vld [vmem:[%s17077_s10 + $0x338] sm:$0xff] }
0x128a   :  { %v4893_v33 = vpop.xlane.xlu1 %4892 }
0x128b   :  { %v4902_v9 = vmul.f32 0.0078125, %v4893_v33 }
0x128d   :  { %v4908_v61 = vadd.f32 1e-05, %v4902_v9 }
0x128e   :  { %v4895_v32 = vpop.xlane.xlu0 %4894 }
0x128f   :  { %v12758_v37 = vpop.eup %12757  ;;  %12761 = vrsqrt.f32 %v4908_v61  ;;  %v4903_v27 = vmul.f32 0.0078125, %v4895_v32 }
0x1290   :  { %v4918_v53 = vmul.f32 %v12758_v37, %v15154_v24  ;;  %v10199_v24 = vld [vmem:[%s17077_s10 + $0x250] sm:$0xff] }
0x1291   :  { %v12760_v47 = vpop.eup %12759  ;;  %v4909_v28 = vadd.f32 1e-05, %v4903_v27  ;;  %v10242_v27 = vcombine.low %v10208_v21, %v10210_v26  ;;  %v12373_v21 = vld [vmem:[%s17080_s12 + $0x340] sm:$0xff]  }
0x1292   :  { %v4930_v35 = vmul.f32 %v15265_v42, %v4918_v53  ;;  %v4919_v62 = vmul.f32 %v12760_v47, %v15156_v18  ;;  %v4897_v17 = vpop.xlane.xlu1 %4896  ;;  %v10201_v18 = vld [vmem:[%s17077_s10 + $0x270] sm:$0xff]  ;;  %v12375_v26 = vld [vmem:[%s17080_s12 + $0x300] sm:$0xff]  }
0x1293   :  { %12763 = vrsqrt.f32 %v4909_v28  ;;  %v4904_v11 = vmul.f32 0.0078125, %v4897_v17  ;;  %v10233_v57 = vcombine.high %v10199_v24, %v10201_v18  ;;  %v10232_v59 = vcombine.low %v10199_v24, %v10201_v18  ;;  %v10216_v17 = vld [vmem:[%s17077_s10 + $0x358] sm:$0xff] }
0x1294   :  { %v4931_v6 = vmul.f32 %v15265_v42, %v4919_v62  ;;  %v4899_v51 = vpop.xlane.xlu0 %4898  ;;  %v15289_v56 = vadd.f32 %v15273_v48, %v4930_v35  ;;  %v10247_v28 = vcombine.high %v10212_v20, %v10214_v54  ;;  %v10215_v62 = vld [vmem:[%s17077_s10 + $0x350] sm:$0xff]  ;;  %v10246_v24 = vcombine.low %v10212_v20, %v10214_v54  ;;  %v12386_v20 = vld [vmem:[%s17080_s12 + $0x3d8] sm:$0xff]  }
0x1295   :  { %v4910_v34 = vadd.f32 1e-05, %v4904_v11  ;;  %v4905_v39 = vmul.f32 0.0078125, %v4899_v51  ;;  %v10218_v11 = vld [vmem:[%s17077_s10 + $0x378] sm:$0xff] }
0x1296   :  { %v15292_v58 = vadd.f32 %v15273_v48, %v4931_v6  ;;  %v10251_v18 = vcombine.high %v10216_v17, %v10218_v11  ;;  %v10250_v41 = vcombine.low %v10216_v17, %v10218_v11  ;;  %v12387_v54 = vld [vmem:[%s17080_s12 + $0x318] sm:$0xff]   ;;  %v12398_v17 = vld [vmem:[%s17080_s12 + $0x3f0] sm:$0xff]  }
0x1297   :  { %12765 = vrsqrt.f32 %v4910_v34  ;;  %v4911_v22 = vadd.f32 1e-05, %v4905_v39  ;;  %v12399_v11 = vld [vmem:[%s17080_s12 + $0x330] sm:$0xff]  }
0x1298   :  { %v15296_v29 = vpack.c.bf16 %v15292_v58, %v15289_v56 }
0x1299   :  { %v12762_v49 = vpop.eup %12761  ;;  %12767 = vrsqrt.f32 %v4911_v22  ;;  %v10222_v22 = vld [vmem:[%s17077_s10 + $0x3b8] sm:$0xff] }
0x129a   :  { %5200 = vmatmul.mubr.bf16.vlgmr.msra.gmra.mrb[176].mxu1 %v15296_v29  ;;  %5263 = vmatmul.mubr.bf16.vlgmr.msra.gmra.mrb[196].mxu0 %v15296_v29  ;;  %v4920_v63 = vmul.f32 %v12762_v49, %v15162_v4  ;;  %v10209_v4 = vld [vmem:[%s17077_s10 + $0x2f0] sm:$0xff] }
0x129b   :  { %5609 = vmatpush1.bf16.msra.mxu1 %v10228_v55  ;;  %5672 = vmatpush1.bf16.msra.mxu0 %v10230_v36  ;;  %v10238_v36 = vcombine.low %v10204_v30, %v10206_v50  ;;  %v10241_v14 = vcombine.high %v10207_v2, %v10209_v4  ;;  %v10240_v37 = vcombine.low %v10207_v2, %v10209_v4  ;;  %v10223_v50 = vld [vmem:[%s17077_s10 + $0x3d0] sm:$0xff] }
0x129c   :  { %5610 = vmatprep.subr.bf16.mxu1 %v10233_v57  ;;  %5673 = vmatprep.subr.bf16.mxu0 %v10235_v46  ;;  %v4932_v60 = vmul.f32 %v15265_v42, %v4920_v63  ;;  %v10255_v30 = vcombine.high %v10220_v43, %v10222_v22  ;;  %v10224_v63 = vld [vmem:[%s17077_s10 + $0x3d8] sm:$0xff] }
0x129d   :  { %v12764_v12 = vpop.eup %12763  ;;  %5209 = vmatprep.mubr.bf16.mxu1 %v12951_v38  ;;  %5272 = vmatprep.mubr.bf16.mxu0 %v12951_v38 }
0x129e   :  { %v4921_v55 = vmul.f32 %v12764_v12, %v15166_v25  ;;  %v10213_v25 = vld [vmem:[%s17077_s10 + $0x330] sm:$0xff]  ;;  %v15343_v33 = vadd.f32 %v15273_v48, %v4932_v60  ;;  %v12377_v60 = vld [vmem:[%s17080_s12 + $0x348] sm:$0xff]  }
0x129f   :  { %5611 = vmatpush1.bf16.msra.mxu1 %v10232_v59  ;;  %5674 = vmatpush1.bf16.msra.mxu0 %v10234_v19  ;;  %v10245_v53 = vcombine.high %v10211_v15, %v10213_v25  ;;  %v10244_v51 = vcombine.low %v10211_v15, %v10213_v25  ;;  %v10226_v59 = vld [vmem:[%s17077_s10 + $0x3f8] sm:$0xff]  ;;  %v12383_v15 = vld [vmem:[%s17080_s12 + $0x310] sm:$0xff]  }
0x12a0   :  { %5612 = vmatprep.subr.bf16.mxu1 %v10237_v13  ;;  %5675 = vmatprep.subr.bf16.mxu0 %v10239_v40  ;;  %v4933_v1 = vmul.f32 %v15265_v42, %v4921_v55  ;;  %v10254_v13 = vcombine.low %v10220_v43, %v10222_v22  ;;  %v10259_v2 = vcombine.high %v10224_v63, %v10226_v59  ;;  %v12376_v55 = vld [vmem:[%s17080_s12 + $0x380] sm:$0xff]   ;;  %v12384_v25 = vld [vmem:[%s17080_s12 + $0x390] sm:$0xff]  }
0x12a1   :  { %v12766_v31 = vpop.eup %12765  ;;  %v10258_v4 = vcombine.low %v10224_v63, %v10226_v59 }
0x12a2   :  { %v15346_v9 = vadd.f32 %v15273_v48, %v4933_v1  ;;  %v4922_v61 = vmul.f32 %v12766_v31, %v15179_v10  ;;  %v10217_v10 = vld [vmem:[%s17077_s10 + $0x370] sm:$0xff]  ;;  %v12380_v1 = vld [vmem:[%s17080_s12 + $0x388] sm:$0xff]   ;;  %v12385_v31 = vld [vmem:[%s17080_s12 + $0x358] sm:$0xff]  }
0x12a3   :  { %v12768_v32 = vpop.eup %12767  ;;  %5613 = vmatpush1.bf16.msra.mxu1 %v10236_v3  ;;  %5676 = vmatpush1.bf16.msra.mxu0 %v10238_v36  ;;  %v10249_v39 = vcombine.high %v10215_v62, %v10217_v10  ;;  %v10248_v46 = vcombine.low %v10215_v62, %v10217_v10  ;;  %v12378_v3 = vld [vmem:[%s17080_s12 + $0x3c8] sm:$0xff]   ;;  %v12397_v10 = vld [vmem:[%s17080_s12 + $0x370] sm:$0xff]  }
0x12a4   :  { %v15351_v47 = vpack.c.bf16 %v15346_v9, %v15343_v33  ;;  %5614 = vmatprep.subr.bf16.mxu1 %v10241_v14  ;;  %5677 = vmatprep.subr.bf16.mxu0 %v10243_v23  ;;  %v4923_v35 = vmul.f32 %v12768_v32, %v15184_v52  ;;  %v4934_v52 = vmul.f32 %v15265_v42, %v4922_v61  ;;  %v12379_v36 = vld [vmem:[%s17080_s12 + $0x308] sm:$0xff]   ;;  %v12381_v14 = vld [vmem:[%s17080_s12 + $0x350] sm:$0xff]   ;;  %v12388_v61 = vld [vmem:[%s17080_s12 + $0x398] sm:$0xff]  }
0x12a5   :  { %v12382_v23 = vld [vmem:[%s17080_s12 + $0x3d0] sm:$0xff]   ;;  %v12389_v32 = vld [vmem:[%s17080_s12 + $0x360] sm:$0xff]   ;;  %v12396_v62 = vld [vmem:[%s17080_s12 + $0x3a8] sm:$0xff]  }
0x12a6   :  { %5210 = vmatmul.mubr.bf16.gmra.mrb[180].mxu1 %v15351_v47  ;;  %5273 = vmatmul.mubr.bf16.gmra.mrb[200].mxu0 %v15351_v47  ;;  %v4935_v6 = vmul.f32 %v15265_v42, %v4923_v35  ;;  %v10221_v42 = vld [vmem:[%s17077_s10 + $0x3b0] sm:$0xff]  ;;  %v15388_v57 = vadd.f32 %v15273_v48, %v4934_v52  ;;  %v12395_v35 = vld [vmem:[%s17080_s12 + $0x328] sm:$0xff]  }
0x12a7   :  { %5615 = vmatpush1.bf16.msra.mxu1 %v10240_v37  ;;  %5678 = vmatpush1.bf16.msra.mxu0 %v10242_v27  ;;  %v10253_v16 = vcombine.high %v10219_v44, %v10221_v42  ;;  %v10252_v19 = vcombine.low %v10219_v44, %v10221_v42  ;;  %v12390_v37 = vld [vmem:[%s17080_s12 + $0x3e0] sm:$0xff]   ;;  %v12400_v52 = vld [vmem:[%s17080_s12 + $0x3b0] sm:$0xff]   ;;  %v10098_v42 = vld [vmem:[%s17081_s11 + $0x8] sm:$0xf] }
0x12a8   :  { %5616 = vmatprep.subr.bf16.mxu1 %v10245_v53  ;;  %5679 = vmatprep.subr.bf16.mxu0 %v10247_v28  ;;  %v15371_v34 = vadd.f32 %v15273_v48, %v4935_v6  ;;  %v10225_v48 = vld [vmem:[%s17077_s10 + $0x3f0] sm:$0xff]  ;;  %v12391_v27 = vld [vmem:[%s17080_s12 + $0x320] sm:$0xff]   ;;  %v12394_v28 = vld [vmem:[%s17080_s12 + $0x3e8] sm:$0xff]   ;;  %v15520_v43 = vrot.slane %v10098_v42, %v13217_v5  ;;  %v15523_v22 = vrot.slane %v10098_v42, %v13223_v7 }
0x12a9   :  { %5219 = vmatprep.mubr.bf16.mxu1 %v12951_v38  ;;  %5282 = vmatprep.mubr.bf16.mxu0 %v12951_v38  ;;  %v10257_v40 = vcombine.high %v10223_v50, %v10225_v48  ;;  %v10256_v12 = vcombine.low %v10223_v50, %v10225_v48  ;;  %v12392_v53 = vld [vmem:[%s17080_s12 + $0x3a0] sm:$0xff]   ;;  %v12401_v6 = vld [vmem:[%s17080_s12 + $0x378] sm:$0xff]  }
0x12aa   :  { %v4950_v49 = vpack.c.bf16 %v15371_v34, %v15388_v57  ;;  %v12406_v44 = vld [vmem:[%s17080_s12 + $0x2c0] sm:$0xff]  }
0x12ab   :  { %5617 = vmatpush1.bf16.msra.mxu1 %v10244_v51  ;;  %5680 = vmatpush1.bf16.msra.mxu0 %v10246_v24  ;;  %v12402_v51 = vld [vmem:[%s17080_s12 + $0x3f8] sm:$0xff]  }
0x12ac   :  { %5618 = vmatprep.subr.bf16.mxu1 %v10249_v39  ;;  %5681 = vmatprep.subr.bf16.mxu0 %v10251_v18  ;;  %v12403_v24 = vld [vmem:[%s17080_s12 + $0x338] sm:$0xff]   ;;  %v12405_v18 = vld [vmem:[%s17080_s12 + $0x240] sm:$0xff]  }
0x12ad   :  { %v12404_v39 = vld [vmem:[%s17080_s12 + $0x3b8] sm:$0xff]  }
0x12ae   :  { %5220 = vmatmul.mubr.bf16.gmra.mrb[184].mxu1 %v4950_v49  ;;  %5283 = vmatmul.mubr.bf16.gmra.mrb[204].mxu0 %v4950_v49 }
0x12af   :  { %5619 = vmatpush1.bf16.msra.mxu1 %v10248_v46  ;;  %5682 = vmatpush1.bf16.msra.mxu0 %v10250_v41  ;;  %v15526_v46 = vrot.slane %v10098_v42, %v13226_v8  ;;  %v15529_v41 = vrot.slane %v10098_v42, %v14198_v45 }
0x12b0   :  { %5620 = vmatprep.subr.bf16.mxu1 %v10253_v16  ;;  %5683 = vmatprep.subr.bf16.mxu0 %v10255_v30 }
0x12b1   :  { %5640 = vmatprep.mubr.bf16.mxu1 %v12951_v38  ;;  %5703 = vmatprep.mubr.bf16.mxu0 %v12951_v38 }
0x12b3   :  { %5621 = vmatpush1.bf16.msra.mxu1 %v10252_v19  ;;  %5684 = vmatpush1.bf16.msra.mxu0 %v10254_v13 }
0x12b4   :  { %5622 = vmatprep.subr.bf16.mxu1 %v10257_v40  ;;  %5685 = vmatprep.subr.bf16.mxu0 %v10259_v2 }
0x12b7   :  { %5623 = vmatpush1.bf16.msra.mxu1 %v10256_v12  ;;  %5686 = vmatpush1.bf16.msra.mxu0 %v10258_v4 }
0x12b8   :  { %11116 = vmatprep.subr.bf16.mxu1 %v12373_v21 }
0x12ba   :  { %5641 = vmatmul.mubr.bf16.vlgmr.msra.gmra.mrb[188].mxu1 %v15296_v29  ;;  %5704 = vmatmul.mubr.bf16.vlgmr.msra.gmra.mrb[208].mxu0 %v15296_v29  ;;  %v12374_v29 = vld [vmem:[%s17080_s12 + $0x3c0] sm:$0xff]  }
0x12bb   :  { %5650 = vmatprep.mubr.bf16.mxu1 %v12951_v38  ;;  %5713 = vmatprep.mubr.bf16.mxu0 %v12951_v38 }
0x12bc   :  { %11150 = vmatprep.subr.bf16.mxu0 %v12374_v29  ;;  %11117 = vmatpush3.bf16.msra.mxu1 %v12375_v26 }
0x12bd   :  { %11151 = vmatpush3.bf16.msra.mxu0 %v12376_v55  ;;  %11118 = vmatprep.subr.bf16.mxu1 %v12377_v60 }
0x12be   :  { %11152 = vmatprep.subr.bf16.mxu0 %v12378_v3 }
0x12c0   :  { %11119 = vmatpush3.bf16.msra.mxu1 %v12379_v36 }
0x12c1   :  { %11153 = vmatpush3.bf16.msra.mxu0 %v12380_v1  ;;  %11120 = vmatprep.subr.bf16.mxu1 %v12381_v14 }
0x12c2   :  { %5651 = vmatmul.mubr.bf16.gmra.mrb[192].mxu1 %v15351_v47  ;;  %5714 = vmatmul.mubr.bf16.gmra.mrb[212].mxu0 %v15351_v47  ;;  %v12393_v47 = vld [vmem:[%s17080_s12 + $0x368] sm:$0xff]  }
0x12c3   :  { %5660 = vmatprep.mubr.bf16.mxu1 %v12951_v38  ;;  %5723 = vmatprep.mubr.bf16.mxu0 %v12951_v38 }
0x12c4   :  { %11154 = vmatprep.subr.bf16.mxu0 %v12382_v23  ;;  %11121 = vmatpush3.bf16.msra.mxu1 %v12383_v15 }
0x12c5   :  { %11155 = vmatpush3.bf16.msra.mxu0 %v12384_v25  ;;  %11122 = vmatprep.subr.bf16.mxu1 %v12385_v31 }
0x12c6   :  { %11156 = vmatprep.subr.bf16.mxu0 %v12386_v20 }
0x12c8   :  { %11123 = vmatpush3.bf16.msra.mxu1 %v12387_v54 }
0x12c9   :  { %11157 = vmatpush3.bf16.msra.mxu0 %v12388_v61  ;;  %11124 = vmatprep.subr.bf16.mxu1 %v12389_v32 }
0x12ca   :  { %5661 = vmatmul.mubr.bf16.gmra.mrb[196].mxu1 %v4950_v49  ;;  %5724 = vmatmul.mubr.bf16.gmra.mrb[216].mxu0 %v4950_v49 }
0x12cb   :  { %11158 = vmatprep.subr.bf16.mxu0 %v12390_v37 }
0x12cc   :  { %11125 = vmatpush3.bf16.msra.mxu1 %v12391_v27 }
0x12cd   :  { %11159 = vmatpush3.bf16.msra.mxu0 %v12392_v53  ;;  %11126 = vmatprep.subr.bf16.mxu1 %v12393_v47 }
0x12ce   :  { %11160 = vmatprep.subr.bf16.mxu0 %v12394_v28 }
0x12d0   :  { %11127 = vmatpush3.bf16.msra.mxu1 %v12395_v35 }
0x12d1   :  { %11161 = vmatpush3.bf16.msra.mxu0 %v12396_v62  ;;  %11128 = vmatprep.subr.bf16.mxu1 %v12397_v10 }
0x12d2   :  { %11162 = vmatprep.subr.bf16.mxu0 %v12398_v17 }
0x12d4   :  { %11129 = vmatpush3.bf16.msra.mxu1 %v12399_v11 }
0x12d5   :  { %11163 = vmatpush3.bf16.msra.mxu0 %v12400_v52  ;;  %11130 = vmatprep.subr.bf16.mxu1 %v12401_v6 }
0x12d6   :  { %11164 = vmatprep.subr.bf16.mxu0 %v12402_v51 }
0x12d8   :  { %11131 = vmatpush3.bf16.msra.mxu1 %v12403_v24 }
0x12d9   :  { %11165 = vmatpush3.bf16.msra.mxu0 %v12404_v39  ;;  %11184 = vmatprep.subr.bf16.mxu1 %v12405_v18 }
0x12da   :  { %11218 = vmatprep.subr.bf16.mxu0 %v12406_v44 }
0x136d   :  { %v5201_v49 = vpop.f32.mrb[176].mxu1  ;;  %v5264_v16 = vpop.f32.mrb[196].mxu0 }
0x136e   :  { %v5202_v30 = vadd.f32 %v5201_v49, %v15520_v43  ;;  %v5265_v50 = vadd.f32 %v5264_v16, %v15523_v22  ;;  %v5203_v48 = vpop.f32.mrb[177].mxu1  ;;  %v5266_v63 = vpop.f32.mrb[197].mxu0 }
0x136f   :  { %v5204_v59 = vadd.f32 %v5203_v48, %v15526_v46  ;;  %v5267_v19 = vadd.f32 %v5266_v63, %v15529_v41  ;;  %v5205_v13 = vpop.f32.mrb[178].mxu1  ;;  %v5268_v40 = vpop.f32.mrb[198].mxu0 }
0x1370   :  { %v5206_v2 = vadd.f32 %v5205_v13, %v15520_v43  ;;  %v5269_v12 = vadd.f32 %v5268_v40, %v15523_v22  ;;  %v5207_v4 = vpop.f32.mrb[179].mxu1  ;;  %v5270_v21 = vpop.f32.mrb[199].mxu0  ;;  %v5293_v55 = vmax.f32 %v5202_v30, 0.0  ;;  %v5295_v60 = vmax.f32 %v5265_v50, 0.0 }
0x1371   :  { %v5208_v29 = vadd.f32 %v5207_v4, %v15526_v46  ;;  %v5271_v26 = vadd.f32 %v5270_v21, %v15529_v41  ;;  %v5294_v1 = vmax.f32 %v5204_v59, 0.0  ;;  %v5296_v14 = vmax.f32 %v5267_v19, 0.0 }
0x1372   :  { %v5297_v3 = vmax.f32 %v5206_v2, 0.0  ;;  %v5299_v36 = vmax.f32 %v5269_v12, 0.0 }
0x1373   :  { %v5298_v23 = vmax.f32 %v5208_v29, 0.0  ;;  %v5300_v15 = vmax.f32 %v5271_v26, 0.0 }
0x1374   :  { %v15539_v25 = vpack.c.bf16 %v5297_v3, %v5293_v55  ;;  %v15541_v31 = vpack.c.bf16 %v5299_v36, %v5295_v60 }
0x1375   :  { %v15543_v20 = vpack.c.bf16 %v5298_v23, %v5294_v1  ;;  %v15545_v54 = vpack.c.bf16 %v5300_v15, %v5296_v14 }
0x1379   :  { %v5211_v61 = vpop.f32.mrb[180].mxu1  ;;  %v5274_v32 = vpop.f32.mrb[200].mxu0 }
0x137a   :  { %v5212_v37 = vadd.f32 %v5211_v61, %v15520_v43  ;;  %v5275_v27 = vadd.f32 %v5274_v32, %v15523_v22  ;;  %v5213_v53 = vpop.f32.mrb[181].mxu1  ;;  %v5276_v47 = vpop.f32.mrb[201].mxu0 }
0x137b   :  { %v5214_v28 = vadd.f32 %v5213_v53, %v15526_v46  ;;  %v5277_v35 = vadd.f32 %v5276_v47, %v15529_v41  ;;  %v5215_v62 = vpop.f32.mrb[182].mxu1  ;;  %v5278_v10 = vpop.f32.mrb[202].mxu0 }
0x137c   :  { %v5216_v17 = vadd.f32 %v5215_v62, %v15520_v43  ;;  %v5279_v11 = vadd.f32 %v5278_v10, %v15523_v22  ;;  %v5217_v52 = vpop.f32.mrb[183].mxu1  ;;  %v5280_v6 = vpop.f32.mrb[203].mxu0  ;;  %v5301_v39 = vmax.f32 %v5212_v37, 0.0  ;;  %v5303_v18 = vmax.f32 %v5275_v27, 0.0 }
0x137d   :  { %v5218_v51 = vadd.f32 %v5217_v52, %v15526_v46  ;;  %v5281_v24 = vadd.f32 %v5280_v6, %v15529_v41  ;;  %v5302_v49 = vmax.f32 %v5214_v28, 0.0  ;;  %v5304_v16 = vmax.f32 %v5277_v35, 0.0 }
0x137e   :  { %v5305_v44 = vmax.f32 %v5216_v17, 0.0  ;;  %v5307_v42 = vmax.f32 %v5279_v11, 0.0 }
0x137f   :  { %v5306_v30 = vmax.f32 %v5218_v51, 0.0  ;;  %v5308_v50 = vmax.f32 %v5281_v24, 0.0 }
0x1380   :  { %v15555_v48 = vpack.c.bf16 %v5305_v44, %v5301_v39  ;;  %v15557_v63 = vpack.c.bf16 %v5307_v42, %v5303_v18 }
0x1381   :  { %v15559_v59 = vpack.c.bf16 %v5306_v30, %v5302_v49  ;;  %v15561_v19 = vpack.c.bf16 %v5308_v50, %v5304_v16  ;;  %v5221_v13 = vpop.f32.mrb[184].mxu1  ;;  %v5284_v40 = vpop.f32.mrb[204].mxu0 }
0x1382   :  { %v5222_v2 = vadd.f32 %v5221_v13, %v15520_v43  ;;  %v5285_v12 = vadd.f32 %v5284_v40, %v15523_v22  ;;  %v5223_v4 = vpop.f32.mrb[185].mxu1  ;;  %v5286_v21 = vpop.f32.mrb[205].mxu0 }
0x1383   :  { %v5224_v29 = vadd.f32 %v5223_v4, %v15526_v46  ;;  %v5287_v26 = vadd.f32 %v5286_v21, %v15529_v41  ;;  %v5225_v55 = vpop.f32.mrb[186].mxu1  ;;  %v5288_v60 = vpop.f32.mrb[206].mxu0 }
0x1384   :  { %v5226_v3 = vadd.f32 %v5225_v55, %v15520_v43  ;;  %v5289_v36 = vadd.f32 %v5288_v60, %v15523_v22  ;;  %v5227_v1 = vpop.f32.mrb[187].mxu1  ;;  %v5290_v14 = vpop.f32.mrb[207].mxu0  ;;  %v5309_v61 = vmax.f32 %v5222_v2, 0.0  ;;  %v5311_v32 = vmax.f32 %v5285_v12, 0.0  ;;  %v10227_v43 = vld [vmem:[%s17081_s11 + $0xc] sm:$0xf] }
0x1385   :  { %v5228_v23 = vadd.f32 %v5227_v1, %v15526_v46  ;;  %v5291_v15 = vadd.f32 %v5290_v14, %v15529_v41  ;;  %v5310_v53 = vmax.f32 %v5224_v29, 0.0  ;;  %v5312_v47 = vmax.f32 %v5287_v26, 0.0 }
0x1386   :  { %v5313_v37 = vmax.f32 %v5226_v3, 0.0  ;;  %v5315_v27 = vmax.f32 %v5289_v36, 0.0  ;;  %v15583_v41 = vrot.slane %v10227_v43, %v13217_v5  ;;  %v15586_v17 = vrot.slane %v10227_v43, %v13223_v7 }
0x1387   :  { %v5314_v28 = vmax.f32 %v5228_v23, 0.0  ;;  %v5316_v35 = vmax.f32 %v5291_v15, 0.0  ;;  %v15589_v11 = vrot.slane %v10227_v43, %v13226_v8  ;;  %v15592_v52 = vrot.slane %v10227_v43, %v14198_v45 }
0x1388   :  { %v15574_v62 = vpack.c.bf16 %v5313_v37, %v5309_v61  ;;  %v15576_v22 = vpack.c.bf16 %v5315_v27, %v5311_v32  ;;  %v12407_v27 = vld [vmem:[%s17080_s12 + $0x200] sm:$0xff]  }
0x1389   :  { %v15578_v10 = vpack.c.bf16 %v5314_v28, %v5310_v53  ;;  %v15580_v46 = vpack.c.bf16 %v5316_v35, %v5312_v47  ;;  %v12408_v53 = vld [vmem:[%s17080_s12 + $0x280] sm:$0xff]  }
0x138d   :  { %v5642_v6 = vpop.f32.mrb[188].mxu1  ;;  %v5705_v51 = vpop.f32.mrb[208].mxu0 }
0x138e   :  { %v5643_v24 = vadd.f32 %v5642_v6, %v15583_v41  ;;  %v5706_v39 = vadd.f32 %v5705_v51, %v15586_v17  ;;  %v5644_v18 = vpop.f32.mrb[189].mxu1  ;;  %v5707_v44 = vpop.f32.mrb[209].mxu0  ;;  %v12409_v6 = vld [vmem:[%s17080_s12 + $0x248] sm:$0xff]  }
0x138f   :  { %v5645_v42 = vadd.f32 %v5644_v18, %v15589_v11  ;;  %v5708_v49 = vadd.f32 %v5707_v44, %v15592_v52  ;;  %v5646_v16 = vpop.f32.mrb[190].mxu1  ;;  %v5709_v30 = vpop.f32.mrb[210].mxu0  ;;  %v12410_v51 = vld [vmem:[%s17080_s12 + $0x2c8] sm:$0xff]  }
0x1390   :  { %v5647_v50 = vadd.f32 %v5646_v16, %v15583_v41  ;;  %v5710_v13 = vadd.f32 %v5709_v30, %v15586_v17  ;;  %v5648_v40 = vpop.f32.mrb[191].mxu1  ;;  %v5711_v2 = vpop.f32.mrb[211].mxu0  ;;  %v5734_v21 = vmax.f32 %v5643_v24, 0.0  ;;  %v5736_v29 = vmax.f32 %v5706_v39, 0.0 }
0x1391   :  { %v5649_v12 = vadd.f32 %v5648_v40, %v15589_v11  ;;  %v5712_v4 = vadd.f32 %v5711_v2, %v15592_v52  ;;  %v5735_v60 = vmax.f32 %v5645_v42, 0.0  ;;  %v5737_v3 = vmax.f32 %v5708_v49, 0.0  ;;  %v12411_v40 = vld [vmem:[%s17080_s12 + $0x208] sm:$0xff]  }
0x1392   :  { %v5738_v26 = vmax.f32 %v5647_v50, 0.0  ;;  %v5740_v55 = vmax.f32 %v5710_v13, 0.0  ;;  %v12412_v2 = vld [vmem:[%s17080_s12 + $0x288] sm:$0xff]  }
0x1393   :  { %v5739_v36 = vmax.f32 %v5649_v12, 0.0  ;;  %v5741_v1 = vmax.f32 %v5712_v4, 0.0 }
0x1394   :  { %v5758_v14 = vpack.c.bf16 %v5738_v26, %v5734_v21  ;;  %v5760_v23 = vpack.c.bf16 %v5740_v55, %v5736_v29  ;;  %v12413_v26 = vld [vmem:[%s17080_s12 + $0x250] sm:$0xff]  }
0x1395   :  { %v5759_v15 = vpack.c.bf16 %v5739_v36, %v5735_v60  ;;  %v5761_v61 = vpack.c.bf16 %v5741_v1, %v5737_v3  ;;  %v5652_v32 = vpop.f32.mrb[192].mxu1  ;;  %v5715_v37 = vpop.f32.mrb[212].mxu0  ;;  %v12414_v55 = vld [vmem:[%s17080_s12 + $0x2d0] sm:$0xff]  }
0x1396   :  { %v5653_v47 = vadd.f32 %v5652_v32, %v15583_v41  ;;  %v5716_v28 = vadd.f32 %v5715_v37, %v15586_v17  ;;  %v5654_v35 = vpop.f32.mrb[193].mxu1  ;;  %v5717_v43 = vpop.f32.mrb[213].mxu0 }
0x1397   :  { %v5655_v24 = vadd.f32 %v5654_v35, %v15589_v11  ;;  %v5718_v39 = vadd.f32 %v5717_v43, %v15592_v52  ;;  %v5656_v18 = vpop.f32.mrb[194].mxu1  ;;  %v5719_v44 = vpop.f32.mrb[214].mxu0  ;;  %6058 = vmatprep.mubr.bf16.mxu1 %v5759_v15  ;;  %6115 = vmatprep.mubr.bf16.mxu0 %v5761_v61 }
0x1398   :  { %v5657_v42 = vadd.f32 %v5656_v18, %v15583_v41  ;;  %v5720_v49 = vadd.f32 %v5719_v44, %v15586_v17  ;;  %v5658_v16 = vpop.f32.mrb[195].mxu1  ;;  %v5721_v30 = vpop.f32.mrb[215].mxu0  ;;  %6059 = vmatmul.mubr.bf16.vlgmr.msra.gmra.mrb[200].mxu1 %v5758_v14  ;;  %6116 = vmatmul.mubr.bf16.vlgmr.msra.gmra.mrb[220].mxu0 %v5760_v23  ;;  %v5742_v12 = vmax.f32 %v5653_v47, 0.0  ;;  %v5744_v4 = vmax.f32 %v5716_v28, 0.0 }
0x1399   :  { %v5659_v50 = vadd.f32 %v5658_v16, %v15589_v11  ;;  %v5722_v13 = vadd.f32 %v5721_v30, %v15592_v52  ;;  %11185 = vmatpush3.bf16.msra.mxu1 %v12407_v27  ;;  %11219 = vmatpush3.bf16.msra.mxu0 %v12408_v53  ;;  %v5743_v60 = vmax.f32 %v5655_v24, 0.0  ;;  %v5745_v3 = vmax.f32 %v5718_v39, 0.0  ;;  %v12415_v27 = vld [vmem:[%s17080_s12 + $0x210] sm:$0xff]  }
0x139a   :  { %v5746_v21 = vmax.f32 %v5657_v42, 0.0  ;;  %v5748_v29 = vmax.f32 %v5720_v49, 0.0  ;;  %11186 = vmatprep.subr.bf16.mxu1 %v12409_v6  ;;  %11220 = vmatprep.subr.bf16.mxu0 %v12410_v51  ;;  %v12416_v53 = vld [vmem:[%s17080_s12 + $0x290] sm:$0xff]   ;;  %v12417_v6 = vld [vmem:[%s17080_s12 + $0x258] sm:$0xff]  }
0x139b   :  { %v5747_v36 = vmax.f32 %v5659_v50, 0.0  ;;  %v5749_v1 = vmax.f32 %v5722_v13, 0.0  ;;  %v12418_v51 = vld [vmem:[%s17080_s12 + $0x2d8] sm:$0xff]  }
0x139c   :  { %v5762_v14 = vpack.c.bf16 %v5746_v21, %v5742_v12  ;;  %v5764_v23 = vpack.c.bf16 %v5748_v29, %v5744_v4 }
0x139d   :  { %v5763_v15 = vpack.c.bf16 %v5747_v36, %v5743_v60  ;;  %v5765_v61 = vpack.c.bf16 %v5749_v1, %v5745_v3  ;;  %11187 = vmatpush3.bf16.msra.mxu1 %v12411_v40  ;;  %11221 = vmatpush3.bf16.msra.mxu0 %v12412_v2  ;;  %v5662_v32 = vpop.f32.mrb[196].mxu1  ;;  %v5725_v37 = vpop.f32.mrb[216].mxu0  ;;  %v12419_v40 = vld [vmem:[%s17080_s12 + $0x218] sm:$0xff]  }
0x139e   :  { %v5663_v47 = vadd.f32 %v5662_v32, %v15583_v41  ;;  %v5726_v28 = vadd.f32 %v5725_v37, %v15586_v17  ;;  %v5664_v35 = vpop.f32.mrb[197].mxu1  ;;  %v5727_v43 = vpop.f32.mrb[217].mxu0  ;;  %11188 = vmatprep.subr.bf16.mxu1 %v12413_v26  ;;  %11222 = vmatprep.subr.bf16.mxu0 %v12414_v55  ;;  %v12427_v32 = vld [vmem:[%s17080_s12 + $0x228] sm:$0xff]  }
0x139f   :  { %v5665_v24 = vadd.f32 %v5664_v35, %v15589_v11  ;;  %v5728_v39 = vadd.f32 %v5727_v43, %v15592_v52  ;;  %v5666_v18 = vpop.f32.mrb[198].mxu1  ;;  %v5729_v44 = vpop.f32.mrb[218].mxu0  ;;  %6066 = vmatprep.mubr.bf16.mxu1 %v5763_v15  ;;  %6123 = vmatprep.mubr.bf16.mxu0 %v5765_v61  ;;  %v12425_v15 = vld [vmem:[%s17080_s12 + $0x268] sm:$0xff]   ;;  %v12435_v35 = vld [vmem:[%s17080_s12 + $0x238] sm:$0xff]  }
0x13a0   :  { %v5667_v42 = vadd.f32 %v5666_v18, %v15583_v41  ;;  %v5730_v49 = vadd.f32 %v5729_v44, %v15586_v17  ;;  %v5668_v16 = vpop.f32.mrb[199].mxu1  ;;  %v5731_v30 = vpop.f32.mrb[219].mxu0  ;;  %6067 = vmatmul.mubr.bf16.gmra.mrb[204].mxu1 %v5762_v14  ;;  %6124 = vmatmul.mubr.bf16.gmra.mrb[224].mxu0 %v5764_v23  ;;  %v12420_v41 = vld [vmem:[%s17080_s12 + $0x298] sm:$0xff]   ;;  %v5750_v2 = vmax.f32 %v5663_v47, 0.0  ;;  %v5752_v17 = vmax.f32 %v5726_v28, 0.0  ;;  %v12423_v14 = vld [vmem:[%s17080_s12 + $0x220] sm:$0xff]  }
0x13a1   :  { %v5669_v50 = vadd.f32 %v5668_v16, %v15589_v11  ;;  %v5732_v13 = vadd.f32 %v5731_v30, %v15592_v52  ;;  %11189 = vmatpush3.bf16.msra.mxu1 %v12415_v27  ;;  %11223 = vmatpush3.bf16.msra.mxu0 %v12416_v53  ;;  %v12421_v11 = vld [vmem:[%s17080_s12 + $0x260] sm:$0xff]   ;;  %v5751_v21 = vmax.f32 %v5665_v24, 0.0  ;;  %v5753_v29 = vmax.f32 %v5728_v39, 0.0  ;;  %v12426_v61 = vld [vmem:[%s17080_s12 + $0x2e8] sm:$0xff]   ;;  %v12429_v27 = vld [vmem:[%s17080_s12 + $0x270] sm:$0xff]  }
0x13a2   :  { %v5754_v12 = vmax.f32 %v5667_v42, 0.0  ;;  %v5756_v4 = vmax.f32 %v5730_v49, 0.0  ;;  %11190 = vmatprep.subr.bf16.mxu1 %v12417_v6  ;;  %11224 = vmatprep.subr.bf16.mxu0 %v12418_v51  ;;  %v12422_v52 = vld [vmem:[%s17080_s12 + $0x2e0] sm:$0xff]   ;;  %v12428_v37 = vld [vmem:[%s17080_s12 + $0x2a8] sm:$0xff]   ;;  %v12430_v53 = vld [vmem:[%s17080_s12 + $0x2f0] sm:$0xff]  }
0x13a3   :  { %v5755_v26 = vmax.f32 %v5669_v50, 0.0  ;;  %v5757_v55 = vmax.f32 %v5732_v13, 0.0  ;;  %v12424_v23 = vld [vmem:[%s17080_s12 + $0x2a0] sm:$0xff]   ;;  %v12431_v47 = vld [vmem:[%s17080_s12 + $0x230] sm:$0xff]   ;;  %v12434_v28 = vld [vmem:[%s17080_s12 + $0x2f8] sm:$0xff]  }
0x13a4   :  { %v5766_v60 = vpack.c.bf16 %v5754_v12, %v5750_v2  ;;  %v5768_v3 = vpack.c.bf16 %v5756_v4, %v5752_v17  ;;  %v12436_v43 = vld [vmem:[%s17080_s12 + $0x2b8] sm:$0xff]  }
0x13a5   :  { %v5767_v36 = vpack.c.bf16 %v5755_v26, %v5751_v21  ;;  %v5769_v1 = vpack.c.bf16 %v5757_v55, %v5753_v29  ;;  %11191 = vmatpush3.bf16.msra.mxu1 %v12419_v40  ;;  %11225 = vmatpush3.bf16.msra.mxu0 %v12420_v41 }
0x13a6   :  { %11192 = vmatprep.subr.bf16.mxu1 %v12421_v11  ;;  %11226 = vmatprep.subr.bf16.mxu0 %v12422_v52 }
0x13a7   :  { %6074 = vmatprep.mubr.bf16.mxu1 %v5767_v36  ;;  %6131 = vmatprep.mubr.bf16.mxu0 %v5769_v1 }
0x13a8   :  { %6075 = vmatmul.mubr.bf16.gmra.mrb[208].mxu1 %v5766_v60  ;;  %6132 = vmatmul.mubr.bf16.gmra.mrb[228].mxu0 %v5768_v3 }
0x13a9   :  { %11193 = vmatpush3.bf16.msra.mxu1 %v12423_v14  ;;  %11227 = vmatpush3.bf16.msra.mxu0 %v12424_v23 }
0x13aa   :  { %6364 = vmatprep.mubr.bf16.mxu1 %v15543_v20  ;;  %6421 = vmatprep.mubr.bf16.mxu0 %v15545_v54  ;;  %v12432_v20 = vld [vmem:[%s17080_s12 + $0x2b0] sm:$0xff]   ;;  %v12433_v54 = vld [vmem:[%s17080_s12 + $0x278] sm:$0xff]  }
0x13ab   :  { %11194 = vmatprep.subr.bf16.mxu1 %v12425_v15  ;;  %11228 = vmatprep.subr.bf16.mxu0 %v12426_v61 }
0x13ad   :  { %11195 = vmatpush3.bf16.msra.mxu1 %v12427_v32  ;;  %11229 = vmatpush3.bf16.msra.mxu0 %v12428_v37 }
0x13ae   :  { %11196 = vmatprep.subr.bf16.mxu1 %v12429_v27  ;;  %11230 = vmatprep.subr.bf16.mxu0 %v12430_v53 }
0x13b1   :  { %11197 = vmatpush3.bf16.msra.mxu1 %v12431_v47  ;;  %11231 = vmatpush3.bf16.msra.mxu0 %v12432_v20 }
0x13b2   :  { %11198 = vmatprep.subr.bf16.mxu1 %v12433_v54  ;;  %11232 = vmatprep.subr.bf16.mxu0 %v12434_v28 }
0x13b5   :  { %11199 = vmatpush3.bf16.msra.mxu1 %v12435_v35  ;;  %11233 = vmatpush3.bf16.msra.mxu0 %v12436_v43 }
0x13b6   :  { %11878 = vmatprep.subr.bf16.mxu0 %v12949_v0 }
0x13b8   :  { %6365 = vmatmul.mubr.bf16.vlgmr.msra.gmra.mrb[212].mxu1 %v15539_v25  ;;  %6422 = vmatmul.mubr.bf16.vlgmr.msra.gmra.mrb[232].mxu0 %v15541_v31 }
0x13b9   :  { %6372 = vmatprep.mubr.bf16.mxu1 %v15559_v59  ;;  %6429 = vmatprep.mubr.bf16.mxu0 %v15561_v19 }
0x13c0   :  { %6373 = vmatmul.mubr.bf16.gmra.mrb[216].mxu1 %v15555_v48  ;;  %6430 = vmatmul.mubr.bf16.gmra.mrb[236].mxu0 %v15557_v63 }
0x13c1   :  { %6380 = vmatprep.mubr.bf16.mxu1 %v15578_v10  ;;  %6437 = vmatprep.mubr.bf16.mxu0 %v15580_v46 }
0x13c8   :  { %6381 = vmatmul.mubr.bf16.gmra.mrb[220].mxu1 %v15574_v62  ;;  %6438 = vmatmul.mubr.bf16.gmra.mrb[240].mxu0 %v15576_v22 }
0x13c9   :  { %6774 = vmatprep.mubr.bf16.mxu1 %v12951_v38  ;;  %11894 = vmatprep.mubr.msk.bf16.mxu0 %vm12950_vm0, %v12949_v0 }
0x146b   :  { %v11132_v25 = vpop.f32.mrb[200].mxu1  ;;  %v11166_v31 = vpop.f32.mrb[220].mxu0 }
0x146c   :  { %v11133_v59 = vpop.f32.mrb[201].mxu1  ;;  %v11167_v19 = vpop.f32.mrb[221].mxu0 }
0x146d   :  { %v11134_v48 = vadd.f32 %v11133_v59, %v11132_v25  ;;  %v11168_v6 = vadd.f32 %v11167_v19, %v11166_v31  ;;  %v11135_v63 = vpop.f32.mrb[202].mxu1  ;;  %v11169_v51 = vpop.f32.mrb[222].mxu0  ;;  %v10389_v19 = vld [vmem:[%s17082_s13 + $0x1] ss:$0 sm:$0xff] }
0x146e   :  { %v11136_v10 = vpop.f32.mrb[203].mxu1  ;;  %v11170_v24 = vpop.f32.mrb[223].mxu0 }
0x146f   :  { %v6118_v46 = vadd.f32 %v11168_v6, %v11134_v48  ;;  %v11137_v39 = vadd.f32 %v11136_v10, %v11135_v63  ;;  %v11171_v62 = vadd.f32 %v11170_v24, %v11169_v51 }
0x1471   :  { %v6121_v18 = vadd.f32 %v11171_v62, %v11137_v39 }
0x1473   :  { %v11138_v22 = vpop.f32.mrb[204].mxu1  ;;  %v11172_v44 = vpop.f32.mrb[224].mxu0 }
0x1474   :  { %v11139_v42 = vpop.f32.mrb[205].mxu1  ;;  %v11173_v49 = vpop.f32.mrb[225].mxu0 }
0x1475   :  { %v11140_v16 = vadd.f32 %v11139_v42, %v11138_v22  ;;  %v11174_v30 = vadd.f32 %v11173_v49, %v11172_v44  ;;  %v11141_v50 = vpop.f32.mrb[206].mxu1  ;;  %v11175_v13 = vpop.f32.mrb[226].mxu0 }
0x1476   :  { %v11142_v40 = vpop.f32.mrb[207].mxu1  ;;  %v11176_v41 = vpop.f32.mrb[227].mxu0 }
0x1477   :  { %v6126_v2 = vadd.f32 %v11174_v30, %v11140_v16  ;;  %v11143_v17 = vadd.f32 %v11142_v40, %v11141_v50  ;;  %v11177_v12 = vadd.f32 %v11176_v41, %v11175_v13 }
0x1479   :  { %v6129_v4 = vadd.f32 %v11177_v12, %v11143_v17 }
0x147b   :  { %v11144_v11 = vpop.f32.mrb[208].mxu1  ;;  %v11178_v52 = vpop.f32.mrb[228].mxu0 }
0x147c   :  { %v11145_v21 = vpop.f32.mrb[209].mxu1  ;;  %v11179_v29 = vpop.f32.mrb[229].mxu0 }
0x147d   :  { %v11146_v26 = vadd.f32 %v11145_v21, %v11144_v11  ;;  %v11180_v55 = vadd.f32 %v11179_v29, %v11178_v52  ;;  %v11147_v60 = vpop.f32.mrb[210].mxu1  ;;  %v11181_v3 = vpop.f32.mrb[230].mxu0 }
0x147e   :  { %v11148_v36 = vpop.f32.mrb[211].mxu1  ;;  %v11182_v1 = vpop.f32.mrb[231].mxu0 }
0x147f   :  { %v6134_v14 = vadd.f32 %v11180_v55, %v11146_v26  ;;  %v11149_v23 = vadd.f32 %v11148_v36, %v11147_v60  ;;  %v11183_v15 = vadd.f32 %v11182_v1, %v11181_v3 }
0x1481   :  { %v6137_v61 = vadd.f32 %v11183_v15, %v11149_v23 }
0x148b   :  { %v11200_v32 = vpop.f32.mrb[212].mxu1  ;;  %v11234_v37 = vpop.f32.mrb[232].mxu0 }
0x148c   :  { %v11201_v27 = vpop.f32.mrb[213].mxu1  ;;  %v11235_v53 = vpop.f32.mrb[233].mxu0 }
0x148d   :  { %v11202_v47 = vadd.f32 %v11201_v27, %v11200_v32  ;;  %v11236_v20 = vadd.f32 %v11235_v53, %v11234_v37  ;;  %v11203_v54 = vpop.f32.mrb[214].mxu1  ;;  %v11237_v28 = vpop.f32.mrb[234].mxu0 }
0x148e   :  { %v11204_v35 = vpop.f32.mrb[215].mxu1  ;;  %v11238_v43 = vpop.f32.mrb[235].mxu0 }
0x148f   :  { %v6367_v25 = vadd.f32 %v11202_v47, %v6118_v46  ;;  %v11205_v31 = vadd.f32 %v11204_v35, %v11203_v54  ;;  %v11239_v59 = vadd.f32 %v11238_v43, %v11237_v28 }
0x1491   :  { %v6424_v48 = vadd.f32 %v11236_v20, %v6367_v25  ;;  %v6370_v6 = vadd.f32 %v11205_v31, %v6121_v18 }
0x1493   :  { %v6454_v63 = vadd.f32 %v10389_v19, %v6424_v48  ;;  %v6427_v51 = vadd.f32 %v11239_v59, %v6370_v6  ;;  %v11206_v10 = vpop.f32.mrb[216].mxu1  ;;  %v11240_v24 = vpop.f32.mrb[236].mxu0 }
0x1494   :  { %v11207_v39 = vpop.f32.mrb[217].mxu1  ;;  %v11241_v62 = vpop.f32.mrb[237].mxu0 }
0x1495   :  { %v6455_v22 = vadd.f32 %v10389_v19, %v6427_v51  ;;  %v11208_v44 = vadd.f32 %v11207_v39, %v11206_v10  ;;  %v11242_v42 = vadd.f32 %v11241_v62, %v11240_v24  ;;  %v11209_v49 = vpop.f32.mrb[218].mxu1  ;;  %v11243_v16 = vpop.f32.mrb[238].mxu0  ;;  %v6460_v46 = vadd.f32 %v6454_v63, %v15289_v56 }
0x1496   :  { %v11210_v30 = vpop.f32.mrb[219].mxu1  ;;  %v11244_v50 = vpop.f32.mrb[239].mxu0 }
0x1497   :  { %v6375_v13 = vadd.f32 %v11208_v44, %v6126_v2  ;;  %v11211_v40 = vadd.f32 %v11210_v30, %v11209_v49  ;;  %v11245_v41 = vadd.f32 %v11244_v50, %v11243_v16  ;;  %6470 = vadd.xlane.f32.xlu1 %v6460_v46  ;;  %v6461_v18 = vadd.f32 %v6455_v22, %v15292_v58 }
0x1499   :  { %v6432_v17 = vadd.f32 %v11242_v42, %v6375_v13  ;;  %v6378_v12 = vadd.f32 %v11211_v40, %v6129_v4  ;;  %6472 = vadd.xlane.f32.xlu0 %v6461_v18  ;;  %v12447_v13 = vld [vmem:[%s17070_s4 + $0x1b4] ss:$12 sps:$4 sm:$0xff]  }
0x149b   :  { %v6456_v11 = vadd.f32 %v10389_v19, %v6432_v17  ;;  %v6435_v52 = vadd.f32 %v11245_v41, %v6378_v12  ;;  %v11212_v21 = vpop.f32.mrb[220].mxu1  ;;  %v11246_v29 = vpop.f32.mrb[240].mxu0  ;;  %v12448_v17 = vld [vmem:[%s17070_s4 + $0x1b8] ss:$12 sps:$4 sm:$0xff]  }
0x149c   :  { %v11213_v26 = vpop.f32.mrb[221].mxu1  ;;  %v11247_v55 = vpop.f32.mrb[241].mxu0 }
0x149d   :  { %v6457_v60 = vadd.f32 %v10389_v19, %v6435_v52  ;;  %v11214_v3 = vadd.f32 %v11213_v26, %v11212_v21  ;;  %v11248_v56 = vadd.f32 %v11247_v55, %v11246_v29  ;;  %v11215_v36 = vpop.f32.mrb[222].mxu1  ;;  %v11249_v1 = vpop.f32.mrb[242].mxu0  ;;  %v6462_v2 = vadd.f32 %v6456_v11, %v15343_v33  ;;  %v12437_v33 = vld [vmem:[%s17070_s4 + $0x180] ss:$12 sps:$4 sm:$0xff]   ;;  %v12449_v52 = vld [vmem:[%s17070_s4 + $0x1c8] ss:$12 sps:$4 sm:$0xff]  }
0x149e   :  { %v11216_v23 = vpop.f32.mrb[223].mxu1  ;;  %v11250_v15 = vpop.f32.mrb[243].mxu0  ;;  %v12451_v11 = vld [vmem:[%s17070_s4 + $0x1cc] ss:$12 sps:$4 sm:$0xff]   ;;  %v12452_v21 = vld [vmem:[%s17070_s4 + $0x1d0] ss:$12 sps:$4 sm:$0xff]  }
0x149f   :  { %v6383_v32 = vadd.f32 %v11214_v3, %v6134_v14  ;;  %v11217_v58 = vadd.f32 %v11216_v23, %v11215_v36  ;;  %v11251_v37 = vadd.f32 %v11250_v15, %v11249_v1  ;;  %6474 = vadd.xlane.f32.xlu1 %v6462_v2  ;;  %v6463_v4 = vadd.f32 %v6457_v60, %v15346_v9  ;;  %v12439_v9 = vld [vmem:[%s17070_s4 + $0x184] ss:$12 sps:$4 sm:$0xff]   ;;  %v12440_v14 = vld [vmem:[%s17070_s4 + $0x188] ss:$12 sps:$4 sm:$0xff]   ;;  %v12453_v26 = vld [vmem:[%s17070_s4 + $0x1e0] ss:$12 sps:$4 sm:$0xff]  }
0x14a0   :  { %6742 = vmatprep.subr.bf16.mxu1 %v12439_v9  ;;  %11879 = vmatpush3.bf16.msra.mxu0 %v12440_v14  ;;  %v12455_v29 = vld [vmem:[%s17070_s4 + $0x1e4] ss:$12 sps:$4 sm:$0xff]   ;;  %v12456_v55 = vld [vmem:[%s17070_s4 + $0x1e8] ss:$12 sps:$4 sm:$0xff]   ;;  %v12467_v23 = vld [vmem:[%s17070_s4 + $0x22c] ss:$12 sps:$4 sm:$0xff]  }
0x14a1   :  { %v6440_v27 = vadd.f32 %v11248_v56, %v6383_v32  ;;  %v6386_v53 = vadd.f32 %v11217_v58, %v6137_v61  ;;  %6476 = vadd.xlane.f32.xlu0 %v6463_v4  ;;  %6743 = vmatpush1.bf16.msra.mxu1 %v12437_v33  ;;  %v12441_v61 = vld [vmem:[%s17070_s4 + $0x198] ss:$12 sps:$4 sm:$0xff]   ;;  %v12459_v60 = vld [vmem:[%s17070_s4 + $0x1fc] ss:$12 sps:$4 sm:$0xff]   ;;  %v12460_v56 = vld [vmem:[%s17070_s4 + $0x200] ss:$12 sps:$4 sm:$0xff]  }
0x14a2   :  { %11880 = vmatprep.subr.bf16.mxu0 %v12949_v0  ;;  %v12457_v3 = vld [vmem:[%s17070_s4 + $0x1f8] ss:$12 sps:$4 sm:$0xff]   ;;  %v12463_v36 = vld [vmem:[%s17070_s4 + $0x214] ss:$12 sps:$4 sm:$0xff]   ;;  %v12461_v1 = vld [vmem:[%s17070_s4 + $0x210] ss:$12 sps:$4 sm:$0xff]  }
0x14a3   :  { %v6458_v47 = vadd.f32 %v10389_v19, %v6440_v27  ;;  %v6443_v20 = vadd.f32 %v11251_v37, %v6386_v53  ;;  %v12465_v15 = vld [vmem:[%s17070_s4 + $0x228] ss:$12 sps:$4 sm:$0xff]   ;;  %v12468_v32 = vld [vmem:[%s17070_s4 + $0x230] ss:$12 sps:$4 sm:$0xff]  }
0x14a5   :  { %v6459_v54 = vadd.f32 %v10389_v19, %v6443_v20  ;;  %v6464_v28 = vadd.f32 %v6458_v47, %v15388_v57  ;;  %v12443_v57 = vld [vmem:[%s17070_s4 + $0x19c] ss:$12 sps:$4 sm:$0xff]  }
0x14a6   :  { %6744 = vmatprep.subr.bf16.mxu1 %v12443_v57  ;;  %v10392_v57 = vld [vmem:[%s17083_s14 + $0x1] ss:$0 sm:$0xff] }
0x14a7   :  { %6478 = vadd.xlane.f32.xlu1 %v6464_v28  ;;  %v6465_v35 = vadd.f32 %v6459_v54, %v15371_v34  ;;  %v12444_v34 = vld [vmem:[%s17070_s4 + $0x1a0] ss:$12 sps:$4 sm:$0xff]   ;;  %6745 = vmatpush1.bf16.msra.mxu1 %v12441_v61 }
0x14a8   :  { %11881 = vmatpush3.bf16.msra.mxu0 %v12444_v34  ;;  %6746 = vmatprep.subr.bf16.mxu1 %v12447_v13 }
0x14a9   :  { %6480 = vadd.xlane.f32.xlu0 %v6465_v35  ;;  %11882 = vmatprep.subr.bf16.mxu0 %v12949_v0 }
0x14ac   :  { %11883 = vmatpush3.bf16.msra.mxu0 %v12448_v17 }
0x14ad   :  { %11884 = vmatprep.subr.bf16.mxu0 %v12949_v0 }
0x14b0   :  { %11885 = vmatpush3.bf16.msra.mxu0 %v12452_v21 }
0x14b1   :  { %11886 = vmatprep.subr.bf16.mxu0 %v12949_v0 }
0x14b4   :  { %11887 = vmatpush3.bf16.msra.mxu0 %v12456_v55 }
0x14b5   :  { %11888 = vmatprep.subr.bf16.mxu0 %v12949_v0 }
0x14b8   :  { %11889 = vmatpush3.bf16.msra.mxu0 %v12460_v56 }
0x14b9   :  { %11890 = vmatprep.subr.bf16.mxu0 %v12949_v0 }
0x1524   :  { %v6471_v43 = vpop.xlane.xlu1 %6470 }
0x1525   :  { %v6482_v25 = vmul.f32 0.0078125, %v6471_v43 }
0x1526   :  { %v6473_v31 = vpop.xlane.xlu0 %6472 }
0x1527   :  { %v15753_v59 = vsub.f32 %v6460_v46, %v6482_v25  ;;  %v6483_v19 = vmul.f32 0.0078125, %v6473_v31 }
0x1529   :  { %v15755_v48 = vsub.f32 %v6461_v18, %v6483_v19  ;;  %v6494_v6 = vmul.f32 %v15753_v59, %v15753_v59  ;;  %v12445_v18 = vld [vmem:[%s17070_s4 + $0x1b0] ss:$12 sps:$4 sm:$0xff]  }
0x152a   :  { %6747 = vmatpush1.bf16.msra.mxu1 %v12445_v18 }
0x152b   :  { %6500 = vadd.xlane.f32.xlu1 %v6494_v6  ;;  %v6495_v63 = vmul.f32 %v15755_v48, %v15755_v48  ;;  %6748 = vmatprep.subr.bf16.mxu1 %v12451_v11 }
0x152c   :  { %v6475_v51 = vpop.xlane.xlu1 %6474 }
0x152d   :  { %v6484_v10 = vmul.f32 0.0078125, %v6475_v51  ;;  %6502 = vadd.xlane.f32.xlu0 %v6495_v63 }
0x152e   :  { %v6477_v24 = vpop.xlane.xlu0 %6476  ;;  %6749 = vmatpush1.bf16.msra.mxu1 %v12449_v52 }
0x152f   :  { %v15761_v39 = vsub.f32 %v6462_v2, %v6484_v10  ;;  %v6485_v62 = vmul.f32 0.0078125, %v6477_v24  ;;  %6750 = vmatprep.subr.bf16.mxu1 %v12455_v29  ;;  %v12464_v2 = vld [vmem:[%s17070_s4 + $0x218] ss:$12 sps:$4 sm:$0xff]   ;;  %v10393_v10 = vld [vmem:[%s17084_s15 + $0x1] ss:$0 sm:$0xff] }
0x1530   :  { %11891 = vmatpush3.bf16.msra.mxu0 %v12464_v2 }
0x1531   :  { %v15763_v22 = vsub.f32 %v6463_v4, %v6485_v62  ;;  %v6496_v44 = vmul.f32 %v15761_v39, %v15761_v39  ;;  %11892 = vmatprep.subr.bf16.mxu0 %v12949_v0 }
0x1532   :  { %6751 = vmatpush1.bf16.msra.mxu1 %v12453_v26 }
0x1533   :  { %6504 = vadd.xlane.f32.xlu1 %v6496_v44  ;;  %v6497_v42 = vmul.f32 %v15763_v22, %v15763_v22  ;;  %6752 = vmatprep.subr.bf16.mxu1 %v12459_v60 }
0x1534   :  { %v6479_v49 = vpop.xlane.xlu1 %6478  ;;  %11893 = vmatpush3.bf16.msra.mxu0 %v12468_v32 }
0x1535   :  { %v6486_v16 = vmul.f32 0.0078125, %v6479_v49  ;;  %6506 = vadd.xlane.f32.xlu0 %v6497_v42  ;;  %11924 = vmatprep.subr.bf16.mxu0 %v12949_v0 }
0x1536   :  { %v6481_v46 = vpop.xlane.xlu0 %6480  ;;  %6753 = vmatpush1.bf16.msra.mxu1 %v12457_v3 }
0x1537   :  { %v15769_v30 = vsub.f32 %v6464_v28, %v6486_v16  ;;  %v6487_v50 = vmul.f32 0.0078125, %v6481_v46  ;;  %6754 = vmatprep.subr.bf16.mxu1 %v12463_v36 }
0x1539   :  { %v15774_v40 = vsub.f32 %v6465_v35, %v6487_v50  ;;  %v6498_v41 = vmul.f32 %v15769_v30, %v15769_v30 }
0x153a   :  { %6755 = vmatpush1.bf16.msra.mxu1 %v12461_v1 }
0x153b   :  { %6508 = vadd.xlane.f32.xlu1 %v6498_v41  ;;  %v6499_v12 = vmul.f32 %v15774_v40, %v15774_v40  ;;  %6756 = vmatprep.subr.bf16.mxu1 %v12467_v23 }
0x153d   :  { %6510 = vadd.xlane.f32.xlu0 %v6499_v12 }
0x153e   :  { %6757 = vmatpush1.bf16.msra.mxu1 %v12465_v15 }
0x153f   :  { %11906 = vmatprep.subr.bf16.mxu1 %v12949_v0 }
0x15b8   :  { %v6501_v58 = vpop.xlane.xlu1 %6500 }
0x15b9   :  { %v6512_v37 = vmul.f32 0.0078125, %v6501_v58 }
0x15ba   :  { %v6503_v4 = vpop.xlane.xlu0 %6502 }
0x15bb   :  { %v6518_v27 = vadd.f32 1e-05, %v6512_v37  ;;  %v6513_v53 = vmul.f32 0.0078125, %v6503_v4 }
0x15bd   :  { %12769 = vrsqrt.f32 %v6518_v27  ;;  %v6519_v47 = vadd.f32 1e-05, %v6513_v53 }
0x15bf   :  { %12771 = vrsqrt.f32 %v6519_v47 }
0x15c0   :  { %v6505_v20 = vpop.xlane.xlu1 %6504 }
0x15c1   :  { %v6514_v54 = vmul.f32 0.0078125, %v6505_v20 }
0x15c2   :  { %v6507_v28 = vpop.xlane.xlu0 %6506 }
0x15c3   :  { %v6520_v35 = vadd.f32 1e-05, %v6514_v54  ;;  %v6515_v33 = vmul.f32 0.0078125, %v6507_v28 }
0x15c5   :  { %12773 = vrsqrt.f32 %v6520_v35  ;;  %v6521_v9 = vadd.f32 1e-05, %v6515_v33 }
0x15c7   :  { %v12770_v14 = vpop.eup %12769  ;;  %12775 = vrsqrt.f32 %v6521_v9 }
0x15c8   :  { %v6530_v34 = vmul.f32 %v12770_v14, %v15753_v59  ;;  %v6509_v61 = vpop.xlane.xlu1 %6508 }
0x15c9   :  { %v12772_v43 = vpop.eup %12771  ;;  %v6516_v25 = vmul.f32 0.0078125, %v6509_v61 }
0x15ca   :  { %v6542_v31 = vmul.f32 %v10392_v57, %v6530_v34  ;;  %v6531_v19 = vmul.f32 %v12772_v43, %v15755_v48  ;;  %v6511_v6 = vpop.xlane.xlu0 %6510 }
0x15cb   :  { %v6522_v63 = vadd.f32 1e-05, %v6516_v25  ;;  %v6517_v51 = vmul.f32 0.0078125, %v6511_v6 }
0x15cc   :  { %v6543_v24 = vmul.f32 %v10392_v57, %v6531_v19  ;;  %v15846_v44 = vadd.f32 %v10393_v10, %v6542_v31 }
0x15cd   :  { %12777 = vrsqrt.f32 %v6522_v63  ;;  %v6523_v62 = vadd.f32 1e-05, %v6517_v51 }
0x15ce   :  { %v15848_v42 = vadd.f32 %v10393_v10, %v6543_v24 }
0x15cf   :  { %v12774_v59 = vpop.eup %12773  ;;  %12779 = vrsqrt.f32 %v6523_v62 }
0x15d0   :  { %v6560_v49 = vpack.c.bf16 %v15848_v42, %v15846_v44  ;;  %v6532_v48 = vmul.f32 %v12774_v59, %v15761_v39 }
0x15d1   :  { %v12776_v16 = vpop.eup %12775 }
0x15d2   :  { %6775 = vmatmul.mubr.bf16.vlgmr.msra.gmra.mrb[224].mxu1 %v6560_v49  ;;  %11895 = vmatmul.mubr.bf16.vlgmr.msra.gmra.mrb[244].mxu0 %v6560_v49  ;;  %v6533_v46 = vmul.f32 %v12776_v16, %v15763_v22  ;;  %v6544_v50 = vmul.f32 %v10392_v57, %v6532_v48 }
0x15d3   :  { %6784 = vmatprep.mubr.bf16.mxu1 %v12951_v38  ;;  %11898 = vmatprep.mubr.msk.bf16.mxu0 %vm12950_vm0, %v12949_v0 }
0x15d4   :  { %v6545_v13 = vmul.f32 %v10392_v57, %v6533_v46  ;;  %v15857_v41 = vadd.f32 %v10393_v10, %v6544_v50 }
0x15d6   :  { %v15859_v18 = vadd.f32 %v10393_v10, %v6545_v13 }
0x15d7   :  { %v12778_v17 = vpop.eup %12777 }
0x15d8   :  { %v6561_v39 = vpack.c.bf16 %v15859_v18, %v15857_v41  ;;  %v6534_v12 = vmul.f32 %v12778_v17, %v15769_v30  ;;  %v10426_v30 = vld [vmem:[%s17073_s5 + $0x6] sm:$0x7] }
0x15d9   :  { %v12780_v11 = vpop.eup %12779  ;;  %v6610_v60 = vrot.slane %v10426_v30, %v13223_v7  ;;  %v6606_v36 = vrot.slane %v10426_v30, %v13226_v8 }
0x15da   :  { %6785 = vmatmul.mubr.bf16.gmra.mrb[228].mxu1 %v6561_v39  ;;  %11899 = vmatmul.mubr.bf16.gmra.mrb[248].mxu0 %v6561_v39  ;;  %v6535_v22 = vmul.f32 %v12780_v11, %v15774_v40  ;;  %v6546_v52 = vmul.f32 %v10392_v57, %v6534_v12  ;;  %v6602_v40 = vrot.slane %v10426_v30, %v13217_v5 }
0x15db   :  { %6794 = vmatprep.mubr.bf16.mxu1 %v12951_v38  ;;  %11902 = vmatprep.mubr.msk.bf16.mxu0 %vm12950_vm0, %v12949_v0 }
0x15dc   :  { %v6547_v21 = vmul.f32 %v10392_v57, %v6535_v22  ;;  %v15868_v29 = vadd.f32 %v10393_v10, %v6546_v52 }
0x15de   :  { %v15870_v26 = vadd.f32 %v10393_v10, %v6547_v21 }
0x15e0   :  { %v6562_v55 = vpack.c.bf16 %v15870_v26, %v15868_v29 }
0x15e2   :  { %6795 = vmatmul.mubr.bf16.gmra.mrb[232].mxu1 %v6562_v55  ;;  %11903 = vmatmul.mubr.bf16.gmra.mrb[252].mxu0 %v6562_v55 }
0x15e3   :  { %11912 = vmatprep.mubr.msk.bf16.mxu1 %vm12950_vm0, %v12949_v0  ;;  %11930 = vmatprep.mubr.msk.bf16.mxu0 %vm12950_vm0, %v12949_v0 }
0x16a5   :  { %v6776_v3 = vpop.f32.mrb[224].mxu1  ;;  %v6839_v56 = vpop.f32.mrb[244].mxu0 }
0x16a6   :  { %v6777_v1 = vadd.f32 %v6776_v3, %v6602_v40  ;;  %v6778_v2 = vpop.f32.mrb[225].mxu1  ;;  %v11896_v23 = vpop.f32.mrb[245].mxu0  ;;  %v6840_v58 = vadd.f32 %v6839_v56, %v6610_v60 }
0x16a7   :  { %v6780_v15 = vpop.f32.mrb[226].mxu1  ;;  %v6842_v32 = vpop.f32.mrb[246].mxu0  ;;  %v6779_v47 = vadd.f32 %v6778_v2, %v6606_v36 }
0x16a8   :  { %v6781_v37 = vadd.f32 %v6780_v15, %v6602_v40  ;;  %v6843_v4 = vadd.f32 %v6842_v32, %v6610_v60  ;;  %v6782_v27 = vpop.f32.mrb[227].mxu1  ;;  %v11897_v53 = vpop.f32.mrb[247].mxu0  ;;  %v6862_v54 = vmul.f32 0.17677669, %v6777_v1 }
0x16a9   :  { %v6783_v20 = vadd.f32 %v6782_v27, %v6606_v36 }
0x16aa   :  { %v6863_v28 = vmul.f32 0.17677669, %v6781_v37  ;;  %v15884_v35 = vpack.c.bf16 %v6843_v4, %v6840_v58 }
0x16ab   :  { %v6871_v33 = vpack.c.bf16 %v6783_v20, %v6779_v47 }
0x16ac   :  { %v15886_v9 = vpack.c.bf16 %v6863_v28, %v6862_v54 }
0x16ad   :  { %6964 = vrot.lane.b32.xlu1 %v6871_v33, %s12952_s27  ;;  %v6786_v14 = vpop.f32.mrb[228].mxu1  ;;  %v6847_v57 = vpop.f32.mrb[248].mxu0  ;;  %v6887_v34 = vsel %vm507_vm2, %v6871_v33, 0 }
0x16ae   :  { %v6787_v61 = vadd.f32 %v6786_v14, %v6602_v40  ;;  %v6788_v43 = vpop.f32.mrb[229].mxu1  ;;  %v11900_v25 = vpop.f32.mrb[249].mxu0  ;;  %11907 = vmatpush3.bf16.xpose.msra.mxu1 %v6887_v34  ;;  %v6848_v6 = vadd.f32 %v6847_v57, %v6610_v60 }
0x16af   :  { %v6790_v31 = vpop.f32.mrb[230].mxu1  ;;  %v6850_v19 = vpop.f32.mrb[250].mxu0  ;;  %11908 = vmatprep.subr.bf16.mxu1 %v12949_v0  ;;  %v6789_v62 = vadd.f32 %v6788_v43, %v6606_v36 }
0x16b0   :  { %v6791_v63 = vadd.f32 %v6790_v31, %v6602_v40  ;;  %v6851_v51 = vadd.f32 %v6850_v19, %v6610_v60  ;;  %v6792_v10 = vpop.f32.mrb[231].mxu1  ;;  %v11901_v24 = vpop.f32.mrb[251].mxu0  ;;  %v6864_v49 = vmul.f32 0.17677669, %v6787_v61 }
0x16b1   :  { %v6793_v59 = vadd.f32 %v6792_v10, %v6606_v36 }
0x16b2   :  { %v6865_v48 = vmul.f32 0.17677669, %v6791_v63  ;;  %v15891_v16 = vpack.c.bf16 %v6851_v51, %v6848_v6 }
0x16b3   :  { %v6872_v46 = vpack.c.bf16 %v6793_v59, %v6789_v62 }
0x16b4   :  { %v6869_v50 = vpack.c.bf16 %v6865_v48, %v6864_v49 }
0x16b5   :  { %6966 = vrot.lane.b32.xlu0 %v6872_v46, %s12952_s27  ;;  %v6796_v13 = vpop.f32.mrb[232].mxu1  ;;  %v6855_v17 = vpop.f32.mrb[252].mxu0  ;;  %v6890_v39 = vsel %vm507_vm2, %v6872_v46, 0 }
0x16b6   :  { %v6797_v12 = vadd.f32 %v6796_v13, %v6602_v40  ;;  %v6798_v11 = vpop.f32.mrb[233].mxu1  ;;  %v11904_v22 = vpop.f32.mrb[253].mxu0  ;;  %11909 = vmatpush3.bf16.xpose.msra.mxu1 %v6890_v39  ;;  %v6856_v55 = vadd.f32 %v6855_v17, %v6610_v60  ;;  %v12925_v39 = vld [vmem:[%s17074_s3] sm:$0xff] }
0x16b7   :  { %v6800_v52 = vpop.f32.mrb[234].mxu1  ;;  %v6858_v21 = vpop.f32.mrb[254].mxu0  ;;  %11910 = vmatprep.subr.bf16.mxu1 %v12949_v0  ;;  %v6799_v2 = vadd.f32 %v6798_v11, %v6606_v36 }
0x16b8   :  { %v6801_v30 = vadd.f32 %v6800_v52, %v6602_v40  ;;  %v6859_v3 = vadd.f32 %v6858_v21, %v6610_v60  ;;  %v6802_v56 = vpop.f32.mrb[235].mxu1  ;;  %v11905_v1 = vpop.f32.mrb[255].mxu0  ;;  %v6866_v15 = vmul.f32 0.17677669, %v6797_v12  ;;  %v12926_v52 = vld [vmem:[%s17074_s3 + $0x8] sm:$0xff] }
0x16b9   :  { %v6803_v23 = vadd.f32 %v6802_v56, %v6606_v36  ;;  %6955 = vrot.lane.b32.xlu0 %v15886_v9, %s12952_s27  ;;  %v12927_v1 = vld [vmem:[%s17074_s3 + $0x10] sm:$0xff] }
0x16ba   :  { %v6867_v32 = vmul.f32 0.17677669, %v6801_v30  ;;  %v15898_v58 = vpack.c.bf16 %v6859_v3, %v6856_v55 }
0x16bb   :  { %v6873_v37 = vpack.c.bf16 %v6803_v23, %v6799_v2 }
0x16bc   :  { %v6870_v4 = vpack.c.bf16 %v6867_v32, %v6866_v15  ;;  %v12928_v32 = vld [vmem:[%s17074_s3 + $0x18] sm:$0xff] }
0x16bd   :  { %7053 = vrot.lane.b32.xlu0 %v6872_v46, %s12953_s23  ;;  %6968 = vrot.lane.b32.xlu1 %v6873_v37, %s12952_s27  ;;  %v6893_v40 = vsel %vm507_vm2, %v6873_v37, 0 }
0x16be   :  { %11911 = vmatpush3.bf16.xpose.msra.mxu1 %v6893_v40 }
0x16bf   :  { %11942 = vmatprep.subr.bf16.mxu1 %v12949_v0 }
0x16c1   :  { %7140 = vrot.lane.b32.xlu0 %v6872_v46, %s12954_s28  ;;  %7051 = vrot.lane.b32.xlu1 %v6871_v33, %s12953_s23 }
0x16c5   :  { %7138 = vrot.lane.b32.xlu1 %v6871_v33, %s12954_s28  ;;  %11913 = vmatmul.mubr.msk.bf16.vlgmr.msra.gmra.mrb[236].mxu1 %vm507_vm2, %v15886_v9 }
0x16c6   :  { %6959 = vrot.lane.b32.xlu0 %v6870_v4, %s12952_s27  ;;  %11916 = vmatprep.mubr.msk.bf16.mxu1 %vm12950_vm0, %v12949_v0 }
0x16c9   :  { %6957 = vrot.lane.b32.xlu1 %v6869_v50, %s12952_s27 }
0x16ca   :  { %7045 = vrot.lane.b32.xlu0 %v15886_v9, %s12953_s23 }
0x16cd   :  { %7055 = vrot.lane.b32.xlu1 %v6873_v37, %s12953_s23  ;;  %11917 = vmatmul.mubr.msk.bf16.gmra.mrb[240].mxu1 %vm507_vm2, %v6869_v50 }
0x16ce   :  { %7047 = vrot.lane.b32.xlu0 %v6869_v50, %s12953_s23  ;;  %11920 = vmatprep.mubr.msk.bf16.mxu1 %vm12950_vm0, %v12949_v0 }
0x16d1   :  { %7142 = vrot.lane.b32.xlu1 %v6873_v37, %s12954_s28 }
0x16d2   :  { %7049 = vrot.lane.b32.xlu0 %v6870_v4, %s12953_s23 }
0x16d5   :  { %7132 = vrot.lane.b32.xlu1 %v15886_v9, %s12954_s28  ;;  %11921 = vmatmul.mubr.msk.bf16.gmra.mrb[244].mxu1 %vm507_vm2, %v6870_v4 }
0x16d6   :  { %7590 = vrot.lane.b32.xlu0 %v15891_v16, %s12952_s27  ;;  %11948 = vmatprep.mubr.msk.bf16.mxu1 %vm12950_vm0, %v12949_v0 }
0x16d9   :  { %7134 = vrot.lane.b32.xlu1 %v6869_v50, %s12954_s28 }
0x16dd   :  { %7136 = vrot.lane.b32.xlu1 %v6870_v4, %s12954_s28 }
0x16e1   :  { %7588 = vrot.lane.b32.xlu1 %v15884_v35, %s12952_s27 }
0x16e5   :  { %7592 = vrot.lane.b32.xlu1 %v15898_v58, %s12952_s27 }
0x16e9   :  { %7663 = vrot.lane.b32.xlu1 %v15884_v35, %s12953_s23 }
0x171f   :  { %v6965_v60 = vpop.permute.xlu1 %6964 }
0x1720   :  { %v6980_v36 = vsel %vm507_vm2, %v6965_v60, 0 }
0x1721   :  { %11925 = vmatpush3.bf16.xpose.msra.mxu0 %v6980_v36 }
0x1722   :  { %11926 = vmatprep.subr.bf16.mxu0 %v12949_v0 }
0x1727   :  { %v6967_v27 = vpop.permute.xlu0 %6966 }
0x1728   :  { %v6983_v53 = vsel %vm507_vm2, %v6967_v27, 0  ;;  %v12929_v27 = vld [vmem:[%s17074_s3 + $0x20] sm:$0xff] }
0x1729   :  { %11927 = vmatpush3.bf16.xpose.msra.mxu0 %v6983_v53 }
0x172a   :  { %11928 = vmatprep.subr.bf16.mxu0 %v12949_v0 }
0x172b   :  { %v6956_v47 = vpop.permute.xlu0 %6955 }
0x172f   :  { %v6969_v20 = vpop.permute.xlu1 %6968  ;;  %v7054_v33 = vpop.permute.xlu0 %7053 }
0x1730   :  { %v6986_v54 = vsel %vm507_vm2, %v6969_v20, 0  ;;  %v7070_v43 = vsel %vm507_vm2, %v7054_v33, 0 }
0x1731   :  { %11929 = vmatpush3.bf16.xpose.msra.mxu0 %v6986_v54  ;;  %v12930_v54 = vld [vmem:[%s17074_s3 + $0x28] sm:$0xff] }
0x1732   :  { %11960 = vmatprep.subr.bf16.mxu0 %v12949_v0 }
0x1733   :  { %v7052_v28 = vpop.permute.xlu1 %7051  ;;  %v7141_v34 = vpop.permute.xlu0 %7140 }
0x1734   :  { %v7067_v9 = vsel %vm507_vm2, %v7052_v28, 0  ;;  %v7157_v31 = vsel %vm507_vm2, %v7141_v34, 0  ;;  %v12931_v34 = vld [vmem:[%s17074_s3 + $0x30] sm:$0xff] }
0x1735   :  { %11943 = vmatpush3.bf16.xpose.msra.mxu1 %v7067_v9 }
0x1736   :  { %11944 = vmatprep.subr.bf16.mxu1 %v12949_v0 }
0x1737   :  { %v7139_v14 = vpop.permute.xlu1 %7138 }
0x1738   :  { %v7154_v57 = vsel %vm507_vm2, %v7139_v14, 0  ;;  %11931 = vmatmul.mubr.msk.bf16.vlgmr.msra.gmra.mrb[0].mxu0 %vm507_vm2, %v6956_v47  ;;  %v6960_v19 = vpop.permute.xlu0 %6959 }
0x1739   :  { %11961 = vmatpush3.bf16.xpose.msra.mxu0 %v7154_v57  ;;  %11934 = vmatprep.mubr.msk.bf16.mxu0 %vm12950_vm0, %v12949_v0 }
0x173a   :  { %11962 = vmatprep.subr.bf16.mxu0 %v12949_v0 }
0x173b   :  { %v6958_v61 = vpop.permute.xlu1 %6957 }
0x173c   :  { %v7046_v51 = vpop.permute.xlu0 %7045 }
0x173d   :  { %11945 = vmatpush3.bf16.xpose.msra.mxu1 %v7070_v43 }
0x173e   :  { %11946 = vmatprep.subr.bf16.mxu1 %v12949_v0 }
0x173f   :  { %v7056_v25 = vpop.permute.xlu1 %7055 }
0x1740   :  { %11935 = vmatmul.mubr.msk.bf16.gmra.mrb[4].mxu0 %vm507_vm2, %v6958_v61  ;;  %v7073_v63 = vsel %vm507_vm2, %v7056_v25, 0  ;;  %v7048_v59 = vpop.permute.xlu0 %7047 }
0x1741   :  { %11963 = vmatpush3.bf16.xpose.msra.mxu0 %v7157_v31  ;;  %11938 = vmatprep.mubr.msk.bf16.mxu0 %vm12950_vm0, %v12949_v0  ;;  %v12932_v31 = vld [vmem:[%s17074_s3 + $0x38] sm:$0xff] }
0x1742   :  { %11964 = vmatprep.subr.bf16.mxu0 %v12949_v0 }
0x1743   :  { %v7143_v6 = vpop.permute.xlu1 %7142 }
0x1744   :  { %v7160_v24 = vsel %vm507_vm2, %v7143_v6, 0  ;;  %v7050_v48 = vpop.permute.xlu0 %7049 }
0x1745   :  { %11947 = vmatpush3.bf16.xpose.msra.mxu1 %v7073_v63 }
0x1746   :  { %11978 = vmatprep.subr.bf16.mxu1 %v12949_v0 }
0x1747   :  { %v7133_v10 = vpop.permute.xlu1 %7132 }
0x1748   :  { %11939 = vmatmul.mubr.msk.bf16.gmra.mrb[8].mxu0 %vm507_vm2, %v6960_v19  ;;  %v7591_v50 = vpop.permute.xlu0 %7590 }
0x1749   :  { %11965 = vmatpush3.bf16.xpose.msra.mxu0 %v7160_v24  ;;  %11966 = vmatprep.mubr.msk.bf16.mxu0 %vm12950_vm0, %v12949_v0 }
0x174a   :  { %11996 = vmatprep.subr.bf16.mxu0 %v12949_v0 }
0x174b   :  { %v7135_v62 = vpop.permute.xlu1 %7134 }
0x174c   :  { %11949 = vmatmul.mubr.msk.bf16.vlgmr.msra.gmra.mrb[248].mxu1 %vm507_vm2, %v7046_v51 }
0x174d   :  { %11979 = vmatpush3.bf16.msra.mxu1 %v15884_v35  ;;  %11952 = vmatprep.mubr.msk.bf16.mxu1 %vm12950_vm0, %v12949_v0 }
0x174e   :  { %11980 = vmatprep.subr.bf16.mxu1 %v12949_v0 }
0x174f   :  { %v7137_v49 = vpop.permute.xlu1 %7136 }
0x1750   :  { %11967 = vmatmul.mubr.msk.bf16.vlgmr.msra.gmra.mrb[12].mxu0 %vm507_vm2, %v7133_v10 }
0x1751   :  { %11981 = vmatpush3.bf16.msra.mxu1 %v15891_v16  ;;  %11970 = vmatprep.mubr.msk.bf16.mxu0 %vm12950_vm0, %v12949_v0 }
0x1752   :  { %11982 = vmatprep.subr.bf16.mxu1 %v12949_v0 }
0x1753   :  { %v7589_v46 = vpop.permute.xlu1 %7588 }
0x1754   :  { %11953 = vmatmul.mubr.msk.bf16.gmra.mrb[252].mxu1 %vm507_vm2, %v7048_v59  ;;  %11997 = vmatpush3.bf16.msra.mxu0 %v7589_v46 }
0x1755   :  { %11983 = vmatpush3.bf16.msra.mxu1 %v15898_v58  ;;  %11998 = vmatprep.subr.bf16.mxu0 %v12949_v0 }
0x1756   :  { %11956 = vmatprep.mubr.msk.bf16.mxu1 %vm12950_vm0, %v12949_v0  ;;  %12014 = vmatprep.subr.bf16.mxu1 %v12949_v0 }
0x1757   :  { %v7593_v13 = vpop.permute.xlu1 %7592 }
0x1758   :  { %11971 = vmatmul.mubr.msk.bf16.gmra.mrb[16].mxu0 %vm507_vm2, %v7135_v62 }
0x1759   :  { %11999 = vmatpush3.bf16.msra.mxu0 %v7591_v50  ;;  %11974 = vmatprep.mubr.msk.bf16.mxu0 %vm12950_vm0, %v12949_v0 }
0x175a   :  { %12000 = vmatprep.subr.bf16.mxu0 %v12949_v0 }
0x175c   :  { %11957 = vmatmul.mubr.msk.bf16.gmra.mrb[0].mxu1 %vm507_vm2, %v7050_v48 }
0x175d   :  { %12001 = vmatpush3.bf16.msra.mxu0 %v7593_v13  ;;  %11984 = vmatprep.mubr.msk.bf16.mxu1 %vm12950_vm0, %v12949_v0 }
0x175e   :  { %12032 = vmatprep.subr.bf16.mxu0 %v12949_v0 }
0x1760   :  { %11975 = vmatmul.mubr.msk.bf16.gmra.mrb[20].mxu0 %vm507_vm2, %v7137_v49 }
0x1761   :  { %12002 = vmatprep.mubr.msk.bf16.mxu0 %vm12950_vm0, %v12949_v0 }
0x1798   :  { %v6929_v17 = vpop.f32.mrb[236].mxu1 }
0x1799   :  { %v15994_v12 = vadd.f32 %v12925_v39, %v6929_v17  ;;  %v11914_v11 = vpop.f32.mrb[237].mxu1  ;;  %v12933_v17 = vld [vmem:[%s17074_s3 + $0x60] sm:$0xff] }
0x179a   :  { %v6932_v22 = vpop.f32.mrb[238].mxu1 }
0x179b   :  { %v15999_v21 = vadd.f32 %v12926_v52, %v6932_v22  ;;  %v11915_v55 = vpop.f32.mrb[239].mxu1  ;;  %v7243_v30 = vsel %vm874_vm3, %v15994_v12, -inf  ;;  %v12934_v52 = vld [vmem:[%s17074_s3 + $0x40] sm:$0xff] }
0x179c   :  { %7244 = vmax.xlane.f32.xlu0 %v7243_v30  ;;  %v12935_v30 = vld [vmem:[%s17074_s3 + $0x68] sm:$0xff] }
0x179d   :  { %v7246_v3 = vsel %vm874_vm3, %v15999_v21, -inf }
0x179e   :  { %7247 = vmax.xlane.f32.xlu1 %v7246_v3 }
0x17a0   :  { %v6937_v56 = vpop.f32.mrb[240].mxu1 }
0x17a1   :  { %v16008_v2 = vadd.f32 %v12927_v1, %v6937_v56  ;;  %v11918_v23 = vpop.f32.mrb[241].mxu1 }
0x17a2   :  { %v6940_v15 = vpop.f32.mrb[242].mxu1 }
0x17a3   :  { %v16013_v37 = vadd.f32 %v12928_v32, %v6940_v15  ;;  %v11919_v4 = vpop.f32.mrb[243].mxu1  ;;  %v7249_v40 = vsel %vm874_vm3, %v16008_v2, -inf  ;;  %v12936_v15 = vld [vmem:[%s17074_s3 + $0x48] sm:$0xff] }
0x17a4   :  { %7250 = vmax.xlane.f32.xlu1 %v7249_v40 }
0x17a5   :  { %v7252_v60 = vsel %vm874_vm3, %v16013_v37, -inf }
0x17a6   :  { %7253 = vmax.xlane.f32.xlu0 %v7252_v60 }
0x17a8   :  { %v6945_v36 = vpop.f32.mrb[244].mxu1 }
0x17a9   :  { %v16022_v53 = vadd.f32 %v12929_v27, %v6945_v36  ;;  %v11922_v47 = vpop.f32.mrb[245].mxu1 }
0x17aa   :  { %v6948_v20 = vpop.f32.mrb[246].mxu1 }
0x17ab   :  { %v16027_v28 = vadd.f32 %v12930_v54, %v6948_v20  ;;  %v11923_v33 = vpop.f32.mrb[247].mxu1  ;;  %v7255_v9 = vsel %vm874_vm3, %v16022_v53, -inf  ;;  %v12937_v20 = vld [vmem:[%s17074_s3 + $0x70] sm:$0xff] }
0x17ac   :  { %7256 = vmax.xlane.f32.xlu1 %v7255_v9 }
0x17ad   :  { %v7258_v14 = vsel %vm874_vm3, %v16027_v28, -inf }
0x17ae   :  { %7259 = vmax.xlane.f32.xlu0 %v7258_v14 }
0x180b   :  { %v7022_v57 = vpop.f32.mrb[0].mxu0 }
0x180c   :  { %v16036_v61 = vadd.f32 %v12931_v34, %v7022_v57  ;;  %v11932_v43 = vpop.f32.mrb[1].mxu0  ;;  %v12938_v57 = vld [vmem:[%s17074_s3 + $0x50] sm:$0xff] }
0x180d   :  { %v7025_v25 = vpop.f32.mrb[2].mxu0  ;;  %v12939_v43 = vld [vmem:[%s17074_s3 + $0x78] sm:$0xff] }
0x180e   :  { %v16041_v19 = vadd.f32 %v12932_v31, %v7025_v25  ;;  %v11933_v6 = vpop.f32.mrb[3].mxu0  ;;  %v7261_v63 = vsel %vm874_vm3, %v16036_v61, -inf }
0x180f   :  { %7262 = vmax.xlane.f32.xlu0 %v7261_v63 }
0x1810   :  { %v7264_v51 = vsel %vm874_vm3, %v16041_v19, -inf }
0x1813   :  { %7265 = vmax.xlane.f32.xlu0 %v7264_v51  ;;  %v7030_v10 = vpop.f32.mrb[4].mxu0  ;;  %v12940_v51 = vld [vmem:[%s17074_s3 + $0x58] sm:$0xff] }
0x1814   :  { %v11936_v24 = vpop.f32.mrb[5].mxu0  ;;  %v16055_v55 = vadd.f32 %v12934_v52, %v7030_v10  ;;  %v12942_v52 = vld [vmem:[%s17074_s3 + $0x90] sm:$0xff] }
0x1815   :  { %v7033_v62 = vpop.f32.mrb[6].mxu0 }
0x1816   :  { %v11937_v59 = vpop.f32.mrb[7].mxu0  ;;  %v16067_v32 = vadd.f32 %v12936_v15, %v7033_v62  ;;  %v7267_v27 = vsel %vm874_vm3, %v16055_v55, -inf }
0x1818   :  { %v7270_v9 = vsel %vm874_vm3, %v16067_v32, -inf }
0x181b   :  { %v7038_v49 = vpop.f32.mrb[8].mxu0 }
0x181c   :  { %v11940_v48 = vpop.f32.mrb[9].mxu0  ;;  %v16083_v34 = vadd.f32 %v12938_v57, %v7038_v49 }
0x181d   :  { %v7041_v46 = vpop.f32.mrb[10].mxu0 }
0x181e   :  { %v11941_v50 = vpop.f32.mrb[11].mxu0  ;;  %v16095_v10 = vadd.f32 %v12940_v51, %v7041_v46  ;;  %v7273_v48 = vsel %vm874_vm3, %v16083_v34, -inf  ;;  %v16149_v51 = vpop.permute.xlu1 %7663 }
0x181f   :  { %v7109_v13 = vpop.f32.mrb[248].mxu1 }
0x1820   :  { %v16050_v39 = vadd.f32 %v12933_v17, %v7109_v13  ;;  %v11950_v11 = vpop.f32.mrb[249].mxu1  ;;  %v12941_v13 = vld [vmem:[%s17074_s3 + $0x80] sm:$0xff] }
0x1821   :  { %v7112_v22 = vpop.f32.mrb[250].mxu1  ;;  %v7276_v11 = vsel %vm874_vm3, %v16095_v10, -inf }
0x1822   :  { %v16060_v3 = vadd.f32 %v12935_v30, %v7112_v22  ;;  %v11951_v56 = vpop.f32.mrb[251].mxu1  ;;  %v7279_v1 = vsel %vm874_vm3, %v16050_v39, -inf }
0x1823   :  { %7280 = vmax.xlane.f32.xlu1 %v7279_v1  ;;  %v7196_v23 = vpop.f32.mrb[12].mxu0  ;;  %v12943_v56 = vld [vmem:[%s17074_s3 + $0x88] sm:$0xff] }
0x1824   :  { %v11968_v4 = vpop.f32.mrb[13].mxu0  ;;  %v7282_v40 = vsel %vm874_vm3, %v16060_v3, -inf  ;;  %v16111_v30 = vadd.f32 %v12942_v52, %v7196_v23 }
0x1825   :  { %7283 = vmax.xlane.f32.xlu0 %v7282_v40  ;;  %v7199_v60 = vpop.f32.mrb[14].mxu0 }
0x1826   :  { %v11969_v36 = vpop.f32.mrb[15].mxu0  ;;  %v7297_v57 = vsel %vm874_vm3, %v16111_v30, -inf }
0x1827   :  { %7268 = vmax.xlane.f32.xlu1 %v7267_v27  ;;  %v7117_v47 = vpop.f32.mrb[252].mxu1  ;;  %v12944_v36 = vld [vmem:[%s17074_s3 + $0x98] sm:$0xff] }
0x1828   :  { %v16076_v54 = vadd.f32 %v12937_v20, %v7117_v47  ;;  %v11954_v33 = vpop.f32.mrb[253].mxu1  ;;  %v16123_v27 = vadd.f32 %v12944_v36, %v7199_v60  ;;  %v12946_v60 = vld [vmem:[%s17074_s3 + $0xa8] sm:$0xff] }
0x1829   :  { %7271 = vmax.xlane.f32.xlu0 %v7270_v9  ;;  %v7120_v14 = vpop.f32.mrb[254].mxu1  ;;  %v12945_v33 = vld [vmem:[%s17074_s3 + $0xa0] sm:$0xff] }
0x182a   :  { %v16088_v25 = vadd.f32 %v12939_v43, %v7120_v14  ;;  %v11955_v31 = vpop.f32.mrb[255].mxu1  ;;  %v7285_v6 = vsel %vm874_vm3, %v16076_v54, -inf }
0x182b   :  { %7286 = vmax.xlane.f32.xlu1 %v7285_v6  ;;  %v7204_v63 = vpop.f32.mrb[16].mxu0  ;;  %v7300_v31 = vsel %vm874_vm3, %v16123_v27, -inf }
0x182c   :  { %v11972_v24 = vpop.f32.mrb[17].mxu0  ;;  %v7288_v62 = vsel %vm874_vm3, %v16088_v25, -inf  ;;  %v16130_v9 = vadd.f32 %v12945_v33, %v7204_v63 }
0x182d   :  { %7289 = vmax.xlane.f32.xlu0 %v7288_v62  ;;  %v7207_v59 = vpop.f32.mrb[18].mxu0  ;;  %v7245_v24 = vpop.xlane.xlu0 %7244 }
0x182e   :  { %v11973_v49 = vpop.f32.mrb[19].mxu0  ;;  %v16137_v43 = vadd.f32 %v12946_v60, %v7207_v59  ;;  %v7303_v6 = vsel %vm874_vm3, %v16130_v9, -inf  ;;  %v7248_v62 = vpop.xlane.xlu1 %7247 }
0x182f   :  { %7274 = vmax.xlane.f32.xlu1 %v7273_v48  ;;  %v7125_v50 = vpop.f32.mrb[0].mxu1  ;;  %v7316_v59 = vsub.f32 %v15999_v21, %v7248_v62  ;;  %v12948_v21 = vld [vmem:[%s17074_s3 + $0xb8] sm:$0xff] }
0x1830   :  { %v16104_v17 = vadd.f32 %v12941_v13, %v7125_v50  ;;  %v11958_v46 = vpop.f32.mrb[1].mxu1  ;;  %v7306_v63 = vsel %vm874_vm3, %v16137_v43, -inf }
0x1831   :  { %7277 = vmax.xlane.f32.xlu0 %v7276_v11  ;;  %v7128_v22 = vpop.f32.mrb[2].mxu1  ;;  %v7341_v48 = vmul.f32 1.442695, %v7316_v59 }
0x1832   :  { %v16116_v1 = vadd.f32 %v12943_v56, %v7128_v22  ;;  %v11959_v15 = vpop.f32.mrb[3].mxu1  ;;  %v7291_v4 = vsel %vm874_vm3, %v16104_v17, -inf  ;;  %v12947_v22 = vld [vmem:[%s17074_s3 + $0xb0] sm:$0xff]  ;;  %v7251_v33 = vpop.xlane.xlu1 %7250 }
0x1833   :  { %7292 = vmax.xlane.f32.xlu1 %v7291_v4  ;;  %v7212_v40 = vpop.f32.mrb[20].mxu0  ;;  %v7254_v49 = vpop.xlane.xlu0 %7253  ;;  %12781 = vpow2.f32 %v7341_v48 }
0x1834   :  { %v11976_v23 = vpop.f32.mrb[21].mxu0  ;;  %v7294_v47 = vsel %vm874_vm3, %v16116_v1, -inf  ;;  %v7318_v50 = vsub.f32 %v16013_v37, %v7254_v49 }
0x1835   :  { %7295 = vmax.xlane.f32.xlu0 %v7294_v47  ;;  %v7215_v20 = vpop.f32.mrb[22].mxu0 }
0x1836   :  { %v11977_v14 = vpop.f32.mrb[23].mxu0  ;;  %v7345_v46 = vmul.f32 1.442695, %v7318_v50  ;;  %v16162_v56 = vadd.f32 %v12948_v21, %v7215_v20  ;;  %v7315_v20 = vsub.f32 %v15994_v12, %v7245_v24 }
0x1837   :  { %7298 = vmax.xlane.f32.xlu1 %v7297_v57  ;;  %v7317_v57 = vsub.f32 %v16008_v2, %v7251_v33 }
0x1838   :  { %12783 = vpow2.f32 %v7345_v46  ;;  %v7339_v14 = vmul.f32 1.442695, %v7315_v20 }
0x1839   :  { %7301 = vmax.xlane.f32.xlu0 %v7300_v31  ;;  %v7257_v60 = vpop.xlane.xlu1 %7256  ;;  %v7343_v31 = vmul.f32 1.442695, %v7317_v57 }
0x183b   :  { %7304 = vmax.xlane.f32.xlu1 %v7303_v6  ;;  %v7260_v13 = vpop.xlane.xlu0 %7259  ;;  %v7319_v6 = vsub.f32 %v16022_v53, %v7257_v60 }
0x183c   :  { %v7320_v11 = vsub.f32 %v16027_v28, %v7260_v13  ;;  %v7312_v28 = vsel %vm874_vm3, %v16162_v56, -inf }
0x183d   :  { %7307 = vmax.xlane.f32.xlu0 %v7306_v63  ;;  %v16168_v15 = vpop.eup %12781  ;;  %v7347_v63 = vmul.f32 1.442695, %v7319_v6 }
0x183e   :  { %v7349_v52 = vmul.f32 1.442695, %v7320_v11  ;;  %v7390_v4 = vsel %vm874_vm3, %v16168_v15, 0.0 }
0x1840   :  { %12785 = vpow2.f32 %v7349_v52 }
0x1841   :  { %12787 = vpow2.f32 %v7339_v14 }
0x1842   :  { %12789 = vpow2.f32 %v7343_v31 }
0x1843   :  { %12791 = vpow2.f32 %v7347_v63 }
0x184c   :  { %7665 = vrot.lane.b32.xlu1 %v15891_v16, %s12953_s23 }
0x1853   :  { %7738 = vrot.lane.b32.xlu0 %v15884_v35, %s12954_s28  ;;  %v16157_v35 = vadd.f32 %v12947_v22, %v7212_v40  ;;  %v16172_v40 = vpop.eup %12783 }
0x1854   :  { %v7396_v36 = vsel %vm874_vm3, %v16172_v40, 0.0  ;;  %v16176_v23 = vpop.eup %12785 }
0x1855   :  { %v7309_v37 = vsel %vm874_vm3, %v16157_v35, -inf  ;;  %v7402_v47 = vsel %vm874_vm3, %v16176_v23, 0.0 }
0x1870   :  { %7310 = vmax.xlane.f32.xlu1 %v7309_v37 }
0x1872   :  { %7313 = vmax.xlane.f32.xlu0 %v7312_v28 }
0x1876   :  { %7391 = vadd.xlane.f32.xlu0 %v7390_v4 }
0x187a   :  { %7397 = vadd.xlane.f32.xlu0 %v7396_v36 }
0x187e   :  { %7403 = vadd.xlane.f32.xlu0 %v7402_v47 }
0x1881   :  { %7740 = vrot.lane.b32.xlu1 %v15891_v16, %s12954_s28  ;;  %v16186_v16 = vpop.eup %12787 }
0x1882   :  { %v7387_v2 = vsel %vm874_vm3, %v16186_v16, 0.0  ;;  %v16191_v50 = vpop.eup %12789 }
0x1883   :  { %v7393_v53 = vsel %vm874_vm3, %v16191_v50, 0.0 }
0x189c   :  { %v7263_v62 = vpop.xlane.xlu0 %7262 }
0x189d   :  { %v7321_v59 = vsub.f32 %v16036_v61, %v7263_v62  ;;  %v16195_v61 = vpop.eup %12791 }
0x189e   :  { %v7399_v13 = vsel %vm874_vm3, %v16195_v61, 0.0 }
0x189f   :  { %v7351_v49 = vmul.f32 1.442695, %v7321_v59 }
0x18a0   :  { %v7266_v48 = vpop.xlane.xlu0 %7265 }
0x18a1   :  { %v7322_v12 = vsub.f32 %v16041_v19, %v7266_v48  ;;  %12793 = vpow2.f32 %v7351_v49 }
0x18a3   :  { %v7353_v24 = vmul.f32 1.442695, %v7322_v12 }
0x18a5   :  { %12795 = vpow2.f32 %v7353_v24  ;;  %7388 = vadd.xlane.f32.xlu1 %v7387_v2 }
0x18a9   :  { %7394 = vadd.xlane.f32.xlu1 %v7393_v53 }
0x18ab   :  { %v16199_v46 = vpop.eup %12793 }
0x18ac   :  { %v7405_v52 = vsel %vm874_vm3, %v16199_v46, 0.0 }
0x18ad   :  { %7400 = vadd.xlane.f32.xlu1 %v7399_v13 }
0x18af   :  { %v16201_v19 = vpop.eup %12795 }
0x18b0   :  { %v7281_v11 = vpop.xlane.xlu1 %7280  ;;  %v7408_v22 = vsel %vm874_vm3, %v16201_v19, 0.0 }
0x18b1   :  { %v7327_v21 = vsub.f32 %v16050_v39, %v7281_v11  ;;  %7409 = vadd.xlane.f32.xlu0 %v7408_v22  ;;  %7406 = vadd.xlane.f32.xlu1 %v7405_v52 }
0x18b2   :  { %v7284_v37 = vpop.xlane.xlu0 %7283 }
0x18b3   :  { %v7363_v28 = vmul.f32 1.442695, %v7327_v21  ;;  %v7328_v4 = vsub.f32 %v16060_v3, %v7284_v37 }
0x18b4   :  { %v7269_v36 = vpop.xlane.xlu1 %7268 }
0x18b5   :  { %12797 = vpow2.f32 %v7363_v28  ;;  %v7365_v47 = vmul.f32 1.442695, %v7328_v4  ;;  %v7323_v20 = vsub.f32 %v16055_v55, %v7269_v36 }
0x18b6   :  { %v7272_v33 = vpop.xlane.xlu0 %7271 }
0x18b7   :  { %12799 = vpow2.f32 %v7365_v47  ;;  %v7355_v14 = vmul.f32 1.442695, %v7323_v20  ;;  %v7324_v57 = vsub.f32 %v16067_v32, %v7272_v33 }
0x18b8   :  { %v7287_v60 = vpop.xlane.xlu1 %7286 }
0x18b9   :  { %12801 = vpow2.f32 %v7355_v14  ;;  %v7329_v39 = vsub.f32 %v16076_v54, %v7287_v60  ;;  %v7357_v6 = vmul.f32 1.442695, %v7324_v57 }
0x18ba   :  { %v7290_v31 = vpop.xlane.xlu0 %7289 }
0x18bb   :  { %v7367_v63 = vmul.f32 1.442695, %v7329_v39  ;;  %v7330_v62 = vsub.f32 %v16088_v25, %v7290_v31 }
0x18bc   :  { %v7275_v3 = vpop.xlane.xlu1 %7274 }
0x18bd   :  { %12803 = vpow2.f32 %v7367_v63  ;;  %v7325_v59 = vsub.f32 %v16083_v34, %v7275_v3  ;;  %v7369_v48 = vmul.f32 1.442695, %v7330_v62 }
0x18be   :  { %v7278_v49 = vpop.xlane.xlu0 %7277  ;;  %12805 = vpow2.f32 %v7357_v6 }
0x18bf   :  { %v16214_v55 = vpop.eup %12797  ;;  %v7359_v12 = vmul.f32 1.442695, %v7325_v59  ;;  %v7326_v32 = vsub.f32 %v16095_v10, %v7278_v49 }
0x18c0   :  { %v7293_v24 = vpop.xlane.xlu1 %7292  ;;  %v7423_v54 = vsel %vm874_vm3, %v16214_v55, 0.0 }
0x18c1   :  { %v16219_v2 = vpop.eup %12799  ;;  %12807 = vpow2.f32 %v7359_v12  ;;  %v7331_v25 = vsub.f32 %v16104_v17, %v7293_v24  ;;  %7424 = vadd.xlane.f32.xlu1 %v7423_v54  ;;  %v7361_v11 = vmul.f32 1.442695, %v7326_v32 }
0x18c2   :  { %v7296_v53 = vpop.xlane.xlu0 %7295  ;;  %v7426_v34 = vsel %vm874_vm3, %v16219_v2, 0.0  ;;  %12809 = vpow2.f32 %v7369_v48 }
0x18c3   :  { %v16224_v13 = vpop.eup %12801  ;;  %v7371_v22 = vmul.f32 1.442695, %v7331_v25  ;;  %v7332_v10 = vsub.f32 %v16116_v1, %v7296_v53  ;;  %7427 = vadd.xlane.f32.xlu0 %v7426_v34 }
0x18c4   :  { %v7299_v52 = vpop.xlane.xlu1 %7298  ;;  %v7411_v21 = vsel %vm874_vm3, %v16224_v13, 0.0 }
0x18c5   :  { %12811 = vpow2.f32 %v7371_v22  ;;  %v7333_v17 = vsub.f32 %v16111_v30, %v7299_v52  ;;  %7412 = vadd.xlane.f32.xlu1 %v7411_v21  ;;  %v7373_v4 = vmul.f32 1.442695, %v7332_v10 }
0x18c6   :  { %v7302_v37 = vpop.xlane.xlu0 %7301  ;;  %12813 = vpow2.f32 %v7361_v11 }
0x18c7   :  { %v16230_v28 = vpop.eup %12803  ;;  %v7375_v36 = vmul.f32 1.442695, %v7333_v17  ;;  %v7334_v47 = vsub.f32 %v16123_v27, %v7302_v37 }
0x18c8   :  { %v7305_v20 = vpop.xlane.xlu1 %7304  ;;  %v7429_v1 = vsel %vm874_vm3, %v16230_v28, 0.0  ;;  %v16235_v33 = vpop.eup %12805 }
0x18c9   :  { %12815 = vpow2.f32 %v7375_v36  ;;  %7430 = vadd.xlane.f32.xlu0 %v7429_v1  ;;  %v7377_v30 = vmul.f32 1.442695, %v7334_v47  ;;  %v7335_v57 = vsub.f32 %v16130_v9, %v7305_v20  ;;  %v7414_v39 = vsel %vm874_vm3, %v16235_v33, 0.0 }
0x18ca   :  { %12817 = vpow2.f32 %v7373_v4  ;;  %v7308_v60 = vpop.xlane.xlu0 %7307 }
0x18cb   :  { %v16237_v14 = vpop.eup %12807  ;;  %12819 = vpow2.f32 %v7377_v30  ;;  %v7379_v63 = vmul.f32 1.442695, %v7335_v57  ;;  %v7336_v62 = vsub.f32 %v16137_v43, %v7308_v60 }
0x18cc   :  { %v7417_v27 = vsel %vm874_vm3, %v16237_v14, 0.0  ;;  %v16244_v31 = vpop.eup %12809  ;;  %v7666_v10 = vpop.permute.xlu1 %7665 }
0x18cd   :  { %7415 = vadd.xlane.f32.xlu0 %v7414_v39  ;;  %7418 = vadd.xlane.f32.xlu1 %v7417_v27  ;;  %v7432_v9 = vsel %vm874_vm3, %v16244_v31, 0.0  ;;  %12821 = vpow2.f32 %v7379_v63  ;;  %v7381_v48 = vmul.f32 1.442695, %v7336_v62 }
0x18ce   :  { %v7739_v52 = vpop.permute.xlu0 %7738 }
0x18cf   :  { %v16246_v6 = vpop.eup %12811  ;;  %12823 = vpow2.f32 %v7381_v48 }
0x18d0   :  { %v7435_v3 = vsel %vm874_vm3, %v16246_v6, 0.0  ;;  %v16253_v59 = vpop.eup %12813 }
0x18d1   :  { %7433 = vadd.xlane.f32.xlu0 %v7432_v9  ;;  %7436 = vadd.xlane.f32.xlu1 %v7435_v3  ;;  %v7420_v12 = vsel %vm874_vm3, %v16253_v59, 0.0 }
0x18d3   :  { %v16255_v49 = vpop.eup %12815 }
0x18d4   :  { %v7441_v43 = vsel %vm874_vm3, %v16255_v49, 0.0  ;;  %v16261_v32 = vpop.eup %12817 }
0x18d5   :  { %7421 = vadd.xlane.f32.xlu0 %v7420_v12  ;;  %7442 = vadd.xlane.f32.xlu1 %v7441_v43  ;;  %v7438_v24 = vsel %vm874_vm3, %v16261_v32, 0.0  ;;  %v16265_v54 = vpop.eup %12819 }
0x18d6   :  { %v7444_v25 = vsel %vm874_vm3, %v16265_v54, 0.0 }
0x18d7   :  { %v16269_v53 = vpop.eup %12821 }
0x18d8   :  { %v7447_v34 = vsel %vm874_vm3, %v16269_v53, 0.0 }
0x18d9   :  { %7439 = vadd.xlane.f32.xlu0 %v7438_v24  ;;  %v16273_v11 = vpop.eup %12823 }
0x18da   :  { %v7450_v22 = vsel %vm874_vm3, %v16273_v11, 0.0 }
0x18dd   :  { %7445 = vadd.xlane.f32.xlu0 %v7444_v25 }
0x18e1   :  { %7448 = vadd.xlane.f32.xlu0 %v7447_v34 }
0x18e5   :  { %7451 = vadd.xlane.f32.xlu0 %v7450_v22 }
0x18e6   :  { %7667 = vrot.lane.b32.xlu1 %v15898_v58, %s12953_s23 }
0x18fd   :  { %v7311_v21 = vpop.xlane.xlu1 %7310 }
0x18fe   :  { %v7337_v17 = vsub.f32 %v16157_v35, %v7311_v21 }
0x18ff   :  { %v7314_v37 = vpop.xlane.xlu0 %7313 }
0x1900   :  { %v7383_v4 = vmul.f32 1.442695, %v7337_v17  ;;  %v7338_v36 = vsub.f32 %v16162_v56, %v7314_v37 }
0x1901   :  { %v7741_v35 = vpop.permute.xlu1 %7740 }
0x1902   :  { %12825 = vpow2.f32 %v7383_v4  ;;  %v7385_v47 = vmul.f32 1.442695, %v7338_v36 }
0x1903   :  { %v7392_v56 = vpop.xlane.xlu0 %7391 }
0x1904   :  { %12827 = vpow2.f32 %v7385_v47 }
0x1905   :  { %12829 = vrcp.f32 %v7392_v56 }
0x1907   :  { %v7398_v39 = vpop.xlane.xlu0 %7397 }
0x190b   :  { %v7404_v63 = vpop.xlane.xlu0 %7403 }
0x190c   :  { %v16281_v20 = vpop.eup %12825 }
0x190d   :  { %v7453_v1 = vsel %vm874_vm3, %v16281_v20, 0.0 }
0x190e   :  { %v16285_v30 = vpop.eup %12827  ;;  %7454 = vadd.xlane.f32.xlu0 %v7453_v1 }
0x190f   :  { %v7456_v57 = vsel %vm874_vm3, %v16285_v30, 0.0  ;;  %v12830_v9 = vpop.eup %12829 }
0x1910   :  { %v7484_v48 = vmul.f32 %v12830_v9, %v16168_v15 }
0x1912   :  { %7457 = vadd.xlane.f32.xlu0 %v7456_v57 }
0x1928   :  { %7742 = vrot.lane.b32.xlu0 %v15898_v58, %s12954_s28 }
0x1932   :  { %v7389_v60 = vpop.xlane.xlu1 %7388 }
0x1933   :  { %12831 = vrcp.f32 %v7389_v60 }
0x1936   :  { %v7395_v27 = vpop.xlane.xlu1 %7394 }
0x1937   :  { %12833 = vrcp.f32 %v7395_v27 }
0x1938   :  { %12835 = vrcp.f32 %v7398_v39 }
0x193a   :  { %v7401_v62 = vpop.xlane.xlu1 %7400 }
0x193b   :  { %12837 = vrcp.f32 %v7401_v62 }
0x193d   :  { %v12832_v3 = vpop.eup %12831 }
0x193e   :  { %v7483_v12 = vmul.f32 %v12832_v3, %v16186_v16  ;;  %v7410_v43 = vpop.xlane.xlu0 %7409  ;;  %v7407_v58 = vpop.xlane.xlu1 %7406 }
0x193f   :  { %12839 = vrcp.f32 %v7410_v43 }
0x1940   :  { %v7507_v24 = vpack.c.bf16 %v7484_v48, %v7483_v12  ;;  %12841 = vrcp.f32 %v7407_v58 }
0x1941   :  { %v12834_v25 = vpop.eup %12833  ;;  %12843 = vrcp.f32 %v7404_v63 }
0x1942   :  { %11985 = vmatmul.mubr.msk.bf16.vlgmr.msra.gmra.mrb[4].mxu1 %vm874_vm3, %v7507_v24  ;;  %v12836_v34 = vpop.eup %12835  ;;  %v7485_v15 = vmul.f32 %v12834_v25, %v16191_v50 }
0x1943   :  { %12015 = vmatpush3.bf16.msra.mxu1 %v16149_v51  ;;  %11988 = vmatprep.mubr.msk.bf16.mxu1 %vm12950_vm0, %v12949_v0  ;;  %v7486_v16 = vmul.f32 %v12836_v34, %v16172_v40 }
0x1944   :  { %12016 = vmatprep.subr.bf16.mxu1 %v12949_v0 }
0x1945   :  { %v12838_v22 = vpop.eup %12837  ;;  %v7508_v21 = vpack.c.bf16 %v7486_v16, %v7485_v15 }
0x1946   :  { %v7487_v50 = vmul.f32 %v12838_v22, %v16195_v61 }
0x1947   :  { %12017 = vmatpush3.bf16.msra.mxu1 %v7666_v10 }
0x1948   :  { %12018 = vmatprep.subr.bf16.mxu1 %v12949_v0 }
0x1949   :  { %v12840_v17 = vpop.eup %12839 }
0x194a   :  { %v12842_v37 = vpop.eup %12841  ;;  %v7490_v4 = vmul.f32 %v12840_v17, %v16201_v19  ;;  %11989 = vmatmul.mubr.msk.bf16.gmra.mrb[8].mxu1 %vm874_vm3, %v7508_v21 }
0x194b   :  { %v12844_v51 = vpop.eup %12843  ;;  %v7489_v36 = vmul.f32 %v12842_v37, %v16199_v46  ;;  %11992 = vmatprep.mubr.msk.bf16.mxu1 %vm12950_vm0, %v12949_v0 }
0x194c   :  { %v7488_v10 = vmul.f32 %v12844_v51, %v16176_v23 }
0x194d   :  { %v7510_v40 = vpack.c.bf16 %v7490_v4, %v7489_v36 }
0x194e   :  { %v7509_v47 = vpack.c.bf16 %v7488_v10, %v7487_v50  ;;  %v7425_v1 = vpop.xlane.xlu1 %7424 }
0x194f   :  { %12003 = vmatmul.mubr.msk.bf16.vlgmr.msra.gmra.mrb[24].mxu0 %vm874_vm3, %v7510_v40 }
0x1950   :  { %12033 = vmatpush3.bf16.msra.mxu0 %v7739_v52  ;;  %12006 = vmatprep.mubr.msk.bf16.mxu0 %vm12950_vm0, %v12949_v0  ;;  %v7428_v19 = vpop.xlane.xlu0 %7427 }
0x1951   :  { %12034 = vmatprep.subr.bf16.mxu0 %v12949_v0  ;;  %12845 = vrcp.f32 %v7428_v19 }
0x1952   :  { %11993 = vmatmul.mubr.msk.bf16.gmra.mrb[12].mxu1 %vm874_vm3, %v7509_v47  ;;  %v7413_v23 = vpop.xlane.xlu1 %7412  ;;  %12847 = vrcp.f32 %v7425_v1 }
0x1953   :  { %12020 = vmatprep.mubr.msk.bf16.mxu1 %vm12950_vm0, %v12949_v0  ;;  %12849 = vrcp.f32 %v7413_v23 }
0x1954   :  { %12035 = vmatpush3.bf16.msra.mxu0 %v7741_v35 }
0x1955   :  { %12036 = vmatprep.subr.bf16.mxu0 %v12949_v0 }
0x1956   :  { %v7431_v61 = vpop.xlane.xlu0 %7430 }
0x195a   :  { %v7416_v46 = vpop.xlane.xlu0 %7415  ;;  %v7419_v52 = vpop.xlane.xlu1 %7418 }
0x195b   :  { %12851 = vrcp.f32 %v7416_v46  ;;  %v12846_v60 = vpop.eup %12845 }
0x195c   :  { %v12848_v39 = vpop.eup %12847  ;;  %v7496_v62 = vmul.f32 %v12846_v60, %v16219_v2 }
0x195d   :  { %v12850_v35 = vpop.eup %12849  ;;  %v7495_v3 = vmul.f32 %v12848_v39, %v16214_v55 }
0x195e   :  { %v7434_v57 = vpop.xlane.xlu0 %7433  ;;  %v7437_v56 = vpop.xlane.xlu1 %7436  ;;  %v7491_v48 = vmul.f32 %v12850_v35, %v16224_v13 }
0x195f   :  { %12853 = vrcp.f32 %v7434_v57  ;;  %v7513_v24 = vpack.c.bf16 %v7496_v62, %v7495_v3 }
0x1960   :  { %12855 = vrcp.f32 %v7431_v61 }
0x1961   :  { %12857 = vrcp.f32 %v7419_v52 }
0x1962   :  { %v7422_v27 = vpop.xlane.xlu0 %7421  ;;  %v7443_v63 = vpop.xlane.xlu1 %7442 }
0x1963   :  { %12859 = vrcp.f32 %v7422_v27 }
0x1965   :  { %v12852_v9 = vpop.eup %12851 }
0x1966   :  { %v7492_v12 = vmul.f32 %v12852_v9, %v16235_v33  ;;  %v7440_v43 = vpop.xlane.xlu0 %7439  ;;  %v7668_v58 = vpop.permute.xlu1 %7667 }
0x1967   :  { %12861 = vrcp.f32 %v7440_v43  ;;  %12019 = vmatpush3.bf16.msra.mxu1 %v7668_v58 }
0x1968   :  { %v7511_v25 = vpack.c.bf16 %v7492_v12, %v7491_v48  ;;  %12050 = vmatprep.subr.bf16.mxu1 %v12949_v0  ;;  %12863 = vrcp.f32 %v7437_v56 }
0x1969   :  { %v12854_v34 = vpop.eup %12853 }
0x196a   :  { %v12856_v15 = vpop.eup %12855  ;;  %12007 = vmatmul.mubr.msk.bf16.gmra.mrb[28].mxu0 %vm874_vm3, %v7511_v25  ;;  %12021 = vmatmul.mubr.msk.bf16.vlgmr.msra.gmra.mrb[16].mxu1 %vm874_vm3, %v7513_v24  ;;  %v7498_v2 = vmul.f32 %v12854_v34, %v16244_v31 }
0x196b   :  { %v12858_v55 = vpop.eup %12857  ;;  %12010 = vmatprep.mubr.msk.bf16.mxu0 %vm12950_vm0, %v12949_v0  ;;  %12024 = vmatprep.mubr.msk.bf16.mxu1 %vm12950_vm0, %v12949_v0  ;;  %v7497_v33 = vmul.f32 %v12856_v15, %v16230_v28  ;;  %v12469_v15 = vld [vmem:[%s17075_s6 + $0x80] sm:$0xff]  }
0x196c   :  { %v7493_v16 = vmul.f32 %v12858_v55, %v16237_v14  ;;  %12051 = vmatpush3.bf16.msra.mxu1 %v12469_v15  ;;  %v12470_v55 = vld [vmem:[%s17075_s6 + $0x88] sm:$0xff]  }
0x196d   :  { %v12860_v13 = vpop.eup %12859  ;;  %v7514_v21 = vpack.c.bf16 %v7498_v2, %v7497_v33  ;;  %12052 = vmatprep.subr.bf16.mxu1 %v12949_v0  ;;  %v12471_v33 = vld [vmem:[%s17075_s6 + $0x90] sm:$0xff]  }
0x196e   :  { %v7494_v22 = vmul.f32 %v12860_v13, %v16253_v59  ;;  %v7446_v59 = vpop.xlane.xlu0 %7445 }
0x196f   :  { %12865 = vrcp.f32 %v7446_v59 }
0x1970   :  { %v7512_v17 = vpack.c.bf16 %v7494_v22, %v7493_v16  ;;  %12867 = vrcp.f32 %v7443_v63  ;;  %12053 = vmatpush3.bf16.msra.mxu1 %v12470_v55 }
0x1971   :  { %v12862_v37 = vpop.eup %12861  ;;  %12054 = vmatprep.subr.bf16.mxu1 %v12949_v0 }
0x1972   :  { %12011 = vmatmul.mubr.msk.bf16.gmra.mrb[32].mxu0 %vm874_vm3, %v7512_v17  ;;  %12025 = vmatmul.mubr.msk.bf16.gmra.mrb[20].mxu1 %vm874_vm3, %v7514_v21  ;;  %v12864_v4 = vpop.eup %12863  ;;  %v7500_v28 = vmul.f32 %v12862_v37, %v16261_v32  ;;  %v7449_v51 = vpop.xlane.xlu0 %7448 }
0x1973   :  { %12028 = vmatprep.mubr.msk.bf16.mxu1 %vm12950_vm0, %v12949_v0  ;;  %12038 = vmatprep.mubr.msk.bf16.mxu0 %vm12950_vm0, %v12949_v0  ;;  %v7499_v14 = vmul.f32 %v12864_v4, %v16246_v6 }
0x1974   :  { %12055 = vmatpush3.bf16.msra.mxu1 %v12471_v33 }
0x1975   :  { %v7515_v31 = vpack.c.bf16 %v7500_v28, %v7499_v14  ;;  %12056 = vmatprep.subr.bf16.mxu1 %v12949_v0 }
0x1976   :  { %v7452_v36 = vpop.xlane.xlu0 %7451 }
0x1977   :  { %12869 = vrcp.f32 %v7452_v36  ;;  %v12473_v36 = vld [vmem:[%s17075_s6 + $0xa0] sm:$0xff]  }
0x1978   :  { %12871 = vrcp.f32 %v7449_v51 }
0x1979   :  { %v12866_v40 = vpop.eup %12865 }
0x197a   :  { %12029 = vmatmul.mubr.msk.bf16.gmra.mrb[24].mxu1 %vm874_vm3, %v7515_v31  ;;  %v12868_v47 = vpop.eup %12867  ;;  %v7502_v32 = vmul.f32 %v12866_v40, %v16265_v54  ;;  %v12472_v31 = vld [vmem:[%s17075_s6 + $0x98] sm:$0xff]  }
0x197b   :  { %12066 = vmatprep.mubr.msk.bf16.mxu1 %vm12950_vm0, %v12949_v0  ;;  %v7501_v6 = vmul.f32 %v12868_v47, %v16255_v49  ;;  %12057 = vmatpush3.bf16.msra.mxu1 %v12472_v31 }
0x197c   :  { %12058 = vmatprep.subr.bf16.mxu1 %v12949_v0 }
0x197d   :  { %v7516_v19 = vpack.c.bf16 %v7502_v32, %v7501_v6 }
0x197f   :  { %12059 = vmatpush3.bf16.msra.mxu1 %v12473_v36 }
0x1980   :  { %12060 = vmatprep.subr.bf16.mxu1 %v12949_v0 }
0x1981   :  { %v12870_v23 = vpop.eup %12869 }
0x1982   :  { %v12872_v61 = vpop.eup %12871  ;;  %v7504_v46 = vmul.f32 %v12870_v23, %v16273_v11  ;;  %v12474_v23 = vld [vmem:[%s17075_s6 + $0xa8] sm:$0xff]  }
0x1983   :  { %v7503_v52 = vmul.f32 %v12872_v61, %v16269_v53  ;;  %12061 = vmatpush3.bf16.msra.mxu1 %v12474_v23 }
0x1984   :  { %12062 = vmatprep.subr.bf16.mxu1 %v12949_v0 }
0x1985   :  { %v7517_v57 = vpack.c.bf16 %v7504_v46, %v7503_v52  ;;  %v12475_v46 = vld [vmem:[%s17075_s6 + $0xb0] sm:$0xff]  }
0x1987   :  { %12063 = vmatpush3.bf16.msra.mxu1 %v12475_v46 }
0x1988   :  { %12064 = vmatprep.subr.bf16.mxu1 %v12949_v0 }
0x199b   :  { %v7455_v50 = vpop.xlane.xlu0 %7454 }
0x199f   :  { %v7458_v10 = vpop.xlane.xlu0 %7457 }
0x19a0   :  { %12873 = vrcp.f32 %v7458_v10 }
0x19a1   :  { %12875 = vrcp.f32 %v7455_v50 }
0x19a3   :  { %v7743_v1 = vpop.permute.xlu0 %7742 }
0x19a4   :  { %12037 = vmatpush3.bf16.msra.mxu0 %v7743_v1 }
0x19a7   :  { %12039 = vmatmul.mubr.msk.bf16.vlgmr.msra.gmra.mrb[36].mxu0 %vm874_vm3, %v7516_v19 }
0x19a8   :  { %12042 = vmatprep.mubr.msk.bf16.mxu0 %vm12950_vm0, %v12949_v0 }
0x19aa   :  { %v12874_v54 = vpop.eup %12873 }
0x19ab   :  { %v12876_v49 = vpop.eup %12875  ;;  %v7506_v56 = vmul.f32 %v12874_v54, %v16285_v30 }
0x19ac   :  { %v7505_v60 = vmul.f32 %v12876_v49, %v16281_v20 }
0x19ae   :  { %v7518_v39 = vpack.c.bf16 %v7506_v56, %v7505_v60  ;;  %v12476_v56 = vld [vmem:[%s17075_s6 + $0xb8] sm:$0xff]  }
0x19af   :  { %12043 = vmatmul.mubr.msk.bf16.gmra.mrb[40].mxu0 %vm874_vm3, %v7517_v57  ;;  %12065 = vmatpush3.bf16.msra.mxu1 %v12476_v56 }
0x19b0   :  { %12046 = vmatprep.mubr.msk.bf16.mxu0 %vm12950_vm0, %v12949_v0 }
0x19b7   :  { %12047 = vmatmul.mubr.msk.bf16.gmra.mrb[44].mxu0 %vm874_vm3, %v7518_v39 }
0x19b8   :  { %8387 = vmatprep.mubr.bf16.mxu0 %v12951_v38 }
0x1a15   :  { %v16356_v11 = vpop.f32.mrb[4].mxu1 }
0x1a16   :  { %v11986_v53 = vpop.f32.mrb[5].mxu1 }
0x1a17   :  { %v16358_v27 = vpop.f32.mrb[6].mxu1 }
0x1a18   :  { %v11987_v63 = vpop.f32.mrb[7].mxu1 }
0x1a1d   :  { %v16360_v35 = vpop.f32.mrb[8].mxu1 }
0x1a1e   :  { %v11990_v62 = vpop.f32.mrb[9].mxu1 }
0x1a1f   :  { %v16362_v9 = vpop.f32.mrb[10].mxu1 }
0x1a20   :  { %v11991_v3 = vpop.f32.mrb[11].mxu1 }
0x1a22   :  { %v7640_v30 = vpop.f32.mrb[24].mxu0 }
0x1a23   :  { %v12004_v48 = vpop.f32.mrb[25].mxu0 }
0x1a24   :  { %v7643_v20 = vpop.f32.mrb[26].mxu0 }
0x1a25   :  { %v12180_v12 = vpack.i.bf16 %v7643_v20, %v7640_v30  ;;  %v12005_v43 = vpop.f32.mrb[27].mxu0  ;;  %v16364_v58 = vpop.f32.mrb[12].mxu1 }
0x1a26   :  { %v11994_v24 = vpop.f32.mrb[13].mxu1 }
0x1a27   :  { %12181 = vrot.lane.b32.xlu1 %v12180_v12, %s12954_s28  ;;  %v16367_v25 = vpop.f32.mrb[14].mxu1 }
0x1a28   :  { %v11995_v34 = vpop.f32.mrb[15].mxu1 }
0x1a3d   :  { %v7648_v2 = vpop.f32.mrb[28].mxu0  ;;  %v7715_v13 = vpop.f32.mrb[16].mxu1 }
0x1a3e   :  { %v12008_v16 = vpop.f32.mrb[29].mxu0  ;;  %v12022_v22 = vpop.f32.mrb[17].mxu1 }
0x1a3f   :  { %v7651_v21 = vpop.f32.mrb[30].mxu0  ;;  %v7718_v17 = vpop.f32.mrb[18].mxu1 }
0x1a40   :  { %v12195_v37 = vpack.i.bf16 %v7651_v21, %v7648_v2  ;;  %v12185_v4 = vpack.i.bf16 %v7718_v17, %v7715_v13  ;;  %v12009_v28 = vpop.f32.mrb[31].mxu0  ;;  %v12023_v14 = vpop.f32.mrb[19].mxu1 }
0x1a42   :  { %12186 = vrot.lane.b32.xlu1 %v12185_v4, %s12953_s23 }
0x1a45   :  { %v7656_v59 = vpop.f32.mrb[32].mxu0  ;;  %v7723_v51 = vpop.f32.mrb[20].mxu1 }
0x1a46   :  { %v12012_v50 = vpop.f32.mrb[33].mxu0  ;;  %v12026_v40 = vpop.f32.mrb[21].mxu1 }
0x1a47   :  { %v7659_v10 = vpop.f32.mrb[34].mxu0  ;;  %v7726_v47 = vpop.f32.mrb[22].mxu1 }
0x1a48   :  { %v12210_v32 = vpack.i.bf16 %v7659_v10, %v7656_v59  ;;  %v12200_v6 = vpack.i.bf16 %v7726_v47, %v7723_v51  ;;  %v12013_v1 = vpop.f32.mrb[35].mxu0  ;;  %v12027_v19 = vpop.f32.mrb[23].mxu1 }
0x1a4d   :  { %v7731_v61 = vpop.f32.mrb[24].mxu1 }
0x1a4e   :  { %v12030_v52 = vpop.f32.mrb[25].mxu1 }
0x1a4f   :  { %v7734_v57 = vpop.f32.mrb[26].mxu1 }
0x1a50   :  { %v12215_v54 = vpack.i.bf16 %v7734_v57, %v7731_v61  ;;  %v12031_v49 = vpop.f32.mrb[27].mxu1 }
0x1a7a   :  { %v7790_v60 = vpop.f32.mrb[36].mxu0 }
0x1a7b   :  { %v12040_v39 = vpop.f32.mrb[37].mxu0 }
0x1a7c   :  { %v7793_v53 = vpop.f32.mrb[38].mxu0 }
0x1a7d   :  { %v12190_v63 = vpack.i.bf16 %v7793_v53, %v7790_v60  ;;  %v12041_v62 = vpop.f32.mrb[39].mxu0 }
0x1a7f   :  { %12191 = vrot.lane.b32.xlu1 %v12190_v63, %s12952_s27 }
0x1a82   :  { %v7798_v3 = vpop.f32.mrb[40].mxu0 }
0x1a83   :  { %v12044_v30 = vpop.f32.mrb[41].mxu0  ;;  %12196 = vrot.lane.b32.xlu1 %v12195_v37, %s12954_s28 }
0x1a84   :  { %v7801_v48 = vpop.f32.mrb[42].mxu0 }
0x1a85   :  { %v12205_v20 = vpack.i.bf16 %v7801_v48, %v7798_v3  ;;  %v12045_v12 = vpop.f32.mrb[43].mxu0 }
0x1a87   :  { %12206 = vrot.lane.b32.xlu0 %v12205_v20, %s12952_s27  ;;  %12201 = vrot.lane.b32.xlu1 %v12200_v6, %s12953_s23 }
0x1a8a   :  { %v7806_v43 = vpop.f32.mrb[44].mxu0 }
0x1a8b   :  { %v12048_v24 = vpop.f32.mrb[45].mxu0  ;;  %12211 = vrot.lane.b32.xlu1 %v12210_v32, %s12954_s28  ;;  %12216 = vrot.lane.b32.xlu0 %v12215_v54, %s12953_s23 }
0x1a8c   :  { %v7809_v34 = vpop.f32.mrb[46].mxu0 }
0x1a8d   :  { %v12220_v15 = vpack.i.bf16 %v7809_v34, %v7806_v43  ;;  %v12049_v55 = vpop.f32.mrb[47].mxu0 }
0x1a8f   :  { %12221 = vrot.lane.b32.xlu1 %v12220_v15, %s12952_s27 }
0x1a99   :  { %v12182_v2 = vpop.permute.xlu1 %12181 }
0x1a9a   :  { %v12184_v33 = vunpack.i.h.bf16 %v12182_v2  ;;  %v12183_v16 = vunpack.i.l.bf16 %v12182_v2 }
0x1a9c   :  { %v7886_v37 = vsel %vm507_vm2, %v16358_v27, %v12184_v33  ;;  %v7885_v4 = vsel %vm507_vm2, %v16356_v11, %v12183_v16 }
0x1ab4   :  { %v12187_v13 = vpop.permute.xlu1 %12186 }
0x1ab5   :  { %v12189_v22 = vunpack.i.h.bf16 %v12187_v13  ;;  %v12188_v21 = vunpack.i.l.bf16 %v12187_v13 }
0x1ab7   :  { %v7891_v31 = vsel %vm101_vm1, %v7885_v4, %v12188_v21  ;;  %v7892_v59 = vsel %vm101_vm1, %v7886_v37, %v12189_v22 }
0x1af1   :  { %v12192_v17 = vpop.permute.xlu1 %12191 }
0x1af2   :  { %v12194_v28 = vunpack.i.h.bf16 %v12192_v17  ;;  %v12193_v14 = vunpack.i.l.bf16 %v12192_v17 }
0x1af4   :  { %v7897_v51 = vsel %vm1529_vm4, %v7891_v31, %v12193_v14  ;;  %v7898_v36 = vsel %vm1529_vm4, %v7892_v59, %v12194_v28 }
0x1af5   :  { %v7903_v50 = vpack.c.bf16 %v7898_v36, %v7897_v51  ;;  %v12197_v40 = vpop.permute.xlu1 %12196 }
0x1af6   :  { %v12199_v10 = vunpack.i.h.bf16 %v12197_v40  ;;  %v12198_v47 = vunpack.i.l.bf16 %v12197_v40 }
0x1af7   :  { %12067 = vmatmul.mubr.bf16.vlgmr.msra.gmra.mrb[28].mxu1 %v7903_v50 }
0x1af8   :  { %12070 = vmatprep.mubr.msk.bf16.mxu1 %vm12950_vm0, %v12949_v0  ;;  %v7888_v23 = vsel %vm507_vm2, %v16362_v9, %v12199_v10  ;;  %v7887_v61 = vsel %vm507_vm2, %v16360_v35, %v12198_v47  ;;  %v10506_v47 = vld [vmem:[%s17077_s10 + $0x408] sm:$0xff] }
0x1af9   :  { %v12207_v27 = vpop.permute.xlu0 %12206  ;;  %v12202_v11 = vpop.permute.xlu1 %12201 }
0x1afa   :  { %v12209_v32 = vunpack.i.h.bf16 %v12207_v27  ;;  %v12208_v6 = vunpack.i.l.bf16 %v12207_v27  ;;  %v12204_v1 = vunpack.i.h.bf16 %v12202_v11  ;;  %v12203_v19 = vunpack.i.l.bf16 %v12202_v11  ;;  %v10509_v11 = vld [vmem:[%s17077_s10 + $0x440] sm:$0xff] }
0x1afc   :  { %v7893_v46 = vsel %vm101_vm1, %v7887_v61, %v12203_v19  ;;  %v7894_v52 = vsel %vm101_vm1, %v7888_v23, %v12204_v1  ;;  %v10510_v23 = vld [vmem:[%s17077_s10 + $0x448] sm:$0xff] }
0x1afd   :  { %v7899_v57 = vsel %vm1529_vm4, %v7893_v46, %v12208_v6  ;;  %v7900_v54 = vsel %vm1529_vm4, %v7894_v52, %v12209_v32  ;;  %v12217_v49 = vpop.permute.xlu0 %12216  ;;  %v12212_v56 = vpop.permute.xlu1 %12211  ;;  %v10511_v32 = vld [vmem:[%s17077_s10 + $0x460] sm:$0xff]  ;;  %v10512_v61 = vld [vmem:[%s17077_s10 + $0x468] sm:$0xff] }
0x1afe   :  { %v7904_v60 = vpack.c.bf16 %v7900_v54, %v7899_v57  ;;  %v12214_v39 = vunpack.i.h.bf16 %v12212_v56  ;;  %v12219_v53 = vunpack.i.h.bf16 %v12217_v49  ;;  %v12218_v63 = vunpack.i.l.bf16 %v12217_v49 }
0x1aff   :  { %v12213_v62 = vunpack.i.l.bf16 %v12212_v56  ;;  %v10543_v19 = vcombine.high %v10509_v11, %v10511_v32  ;;  %v10545_v46 = vcombine.high %v10510_v23, %v10512_v61  ;;  %v10542_v52 = vcombine.low %v10509_v11, %v10511_v32  ;;  %v10527_v11 = vld [vmem:[%s17077_s10 + $0x560] sm:$0xff]  ;;  %v10526_v32 = vld [vmem:[%s17077_s10 + $0x548] sm:$0xff] }
0x1b00   :  { %v7890_v9 = vsel %vm507_vm2, %v16367_v25, %v12214_v39  ;;  %12071 = vmatmul.mubr.bf16.gmra.mrb[32].mxu1 %v7904_v60  ;;  %v10544_v57 = vcombine.low %v10510_v23, %v10512_v61 }
0x1b01   :  { %v7889_v35 = vsel %vm507_vm2, %v16364_v58, %v12213_v62  ;;  %v12222_v3 = vpop.permute.xlu1 %12221  ;;  %12074 = vmatprep.mubr.msk.bf16.mxu1 %vm12950_vm0, %v12949_v0  ;;  %v7896_v12 = vsel %vm101_vm1, %v7890_v9, %v12219_v53  ;;  %v10492_v58 = vld [vmem:[%s17076_s7 + $0x2] ss:$0 sm:$0xff] }
0x1b02   :  { %v12224_v30 = vunpack.i.h.bf16 %v12222_v3  ;;  %v12223_v48 = vunpack.i.l.bf16 %v12222_v3  ;;  %v7895_v20 = vsel %vm101_vm1, %v7889_v35, %v12218_v63 }
0x1b04   :  { %v7901_v43 = vsel %vm1529_vm4, %v7895_v20, %v12223_v48  ;;  %v7902_v24 = vsel %vm1529_vm4, %v7896_v12, %v12224_v30 }
0x1b05   :  { %v7905_v34 = vpack.c.bf16 %v7902_v24, %v7901_v43 }
0x1b08   :  { %12075 = vmatmul.mubr.bf16.gmra.mrb[36].mxu1 %v7905_v34 }
0x1b09   :  { %8450 = vmatprep.mubr.bf16.mxu1 %v12951_v38 }
0x1bca   :  { %v8013_v25 = vpop.f32.mrb[28].mxu1 }
0x1bcb   :  { %v8014_v0 = vadd.f32 %v10492_v58, %v8013_v25  ;;  %v12068_v15 = vpop.f32.mrb[29].mxu1 }
0x1bcc   :  { %v8016_v55 = vpop.f32.mrb[30].mxu1  ;;  %v10513_v15 = vld [vmem:[%s17077_s10 + $0x480] sm:$0xff] }
0x1bcd   :  { %v8036_v2 = vadd.f32 %v8014_v0, %v15846_v44  ;;  %v8017_v13 = vadd.f32 %v10492_v58, %v8016_v55  ;;  %v12069_v33 = vpop.f32.mrb[31].mxu1  ;;  %v10515_v55 = vld [vmem:[%s17077_s10 + $0x4a0] sm:$0xff] }
0x1bce   :  { %v10516_v33 = vld [vmem:[%s17077_s10 + $0x4a8] sm:$0xff] }
0x1bcf   :  { %v8037_v16 = vadd.f32 %v8017_v13, %v15848_v42  ;;  %8046 = vadd.xlane.f32.xlu0 %v8036_v2  ;;  %v10547_v13 = vcombine.high %v10513_v15, %v10515_v55 }
0x1bd1   :  { %8048 = vadd.xlane.f32.xlu1 %v8037_v16 }
0x1bd3   :  { %v8021_v22 = vpop.f32.mrb[32].mxu1 }
0x1bd4   :  { %v8022_v21 = vadd.f32 %v10492_v58, %v8021_v22  ;;  %v12072_v17 = vpop.f32.mrb[33].mxu1 }
0x1bd5   :  { %v8024_v37 = vpop.f32.mrb[34].mxu1 }
0x1bd6   :  { %v8038_v4 = vadd.f32 %v8022_v21, %v15857_v41  ;;  %v8025_v28 = vadd.f32 %v10492_v58, %v8024_v37  ;;  %v12073_v14 = vpop.f32.mrb[35].mxu1  ;;  %v10505_v41 = vld [vmem:[%s17077_s10 + $0x400] sm:$0xff]  ;;  %v10546_v21 = vcombine.low %v10513_v15, %v10515_v55  ;;  %v10637_v55 = vld [vmem:[%s17077_s10 + $0x438] sm:$0xff] }
0x1bd7   :  { %v10519_v14 = vld [vmem:[%s17077_s10 + $0x4e0] sm:$0xff] }
0x1bd8   :  { %8050 = vadd.xlane.f32.xlu0 %v8038_v4  ;;  %v8039_v31 = vadd.f32 %v8025_v28, %v15859_v18  ;;  %v10507_v18 = vld [vmem:[%s17077_s10 + $0x420] sm:$0xff] }
0x1bd9   :  { %v10538_v27 = vcombine.low %v10505_v41, %v10507_v18  ;;  %v10517_v28 = vld [vmem:[%s17077_s10 + $0x4c0] sm:$0xff] }
0x1bdb   :  { %v8029_v59 = vpop.f32.mrb[36].mxu1 }
0x1bdc   :  { %v8030_v51 = vadd.f32 %v10492_v58, %v8029_v59  ;;  %8052 = vadd.xlane.f32.xlu0 %v8039_v31  ;;  %v12076_v44 = vpop.f32.mrb[37].mxu1  ;;  %v10551_v59 = vcombine.high %v10517_v28, %v10519_v14 }
0x1bdd   :  { %v8032_v36 = vpop.f32.mrb[38].mxu1  ;;  %v10550_v44 = vcombine.low %v10517_v28, %v10519_v14 }
0x1bde   :  { %v8040_v42 = vadd.f32 %v8030_v51, %v15868_v29  ;;  %v8033_v50 = vadd.f32 %v10492_v58, %v8032_v36  ;;  %v12077_v40 = vpop.f32.mrb[39].mxu1  ;;  %v10539_v29 = vcombine.high %v10505_v41, %v10507_v18  ;;  %v10520_v51 = vld [vmem:[%s17077_s10 + $0x4e8] sm:$0xff] }
0x1bdf   :  { %v10523_v40 = vld [vmem:[%s17077_s10 + $0x520] sm:$0xff]  ;;  %v10524_v18 = vld [vmem:[%s17077_s10 + $0x528] sm:$0xff] }
0x1be0   :  { %v8041_v10 = vadd.f32 %v8033_v50, %v15870_v26  ;;  %8054 = vadd.xlane.f32.xlu1 %v8040_v42  ;;  %v10508_v26 = vld [vmem:[%s17077_s10 + $0x428] sm:$0xff]  ;;  %8355 = vmatprep.subr.bf16.mxu0 %v10539_v29  ;;  %v10521_v50 = vld [vmem:[%s17077_s10 + $0x500] sm:$0xff] }
0x1be1   :  { %v10540_v6 = vcombine.low %v10506_v47, %v10508_v26  ;;  %v10541_v1 = vcombine.high %v10506_v47, %v10508_v26  ;;  %8356 = vmatpush1.bf16.msra.mxu0 %v10538_v27  ;;  %v10555_v41 = vcombine.high %v10521_v50, %v10523_v40  ;;  %v10554_v47 = vcombine.low %v10521_v50, %v10523_v40  ;;  %v10525_v26 = vld [vmem:[%s17077_s10 + $0x540] sm:$0xff] }
0x1be2   :  { %8056 = vadd.xlane.f32.xlu0 %v8041_v10  ;;  %8357 = vmatprep.subr.bf16.mxu0 %v10543_v19  ;;  %v10558_v19 = vcombine.low %v10525_v26, %v10527_v11 }
0x1be3   :  { %8418 = vmatprep.subr.bf16.mxu1 %v10541_v1  ;;  %v10528_v1 = vld [vmem:[%s17077_s10 + $0x568] sm:$0xff] }
0x1be4   :  { %8419 = vmatpush1.bf16.msra.mxu1 %v10540_v6  ;;  %v10559_v6 = vcombine.high %v10525_v26, %v10527_v11  ;;  %v10560_v23 = vcombine.low %v10526_v32, %v10528_v1  ;;  %v10561_v61 = vcombine.high %v10526_v32, %v10528_v1  ;;  %v10639_v1 = vld [vmem:[%s17077_s10 + $0x458] sm:$0xff] }
0x1be5   :  { %8420 = vmatprep.subr.bf16.mxu1 %v10545_v46  ;;  %8358 = vmatpush1.bf16.msra.mxu0 %v10542_v52  ;;  %v10529_v46 = vld [vmem:[%s17077_s10 + $0x580] sm:$0xff] }
0x1be6   :  { %8359 = vmatprep.subr.bf16.mxu0 %v10547_v13  ;;  %v10531_v52 = vld [vmem:[%s17077_s10 + $0x5a0] sm:$0xff] }
0x1be8   :  { %8421 = vmatpush1.bf16.msra.mxu1 %v10544_v57  ;;  %v10530_v57 = vld [vmem:[%s17077_s10 + $0x588] sm:$0xff] }
0x1be9   :  { %8360 = vmatpush1.bf16.msra.mxu0 %v10546_v21 }
0x1bea   :  { %8361 = vmatprep.subr.bf16.mxu0 %v10551_v59 }
0x1bed   :  { %8362 = vmatpush1.bf16.msra.mxu0 %v10550_v44 }
0x1bee   :  { %8363 = vmatprep.subr.bf16.mxu0 %v10555_v41 }
0x1bf1   :  { %8364 = vmatpush1.bf16.msra.mxu0 %v10554_v47 }
0x1bf2   :  { %8365 = vmatprep.subr.bf16.mxu0 %v10559_v6 }
0x1bf5   :  { %8366 = vmatpush1.bf16.msra.mxu0 %v10558_v19  ;;  %v10641_v19 = vld [vmem:[%s17077_s10 + $0x478] sm:$0xff] }
0x1c5c   :  { %v8047_v54 = vpop.xlane.xlu0 %8046 }
0x1c5d   :  { %v8058_v49 = vmul.f32 0.0078125, %v8047_v54  ;;  %v10563_v54 = vcombine.high %v10529_v46, %v10531_v52 }
0x1c5e   :  { %v8049_v56 = vpop.xlane.xlu1 %8048 }
0x1c5f   :  { %v16470_v60 = vsub.f32 %v8036_v2, %v8058_v49  ;;  %v8059_v39 = vmul.f32 0.0078125, %v8049_v56  ;;  %v10514_v2 = vld [vmem:[%s17077_s10 + $0x488] sm:$0xff]  ;;  %v10562_v56 = vcombine.low %v10529_v46, %v10531_v52  ;;  %8367 = vmatprep.subr.bf16.mxu0 %v10563_v54 }
0x1c60   :  { %v10548_v17 = vcombine.low %v10514_v2, %v10516_v33  ;;  %v10549_v37 = vcombine.high %v10514_v2, %v10516_v33  ;;  %v10532_v49 = vld [vmem:[%s17077_s10 + $0x5a8] sm:$0xff] }
0x1c61   :  { %v16472_v53 = vsub.f32 %v8037_v16, %v8059_v39  ;;  %v8070_v63 = vmul.f32 %v16470_v60, %v16470_v60  ;;  %v10564_v39 = vcombine.low %v10530_v57, %v10532_v49  ;;  %8368 = vmatpush1.bf16.msra.mxu0 %v10562_v56  ;;  %v10642_v56 = vld [vmem:[%s17077_s10 + $0x490] sm:$0xff] }
0x1c62   :  { %8422 = vmatprep.subr.bf16.mxu1 %v10549_v37 }
0x1c63   :  { %8076 = vadd.xlane.f32.xlu1 %v8070_v63  ;;  %v8071_v62 = vmul.f32 %v16472_v53, %v16472_v53  ;;  %8423 = vmatpush1.bf16.msra.mxu1 %v10548_v17  ;;  %v10565_v63 = vcombine.high %v10530_v57, %v10532_v49  ;;  %v10674_v49 = vcombine.high %v10639_v1, %v10641_v19 }
0x1c65   :  { %v8051_v9 = vpop.xlane.xlu0 %8050  ;;  %8078 = vadd.xlane.f32.xlu0 %v8071_v62  ;;  %v10533_v62 = vld [vmem:[%s17077_s10 + $0x5c0] sm:$0xff] }
0x1c66   :  { %v8060_v35 = vmul.f32 0.0078125, %v8051_v9  ;;  %v10535_v9 = vld [vmem:[%s17077_s10 + $0x5e0] sm:$0xff] }
0x1c68   :  { %v16478_v3 = vsub.f32 %v8038_v4, %v8060_v35  ;;  %v10534_v35 = vld [vmem:[%s17077_s10 + $0x5c8] sm:$0xff] }
0x1c69   :  { %v8053_v30 = vpop.xlane.xlu0 %8052 }
0x1c6a   :  { %v8061_v48 = vmul.f32 0.0078125, %v8053_v30  ;;  %v8072_v20 = vmul.f32 %v16478_v3, %v16478_v3  ;;  %v10567_v30 = vcombine.high %v10533_v62, %v10535_v9 }
0x1c6c   :  { %v16482_v12 = vsub.f32 %v8039_v31, %v8061_v48  ;;  %8080 = vadd.xlane.f32.xlu1 %v8072_v20  ;;  %v10518_v31 = vld [vmem:[%s17077_s10 + $0x4c8] sm:$0xff]  ;;  %v10566_v20 = vcombine.low %v10533_v62, %v10535_v9  ;;  %8369 = vmatprep.subr.bf16.mxu0 %v10567_v30  ;;  %v10643_v62 = vld [vmem:[%s17077_s10 + $0x498] sm:$0xff] }
0x1c6d   :  { %v8055_v43 = vpop.xlane.xlu1 %8054  ;;  %v10552_v36 = vcombine.low %v10518_v31, %v10520_v51  ;;  %v10536_v48 = vld [vmem:[%s17077_s10 + $0x5e8] sm:$0xff]  ;;  %v10645_v9 = vld [vmem:[%s17077_s10 + $0x4b8] sm:$0xff] }
0x1c6e   :  { %v8062_v24 = vmul.f32 0.0078125, %v8055_v43  ;;  %v8073_v34 = vmul.f32 %v16482_v12, %v16482_v12  ;;  %v10568_v43 = vcombine.low %v10534_v35, %v10536_v48  ;;  %8370 = vmatpush1.bf16.msra.mxu0 %v10566_v20  ;;  %v10678_v20 = vcombine.high %v10643_v62, %v10645_v9 }
0x1c6f   :  { %v8057_v58 = vpop.xlane.xlu0 %8056 }
0x1c70   :  { %v16486_v25 = vsub.f32 %v8040_v42, %v8062_v24  ;;  %v8063_v0 = vmul.f32 0.0078125, %v8057_v58  ;;  %8082 = vadd.xlane.f32.xlu0 %v8073_v34  ;;  %v10553_v42 = vcombine.high %v10518_v31, %v10520_v51  ;;  %v10569_v24 = vcombine.high %v10534_v35, %v10536_v48  ;;  %v10634_v34 = vld [vmem:[%s17077_s10 + $0x410] sm:$0xff] }
0x1c71   :  { %v10636_v58 = vld [vmem:[%s17077_s10 + $0x430] sm:$0xff] }
0x1c72   :  { %v16500_v16 = vsub.f32 %v8041_v10, %v8063_v0  ;;  %v8074_v22 = vmul.f32 %v16486_v25, %v16486_v25  ;;  %8424 = vmatprep.subr.bf16.mxu1 %v10553_v42  ;;  %v10522_v10 = vld [vmem:[%s17077_s10 + $0x508] sm:$0xff]  ;;  %v10635_v0 = vld [vmem:[%s17077_s10 + $0x418] sm:$0xff]  ;;  %v10668_v15 = vcombine.high %v10634_v34, %v10636_v58  ;;  %v10667_v2 = vcombine.low %v10634_v34, %v10636_v58  ;;  %v16581_v42 = vld [vmem:[%s17078_s8 + $0x2] ss:$0 sm:$0xff] }
0x1c73   :  { %8425 = vmatpush1.bf16.msra.mxu1 %v10552_v36  ;;  %v10556_v27 = vcombine.low %v10522_v10, %v10524_v18  ;;  %v10557_v29 = vcombine.high %v10522_v10, %v10524_v18  ;;  %v10669_v13 = vcombine.low %v10635_v0, %v10637_v55  ;;  %v10670_v33 = vcombine.high %v10635_v0, %v10637_v55  ;;  %v10648_v58 = vld [vmem:[%s17077_s10 + $0x4f0] sm:$0xff]  ;;  %v10647_v0 = vld [vmem:[%s17077_s10 + $0x4d8] sm:$0xff] }
0x1c74   :  { %8084 = vadd.xlane.f32.xlu1 %v8074_v22  ;;  %v8075_v4 = vmul.f32 %v16500_v16, %v16500_v16  ;;  %8796 = vmatprep.subr.bf16.mxu0 %v10668_v15  ;;  %v10649_v15 = vld [vmem:[%s17077_s10 + $0x4f8] sm:$0xff] }
0x1c75   :  { %8426 = vmatprep.subr.bf16.mxu1 %v10557_v29  ;;  %v16589_v29 = vld [vmem:[%s17079_s9 + $0x2] ss:$0 sm:$0xff] }
0x1c76   :  { %8086 = vadd.xlane.f32.xlu0 %v8075_v4 }
0x1c77   :  { %8427 = vmatpush1.bf16.msra.mxu1 %v10556_v27 }
0x1c78   :  { %8428 = vmatprep.subr.bf16.mxu1 %v10561_v61 }
0x1c7b   :  { %8429 = vmatpush1.bf16.msra.mxu1 %v10560_v23 }
0x1c7c   :  { %8430 = vmatprep.subr.bf16.mxu1 %v10565_v63  ;;  %v10644_v63 = vld [vmem:[%s17077_s10 + $0x4b0] sm:$0xff] }
0x1c7d   :  { %v10676_v48 = vcombine.high %v10642_v56, %v10644_v63 }
0x1c7f   :  { %8431 = vmatpush1.bf16.msra.mxu1 %v10564_v39 }
0x1c80   :  { %8432 = vmatprep.subr.bf16.mxu1 %v10569_v24 }
0x1c83   :  { %8433 = vmatpush1.bf16.msra.mxu1 %v10568_v43  ;;  %v10646_v43 = vld [vmem:[%s17077_s10 + $0x4d0] sm:$0xff] }
0x1c84   :  { %8859 = vmatprep.subr.bf16.mxu1 %v10670_v33  ;;  %v10680_v33 = vcombine.high %v10646_v43, %v10648_v58 }
0x1cf0   :  { %v8077_v22 = vpop.xlane.xlu1 %8076 }
0x1cf1   :  { %v8088_v21 = vmul.f32 0.0078125, %v8077_v22  ;;  %v10682_v22 = vcombine.high %v10647_v0, %v10649_v15 }
0x1cf2   :  { %v8079_v17 = vpop.xlane.xlu0 %8078 }
0x1cf3   :  { %v8094_v37 = vadd.f32 1e-05, %v8088_v21  ;;  %v8089_v4 = vmul.f32 0.0078125, %v8079_v17  ;;  %v10650_v21 = vld [vmem:[%s17077_s10 + $0x510] sm:$0xff] }
0x1cf5   :  { %12877 = vrsqrt.f32 %v8094_v37  ;;  %v8095_v28 = vadd.f32 1e-05, %v8089_v4 }
0x1cf7   :  { %12879 = vrsqrt.f32 %v8095_v28  ;;  %v10652_v28 = vld [vmem:[%s17077_s10 + $0x530] sm:$0xff] }
0x1cf9   :  { %v8081_v14 = vpop.xlane.xlu1 %8080 }
0x1cfa   :  { %v8090_v31 = vmul.f32 0.0078125, %v8081_v14  ;;  %v10651_v14 = vld [vmem:[%s17077_s10 + $0x518] sm:$0xff] }
0x1cfc   :  { %v8096_v59 = vadd.f32 1e-05, %v8090_v31  ;;  %v10653_v31 = vld [vmem:[%s17077_s10 + $0x538] sm:$0xff] }
0x1cfd   :  { %v8083_v51 = vpop.xlane.xlu0 %8082 }
0x1cfe   :  { %12881 = vrsqrt.f32 %v8096_v59  ;;  %v8091_v44 = vmul.f32 0.0078125, %v8083_v51  ;;  %v10679_v51 = vcombine.low %v10646_v43, %v10648_v58  ;;  %v12480_v58 = vld [vmem:[%s17080_s12 + $0x580] sm:$0xff]  }
0x1cff   :  { %v12878_v36 = vpop.eup %12877 }
0x1d00   :  { %v8106_v50 = vmul.f32 %v12878_v36, %v16470_v60  ;;  %v8097_v40 = vadd.f32 1e-05, %v8091_v44  ;;  %v10638_v60 = vld [vmem:[%s17077_s10 + $0x450] sm:$0xff]  ;;  %v10681_v36 = vcombine.low %v10647_v0, %v10649_v15  ;;  %v12482_v0 = vld [vmem:[%s17080_s12 + $0x5c8] sm:$0xff]  }
0x1d01   :  { %v12880_v10 = vpop.eup %12879  ;;  %v8085_v41 = vpop.xlane.xlu1 %8084  ;;  %v12483_v15 = vld [vmem:[%s17080_s12 + $0x508] sm:$0xff]  }
0x1d02   :  { %v8118_v18 = vmul.f32 %v16581_v42, %v8106_v50  ;;  %v8107_v47 = vmul.f32 %v12880_v10, %v16472_v53  ;;  %12883 = vrsqrt.f32 %v8097_v40  ;;  %v8092_v27 = vmul.f32 0.0078125, %v8085_v41  ;;  %v10640_v53 = vld [vmem:[%s17077_s10 + $0x470] sm:$0xff] }
0x1d03   :  { %v8087_v26 = vpop.xlane.xlu0 %8086  ;;  %v10672_v54 = vcombine.high %v10638_v60, %v10640_v53  ;;  %v10671_v35 = vcombine.low %v10638_v60, %v10640_v53  ;;  %v10684_v50 = vcombine.high %v10650_v21, %v10652_v28  ;;  %v10686_v40 = vcombine.high %v10651_v14, %v10653_v31  ;;  %v10654_v10 = vld [vmem:[%s17077_s10 + $0x550] sm:$0xff] }
0x1d04   :  { %v8119_v11 = vmul.f32 %v16581_v42, %v8107_v47  ;;  %v8098_v32 = vadd.f32 1e-05, %v8092_v27  ;;  %v8093_v6 = vmul.f32 0.0078125, %v8087_v26  ;;  %v16605_v23 = vadd.f32 %v16589_v29, %v8118_v18  ;;  %v10655_v47 = vld [vmem:[%s17077_s10 + $0x558] sm:$0xff]  ;;  %v10658_v60 = vld [vmem:[%s17077_s10 + $0x590] sm:$0xff] }
0x1d05   :  { %v10657_v27 = vld [vmem:[%s17077_s10 + $0x578] sm:$0xff]  ;;  %v10683_v26 = vcombine.low %v10650_v21, %v10652_v28 }
0x1d06   :  { %v16608_v61 = vadd.f32 %v16589_v29, %v8119_v11  ;;  %12885 = vrsqrt.f32 %v8098_v32  ;;  %v8099_v46 = vadd.f32 1e-05, %v8093_v6  ;;  %v10685_v11 = vcombine.low %v10651_v14, %v10653_v31  ;;  %v12490_v21 = vld [vmem:[%s17080_s12 + $0x5d8] sm:$0xff]   ;;  %v12493_v14 = vld [vmem:[%s17080_s12 + $0x560] sm:$0xff]  }
0x1d07   :  { %v10690_v6 = vcombine.high %v10655_v47, %v10657_v27  ;;  %v12492_v28 = vld [vmem:[%s17080_s12 + $0x598] sm:$0xff]   ;;  %v12494_v31 = vld [vmem:[%s17080_s12 + $0x5e0] sm:$0xff]  }
0x1d08   :  { %v12882_v52 = vpop.eup %12881  ;;  %v16612_v57 = vpack.c.bf16 %v16608_v61, %v16605_v23  ;;  %12887 = vrsqrt.f32 %v8099_v46  ;;  %v10661_v46 = vld [vmem:[%s17077_s10 + $0x5b8] sm:$0xff] }
0x1d09   :  { %v8108_v39 = vmul.f32 %v12882_v52, %v16478_v3  ;;  %v10673_v3 = vcombine.low %v10639_v1, %v10641_v19  ;;  %v10660_v1 = vld [vmem:[%s17077_s10 + $0x5b0] sm:$0xff]  ;;  %v10659_v19 = vld [vmem:[%s17077_s10 + $0x598] sm:$0xff] }
0x1d0a   :  { %8388 = vmatmul.mubr.bf16.vlgmr.msra.gmra.mrb[48].mxu0 %v16612_v57  ;;  %8451 = vmatmul.mubr.bf16.vlgmr.msra.gmra.mrb[40].mxu1 %v16612_v57 }
0x1d0b   :  { %8797 = vmatpush1.bf16.msra.mxu0 %v10667_v2  ;;  %8860 = vmatpush1.bf16.msra.mxu1 %v10669_v13  ;;  %v8120_v24 = vmul.f32 %v16581_v42, %v8108_v39  ;;  %v10677_v2 = vcombine.low %v10643_v62, %v10645_v9  ;;  %v10662_v39 = vld [vmem:[%s17077_s10 + $0x5d0] sm:$0xff]  ;;  %v10663_v62 = vld [vmem:[%s17077_s10 + $0x5d8] sm:$0xff] }
0x1d0c   :  { %v12884_v30 = vpop.eup %12883  ;;  %8798 = vmatprep.subr.bf16.mxu0 %v10672_v54  ;;  %8861 = vmatprep.subr.bf16.mxu1 %v10674_v49  ;;  %v10692_v49 = vcombine.high %v10658_v60, %v10660_v1  ;;  %v10665_v9 = vld [vmem:[%s17077_s10 + $0x5f8] sm:$0xff] }
0x1d0d   :  { %v8109_v34 = vmul.f32 %v12884_v30, %v16482_v12  ;;  %8397 = vmatprep.mubr.bf16.mxu0 %v12951_v38  ;;  %8460 = vmatprep.mubr.bf16.mxu1 %v12951_v38  ;;  %v10675_v12 = vcombine.low %v10642_v56, %v10644_v63  ;;  %v16650_v17 = vadd.f32 %v16589_v29, %v8120_v24  ;;  %v10664_v63 = vld [vmem:[%s17077_s10 + $0x5f0] sm:$0xff]  ;;  %v12477_v24 = vld [vmem:[%s17080_s12 + $0x540] sm:$0xff]  }
0x1d0e   :  { %v10694_v56 = vcombine.high %v10659_v19, %v10661_v46  ;;  %v10696_v30 = vcombine.high %v10662_v39, %v10664_v63  ;;  %v10697_v43 = vcombine.low %v10663_v62, %v10665_v9 }
0x1d0f   :  { %v8121_v55 = vmul.f32 %v16581_v42, %v8109_v34  ;;  %8799 = vmatpush1.bf16.msra.mxu0 %v10671_v35  ;;  %8862 = vmatpush1.bf16.msra.mxu1 %v10673_v3  ;;  %v10691_v35 = vcombine.low %v10658_v60, %v10660_v1  ;;  %v10693_v3 = vcombine.low %v10659_v19, %v10661_v46  ;;  %v12479_v34 = vld [vmem:[%s17080_s12 + $0x500] sm:$0xff]  }
0x1d10   :  { %v12886_v13 = vpop.eup %12885  ;;  %8800 = vmatprep.subr.bf16.mxu0 %v10676_v48  ;;  %8863 = vmatprep.subr.bf16.mxu1 %v10678_v20  ;;  %v10698_v48 = vcombine.high %v10663_v62, %v10665_v9  ;;  %v10695_v20 = vcombine.low %v10662_v39, %v10664_v63 }
0x1d11   :  { %v16653_v37 = vadd.f32 %v16589_v29, %v8121_v55  ;;  %v8110_v4 = vmul.f32 %v12886_v13, %v16486_v25  ;;  %v12484_v55 = vld [vmem:[%s17080_s12 + $0x588] sm:$0xff]   ;;  %v12487_v13 = vld [vmem:[%s17080_s12 + $0x510] sm:$0xff]  }
0x1d12   :  { %v12888_v59 = vpop.eup %12887 }
0x1d13   :  { %v16667_v44 = vpack.c.bf16 %v16653_v37, %v16650_v17  ;;  %v8111_v25 = vmul.f32 %v12888_v59, %v16500_v16  ;;  %8801 = vmatpush1.bf16.msra.mxu0 %v10675_v12  ;;  %8864 = vmatpush1.bf16.msra.mxu1 %v10677_v2  ;;  %v8122_v41 = vmul.f32 %v16581_v42, %v8110_v4  ;;  %v10656_v16 = vld [vmem:[%s17077_s10 + $0x570] sm:$0xff]  ;;  %v12491_v4 = vld [vmem:[%s17080_s12 + $0x518] sm:$0xff]   ;;  %v12495_v59 = vld [vmem:[%s17080_s12 + $0x520] sm:$0xff]  }
0x1d14   :  { %8802 = vmatprep.subr.bf16.mxu0 %v10680_v33  ;;  %8865 = vmatprep.subr.bf16.mxu1 %v10682_v22  ;;  %v10688_v32 = vcombine.high %v10654_v10, %v10656_v16  ;;  %v10687_v54 = vcombine.low %v10654_v10, %v10656_v16  ;;  %v12485_v12 = vld [vmem:[%s17080_s12 + $0x550] sm:$0xff]   ;;  %v12489_v22 = vld [vmem:[%s17080_s12 + $0x558] sm:$0xff]  }
0x1d15   :  { %v8123_v18 = vmul.f32 %v16581_v42, %v8111_v25  ;;  %8398 = vmatmul.mubr.bf16.gmra.mrb[52].mxu0 %v16667_v44  ;;  %8461 = vmatmul.mubr.bf16.gmra.mrb[44].mxu1 %v16667_v44  ;;  %v16695_v53 = vadd.f32 %v16589_v29, %v8122_v41  ;;  %v12486_v2 = vld [vmem:[%s17080_s12 + $0x5d0] sm:$0xff]   ;;  %v12498_v25 = vld [vmem:[%s17080_s12 + $0x5e8] sm:$0xff]   ;;  %v12505_v16 = vld [vmem:[%s17080_s12 + $0x578] sm:$0xff]  }
0x1d16   :  { %8407 = vmatprep.mubr.bf16.mxu0 %v12951_v38  ;;  %8470 = vmatprep.mubr.bf16.mxu1 %v12951_v38  ;;  %v12488_v33 = vld [vmem:[%s17080_s12 + $0x590] sm:$0xff]  }
0x1d17   :  { %v16689_v42 = vadd.f32 %v16589_v29, %v8123_v18  ;;  %8803 = vmatpush1.bf16.msra.mxu0 %v10679_v51  ;;  %8866 = vmatpush1.bf16.msra.mxu1 %v10681_v36  ;;  %v10689_v29 = vcombine.low %v10655_v47, %v10657_v27  ;;  %v12496_v51 = vld [vmem:[%s17080_s12 + $0x5a0] sm:$0xff]   ;;  %v12499_v36 = vld [vmem:[%s17080_s12 + $0x528] sm:$0xff]   ;;  %v12502_v10 = vld [vmem:[%s17080_s12 + $0x5f0] sm:$0xff]  }
0x1d18   :  { %8804 = vmatprep.subr.bf16.mxu0 %v10684_v50  ;;  %8867 = vmatprep.subr.bf16.mxu1 %v10686_v40  ;;  %v12500_v50 = vld [vmem:[%s17080_s12 + $0x5a8] sm:$0xff]   ;;  %v12501_v40 = vld [vmem:[%s17080_s12 + $0x570] sm:$0xff]   ;;  %v12506_v47 = vld [vmem:[%s17080_s12 + $0x5f8] sm:$0xff]  }
0x1d19   :  { %v8138_v52 = vpack.c.bf16 %v16689_v42, %v16695_v53  ;;  %v12503_v41 = vld [vmem:[%s17080_s12 + $0x530] sm:$0xff]   ;;  %v12507_v27 = vld [vmem:[%s17080_s12 + $0x538] sm:$0xff]  }
0x1d1a   :  { %v12504_v18 = vld [vmem:[%s17080_s12 + $0x5b0] sm:$0xff]  }
0x1d1b   :  { %8805 = vmatpush1.bf16.msra.mxu0 %v10683_v26  ;;  %8868 = vmatpush1.bf16.msra.mxu1 %v10685_v11  ;;  %v12508_v26 = vld [vmem:[%s17080_s12 + $0x5b8] sm:$0xff]   ;;  %v12509_v11 = vld [vmem:[%s17080_s12 + $0x440] sm:$0xff]  }
0x1d1c   :  { %8806 = vmatprep.subr.bf16.mxu0 %v10688_v32  ;;  %8869 = vmatprep.subr.bf16.mxu1 %v10690_v6  ;;  %v12510_v32 = vld [vmem:[%s17080_s12 + $0x4c0] sm:$0xff]   ;;  %v10537_v6 = vld [vmem:[%s17081_s11 + $0x10] sm:$0xf] }
0x1d1d   :  { %8408 = vmatmul.mubr.bf16.gmra.mrb[56].mxu0 %v8138_v52  ;;  %8471 = vmatmul.mubr.bf16.gmra.mrb[48].mxu1 %v8138_v52  ;;  %v16836_v60 = vrot.slane %v10537_v6, %v13217_v5  ;;  %v16839_v1 = vrot.slane %v10537_v6, %v13223_v7  ;;  %v16842_v19 = vrot.slane %v10537_v6, %v13226_v8 }
0x1d1e   :  { %8828 = vmatprep.mubr.bf16.mxu0 %v12951_v38  ;;  %8891 = vmatprep.mubr.bf16.mxu1 %v12951_v38  ;;  %v16845_v46 = vrot.slane %v10537_v6, %v14198_v45 }
0x1d1f   :  { %8807 = vmatpush1.bf16.msra.mxu0 %v10687_v54  ;;  %8870 = vmatpush1.bf16.msra.mxu1 %v10689_v29 }
0x1d20   :  { %8808 = vmatprep.subr.bf16.mxu0 %v10692_v49  ;;  %8871 = vmatprep.subr.bf16.mxu1 %v10694_v56 }
0x1d23   :  { %8809 = vmatpush1.bf16.msra.mxu0 %v10691_v35  ;;  %8872 = vmatpush1.bf16.msra.mxu1 %v10693_v3 }
0x1d24   :  { %8810 = vmatprep.subr.bf16.mxu0 %v10696_v30  ;;  %8873 = vmatprep.subr.bf16.mxu1 %v10698_v48 }
0x1d27   :  { %8811 = vmatpush1.bf16.msra.mxu0 %v10695_v20  ;;  %8874 = vmatpush1.bf16.msra.mxu1 %v10697_v43 }
0x1d28   :  { %11322 = vmatprep.subr.bf16.mxu0 %v12477_v24 }
0x1d2a   :  { %8829 = vmatmul.mubr.bf16.vlgmr.msra.gmra.mrb[60].mxu0 %v16612_v57  ;;  %8892 = vmatmul.mubr.bf16.vlgmr.msra.gmra.mrb[52].mxu1 %v16612_v57  ;;  %v12478_v57 = vld [vmem:[%s17080_s12 + $0x5c0] sm:$0xff]  }
0x1d2b   :  { %8838 = vmatprep.mubr.bf16.mxu0 %v12951_v38  ;;  %8901 = vmatprep.mubr.bf16.mxu1 %v12951_v38 }
0x1d2c   :  { %11356 = vmatprep.subr.bf16.mxu1 %v12478_v57  ;;  %11323 = vmatpush3.bf16.msra.mxu0 %v12479_v34 }
0x1d2d   :  { %11357 = vmatpush3.bf16.msra.mxu1 %v12480_v58 }
0x1d2e   :  { %11358 = vmatprep.subr.bf16.mxu1 %v12482_v0 }
0x1d31   :  { %11359 = vmatpush3.bf16.msra.mxu1 %v12484_v55 }
0x1d32   :  { %8839 = vmatmul.mubr.bf16.gmra.mrb[64].mxu0 %v16667_v44  ;;  %8902 = vmatmul.mubr.bf16.gmra.mrb[56].mxu1 %v16667_v44  ;;  %v12497_v44 = vld [vmem:[%s17080_s12 + $0x568] sm:$0xff]  }
0x1d33   :  { %8848 = vmatprep.mubr.bf16.mxu0 %v12951_v38  ;;  %8911 = vmatprep.mubr.bf16.mxu1 %v12951_v38  ;;  %v12481_v38 = vld [vmem:[%s17080_s12 + $0x548] sm:$0xff]  }
0x1d34   :  { %11324 = vmatprep.subr.bf16.mxu0 %v12481_v38  ;;  %11360 = vmatprep.subr.bf16.mxu1 %v12486_v2 }
0x1d35   :  { %11325 = vmatpush3.bf16.msra.mxu0 %v12483_v15  ;;  %11361 = vmatpush3.bf16.msra.mxu1 %v12488_v33 }
0x1d36   :  { %11326 = vmatprep.subr.bf16.mxu0 %v12485_v12  ;;  %11362 = vmatprep.subr.bf16.mxu1 %v12490_v21 }
0x1d39   :  { %11327 = vmatpush3.bf16.msra.mxu0 %v12487_v13  ;;  %11363 = vmatpush3.bf16.msra.mxu1 %v12492_v28 }
0x1d3a   :  { %8849 = vmatmul.mubr.bf16.gmra.mrb[68].mxu0 %v8138_v52  ;;  %8912 = vmatmul.mubr.bf16.gmra.mrb[60].mxu1 %v8138_v52 }
0x1d3b   :  { %11328 = vmatprep.subr.bf16.mxu0 %v12489_v22  ;;  %11364 = vmatprep.subr.bf16.mxu1 %v12494_v31 }
0x1d3d   :  { %11329 = vmatpush3.bf16.msra.mxu0 %v12491_v4  ;;  %11365 = vmatpush3.bf16.msra.mxu1 %v12496_v51 }
0x1d3e   :  { %11330 = vmatprep.subr.bf16.mxu0 %v12493_v14  ;;  %11366 = vmatprep.subr.bf16.mxu1 %v12498_v25 }
0x1d41   :  { %11331 = vmatpush3.bf16.msra.mxu0 %v12495_v59  ;;  %11367 = vmatpush3.bf16.msra.mxu1 %v12500_v50 }
0x1d42   :  { %11332 = vmatprep.subr.bf16.mxu0 %v12497_v44  ;;  %11368 = vmatprep.subr.bf16.mxu1 %v12502_v10 }
0x1d45   :  { %11333 = vmatpush3.bf16.msra.mxu0 %v12499_v36  ;;  %11369 = vmatpush3.bf16.msra.mxu1 %v12504_v18 }
0x1d46   :  { %11334 = vmatprep.subr.bf16.mxu0 %v12501_v40  ;;  %11370 = vmatprep.subr.bf16.mxu1 %v12506_v47 }
0x1d49   :  { %11335 = vmatpush3.bf16.msra.mxu0 %v12503_v41  ;;  %11371 = vmatpush3.bf16.msra.mxu1 %v12508_v26 }
0x1d4a   :  { %11336 = vmatprep.subr.bf16.mxu0 %v12505_v16  ;;  %11424 = vmatprep.subr.bf16.mxu1 %v12510_v32 }
0x1d4d   :  { %11337 = vmatpush3.bf16.msra.mxu0 %v12507_v27 }
0x1d4e   :  { %11390 = vmatprep.subr.bf16.mxu0 %v12509_v11 }
0x1ddd   :  { %v8389_v52 = vpop.f32.mrb[48].mxu0  ;;  %v8452_v54 = vpop.f32.mrb[40].mxu1 }
0x1dde   :  { %v8390_v29 = vadd.f32 %v8389_v52, %v16836_v60  ;;  %v8453_v49 = vadd.f32 %v8452_v54, %v16839_v1  ;;  %v8391_v56 = vpop.f32.mrb[49].mxu0  ;;  %v8454_v39 = vpop.f32.mrb[41].mxu1 }
0x1ddf   :  { %v8392_v63 = vadd.f32 %v8391_v56, %v16842_v19  ;;  %v8455_v62 = vadd.f32 %v8454_v39, %v16845_v46  ;;  %v8393_v9 = vpop.f32.mrb[50].mxu0  ;;  %v8456_v35 = vpop.f32.mrb[42].mxu1 }
0x1de0   :  { %v8394_v3 = vadd.f32 %v8393_v9, %v16836_v60  ;;  %v8457_v30 = vadd.f32 %v8456_v35, %v16839_v1  ;;  %v8395_v48 = vpop.f32.mrb[51].mxu0  ;;  %v8458_v20 = vpop.f32.mrb[43].mxu1  ;;  %v8481_v57 = vmax.f32 %v8390_v29, 0.0  ;;  %v8483_v34 = vmax.f32 %v8453_v49, 0.0 }
0x1de1   :  { %v8396_v43 = vadd.f32 %v8395_v48, %v16842_v19  ;;  %v8459_v24 = vadd.f32 %v8458_v20, %v16845_v46  ;;  %v8482_v0 = vmax.f32 %v8392_v63, 0.0  ;;  %v8484_v15 = vmax.f32 %v8455_v62, 0.0 }
0x1de2   :  { %v8485_v58 = vmax.f32 %v8394_v3, 0.0  ;;  %v8487_v38 = vmax.f32 %v8457_v30, 0.0 }
0x1de3   :  { %v8486_v55 = vmax.f32 %v8396_v43, 0.0  ;;  %v8488_v12 = vmax.f32 %v8459_v24, 0.0 }
0x1de4   :  { %v16855_v2 = vpack.c.bf16 %v8485_v58, %v8481_v57  ;;  %v16857_v13 = vpack.c.bf16 %v8487_v38, %v8483_v34 }
0x1de5   :  { %v16859_v33 = vpack.c.bf16 %v8486_v55, %v8482_v0  ;;  %v16861_v22 = vpack.c.bf16 %v8488_v12, %v8484_v15 }
0x1de8   :  { %v8399_v21 = vpop.f32.mrb[52].mxu0  ;;  %v8462_v4 = vpop.f32.mrb[44].mxu1 }
0x1de9   :  { %v8400_v28 = vadd.f32 %v8399_v21, %v16836_v60  ;;  %v8463_v14 = vadd.f32 %v8462_v4, %v16839_v1  ;;  %v8401_v31 = vpop.f32.mrb[53].mxu0  ;;  %v8464_v59 = vpop.f32.mrb[45].mxu1 }
0x1dea   :  { %v8402_v51 = vadd.f32 %v8401_v31, %v16842_v19  ;;  %v8465_v44 = vadd.f32 %v8464_v59, %v16845_v46  ;;  %v8403_v25 = vpop.f32.mrb[54].mxu0  ;;  %v8466_v36 = vpop.f32.mrb[46].mxu1 }
0x1deb   :  { %v8404_v50 = vadd.f32 %v8403_v25, %v16836_v60  ;;  %v8467_v40 = vadd.f32 %v8466_v36, %v16839_v1  ;;  %v8405_v10 = vpop.f32.mrb[55].mxu0  ;;  %v8468_v41 = vpop.f32.mrb[47].mxu1  ;;  %v8489_v47 = vmax.f32 %v8400_v28, 0.0  ;;  %v8491_v27 = vmax.f32 %v8463_v14, 0.0 }
0x1dec   :  { %v8406_v18 = vadd.f32 %v8405_v10, %v16842_v19  ;;  %v8469_v16 = vadd.f32 %v8468_v41, %v16845_v46  ;;  %v8490_v32 = vmax.f32 %v8402_v51, 0.0  ;;  %v8492_v6 = vmax.f32 %v8465_v44, 0.0 }
0x1ded   :  { %v8493_v26 = vmax.f32 %v8404_v50, 0.0  ;;  %v8495_v11 = vmax.f32 %v8467_v40, 0.0 }
0x1dee   :  { %v8494_v52 = vmax.f32 %v8406_v18, 0.0  ;;  %v8496_v54 = vmax.f32 %v8469_v16, 0.0 }
0x1def   :  { %v16871_v29 = vpack.c.bf16 %v8493_v26, %v8489_v47  ;;  %v16873_v49 = vpack.c.bf16 %v8495_v11, %v8491_v27 }
0x1df0   :  { %v16875_v56 = vpack.c.bf16 %v8494_v52, %v8490_v32  ;;  %v16877_v39 = vpack.c.bf16 %v8496_v54, %v8492_v6  ;;  %v8409_v63 = vpop.f32.mrb[56].mxu0  ;;  %v8472_v62 = vpop.f32.mrb[48].mxu1 }
0x1df1   :  { %v8410_v9 = vadd.f32 %v8409_v63, %v16836_v60  ;;  %v8473_v35 = vadd.f32 %v8472_v62, %v16839_v1  ;;  %v8411_v3 = vpop.f32.mrb[57].mxu0  ;;  %v8474_v30 = vpop.f32.mrb[49].mxu1 }
0x1df2   :  { %v8412_v48 = vadd.f32 %v8411_v3, %v16842_v19  ;;  %v8475_v20 = vadd.f32 %v8474_v30, %v16845_v46  ;;  %v8413_v43 = vpop.f32.mrb[58].mxu0  ;;  %v8476_v24 = vpop.f32.mrb[50].mxu1 }
0x1df3   :  { %v8414_v57 = vadd.f32 %v8413_v43, %v16836_v60  ;;  %v8477_v34 = vadd.f32 %v8476_v24, %v16839_v1  ;;  %v8415_v58 = vpop.f32.mrb[59].mxu0  ;;  %v8478_v38 = vpop.f32.mrb[51].mxu1  ;;  %v8497_v55 = vmax.f32 %v8410_v9, 0.0  ;;  %v8499_v12 = vmax.f32 %v8473_v35, 0.0  ;;  %v10666_v60 = vld [vmem:[%s17081_s11 + $0x14] sm:$0xf] }
0x1df4   :  { %v8416_v0 = vadd.f32 %v8415_v58, %v16842_v19  ;;  %v8479_v15 = vadd.f32 %v8478_v38, %v16845_v46  ;;  %v8498_v28 = vmax.f32 %v8412_v48, 0.0  ;;  %v8500_v14 = vmax.f32 %v8475_v20, 0.0  ;;  %v12511_v38 = vld [vmem:[%s17080_s12 + $0x400] sm:$0xff]  }
0x1df5   :  { %v8501_v21 = vmax.f32 %v8414_v57, 0.0  ;;  %v8503_v4 = vmax.f32 %v8477_v34, 0.0  ;;  %v16899_v46 = vrot.slane %v10666_v60, %v13217_v5  ;;  %v16902_v25 = vrot.slane %v10666_v60, %v13223_v7 }
0x1df6   :  { %v8502_v31 = vmax.f32 %v8416_v0, 0.0  ;;  %v8504_v59 = vmax.f32 %v8479_v15, 0.0  ;;  %v16905_v36 = vrot.slane %v10666_v60, %v13226_v8  ;;  %v16908_v50 = vrot.slane %v10666_v60, %v14198_v45  ;;  %v12512_v0 = vld [vmem:[%s17080_s12 + $0x480] sm:$0xff]  }
0x1df7   :  { %v16887_v51 = vpack.c.bf16 %v8501_v21, %v8497_v55  ;;  %v16889_v44 = vpack.c.bf16 %v8503_v4, %v8499_v12  ;;  %v12513_v4 = vld [vmem:[%s17080_s12 + $0x448] sm:$0xff]  }
0x1df8   :  { %v16894_v1 = vpack.c.bf16 %v8502_v31, %v8498_v28  ;;  %v16896_v19 = vpack.c.bf16 %v8504_v59, %v8500_v14  ;;  %v12514_v28 = vld [vmem:[%s17080_s12 + $0x4c8] sm:$0xff]  }
0x1dfd   :  { %v8830_v40 = vpop.f32.mrb[60].mxu0  ;;  %v8893_v10 = vpop.f32.mrb[52].mxu1 }
0x1dfe   :  { %v8831_v41 = vadd.f32 %v8830_v40, %v16899_v46  ;;  %v8894_v18 = vadd.f32 %v8893_v10, %v16902_v25  ;;  %v8832_v16 = vpop.f32.mrb[61].mxu0  ;;  %v8895_v47 = vpop.f32.mrb[53].mxu1 }
0x1dff   :  { %v8833_v5 = vadd.f32 %v8832_v16, %v16905_v36  ;;  %v8896_v27 = vadd.f32 %v8895_v47, %v16908_v50  ;;  %v8834_v7 = vpop.f32.mrb[62].mxu0  ;;  %v8897_v26 = vpop.f32.mrb[54].mxu1 }
0x1e00   :  { %v8835_v8 = vadd.f32 %v8834_v7, %v16899_v46  ;;  %v8898_v11 = vadd.f32 %v8897_v26, %v16902_v25  ;;  %v8836_v45 = vpop.f32.mrb[63].mxu0  ;;  %v8899_v32 = vpop.f32.mrb[55].mxu1  ;;  %v8922_v54 = vmax.f32 %v8831_v41, 0.0  ;;  %v8924_v63 = vmax.f32 %v8894_v18, 0.0 }
0x1e01   :  { %v8837_v6 = vadd.f32 %v8836_v45, %v16905_v36  ;;  %v8900_v52 = vadd.f32 %v8899_v32, %v16908_v50  ;;  %v8923_v35 = vmax.f32 %v8833_v5, 0.0  ;;  %v8925_v3 = vmax.f32 %v8896_v27, 0.0  ;;  %v12515_v5 = vld [vmem:[%s17080_s12 + $0x408] sm:$0xff]   ;;  %v12517_v45 = vld [vmem:[%s17080_s12 + $0x450] sm:$0xff]  }
0x1e02   :  { %v8926_v62 = vmax.f32 %v8835_v8, 0.0  ;;  %v8928_v9 = vmax.f32 %v8898_v11, 0.0  ;;  %v12516_v27 = vld [vmem:[%s17080_s12 + $0x488] sm:$0xff]   ;;  %v12518_v32 = vld [vmem:[%s17080_s12 + $0x4d0] sm:$0xff]  }
0x1e03   :  { %v8927_v30 = vmax.f32 %v8837_v6, 0.0  ;;  %v8929_v48 = vmax.f32 %v8900_v52, 0.0 }
0x1e04   :  { %v8946_v20 = vpack.c.bf16 %v8926_v62, %v8922_v54  ;;  %v8948_v43 = vpack.c.bf16 %v8928_v9, %v8924_v63 }
0x1e05   :  { %v8947_v24 = vpack.c.bf16 %v8927_v30, %v8923_v35  ;;  %v8949_v57 = vpack.c.bf16 %v8929_v48, %v8925_v3  ;;  %v8840_v34 = vpop.f32.mrb[64].mxu0  ;;  %v8903_v58 = vpop.f32.mrb[56].mxu1 }
0x1e06   :  { %v8841_v15 = vadd.f32 %v8840_v34, %v16899_v46  ;;  %v8904_v55 = vadd.f32 %v8903_v58, %v16902_v25  ;;  %v8842_v12 = vpop.f32.mrb[65].mxu0  ;;  %v8905_v21 = vpop.f32.mrb[57].mxu1 }
0x1e07   :  { %v8843_v14 = vadd.f32 %v8842_v12, %v16905_v36  ;;  %v8906_v31 = vadd.f32 %v8905_v21, %v16908_v50  ;;  %v8844_v59 = vpop.f32.mrb[66].mxu0  ;;  %v8907_v60 = vpop.f32.mrb[58].mxu1  ;;  %9246 = vmatprep.mubr.bf16.mxu0 %v8947_v24  ;;  %9303 = vmatprep.mubr.bf16.mxu1 %v8949_v57 }
0x1e08   :  { %v8845_v40 = vadd.f32 %v8844_v59, %v16899_v46  ;;  %v8908_v10 = vadd.f32 %v8907_v60, %v16902_v25  ;;  %v8846_v41 = vpop.f32.mrb[67].mxu0  ;;  %v8909_v18 = vpop.f32.mrb[59].mxu1  ;;  %9247 = vmatmul.mubr.bf16.vlgmr.msra.gmra.mrb[72].mxu0 %v8946_v20  ;;  %9304 = vmatmul.mubr.bf16.vlgmr.msra.gmra.mrb[64].mxu1 %v8948_v43  ;;  %v8930_v7 = vmax.f32 %v8841_v15, 0.0  ;;  %v8932_v26 = vmax.f32 %v8904_v55, 0.0  ;;  %v12519_v20 = vld [vmem:[%s17080_s12 + $0x410] sm:$0xff]  }
0x1e09   :  { %v8847_v16 = vadd.f32 %v8846_v41, %v16905_v36  ;;  %v8910_v47 = vadd.f32 %v8909_v18, %v16908_v50  ;;  %11391 = vmatpush3.bf16.msra.mxu0 %v12511_v38  ;;  %11425 = vmatpush3.bf16.msra.mxu1 %v12512_v0  ;;  %v8931_v6 = vmax.f32 %v8843_v14, 0.0  ;;  %v8933_v52 = vmax.f32 %v8906_v31, 0.0  ;;  %v12520_v43 = vld [vmem:[%s17080_s12 + $0x490] sm:$0xff]   ;;  %v12521_v38 = vld [vmem:[%s17080_s12 + $0x458] sm:$0xff]  }
0x1e0a   :  { %v8934_v8 = vmax.f32 %v8845_v40, 0.0  ;;  %v8936_v11 = vmax.f32 %v8908_v10, 0.0  ;;  %11392 = vmatprep.subr.bf16.mxu0 %v12513_v4  ;;  %11426 = vmatprep.subr.bf16.mxu1 %v12514_v28  ;;  %v12522_v0 = vld [vmem:[%s17080_s12 + $0x4d8] sm:$0xff]  }
0x1e0b   :  { %v8935_v54 = vmax.f32 %v8847_v16, 0.0  ;;  %v8937_v63 = vmax.f32 %v8910_v47, 0.0  ;;  %v12523_v40 = vld [vmem:[%s17080_s12 + $0x418] sm:$0xff]  }
0x1e0c   :  { %v8950_v62 = vpack.c.bf16 %v8934_v8, %v8930_v7  ;;  %v8952_v9 = vpack.c.bf16 %v8936_v11, %v8932_v26 }
0x1e0d   :  { %v8951_v35 = vpack.c.bf16 %v8935_v54, %v8931_v6  ;;  %v8953_v3 = vpack.c.bf16 %v8937_v63, %v8933_v52  ;;  %11393 = vmatpush3.bf16.msra.mxu0 %v12515_v5  ;;  %11427 = vmatpush3.bf16.msra.mxu1 %v12516_v27  ;;  %v8850_v30 = vpop.f32.mrb[68].mxu0  ;;  %v8913_v48 = vpop.f32.mrb[60].mxu1  ;;  %v12529_v6 = vld [vmem:[%s17080_s12 + $0x468] sm:$0xff]  }
0x1e0e   :  { %v8851_v24 = vadd.f32 %v8850_v30, %v16899_v46  ;;  %v8914_v57 = vadd.f32 %v8913_v48, %v16902_v25  ;;  %v8852_v34 = vpop.f32.mrb[69].mxu0  ;;  %v8915_v58 = vpop.f32.mrb[61].mxu1  ;;  %11394 = vmatprep.subr.bf16.mxu0 %v12517_v45  ;;  %11428 = vmatprep.subr.bf16.mxu1 %v12518_v32  ;;  %v12527_v45 = vld [vmem:[%s17080_s12 + $0x420] sm:$0xff]   ;;  %v12530_v52 = vld [vmem:[%s17080_s12 + $0x4e8] sm:$0xff]   ;;  %v12539_v30 = vld [vmem:[%s17080_s12 + $0x438] sm:$0xff]  }
0x1e0f   :  { %v8853_v15 = vadd.f32 %v8852_v34, %v16905_v36  ;;  %v8916_v55 = vadd.f32 %v8915_v58, %v16908_v50  ;;  %v8854_v12 = vpop.f32.mrb[70].mxu0  ;;  %v8917_v21 = vpop.f32.mrb[62].mxu1  ;;  %9254 = vmatprep.mubr.bf16.mxu0 %v8951_v35  ;;  %9311 = vmatprep.mubr.bf16.mxu1 %v8953_v3  ;;  %v12528_v32 = vld [vmem:[%s17080_s12 + $0x4a0] sm:$0xff]   ;;  %v12531_v54 = vld [vmem:[%s17080_s12 + $0x428] sm:$0xff]   ;;  %v12535_v35 = vld [vmem:[%s17080_s12 + $0x430] sm:$0xff]  }
0x1e10   :  { %v8855_v4 = vadd.f32 %v8854_v12, %v16899_v46  ;;  %v8918_v28 = vadd.f32 %v8917_v21, %v16902_v25  ;;  %v8856_v14 = vpop.f32.mrb[71].mxu0  ;;  %v8919_v31 = vpop.f32.mrb[63].mxu1  ;;  %9255 = vmatmul.mubr.bf16.gmra.mrb[76].mxu0 %v8950_v62  ;;  %9312 = vmatmul.mubr.bf16.gmra.mrb[68].mxu1 %v8952_v9  ;;  %v12524_v46 = vld [vmem:[%s17080_s12 + $0x498] sm:$0xff]   ;;  %v8938_v10 = vmax.f32 %v8851_v24, 0.0  ;;  %v8940_v25 = vmax.f32 %v8914_v57, 0.0  ;;  %v12532_v63 = vld [vmem:[%s17080_s12 + $0x4a8] sm:$0xff]  }
0x1e11   :  { %v8857_v59 = vadd.f32 %v8856_v14, %v16905_v36  ;;  %v8920_v60 = vadd.f32 %v8919_v31, %v16908_v50  ;;  %11395 = vmatpush3.bf16.msra.mxu0 %v12519_v20  ;;  %11429 = vmatpush3.bf16.msra.mxu1 %v12520_v43  ;;  %v12525_v36 = vld [vmem:[%s17080_s12 + $0x460] sm:$0xff]   ;;  %v8939_v16 = vmax.f32 %v8853_v15, 0.0  ;;  %v8941_v47 = vmax.f32 %v8916_v55, 0.0  ;;  %v12533_v62 = vld [vmem:[%s17080_s12 + $0x470] sm:$0xff]   ;;  %v12538_v3 = vld [vmem:[%s17080_s12 + $0x4f8] sm:$0xff]  }
0x1e12   :  { %v8942_v41 = vmax.f32 %v8855_v4, 0.0  ;;  %v8944_v18 = vmax.f32 %v8918_v28, 0.0  ;;  %11396 = vmatprep.subr.bf16.mxu0 %v12521_v38  ;;  %11430 = vmatprep.subr.bf16.mxu1 %v12522_v0  ;;  %v12526_v50 = vld [vmem:[%s17080_s12 + $0x4e0] sm:$0xff]   ;;  %v12534_v9 = vld [vmem:[%s17080_s12 + $0x4f0] sm:$0xff]   ;;  %v12540_v48 = vld [vmem:[%s17080_s12 + $0x4b8] sm:$0xff]  }
0x1e13   :  { %v8943_v5 = vmax.f32 %v8857_v59, 0.0  ;;  %v8945_v27 = vmax.f32 %v8920_v60, 0.0 }
0x1e14   :  { %v8954_v7 = vpack.c.bf16 %v8942_v41, %v8938_v10  ;;  %v8956_v26 = vpack.c.bf16 %v8944_v18, %v8940_v25 }
0x1e15   :  { %v8955_v8 = vpack.c.bf16 %v8943_v5, %v8939_v16  ;;  %v8957_v11 = vpack.c.bf16 %v8945_v27, %v8941_v47  ;;  %11397 = vmatpush3.bf16.msra.mxu0 %v12523_v40  ;;  %11431 = vmatpush3.bf16.msra.mxu1 %v12524_v46 }
0x1e16   :  { %11398 = vmatprep.subr.bf16.mxu0 %v12525_v36  ;;  %11432 = vmatprep.subr.bf16.mxu1 %v12526_v50 }
0x1e17   :  { %9262 = vmatprep.mubr.bf16.mxu0 %v8955_v8  ;;  %9319 = vmatprep.mubr.bf16.mxu1 %v8957_v11 }
0x1e18   :  { %9263 = vmatmul.mubr.bf16.gmra.mrb[80].mxu0 %v8954_v7  ;;  %9320 = vmatmul.mubr.bf16.gmra.mrb[72].mxu1 %v8956_v26 }
0x1e19   :  { %11399 = vmatpush3.bf16.msra.mxu0 %v12527_v45  ;;  %11433 = vmatpush3.bf16.msra.mxu1 %v12528_v32 }
0x1e1a   :  { %9552 = vmatprep.mubr.bf16.mxu0 %v16859_v33  ;;  %9609 = vmatprep.mubr.bf16.mxu1 %v16861_v22  ;;  %v12536_v33 = vld [vmem:[%s17080_s12 + $0x4b0] sm:$0xff]   ;;  %v12537_v22 = vld [vmem:[%s17080_s12 + $0x478] sm:$0xff]  }
0x1e1b   :  { %11400 = vmatprep.subr.bf16.mxu0 %v12529_v6  ;;  %11434 = vmatprep.subr.bf16.mxu1 %v12530_v52 }
0x1e1d   :  { %11401 = vmatpush3.bf16.msra.mxu0 %v12531_v54  ;;  %11435 = vmatpush3.bf16.msra.mxu1 %v12532_v63 }
0x1e1e   :  { %11402 = vmatprep.subr.bf16.mxu0 %v12533_v62  ;;  %11436 = vmatprep.subr.bf16.mxu1 %v12534_v9 }
0x1e21   :  { %11403 = vmatpush3.bf16.msra.mxu0 %v12535_v35  ;;  %11437 = vmatpush3.bf16.msra.mxu1 %v12536_v33 }
0x1e22   :  { %11404 = vmatprep.subr.bf16.mxu0 %v12537_v22  ;;  %11438 = vmatprep.subr.bf16.mxu1 %v12538_v3  ;;  %v10828_v3 = vld [vmem:[%s17082_s13 + $0x2] ss:$0 sm:$0xff] }
0x1e25   :  { %11405 = vmatpush3.bf16.msra.mxu0 %v12539_v30  ;;  %11439 = vmatpush3.bf16.msra.mxu1 %v12540_v48 }
0x1e28   :  { %9553 = vmatmul.mubr.bf16.vlgmr.msra.gmra.mrb[84].mxu0 %v16855_v2  ;;  %9610 = vmatmul.mubr.bf16.vlgmr.msra.gmra.mrb[76].mxu1 %v16857_v13 }
0x1e29   :  { %9560 = vmatprep.mubr.bf16.mxu0 %v16875_v56  ;;  %9617 = vmatprep.mubr.bf16.mxu1 %v16877_v39 }
0x1e30   :  { %9561 = vmatmul.mubr.bf16.gmra.mrb[88].mxu0 %v16871_v29  ;;  %9618 = vmatmul.mubr.bf16.gmra.mrb[80].mxu1 %v16873_v49 }
0x1e31   :  { %9568 = vmatprep.mubr.bf16.mxu0 %v16894_v1  ;;  %9625 = vmatprep.mubr.bf16.mxu1 %v16896_v19 }
0x1e38   :  { %9569 = vmatmul.mubr.bf16.gmra.mrb[92].mxu0 %v16887_v51  ;;  %9626 = vmatmul.mubr.bf16.gmra.mrb[84].mxu1 %v16889_v44 }
0x1edb   :  { %v11338_v20 = vpop.f32.mrb[72].mxu0  ;;  %v11372_v2 = vpop.f32.mrb[64].mxu1 }
0x1edc   :  { %v11339_v43 = vpop.f32.mrb[73].mxu0  ;;  %v11373_v13 = vpop.f32.mrb[65].mxu1 }
0x1edd   :  { %v11340_v24 = vadd.f32 %v11339_v43, %v11338_v20  ;;  %v11374_v56 = vadd.f32 %v11373_v13, %v11372_v2  ;;  %v11341_v57 = vpop.f32.mrb[74].mxu0  ;;  %v11375_v39 = vpop.f32.mrb[66].mxu1 }
0x1ede   :  { %v11342_v34 = vpop.f32.mrb[75].mxu0  ;;  %v11376_v29 = vpop.f32.mrb[67].mxu1 }
0x1edf   :  { %v9306_v58 = vadd.f32 %v11374_v56, %v11340_v24  ;;  %v11343_v49 = vadd.f32 %v11342_v34, %v11341_v57  ;;  %v11377_v38 = vadd.f32 %v11376_v29, %v11375_v39 }
0x1ee1   :  { %v9309_v1 = vadd.f32 %v11377_v38, %v11343_v49 }
0x1ee3   :  { %v11344_v0 = vpop.f32.mrb[76].mxu0  ;;  %v11378_v19 = vpop.f32.mrb[68].mxu1 }
0x1ee4   :  { %v11345_v15 = vpop.f32.mrb[77].mxu0  ;;  %v11379_v51 = vpop.f32.mrb[69].mxu1 }
0x1ee5   :  { %v11346_v55 = vadd.f32 %v11345_v15, %v11344_v0  ;;  %v11380_v44 = vadd.f32 %v11379_v51, %v11378_v19  ;;  %v11347_v12 = vpop.f32.mrb[78].mxu0  ;;  %v11381_v21 = vpop.f32.mrb[70].mxu1 }
0x1ee6   :  { %v11348_v4 = vpop.f32.mrb[79].mxu0  ;;  %v11382_v28 = vpop.f32.mrb[71].mxu1 }
0x1ee7   :  { %v9314_v14 = vadd.f32 %v11380_v44, %v11346_v55  ;;  %v11349_v31 = vadd.f32 %v11348_v4, %v11347_v12  ;;  %v11383_v59 = vadd.f32 %v11382_v28, %v11381_v21 }
0x1ee9   :  { %v9317_v60 = vadd.f32 %v11383_v59, %v11349_v31 }
0x1eeb   :  { %v11350_v40 = vpop.f32.mrb[80].mxu0  ;;  %v11384_v46 = vpop.f32.mrb[72].mxu1 }
0x1eec   :  { %v11351_v10 = vpop.f32.mrb[81].mxu0  ;;  %v11385_v25 = vpop.f32.mrb[73].mxu1 }
0x1eed   :  { %v11352_v41 = vadd.f32 %v11351_v10, %v11350_v40  ;;  %v11386_v18 = vadd.f32 %v11385_v25, %v11384_v46  ;;  %v11353_v36 = vpop.f32.mrb[82].mxu0  ;;  %v11387_v50 = vpop.f32.mrb[74].mxu1 }
0x1eee   :  { %v11354_v16 = vpop.f32.mrb[83].mxu0  ;;  %v11388_v47 = vpop.f32.mrb[75].mxu1 }
0x1eef   :  { %v9322_v5 = vadd.f32 %v11386_v18, %v11352_v41  ;;  %v11355_v27 = vadd.f32 %v11354_v16, %v11353_v36  ;;  %v11389_v7 = vadd.f32 %v11388_v47, %v11387_v50 }
0x1ef1   :  { %v9325_v26 = vadd.f32 %v11389_v7, %v11355_v27 }
0x1efb   :  { %v11406_v8 = vpop.f32.mrb[84].mxu0  ;;  %v11440_v11 = vpop.f32.mrb[76].mxu1 }
0x1efc   :  { %v11407_v45 = vpop.f32.mrb[85].mxu0  ;;  %v11441_v32 = vpop.f32.mrb[77].mxu1 }
0x1efd   :  { %v11408_v6 = vadd.f32 %v11407_v45, %v11406_v8  ;;  %v11442_v52 = vadd.f32 %v11441_v32, %v11440_v11  ;;  %v11409_v54 = vpop.f32.mrb[86].mxu0  ;;  %v11443_v63 = vpop.f32.mrb[78].mxu1 }
0x1efe   :  { %v11410_v62 = vpop.f32.mrb[87].mxu0  ;;  %v11444_v9 = vpop.f32.mrb[79].mxu1 }
0x1eff   :  { %v9555_v35 = vadd.f32 %v11408_v6, %v9306_v58  ;;  %v11411_v33 = vadd.f32 %v11410_v62, %v11409_v54  ;;  %v11445_v22 = vadd.f32 %v11444_v9, %v11443_v63 }
0x1f01   :  { %v9612_v30 = vadd.f32 %v11442_v52, %v9555_v35  ;;  %v9558_v48 = vadd.f32 %v11411_v33, %v9309_v1 }
0x1f03   :  { %v9642_v20 = vadd.f32 %v10828_v3, %v9612_v30  ;;  %v9615_v2 = vadd.f32 %v11445_v22, %v9558_v48  ;;  %v11412_v43 = vpop.f32.mrb[88].mxu0  ;;  %v11446_v13 = vpop.f32.mrb[80].mxu1 }
0x1f04   :  { %v11413_v24 = vpop.f32.mrb[89].mxu0  ;;  %v11447_v56 = vpop.f32.mrb[81].mxu1 }
0x1f05   :  { %v9643_v57 = vadd.f32 %v10828_v3, %v9615_v2  ;;  %v11414_v39 = vadd.f32 %v11413_v24, %v11412_v43  ;;  %v11448_v34 = vadd.f32 %v11447_v56, %v11446_v13  ;;  %v11415_v29 = vpop.f32.mrb[90].mxu0  ;;  %v11449_v49 = vpop.f32.mrb[82].mxu1  ;;  %v9648_v58 = vadd.f32 %v9642_v20, %v16605_v23 }
0x1f06   :  { %v11416_v38 = vpop.f32.mrb[91].mxu0  ;;  %v11450_v0 = vpop.f32.mrb[83].mxu1 }
0x1f07   :  { %v9563_v19 = vadd.f32 %v11414_v39, %v9314_v14  ;;  %v11417_v15 = vadd.f32 %v11416_v38, %v11415_v29  ;;  %v11451_v51 = vadd.f32 %v11450_v0, %v11449_v49  ;;  %9658 = vadd.xlane.f32.xlu1 %v9648_v58  ;;  %v9649_v1 = vadd.f32 %v9643_v57, %v16608_v61 }
0x1f09   :  { %v9620_v55 = vadd.f32 %v11448_v34, %v9563_v19  ;;  %v9566_v44 = vadd.f32 %v11417_v15, %v9317_v60  ;;  %9660 = vadd.xlane.f32.xlu0 %v9649_v1 }
0x1f0b   :  { %v9644_v12 = vadd.f32 %v10828_v3, %v9620_v55  ;;  %v9623_v21 = vadd.f32 %v11451_v51, %v9566_v44  ;;  %v11418_v4 = vpop.f32.mrb[92].mxu0  ;;  %v11452_v28 = vpop.f32.mrb[84].mxu1  ;;  %v10831_v55 = vld [vmem:[%s17083_s14 + $0x2] ss:$0 sm:$0xff] }
0x1f0c   :  { %v11419_v31 = vpop.f32.mrb[93].mxu0  ;;  %v11453_v59 = vpop.f32.mrb[85].mxu1 }
0x1f0d   :  { %v9645_v40 = vadd.f32 %v10828_v3, %v9623_v21  ;;  %v11420_v46 = vadd.f32 %v11419_v31, %v11418_v4  ;;  %v11454_v23 = vadd.f32 %v11453_v59, %v11452_v28  ;;  %v11421_v10 = vpop.f32.mrb[94].mxu0  ;;  %v11455_v25 = vpop.f32.mrb[86].mxu1  ;;  %v9650_v14 = vadd.f32 %v9644_v12, %v16650_v17  ;;  %v10832_v4 = vld [vmem:[%s17084_s15 + $0x2] ss:$0 sm:$0xff] }
0x1f0e   :  { %v11422_v41 = vpop.f32.mrb[95].mxu0  ;;  %v11456_v18 = vpop.f32.mrb[87].mxu1 }
0x1f0f   :  { %v9571_v36 = vadd.f32 %v11420_v46, %v9322_v5  ;;  %v11423_v61 = vadd.f32 %v11422_v41, %v11421_v10  ;;  %v11457_v50 = vadd.f32 %v11456_v18, %v11455_v25  ;;  %9662 = vadd.xlane.f32.xlu1 %v9650_v14  ;;  %v9651_v60 = vadd.f32 %v9645_v40, %v16653_v37 }
0x1f11   :  { %v9628_v16 = vadd.f32 %v11454_v23, %v9571_v36  ;;  %v9574_v47 = vadd.f32 %v11423_v61, %v9325_v26  ;;  %9664 = vadd.xlane.f32.xlu0 %v9651_v60 }
0x1f13   :  { %v9646_v27 = vadd.f32 %v10828_v3, %v9628_v16  ;;  %v9631_v7 = vadd.f32 %v11457_v50, %v9574_v47 }
0x1f15   :  { %v9647_v8 = vadd.f32 %v10828_v3, %v9631_v7  ;;  %v9652_v11 = vadd.f32 %v9646_v27, %v16695_v53 }
0x1f17   :  { %9666 = vadd.xlane.f32.xlu1 %v9652_v11  ;;  %v9653_v45 = vadd.f32 %v9647_v8, %v16689_v42 }
0x1f19   :  { %9668 = vadd.xlane.f32.xlu0 %v9653_v45 }
0x1f94   :  { %v9659_v17 = vpop.xlane.xlu1 %9658 }
0x1f95   :  { %v9670_v32 = vmul.f32 0.0078125, %v9659_v17 }
0x1f96   :  { %v9661_v5 = vpop.xlane.xlu0 %9660 }
0x1f97   :  { %v9676_v6 = vsub.f32 %v9648_v58, %v9670_v32  ;;  %v9671_v52 = vmul.f32 0.0078125, %v9661_v5 }
0x1f99   :  { %v9677_v54 = vsub.f32 %v9649_v1, %v9671_v52  ;;  %v9682_v63 = vmul.f32 %v9676_v6, %v9676_v6 }
0x1f9b   :  { %9688 = vadd.xlane.f32.xlu1 %v9682_v63  ;;  %v9683_v37 = vmul.f32 %v9677_v54, %v9677_v54 }
0x1f9c   :  { %v9663_v26 = vpop.xlane.xlu1 %9662 }
0x1f9d   :  { %v9672_v62 = vmul.f32 0.0078125, %v9663_v26  ;;  %9690 = vadd.xlane.f32.xlu0 %v9683_v37 }
0x1f9e   :  { %v9665_v9 = vpop.xlane.xlu0 %9664 }
0x1f9f   :  { %v9678_v35 = vsub.f32 %v9650_v14, %v9672_v62  ;;  %v9673_v33 = vmul.f32 0.0078125, %v9665_v9 }
0x1fa1   :  { %v9679_v53 = vsub.f32 %v9651_v60, %v9673_v33  ;;  %v9684_v22 = vmul.f32 %v9678_v35, %v9678_v35 }
0x1fa3   :  { %9692 = vadd.xlane.f32.xlu1 %v9684_v22  ;;  %v9685_v42 = vmul.f32 %v9679_v53, %v9679_v53 }
0x1fa4   :  { %v9667_v3 = vpop.xlane.xlu1 %9666 }
0x1fa5   :  { %v9674_v30 = vmul.f32 0.0078125, %v9667_v3  ;;  %9694 = vadd.xlane.f32.xlu0 %v9685_v42 }
0x1fa6   :  { %v9669_v48 = vpop.xlane.xlu0 %9668 }
0x1fa7   :  { %v9680_v20 = vsub.f32 %v9652_v11, %v9674_v30  ;;  %v9675_v2 = vmul.f32 0.0078125, %v9669_v48 }
0x1fa9   :  { %v9681_v43 = vsub.f32 %v9653_v45, %v9675_v2  ;;  %v9686_v13 = vmul.f32 %v9680_v20, %v9680_v20 }
0x1fab   :  { %9696 = vadd.xlane.f32.xlu1 %v9686_v13  ;;  %v9687_v24 = vmul.f32 %v9681_v43, %v9681_v43 }
0x1fad   :  { %9698 = vadd.xlane.f32.xlu0 %v9687_v24 }
0x2028   :  { %v9689_v56 = vpop.xlane.xlu1 %9688 }
0x2029   :  { %v9700_v57 = vmul.f32 0.0078125, %v9689_v56 }
0x202a   :  { %v9691_v39 = vpop.xlane.xlu0 %9690 }
0x202b   :  { %v9706_v34 = vadd.f32 1e-05, %v9700_v57  ;;  %v9701_v29 = vmul.f32 0.0078125, %v9691_v39 }
0x202d   :  { %12889 = vrsqrt.f32 %v9706_v34  ;;  %v9707_v49 = vadd.f32 1e-05, %v9701_v29 }
0x202f   :  { %12891 = vrsqrt.f32 %v9707_v49 }
0x2030   :  { %v9693_v58 = vpop.xlane.xlu1 %9692 }
0x2031   :  { %v9702_v38 = vmul.f32 0.0078125, %v9693_v58 }
0x2032   :  { %v9695_v0 = vpop.xlane.xlu0 %9694 }
0x2033   :  { %v9708_v19 = vadd.f32 1e-05, %v9702_v38  ;;  %v9703_v15 = vmul.f32 0.0078125, %v9695_v0 }
0x2035   :  { %12893 = vrsqrt.f32 %v9708_v19  ;;  %v9709_v51 = vadd.f32 1e-05, %v9703_v15 }
0x2037   :  { %v12890_v1 = vpop.eup %12889  ;;  %12895 = vrsqrt.f32 %v9709_v51 }
0x2038   :  { %v9718_v44 = vmul.f32 %v12890_v1, %v9676_v6  ;;  %v9697_v12 = vpop.xlane.xlu1 %9696 }
0x2039   :  { %v12892_v21 = vpop.eup %12891  ;;  %v9704_v28 = vmul.f32 0.0078125, %v9697_v12 }
0x203a   :  { %v9730_v31 = vmul.f32 %v10831_v55, %v9718_v44  ;;  %v9719_v59 = vmul.f32 %v12892_v21, %v9677_v54  ;;  %v9699_v40 = vpop.xlane.xlu0 %9698 }
0x203b   :  { %v9710_v46 = vadd.f32 1e-05, %v9704_v28  ;;  %v9705_v23 = vmul.f32 0.0078125, %v9699_v40 }
0x203c   :  { %v9742_v10 = vadd.f32 %v10832_v4, %v9730_v31  ;;  %v9731_v25 = vmul.f32 %v10831_v55, %v9719_v59 }
0x203d   :  { %12897 = vrsqrt.f32 %v9710_v46  ;;  %v9711_v14 = vadd.f32 1e-05, %v9705_v23 }
0x203e   :  { %9748 = vst [vmem:[%s17085_s16] sm:$0xff] %v9742_v10  ;;  %v9743_v41 = vadd.f32 %v10832_v4, %v9731_v25 }
0x203f   :  { %v12894_v18 = vpop.eup %12893  ;;  %12899 = vrsqrt.f32 %v9711_v14 }
0x2040   :  { %9749 = vst [vmem:[%s17085_s16 + $0x8] sm:$0xff] %v9743_v41  ;;  %v9720_v36 = vmul.f32 %v12894_v18, %v9678_v35 }
0x2041   :  { %v12896_v61 = vpop.eup %12895 }
0x2042   :  { %v9732_v50 = vmul.f32 %v10831_v55, %v9720_v36  ;;  %v9721_v60 = vmul.f32 %v12896_v61, %v9679_v53 }
0x2044   :  { %v9744_v16 = vadd.f32 %v10832_v4, %v9732_v50  ;;  %v9733_v47 = vmul.f32 %v10831_v55, %v9721_v60 }
0x2046   :  { %9750 = vst [vmem:[%s17085_s16 + $0x10] sm:$0xff] %v9744_v16  ;;  %v9745_v27 = vadd.f32 %v10832_v4, %v9733_v47 }
0x2047   :  { %v12898_v7 = vpop.eup %12897 }
0x2048   :  { %9751 = vst [vmem:[%s17085_s16 + $0x18] sm:$0xff] %v9745_v27  ;;  %v9722_v8 = vmul.f32 %v12898_v7, %v9680_v20 }
0x2049   :  { %v12900_v11 = vpop.eup %12899 }
0x204a   :  { %v9734_v45 = vmul.f32 %v10831_v55, %v9722_v8  ;;  %v9723_v17 = vmul.f32 %v12900_v11, %v9681_v43 }
0x204c   :  { %v9746_v32 = vadd.f32 %v10832_v4, %v9734_v45  ;;  %v9735_v5 = vmul.f32 %v10831_v55, %v9723_v17 }
0x204e   :  { %9752 = vst [vmem:[%s17085_s16 + $0x20] sm:$0xff] %v9746_v32  ;;  %v9747_v6 = vadd.f32 %v10832_v4, %v9735_v5 }
0x2050   :  { %9753 = vst [vmem:[%s17085_s16 + $0x28] sm:$0xff] %v9747_v6 }

</bundles_post_ra>
